<compile_context>
chip_gen: v7x
topology: tpu7x:2x2x1
jax: 0.10.0
libtpu: 0.0.40
codegen_flags: <defaults>
</compile_context>

<pallas_src>
import jax
import jax.numpy as jnp
from jax.experimental import pallas as pl
from jax.experimental.pallas import tpu as pltpu

_NEG_SLOPE = 0.2
_EPS = 1e-5


# ----------------------------------------------------------------------------
# In-kernel helpers (operate on VMEM-resident values; all shapes are static).
# ----------------------------------------------------------------------------
def _pad1_hw(a):
    """Zero-pad (H, W, C) by 1 on both spatial dims -> (H+2, W+2, C)."""
    H, W, C = a.shape
    zr = jnp.zeros((1, W, C), a.dtype)
    a = jnp.concatenate([zr, a, zr], axis=0)
    zc = jnp.zeros((H + 2, 1, C), a.dtype)
    return jnp.concatenate([zc, a, zc], axis=1)


def _rows(x, parity):
    """Rows of given parity of (R, W, C), R even -> (R//2, W, C).  Leading-dim reshapes only."""
    R, W, C = x.shape
    return x.reshape(R // 2, 2, W, C)[:, parity:parity + 1].reshape(R // 2, W, C)


def _cols(x, parity):
    """Columns of given parity of (R, W, C), W even -> (R, W//2, C)."""
    R, W, C = x.shape
    flat = x.reshape(R * W, C).reshape(R * (W // 2), 2, C)
    sel = flat[:, parity:parity + 1, :]
    return sel.reshape(R * (W // 2), C).reshape(R, W // 2, C)


def _phases(xp):
    """4 spatial-parity phases of a padded activation: P[py][px][i, j, :] == xp[2i+py, 2j+px, :]."""
    return [[_cols(_rows(xp, py), px) for px in range(2)] for py in range(2)]


def _matmul(patches_f32, w_bf16, b_f32):
    """(Npix, K) x (K, Cout) on the MXU in bf16 with f32 accumulation, plus bias."""
    return jnp.dot(patches_f32.astype(jnp.bfloat16), w_bf16,
                   preferred_element_type=jnp.float32) + b_f32


def _conv3x3_s1(x, w_flat, b):
    """3x3 stride-1 'same' conv.  x: (H, W, Cin), w_flat: (9*Cin, Cout) -> (H*W, Cout)."""
    H, W, C = x.shape
    xp = _pad1_hw(x)
    taps = [xp[ky:ky + H, kx:kx + W, :].reshape(H * W, C)
            for ky in range(3) for kx in range(3)]
    return _matmul(jnp.concatenate(taps, axis=-1), w_flat, b)


def _conv3x3_s2(phases, Ho, Wo, C, w_flat, b):
    """3x3 stride-2 conv from precomputed parity phases of the padded input -> (Ho*Wo, Cout)."""
    taps = []
    for ky in range(3):
        for kx in range(3):
            ph = phases[ky % 2][kx % 2]
            taps.append(ph[ky // 2:ky // 2 + Ho, kx // 2:kx // 2 + Wo, :]
                        .reshape(Ho * Wo, C))
    return _matmul(jnp.concatenate(taps, axis=-1), w_flat, b)


def _conv1x1_s2(phases, Ho, Wo, C, w_flat, b):
    """1x1 stride-2 conv (shortcut): out[i, j] = x[2i, 2j] @ w == xp[2i+1, 2j+1] @ w."""
    tap = phases[1][1][:Ho, :Wo, :].reshape(Ho * Wo, C)
    return _matmul(tap, w_flat, b)


def _instance_norm(y):
    """InstanceNorm2d(affine=False, eps=1e-5) on flattened (Npix, C) activations."""
    mean = jnp.mean(y, axis=0, keepdims=True)
    var = jnp.mean(jnp.square(y - mean), axis=0, keepdims=True)
    return (y - mean) * jax.lax.rsqrt(var + _EPS)


def _lrelu(y):
    return jnp.maximum(y, _NEG_SLOPE * y)


def _resnet_block(x, w1, b1, ws, bs, w2, b2, use_norm):
    """x: (H, W, Cin) f32 -> (H//2, W//2, Cout) f32 (strided ResNet block)."""
    H, W, Cin = x.shape
    Ho, Wo = H // 2, W // 2
    cout = w1.shape[-1]
    phases = _phases(_pad1_hw(x))
    # conv1: 3x3 stride 2 -> [IN] -> LeakyReLU
    h = _conv3x3_s2(phases, Ho, Wo, Cin, w1, b1)
    if use_norm:
        h = _instance_norm(h)
    h = _lrelu(h)
    # shortcut: 1x1 stride 2 (reuses the already-computed phases)
    s = _conv1x1_s2(phases, Ho, Wo, Cin, ws, bs)
    # conv2: 3x3 stride 1 -> [IN] -> + shortcut -> LeakyReLU
    y = _conv3x3_s1(h.reshape(Ho, Wo, cout), w2, b2)
    if use_norm:
        y = _instance_norm(y)
    y = _lrelu(y + s)
    return y.reshape(Ho, Wo, cout)


# ----------------------------------------------------------------------------
# The single fused kernel: full discriminator forward for one batch sample.
# ----------------------------------------------------------------------------
def _discriminator_kernel(x_ref, *rest):
    o_ref = rest[-1]
    w = rest[:-1]                            # 20 weight/bias refs (6 per block + 2 out)
    x = x_ref[0].astype(jnp.float32)         # (H, W, Cin)

    a = _resnet_block(x, w[0][...], w[1][...], w[2][...], w[3][...],
                      w[4][...], w[5][...], use_norm=False)
    a = _resnet_block(a, w[6][...], w[7][...], w[8][...], w[9][...],
                      w[10][...], w[11][...], use_norm=True)
    a = _resnet_block(a, w[12][...], w[13][...], w[14][...], w[15][...],
                      w[16][...], w[17][...], use_norm=True)

    Hf, Wf, _ = a.shape
    y = _conv3x3_s1(a, w[18][...], w[19][...])           # (Hf*Wf, 1)
    o_ref[0] = y.reshape(Hf, Wf, 1).astype(o_ref.dtype)


# ----------------------------------------------------------------------------
# Wrapper: parameter flattening / bf16 pre-cast + NCHW<->NHWC plumbing.
# ----------------------------------------------------------------------------
def _flatten_conv_w(w):
    """(K, K, Cin, Cout) HWIO -> (K*K*Cin, Cout) bf16 (matches in-kernel im2col order)."""
    k0, k1, ci, co = w.shape
    return w.reshape(k0 * k1 * ci, co).astype(jnp.bfloat16)


def _bias2d(b):
    return b.reshape(1, -1).astype(jnp.float32)


def multi_scale_patch_discriminator(x_nchw, params):
    """Forward pass.  x_nchw: (N, Cin, H, W) with H, W divisible by 8."""
    x = jnp.transpose(x_nchw, (0, 2, 3, 1))              # NCHW -> NHWC
    N, H, W, Cin = x.shape
    Hf, Wf = H // 8, W // 8

    weights = []
    for name in ("block1", "block2", "block3"):
        p = params[name]
        weights += [_flatten_conv_w(p["w1"]), _bias2d(p["b1"]),
                    _flatten_conv_w(p["ws"]), _bias2d(p["bs"]),
                    _flatten_conv_w(p["w2"]), _bias2d(p["b2"])]
    weights += [_flatten_conv_w(params["out_w"]), _bias2d(params["out_b"])]

    in_specs = [pl.BlockSpec((1, H, W, Cin), lambda n: (n, 0, 0, 0))]
    in_specs += [pl.BlockSpec(w.shape, lambda n: (0, 0)) for w in weights]

    out = pl.pallas_call(
        _discriminator_kernel,
        out_shape=jax.ShapeDtypeStruct((N, Hf, Wf, 1), jnp.float32),
        grid=(N,),
        in_specs=in_specs,
        out_specs=pl.BlockSpec((1, Hf, Wf, 1), lambda n: (n, 0, 0, 0)),
        compiler_params=pltpu.CompilerParams(dimension_semantics=("parallel",)),
    )(x, *weights)
    return jnp.transpose(out, (0, 3, 1, 2))              # NHWC -> NCHW


# ----------------------------------------------------------------------------
# Parameter init (HWIO weights, like before).
# ----------------------------------------------------------------------------
def init_params(key, in_channels=3, middle_channels=8):
    def conv_p(key, k, cin, cout):
        kw, kb = jax.random.split(key)
        w = 0.05 * jax.random.normal(kw, (k, k, cin, cout), jnp.float32)
        b = 0.05 * jax.random.normal(kb, (cout,), jnp.float32)
        return w, b

    def block_p(key, cin, cout):
        k1, k2, k3 = jax.random.split(key, 3)
        w1, b1 = conv_p(k1, 3, cin, cout)
        w2, b2 = conv_p(k2, 3, cout, cout)
        ws, bs = conv_p(k3, 1, cin, cout)
        return {"w1": w1, "b1": b1, "w2": w2, "b2": b2, "ws": ws, "bs": bs}

    kb1, kb2, kb3, ko = jax.random.split(key, 4)
    m = middle_channels
    out_w, out_b = conv_p(ko, 3, 4 * m, 1)
    return {
        "block1": block_p(kb1, in_channels, m),
        "block2": block_p(kb2, m, 2 * m),
        "block3": block_p(kb3, 2 * m, 4 * m),
        "out_w": out_w,
        "out_b": out_b,
    }


if __name__ == "__main__":
    key = jax.random.PRNGKey(0)
    kx, kp = jax.random.split(key)

    in_channels = 3
    middle_channels = 8          # small for the test (PyTorch default is 64)
    x = jax.random.normal(kx, (2, in_channels, 16, 16), jnp.float32)  # NCHW

    params = init_params(kp, in_channels, middle_channels)
    fwd = jax.jit(multi_scale_patch_discriminator)
    out = fwd(x, params)
    out = jax.block_until_ready(out)

    # 16 -> 8 -> 4 -> 2 spatially; final 1-channel patch map.
    assert out.shape == (2, 1, 2, 2), out.shape
    assert bool(jnp.all(jnp.isfinite(out)))
    print("KERNEL_OK")
</pallas_src>

<mosaic_0001>
module attributes {stable_mosaic.version = 11 : i64} {
  func.func @_discriminator_kernel(%arg0: i32, %arg1: memref<1x16x16x3xf32, #tpu.memory_space<vmem>>, %arg2: memref<27x8xbf16, #tpu.memory_space<vmem>>, %arg3: memref<1x8xf32, #tpu.memory_space<vmem>>, %arg4: memref<3x8xbf16, #tpu.memory_space<vmem>>, %arg5: memref<1x8xf32, #tpu.memory_space<vmem>>, %arg6: memref<72x8xbf16, #tpu.memory_space<vmem>>, %arg7: memref<1x8xf32, #tpu.memory_space<vmem>>, %arg8: memref<72x16xbf16, #tpu.memory_space<vmem>>, %arg9: memref<1x16xf32, #tpu.memory_space<vmem>>, %arg10: memref<8x16xbf16, #tpu.memory_space<vmem>>, %arg11: memref<1x16xf32, #tpu.memory_space<vmem>>, %arg12: memref<144x16xbf16, #tpu.memory_space<vmem>>, %arg13: memref<1x16xf32, #tpu.memory_space<vmem>>, %arg14: memref<144x32xbf16, #tpu.memory_space<vmem>>, %arg15: memref<1x32xf32, #tpu.memory_space<vmem>>, %arg16: memref<16x32xbf16, #tpu.memory_space<vmem>>, %arg17: memref<1x32xf32, #tpu.memory_space<vmem>>, %arg18: memref<288x32xbf16, #tpu.memory_space<vmem>>, %arg19: memref<1x32xf32, #tpu.memory_space<vmem>>, %arg20: memref<288x1xbf16, #tpu.memory_space<vmem>>, %arg21: memref<1x1xf32, #tpu.memory_space<vmem>>, %arg22: memref<1x2x2x1xf32, #tpu.memory_space<vmem>>) attributes {dimension_semantics = [#tpu.dimension_semantics<parallel>], iteration_bounds = array<i64: 2>, scalar_prefetch = 0 : i64, scratch_operands = 0 : i64, tpu.core_type = #tpu.core_type<tc>, window_params = [{transform_indices = @transform_0, window_bounds = array<i64: 1, 16, 16, 3>}, {pipeline_mode = #tpu.pipeline_mode<synchronous>, transform_indices = @transform_1, window_bounds = array<i64: 27, 8>}, {pipeline_mode = #tpu.pipeline_mode<synchronous>, transform_indices = @transform_2, window_bounds = array<i64: 1, 8>}, {pipeline_mode = #tpu.pipeline_mode<synchronous>, transform_indices = @transform_3, window_bounds = array<i64: 3, 8>}, {pipeline_mode = #tpu.pipeline_mode<synchronous>, transform_indices = @transform_4, window_bounds = array<i64: 1, 8>}, {pipeline_mode = #tpu.pipeline_mode<synchronous>, transform_indices = @transform_5, window_bounds = array<i64: 72, 8>}, {pipeline_mode = #tpu.pipeline_mode<synchronous>, transform_indices = @transform_6, window_bounds = array<i64: 1, 8>}, {pipeline_mode = #tpu.pipeline_mode<synchronous>, transform_indices = @transform_7, window_bounds = array<i64: 72, 16>}, {pipeline_mode = #tpu.pipeline_mode<synchronous>, transform_indices = @transform_8, window_bounds = array<i64: 1, 16>}, {pipeline_mode = #tpu.pipeline_mode<synchronous>, transform_indices = @transform_9, window_bounds = array<i64: 8, 16>}, {pipeline_mode = #tpu.pipeline_mode<synchronous>, transform_indices = @transform_10, window_bounds = array<i64: 1, 16>}, {pipeline_mode = #tpu.pipeline_mode<synchronous>, transform_indices = @transform_11, window_bounds = array<i64: 144, 16>}, {pipeline_mode = #tpu.pipeline_mode<synchronous>, transform_indices = @transform_12, window_bounds = array<i64: 1, 16>}, {pipeline_mode = #tpu.pipeline_mode<synchronous>, transform_indices = @transform_13, window_bounds = array<i64: 144, 32>}, {pipeline_mode = #tpu.pipeline_mode<synchronous>, transform_indices = @transform_14, window_bounds = array<i64: 1, 32>}, {pipeline_mode = #tpu.pipeline_mode<synchronous>, transform_indices = @transform_15, window_bounds = array<i64: 16, 32>}, {pipeline_mode = #tpu.pipeline_mode<synchronous>, transform_indices = @transform_16, window_bounds = array<i64: 1, 32>}, {pipeline_mode = #tpu.pipeline_mode<synchronous>, transform_indices = @transform_17, window_bounds = array<i64: 288, 32>}, {pipeline_mode = #tpu.pipeline_mode<synchronous>, transform_indices = @transform_18, window_bounds = array<i64: 1, 32>}, {pipeline_mode = #tpu.pipeline_mode<synchronous>, transform_indices = @transform_19, window_bounds = array<i64: 288, 1>}, {pipeline_mode = #tpu.pipeline_mode<synchronous>, transform_indices = @transform_20, window_bounds = array<i64: 1, 1>}, {transform_indices = @transform_21, window_bounds = array<i64: 1, 2, 2, 1>}]} {
    %c0 = arith.constant 0 : index
    %c0_0 = arith.constant 0 : index
    %c0_1 = arith.constant 0 : index
    %c0_2 = arith.constant 0 : index
    %0 = vector.load %arg1[%c0, %c0_0, %c0_1, %c0_2] : memref<1x16x16x3xf32, #tpu.memory_space<vmem>>, vector<1x16x16x3xf32>
    %1 = vector.shape_cast %0 : vector<1x16x16x3xf32> to vector<16x16x3xf32>
    %c0_3 = arith.constant 0 : index
    %c0_4 = arith.constant 0 : index
    %2 = vector.load %arg2[%c0_3, %c0_4] : memref<27x8xbf16, #tpu.memory_space<vmem>>, vector<27x8xbf16>
    %c0_5 = arith.constant 0 : index
    %c0_6 = arith.constant 0 : index
    %3 = vector.load %arg3[%c0_5, %c0_6] : memref<1x8xf32, #tpu.memory_space<vmem>>, vector<1x8xf32>
    %c0_7 = arith.constant 0 : index
    %c0_8 = arith.constant 0 : index
    %4 = vector.load %arg4[%c0_7, %c0_8] : memref<3x8xbf16, #tpu.memory_space<vmem>>, vector<3x8xbf16>
    %c0_9 = arith.constant 0 : index
    %c0_10 = arith.constant 0 : index
    %5 = vector.load %arg5[%c0_9, %c0_10] : memref<1x8xf32, #tpu.memory_space<vmem>>, vector<1x8xf32>
    %c0_11 = arith.constant 0 : index
    %c0_12 = arith.constant 0 : index
    %6 = vector.load %arg6[%c0_11, %c0_12] : memref<72x8xbf16, #tpu.memory_space<vmem>>, vector<72x8xbf16>
    %c0_13 = arith.constant 0 : index
    %c0_14 = arith.constant 0 : index
    %7 = vector.load %arg7[%c0_13, %c0_14] : memref<1x8xf32, #tpu.memory_space<vmem>>, vector<1x8xf32>
    %cst = arith.constant 0.000000e+00 : f32
    %8 = vector.broadcast %cst : f32 to vector<1x16x3xf32>
    %9 = tpu.concatenate %8, %1, %8 in 0 : vector<1x16x3xf32>, vector<16x16x3xf32>, vector<1x16x3xf32> -> vector<18x16x3xf32>
    %cst_15 = arith.constant 0.000000e+00 : f32
    %10 = vector.broadcast %cst_15 : f32 to vector<18x1x3xf32>
    %11 = tpu.concatenate %10, %9, %10 in 1 : vector<18x1x3xf32>, vector<18x16x3xf32>, vector<18x1x3xf32> -> vector<18x18x3xf32>
    %12 = vector.shape_cast %11 : vector<18x18x3xf32> to vector<9x2x18x3xf32>
    %13 = vector.extract_strided_slice %12 {offsets = [0, 0, 0, 0], sizes = [9, 1, 18, 3], strides = [1, 1, 1, 1]} : vector<9x2x18x3xf32> to vector<9x1x18x3xf32>
    %14 = vector.shape_cast %13 : vector<9x1x18x3xf32> to vector<9x18x3xf32>
    %15 = vector.shape_cast %14 : vector<9x18x3xf32> to vector<162x3xf32>
    %16 = vector.shape_cast %15 : vector<162x3xf32> to vector<81x2x3xf32>
    %17 = vector.extract_strided_slice %16 {offsets = [0, 0, 0], sizes = [81, 1, 3], strides = [1, 1, 1]} : vector<81x2x3xf32> to vector<81x1x3xf32>
    %18 = vector.shape_cast %17 : vector<81x1x3xf32> to vector<81x3xf32>
    %19 = vector.shape_cast %18 : vector<81x3xf32> to vector<9x9x3xf32>
    %20 = vector.shape_cast %11 : vector<18x18x3xf32> to vector<9x2x18x3xf32>
    %21 = vector.extract_strided_slice %20 {offsets = [0, 0, 0, 0], sizes = [9, 1, 18, 3], strides = [1, 1, 1, 1]} : vector<9x2x18x3xf32> to vector<9x1x18x3xf32>
    %22 = vector.shape_cast %21 : vector<9x1x18x3xf32> to vector<9x18x3xf32>
    %23 = vector.shape_cast %22 : vector<9x18x3xf32> to vector<162x3xf32>
    %24 = vector.shape_cast %23 : vector<162x3xf32> to vector<81x2x3xf32>
    %25 = vector.extract_strided_slice %24 {offsets = [0, 1, 0], sizes = [81, 1, 3], strides = [1, 1, 1]} : vector<81x2x3xf32> to vector<81x1x3xf32>
    %26 = vector.shape_cast %25 : vector<81x1x3xf32> to vector<81x3xf32>
    %27 = vector.shape_cast %26 : vector<81x3xf32> to vector<9x9x3xf32>
    %28 = vector.shape_cast %11 : vector<18x18x3xf32> to vector<9x2x18x3xf32>
    %29 = vector.extract_strided_slice %28 {offsets = [0, 1, 0, 0], sizes = [9, 1, 18, 3], strides = [1, 1, 1, 1]} : vector<9x2x18x3xf32> to vector<9x1x18x3xf32>
    %30 = vector.shape_cast %29 : vector<9x1x18x3xf32> to vector<9x18x3xf32>
    %31 = vector.shape_cast %30 : vector<9x18x3xf32> to vector<162x3xf32>
    %32 = vector.shape_cast %31 : vector<162x3xf32> to vector<81x2x3xf32>
    %33 = vector.extract_strided_slice %32 {offsets = [0, 0, 0], sizes = [81, 1, 3], strides = [1, 1, 1]} : vector<81x2x3xf32> to vector<81x1x3xf32>
    %34 = vector.shape_cast %33 : vector<81x1x3xf32> to vector<81x3xf32>
    %35 = vector.shape_cast %34 : vector<81x3xf32> to vector<9x9x3xf32>
    %36 = vector.shape_cast %11 : vector<18x18x3xf32> to vector<9x2x18x3xf32>
    %37 = vector.extract_strided_slice %36 {offsets = [0, 1, 0, 0], sizes = [9, 1, 18, 3], strides = [1, 1, 1, 1]} : vector<9x2x18x3xf32> to vector<9x1x18x3xf32>
    %38 = vector.shape_cast %37 : vector<9x1x18x3xf32> to vector<9x18x3xf32>
    %39 = vector.shape_cast %38 : vector<9x18x3xf32> to vector<162x3xf32>
    %40 = vector.shape_cast %39 : vector<162x3xf32> to vector<81x2x3xf32>
    %41 = vector.extract_strided_slice %40 {offsets = [0, 1, 0], sizes = [81, 1, 3], strides = [1, 1, 1]} : vector<81x2x3xf32> to vector<81x1x3xf32>
    %42 = vector.shape_cast %41 : vector<81x1x3xf32> to vector<81x3xf32>
    %43 = vector.shape_cast %42 : vector<81x3xf32> to vector<9x9x3xf32>
    %44 = vector.extract_strided_slice %19 {offsets = [0, 0, 0], sizes = [8, 8, 3], strides = [1, 1, 1]} : vector<9x9x3xf32> to vector<8x8x3xf32>
    %45 = vector.shape_cast %44 : vector<8x8x3xf32> to vector<64x3xf32>
    %46 = vector.extract_strided_slice %27 {offsets = [0, 0, 0], sizes = [8, 8, 3], strides = [1, 1, 1]} : vector<9x9x3xf32> to vector<8x8x3xf32>
    %47 = vector.shape_cast %46 : vector<8x8x3xf32> to vector<64x3xf32>
    %48 = vector.extract_strided_slice %19 {offsets = [0, 1, 0], sizes = [8, 8, 3], strides = [1, 1, 1]} : vector<9x9x3xf32> to vector<8x8x3xf32>
    %49 = vector.shape_cast %48 : vector<8x8x3xf32> to vector<64x3xf32>
    %50 = vector.extract_strided_slice %35 {offsets = [0, 0, 0], sizes = [8, 8, 3], strides = [1, 1, 1]} : vector<9x9x3xf32> to vector<8x8x3xf32>
    %51 = vector.shape_cast %50 : vector<8x8x3xf32> to vector<64x3xf32>
    %52 = vector.extract_strided_slice %43 {offsets = [0, 0, 0], sizes = [8, 8, 3], strides = [1, 1, 1]} : vector<9x9x3xf32> to vector<8x8x3xf32>
    %53 = vector.shape_cast %52 : vector<8x8x3xf32> to vector<64x3xf32>
    %54 = vector.extract_strided_slice %35 {offsets = [0, 1, 0], sizes = [8, 8, 3], strides = [1, 1, 1]} : vector<9x9x3xf32> to vector<8x8x3xf32>
    %55 = vector.shape_cast %54 : vector<8x8x3xf32> to vector<64x3xf32>
    %56 = vector.extract_strided_slice %19 {offsets = [1, 0, 0], sizes = [8, 8, 3], strides = [1, 1, 1]} : vector<9x9x3xf32> to vector<8x8x3xf32>
    %57 = vector.shape_cast %56 : vector<8x8x3xf32> to vector<64x3xf32>
    %58 = vector.extract_strided_slice %27 {offsets = [1, 0, 0], sizes = [8, 8, 3], strides = [1, 1, 1]} : vector<9x9x3xf32> to vector<8x8x3xf32>
    %59 = vector.shape_cast %58 : vector<8x8x3xf32> to vector<64x3xf32>
    %60 = vector.extract_strided_slice %19 {offsets = [1, 1, 0], sizes = [8, 8, 3], strides = [1, 1, 1]} : vector<9x9x3xf32> to vector<8x8x3xf32>
    %61 = vector.shape_cast %60 : vector<8x8x3xf32> to vector<64x3xf32>
    %62 = tpu.concatenate %45, %47, %49, %51, %53, %55, %57, %59, %61 in 1 : vector<64x3xf32>, vector<64x3xf32>, vector<64x3xf32>, vector<64x3xf32>, vector<64x3xf32>, vector<64x3xf32>, vector<64x3xf32>, vector<64x3xf32>, vector<64x3xf32> -> vector<64x27xf32>
    %63 = arith.truncf %62 : vector<64x27xf32> to vector<64x27xbf16>
    %cst_16 = arith.constant dense<0.000000e+00> : vector<64x8xf32>
    %64 = tpu.matmul %63, %2, %cst_16 {dimension_numbers = #tpu.dot_dimension_numbers<[1], [0], [0], [1], [0, 0, 1, 1], [], []>} : vector<64x27xbf16>, vector<27x8xbf16>, vector<64x8xf32> -> vector<64x8xf32>
    %65 = vector.broadcast %3 : vector<1x8xf32> to vector<64x8xf32>
    %66 = arith.addf %64, %65 : vector<64x8xf32>
    %cst_17 = arith.constant 2.000000e-01 : f32
    %67 = vector.broadcast %cst_17 : f32 to vector<64x8xf32>
    %68 = arith.mulf %67, %66 : vector<64x8xf32>
    %69 = arith.maximumf %66, %68 : vector<64x8xf32>
    %70 = vector.extract_strided_slice %43 {offsets = [0, 0, 0], sizes = [8, 8, 3], strides = [1, 1, 1]} : vector<9x9x3xf32> to vector<8x8x3xf32>
    %71 = vector.shape_cast %70 : vector<8x8x3xf32> to vector<64x3xf32>
    %72 = arith.truncf %71 : vector<64x3xf32> to vector<64x3xbf16>
    %cst_18 = arith.constant dense<0.000000e+00> : vector<64x8xf32>
    %73 = tpu.matmul %72, %4, %cst_18 {dimension_numbers = #tpu.dot_dimension_numbers<[1], [0], [0], [1], [0, 0, 1, 1], [], []>} : vector<64x3xbf16>, vector<3x8xbf16>, vector<64x8xf32> -> vector<64x8xf32>
    %74 = vector.broadcast %5 : vector<1x8xf32> to vector<64x8xf32>
    %75 = arith.addf %73, %74 : vector<64x8xf32>
    %76 = vector.shape_cast %69 : vector<64x8xf32> to vector<8x8x8xf32>
    %cst_19 = arith.constant 0.000000e+00 : f32
    %77 = vector.broadcast %cst_19 : f32 to vector<1x8x8xf32>
    %78 = tpu.concatenate %77, %76, %77 in 0 : vector<1x8x8xf32>, vector<8x8x8xf32>, vector<1x8x8xf32> -> vector<10x8x8xf32>
    %cst_20 = arith.constant 0.000000e+00 : f32
    %79 = vector.broadcast %cst_20 : f32 to vector<10x1x8xf32>
    %80 = tpu.concatenate %79, %78, %79 in 1 : vector<10x1x8xf32>, vector<10x8x8xf32>, vector<10x1x8xf32> -> vector<10x10x8xf32>
    %81 = vector.extract_strided_slice %80 {offsets = [0, 0, 0], sizes = [8, 8, 8], strides = [1, 1, 1]} : vector<10x10x8xf32> to vector<8x8x8xf32>
    %82 = vector.shape_cast %81 : vector<8x8x8xf32> to vector<64x8xf32>
    %83 = vector.extract_strided_slice %80 {offsets = [0, 1, 0], sizes = [8, 8, 8], strides = [1, 1, 1]} : vector<10x10x8xf32> to vector<8x8x8xf32>
    %84 = vector.shape_cast %83 : vector<8x8x8xf32> to vector<64x8xf32>
    %85 = vector.extract_strided_slice %80 {offsets = [0, 2, 0], sizes = [8, 8, 8], strides = [1, 1, 1]} : vector<10x10x8xf32> to vector<8x8x8xf32>
    %86 = vector.shape_cast %85 : vector<8x8x8xf32> to vector<64x8xf32>
    %87 = vector.extract_strided_slice %80 {offsets = [1, 0, 0], sizes = [8, 8, 8], strides = [1, 1, 1]} : vector<10x10x8xf32> to vector<8x8x8xf32>
    %88 = vector.shape_cast %87 : vector<8x8x8xf32> to vector<64x8xf32>
    %89 = vector.extract_strided_slice %80 {offsets = [1, 1, 0], sizes = [8, 8, 8], strides = [1, 1, 1]} : vector<10x10x8xf32> to vector<8x8x8xf32>
    %90 = vector.shape_cast %89 : vector<8x8x8xf32> to vector<64x8xf32>
    %91 = vector.extract_strided_slice %80 {offsets = [1, 2, 0], sizes = [8, 8, 8], strides = [1, 1, 1]} : vector<10x10x8xf32> to vector<8x8x8xf32>
    %92 = vector.shape_cast %91 : vector<8x8x8xf32> to vector<64x8xf32>
    %93 = vector.extract_strided_slice %80 {offsets = [2, 0, 0], sizes = [8, 8, 8], strides = [1, 1, 1]} : vector<10x10x8xf32> to vector<8x8x8xf32>
    %94 = vector.shape_cast %93 : vector<8x8x8xf32> to vector<64x8xf32>
    %95 = vector.extract_strided_slice %80 {offsets = [2, 1, 0], sizes = [8, 8, 8], strides = [1, 1, 1]} : vector<10x10x8xf32> to vector<8x8x8xf32>
    %96 = vector.shape_cast %95 : vector<8x8x8xf32> to vector<64x8xf32>
    %97 = vector.extract_strided_slice %80 {offsets = [2, 2, 0], sizes = [8, 8, 8], strides = [1, 1, 1]} : vector<10x10x8xf32> to vector<8x8x8xf32>
    %98 = vector.shape_cast %97 : vector<8x8x8xf32> to vector<64x8xf32>
    %99 = tpu.concatenate %82, %84, %86, %88, %90, %92, %94, %96, %98 in 1 : vector<64x8xf32>, vector<64x8xf32>, vector<64x8xf32>, vector<64x8xf32>, vector<64x8xf32>, vector<64x8xf32>, vector<64x8xf32>, vector<64x8xf32>, vector<64x8xf32> -> vector<64x72xf32>
    %100 = arith.truncf %99 : vector<64x72xf32> to vector<64x72xbf16>
    %cst_21 = arith.constant dense<0.000000e+00> : vector<64x8xf32>
    %101 = tpu.matmul %100, %6, %cst_21 {dimension_numbers = #tpu.dot_dimension_numbers<[1], [0], [0], [1], [0, 0, 1, 1], [], []>} : vector<64x72xbf16>, vector<72x8xbf16>, vector<64x8xf32> -> vector<64x8xf32>
    %102 = vector.broadcast %7 : vector<1x8xf32> to vector<64x8xf32>
    %103 = arith.addf %101, %102 : vector<64x8xf32>
    %104 = arith.addf %103, %75 : vector<64x8xf32>
    %cst_22 = arith.constant 2.000000e-01 : f32
    %105 = vector.broadcast %cst_22 : f32 to vector<64x8xf32>
    %106 = arith.mulf %105, %104 : vector<64x8xf32>
    %107 = arith.maximumf %104, %106 : vector<64x8xf32>
    %108 = vector.shape_cast %107 : vector<64x8xf32> to vector<8x8x8xf32>
    %c0_23 = arith.constant 0 : index
    %c0_24 = arith.constant 0 : index
    %109 = vector.load %arg8[%c0_23, %c0_24] : memref<72x16xbf16, #tpu.memory_space<vmem>>, vector<72x16xbf16>
    %c0_25 = arith.constant 0 : index
    %c0_26 = arith.constant 0 : index
    %110 = vector.load %arg9[%c0_25, %c0_26] : memref<1x16xf32, #tpu.memory_space<vmem>>, vector<1x16xf32>
    %c0_27 = arith.constant 0 : index
    %c0_28 = arith.constant 0 : index
    %111 = vector.load %arg10[%c0_27, %c0_28] : memref<8x16xbf16, #tpu.memory_space<vmem>>, vector<8x16xbf16>
    %c0_29 = arith.constant 0 : index
    %c0_30 = arith.constant 0 : index
    %112 = vector.load %arg11[%c0_29, %c0_30] : memref<1x16xf32, #tpu.memory_space<vmem>>, vector<1x16xf32>
    %c0_31 = arith.constant 0 : index
    %c0_32 = arith.constant 0 : index
    %113 = vector.load %arg12[%c0_31, %c0_32] : memref<144x16xbf16, #tpu.memory_space<vmem>>, vector<144x16xbf16>
    %c0_33 = arith.constant 0 : index
    %c0_34 = arith.constant 0 : index
    %114 = vector.load %arg13[%c0_33, %c0_34] : memref<1x16xf32, #tpu.memory_space<vmem>>, vector<1x16xf32>
    %cst_35 = arith.constant 0.000000e+00 : f32
    %115 = vector.broadcast %cst_35 : f32 to vector<1x8x8xf32>
    %116 = tpu.concatenate %115, %108, %115 in 0 : vector<1x8x8xf32>, vector<8x8x8xf32>, vector<1x8x8xf32> -> vector<10x8x8xf32>
    %cst_36 = arith.constant 0.000000e+00 : f32
    %117 = vector.broadcast %cst_36 : f32 to vector<10x1x8xf32>
    %118 = tpu.concatenate %117, %116, %117 in 1 : vector<10x1x8xf32>, vector<10x8x8xf32>, vector<10x1x8xf32> -> vector<10x10x8xf32>
    %119 = vector.shape_cast %118 : vector<10x10x8xf32> to vector<5x2x10x8xf32>
    %120 = vector.extract_strided_slice %119 {offsets = [0, 0, 0, 0], sizes = [5, 1, 10, 8], strides = [1, 1, 1, 1]} : vector<5x2x10x8xf32> to vector<5x1x10x8xf32>
    %121 = vector.shape_cast %120 : vector<5x1x10x8xf32> to vector<5x10x8xf32>
    %122 = vector.shape_cast %121 : vector<5x10x8xf32> to vector<50x8xf32>
    %123 = vector.shape_cast %122 : vector<50x8xf32> to vector<25x2x8xf32>
    %124 = vector.extract_strided_slice %123 {offsets = [0, 0, 0], sizes = [25, 1, 8], strides = [1, 1, 1]} : vector<25x2x8xf32> to vector<25x1x8xf32>
    %125 = vector.shape_cast %124 : vector<25x1x8xf32> to vector<25x8xf32>
    %126 = vector.shape_cast %125 : vector<25x8xf32> to vector<5x5x8xf32>
    %127 = vector.shape_cast %118 : vector<10x10x8xf32> to vector<5x2x10x8xf32>
    %128 = vector.extract_strided_slice %127 {offsets = [0, 0, 0, 0], sizes = [5, 1, 10, 8], strides = [1, 1, 1, 1]} : vector<5x2x10x8xf32> to vector<5x1x10x8xf32>
    %129 = vector.shape_cast %128 : vector<5x1x10x8xf32> to vector<5x10x8xf32>
    %130 = vector.shape_cast %129 : vector<5x10x8xf32> to vector<50x8xf32>
    %131 = vector.shape_cast %130 : vector<50x8xf32> to vector<25x2x8xf32>
    %132 = vector.extract_strided_slice %131 {offsets = [0, 1, 0], sizes = [25, 1, 8], strides = [1, 1, 1]} : vector<25x2x8xf32> to vector<25x1x8xf32>
    %133 = vector.shape_cast %132 : vector<25x1x8xf32> to vector<25x8xf32>
    %134 = vector.shape_cast %133 : vector<25x8xf32> to vector<5x5x8xf32>
    %135 = vector.shape_cast %118 : vector<10x10x8xf32> to vector<5x2x10x8xf32>
    %136 = vector.extract_strided_slice %135 {offsets = [0, 1, 0, 0], sizes = [5, 1, 10, 8], strides = [1, 1, 1, 1]} : vector<5x2x10x8xf32> to vector<5x1x10x8xf32>
    %137 = vector.shape_cast %136 : vector<5x1x10x8xf32> to vector<5x10x8xf32>
    %138 = vector.shape_cast %137 : vector<5x10x8xf32> to vector<50x8xf32>
    %139 = vector.shape_cast %138 : vector<50x8xf32> to vector<25x2x8xf32>
    %140 = vector.extract_strided_slice %139 {offsets = [0, 0, 0], sizes = [25, 1, 8], strides = [1, 1, 1]} : vector<25x2x8xf32> to vector<25x1x8xf32>
    %141 = vector.shape_cast %140 : vector<25x1x8xf32> to vector<25x8xf32>
    %142 = vector.shape_cast %141 : vector<25x8xf32> to vector<5x5x8xf32>
    %143 = vector.shape_cast %118 : vector<10x10x8xf32> to vector<5x2x10x8xf32>
    %144 = vector.extract_strided_slice %143 {offsets = [0, 1, 0, 0], sizes = [5, 1, 10, 8], strides = [1, 1, 1, 1]} : vector<5x2x10x8xf32> to vector<5x1x10x8xf32>
    %145 = vector.shape_cast %144 : vector<5x1x10x8xf32> to vector<5x10x8xf32>
    %146 = vector.shape_cast %145 : vector<5x10x8xf32> to vector<50x8xf32>
    %147 = vector.shape_cast %146 : vector<50x8xf32> to vector<25x2x8xf32>
    %148 = vector.extract_strided_slice %147 {offsets = [0, 1, 0], sizes = [25, 1, 8], strides = [1, 1, 1]} : vector<25x2x8xf32> to vector<25x1x8xf32>
    %149 = vector.shape_cast %148 : vector<25x1x8xf32> to vector<25x8xf32>
    %150 = vector.shape_cast %149 : vector<25x8xf32> to vector<5x5x8xf32>
    %151 = vector.extract_strided_slice %126 {offsets = [0, 0, 0], sizes = [4, 4, 8], strides = [1, 1, 1]} : vector<5x5x8xf32> to vector<4x4x8xf32>
    %152 = vector.shape_cast %151 : vector<4x4x8xf32> to vector<16x8xf32>
    %153 = vector.extract_strided_slice %134 {offsets = [0, 0, 0], sizes = [4, 4, 8], strides = [1, 1, 1]} : vector<5x5x8xf32> to vector<4x4x8xf32>
    %154 = vector.shape_cast %153 : vector<4x4x8xf32> to vector<16x8xf32>
    %155 = vector.extract_strided_slice %126 {offsets = [0, 1, 0], sizes = [4, 4, 8], strides = [1, 1, 1]} : vector<5x5x8xf32> to vector<4x4x8xf32>
    %156 = vector.shape_cast %155 : vector<4x4x8xf32> to vector<16x8xf32>
    %157 = vector.extract_strided_slice %142 {offsets = [0, 0, 0], sizes = [4, 4, 8], strides = [1, 1, 1]} : vector<5x5x8xf32> to vector<4x4x8xf32>
    %158 = vector.shape_cast %157 : vector<4x4x8xf32> to vector<16x8xf32>
    %159 = vector.extract_strided_slice %150 {offsets = [0, 0, 0], sizes = [4, 4, 8], strides = [1, 1, 1]} : vector<5x5x8xf32> to vector<4x4x8xf32>
    %160 = vector.shape_cast %159 : vector<4x4x8xf32> to vector<16x8xf32>
    %161 = vector.extract_strided_slice %142 {offsets = [0, 1, 0], sizes = [4, 4, 8], strides = [1, 1, 1]} : vector<5x5x8xf32> to vector<4x4x8xf32>
    %162 = vector.shape_cast %161 : vector<4x4x8xf32> to vector<16x8xf32>
    %163 = vector.extract_strided_slice %126 {offsets = [1, 0, 0], sizes = [4, 4, 8], strides = [1, 1, 1]} : vector<5x5x8xf32> to vector<4x4x8xf32>
    %164 = vector.shape_cast %163 : vector<4x4x8xf32> to vector<16x8xf32>
    %165 = vector.extract_strided_slice %134 {offsets = [1, 0, 0], sizes = [4, 4, 8], strides = [1, 1, 1]} : vector<5x5x8xf32> to vector<4x4x8xf32>
    %166 = vector.shape_cast %165 : vector<4x4x8xf32> to vector<16x8xf32>
    %167 = vector.extract_strided_slice %126 {offsets = [1, 1, 0], sizes = [4, 4, 8], strides = [1, 1, 1]} : vector<5x5x8xf32> to vector<4x4x8xf32>
    %168 = vector.shape_cast %167 : vector<4x4x8xf32> to vector<16x8xf32>
    %169 = tpu.concatenate %152, %154, %156, %158, %160, %162, %164, %166, %168 in 1 : vector<16x8xf32>, vector<16x8xf32>, vector<16x8xf32>, vector<16x8xf32>, vector<16x8xf32>, vector<16x8xf32>, vector<16x8xf32>, vector<16x8xf32>, vector<16x8xf32> -> vector<16x72xf32>
    %170 = arith.truncf %169 : vector<16x72xf32> to vector<16x72xbf16>
    %cst_37 = arith.constant dense<0.000000e+00> : vector<16x16xf32>
    %171 = tpu.matmul %170, %109, %cst_37 {dimension_numbers = #tpu.dot_dimension_numbers<[1], [0], [0], [1], [0, 0, 1, 1], [], []>} : vector<16x72xbf16>, vector<72x16xbf16>, vector<16x16xf32> -> vector<16x16xf32>
    %172 = vector.broadcast %110 : vector<1x16xf32> to vector<16x16xf32>
    %173 = arith.addf %171, %172 : vector<16x16xf32>
    %cst_38 = arith.constant dense<0.000000e+00> : vector<16xf32>
    %174 = vector.multi_reduction <add>, %173, %cst_38 [0] : vector<16x16xf32> to vector<16xf32>
    %175 = vector.shape_cast %174 : vector<16xf32> to vector<1x16xf32>
    %cst_39 = arith.constant 1.600000e+01 : f32
    %176 = vector.broadcast %cst_39 : f32 to vector<1x16xf32>
    %177 = arith.divf %175, %176 : vector<1x16xf32>
    %178 = vector.broadcast %177 : vector<1x16xf32> to vector<16x16xf32>
    %179 = arith.subf %173, %178 : vector<16x16xf32>
    %180 = arith.mulf %179, %179 : vector<16x16xf32>
    %cst_40 = arith.constant dense<0.000000e+00> : vector<16xf32>
    %181 = vector.multi_reduction <add>, %180, %cst_40 [0] : vector<16x16xf32> to vector<16xf32>
    %182 = vector.shape_cast %181 : vector<16xf32> to vector<1x16xf32>
    %cst_41 = arith.constant 1.600000e+01 : f32
    %183 = vector.broadcast %cst_41 : f32 to vector<1x16xf32>
    %184 = arith.divf %182, %183 : vector<1x16xf32>
    %185 = vector.broadcast %177 : vector<1x16xf32> to vector<16x16xf32>
    %186 = arith.subf %173, %185 : vector<16x16xf32>
    %cst_42 = arith.constant 9.99999974E-6 : f32
    %187 = vector.broadcast %cst_42 : f32 to vector<1x16xf32>
    %188 = arith.addf %184, %187 : vector<1x16xf32>
    %189 = math.rsqrt %188 : vector<1x16xf32>
    %190 = vector.broadcast %189 : vector<1x16xf32> to vector<16x16xf32>
    %191 = arith.mulf %186, %190 : vector<16x16xf32>
    %cst_43 = arith.constant 2.000000e-01 : f32
    %192 = vector.broadcast %cst_43 : f32 to vector<16x16xf32>
    %193 = arith.mulf %192, %191 : vector<16x16xf32>
    %194 = arith.maximumf %191, %193 : vector<16x16xf32>
    %195 = vector.extract_strided_slice %150 {offsets = [0, 0, 0], sizes = [4, 4, 8], strides = [1, 1, 1]} : vector<5x5x8xf32> to vector<4x4x8xf32>
    %196 = vector.shape_cast %195 : vector<4x4x8xf32> to vector<16x8xf32>
    %197 = arith.truncf %196 : vector<16x8xf32> to vector<16x8xbf16>
    %cst_44 = arith.constant dense<0.000000e+00> : vector<16x16xf32>
    %198 = tpu.matmul %197, %111, %cst_44 {dimension_numbers = #tpu.dot_dimension_numbers<[1], [0], [0], [1], [0, 0, 1, 1], [], []>} : vector<16x8xbf16>, vector<8x16xbf16>, vector<16x16xf32> -> vector<16x16xf32>
    %199 = vector.broadcast %112 : vector<1x16xf32> to vector<16x16xf32>
    %200 = arith.addf %198, %199 : vector<16x16xf32>
    %201 = vector.shape_cast %194 : vector<16x16xf32> to vector<4x4x16xf32>
    %cst_45 = arith.constant 0.000000e+00 : f32
    %202 = vector.broadcast %cst_45 : f32 to vector<1x4x16xf32>
    %203 = tpu.concatenate %202, %201, %202 in 0 : vector<1x4x16xf32>, vector<4x4x16xf32>, vector<1x4x16xf32> -> vector<6x4x16xf32>
    %cst_46 = arith.constant 0.000000e+00 : f32
    %204 = vector.broadcast %cst_46 : f32 to vector<6x1x16xf32>
    %205 = tpu.concatenate %204, %203, %204 in 1 : vector<6x1x16xf32>, vector<6x4x16xf32>, vector<6x1x16xf32> -> vector<6x6x16xf32>
    %206 = vector.extract_strided_slice %205 {offsets = [0, 0, 0], sizes = [4, 4, 16], strides = [1, 1, 1]} : vector<6x6x16xf32> to vector<4x4x16xf32>
    %207 = vector.shape_cast %206 : vector<4x4x16xf32> to vector<16x16xf32>
    %208 = vector.extract_strided_slice %205 {offsets = [0, 1, 0], sizes = [4, 4, 16], strides = [1, 1, 1]} : vector<6x6x16xf32> to vector<4x4x16xf32>
    %209 = vector.shape_cast %208 : vector<4x4x16xf32> to vector<16x16xf32>
    %210 = vector.extract_strided_slice %205 {offsets = [0, 2, 0], sizes = [4, 4, 16], strides = [1, 1, 1]} : vector<6x6x16xf32> to vector<4x4x16xf32>
    %211 = vector.shape_cast %210 : vector<4x4x16xf32> to vector<16x16xf32>
    %212 = vector.extract_strided_slice %205 {offsets = [1, 0, 0], sizes = [4, 4, 16], strides = [1, 1, 1]} : vector<6x6x16xf32> to vector<4x4x16xf32>
    %213 = vector.shape_cast %212 : vector<4x4x16xf32> to vector<16x16xf32>
    %214 = vector.extract_strided_slice %205 {offsets = [1, 1, 0], sizes = [4, 4, 16], strides = [1, 1, 1]} : vector<6x6x16xf32> to vector<4x4x16xf32>
    %215 = vector.shape_cast %214 : vector<4x4x16xf32> to vector<16x16xf32>
    %216 = vector.extract_strided_slice %205 {offsets = [1, 2, 0], sizes = [4, 4, 16], strides = [1, 1, 1]} : vector<6x6x16xf32> to vector<4x4x16xf32>
    %217 = vector.shape_cast %216 : vector<4x4x16xf32> to vector<16x16xf32>
    %218 = vector.extract_strided_slice %205 {offsets = [2, 0, 0], sizes = [4, 4, 16], strides = [1, 1, 1]} : vector<6x6x16xf32> to vector<4x4x16xf32>
    %219 = vector.shape_cast %218 : vector<4x4x16xf32> to vector<16x16xf32>
    %220 = vector.extract_strided_slice %205 {offsets = [2, 1, 0], sizes = [4, 4, 16], strides = [1, 1, 1]} : vector<6x6x16xf32> to vector<4x4x16xf32>
    %221 = vector.shape_cast %220 : vector<4x4x16xf32> to vector<16x16xf32>
    %222 = vector.extract_strided_slice %205 {offsets = [2, 2, 0], sizes = [4, 4, 16], strides = [1, 1, 1]} : vector<6x6x16xf32> to vector<4x4x16xf32>
    %223 = vector.shape_cast %222 : vector<4x4x16xf32> to vector<16x16xf32>
    %224 = tpu.concatenate %207, %209, %211, %213, %215, %217, %219, %221, %223 in 1 : vector<16x16xf32>, vector<16x16xf32>, vector<16x16xf32>, vector<16x16xf32>, vector<16x16xf32>, vector<16x16xf32>, vector<16x16xf32>, vector<16x16xf32>, vector<16x16xf32> -> vector<16x144xf32>
    %225 = arith.truncf %224 : vector<16x144xf32> to vector<16x144xbf16>
    %cst_47 = arith.constant dense<0.000000e+00> : vector<16x16xf32>
    %226 = tpu.matmul %225, %113, %cst_47 {dimension_numbers = #tpu.dot_dimension_numbers<[1], [0], [0], [1], [0, 0, 1, 1], [], []>} : vector<16x144xbf16>, vector<144x16xbf16>, vector<16x16xf32> -> vector<16x16xf32>
    %227 = vector.broadcast %114 : vector<1x16xf32> to vector<16x16xf32>
    %228 = arith.addf %226, %227 : vector<16x16xf32>
    %cst_48 = arith.constant dense<0.000000e+00> : vector<16xf32>
    %229 = vector.multi_reduction <add>, %228, %cst_48 [0] : vector<16x16xf32> to vector<16xf32>
    %230 = vector.shape_cast %229 : vector<16xf32> to vector<1x16xf32>
    %cst_49 = arith.constant 1.600000e+01 : f32
    %231 = vector.broadcast %cst_49 : f32 to vector<1x16xf32>
    %232 = arith.divf %230, %231 : vector<1x16xf32>
    %233 = vector.broadcast %232 : vector<1x16xf32> to vector<16x16xf32>
    %234 = arith.subf %228, %233 : vector<16x16xf32>
    %235 = arith.mulf %234, %234 : vector<16x16xf32>
    %cst_50 = arith.constant dense<0.000000e+00> : vector<16xf32>
    %236 = vector.multi_reduction <add>, %235, %cst_50 [0] : vector<16x16xf32> to vector<16xf32>
    %237 = vector.shape_cast %236 : vector<16xf32> to vector<1x16xf32>
    %cst_51 = arith.constant 1.600000e+01 : f32
    %238 = vector.broadcast %cst_51 : f32 to vector<1x16xf32>
    %239 = arith.divf %237, %238 : vector<1x16xf32>
    %240 = vector.broadcast %232 : vector<1x16xf32> to vector<16x16xf32>
    %241 = arith.subf %228, %240 : vector<16x16xf32>
    %cst_52 = arith.constant 9.99999974E-6 : f32
    %242 = vector.broadcast %cst_52 : f32 to vector<1x16xf32>
    %243 = arith.addf %239, %242 : vector<1x16xf32>
    %244 = math.rsqrt %243 : vector<1x16xf32>
    %245 = vector.broadcast %244 : vector<1x16xf32> to vector<16x16xf32>
    %246 = arith.mulf %241, %245 : vector<16x16xf32>
    %247 = arith.addf %246, %200 : vector<16x16xf32>
    %cst_53 = arith.constant 2.000000e-01 : f32
    %248 = vector.broadcast %cst_53 : f32 to vector<16x16xf32>
    %249 = arith.mulf %248, %247 : vector<16x16xf32>
    %250 = arith.maximumf %247, %249 : vector<16x16xf32>
    %251 = vector.shape_cast %250 : vector<16x16xf32> to vector<4x4x16xf32>
    %c0_54 = arith.constant 0 : index
    %c0_55 = arith.constant 0 : index
    %252 = vector.load %arg14[%c0_54, %c0_55] : memref<144x32xbf16, #tpu.memory_space<vmem>>, vector<144x32xbf16>
    %c0_56 = arith.constant 0 : index
    %c0_57 = arith.constant 0 : index
    %253 = vector.load %arg15[%c0_56, %c0_57] : memref<1x32xf32, #tpu.memory_space<vmem>>, vector<1x32xf32>
    %c0_58 = arith.constant 0 : index
    %c0_59 = arith.constant 0 : index
    %254 = vector.load %arg16[%c0_58, %c0_59] : memref<16x32xbf16, #tpu.memory_space<vmem>>, vector<16x32xbf16>
    %c0_60 = arith.constant 0 : index
    %c0_61 = arith.constant 0 : index
    %255 = vector.load %arg17[%c0_60, %c0_61] : memref<1x32xf32, #tpu.memory_space<vmem>>, vector<1x32xf32>
    %c0_62 = arith.constant 0 : index
    %c0_63 = arith.constant 0 : index
    %256 = vector.load %arg18[%c0_62, %c0_63] : memref<288x32xbf16, #tpu.memory_space<vmem>>, vector<288x32xbf16>
    %c0_64 = arith.constant 0 : index
    %c0_65 = arith.constant 0 : index
    %257 = vector.load %arg19[%c0_64, %c0_65] : memref<1x32xf32, #tpu.memory_space<vmem>>, vector<1x32xf32>
    %cst_66 = arith.constant 0.000000e+00 : f32
    %258 = vector.broadcast %cst_66 : f32 to vector<1x4x16xf32>
    %259 = tpu.concatenate %258, %251, %258 in 0 : vector<1x4x16xf32>, vector<4x4x16xf32>, vector<1x4x16xf32> -> vector<6x4x16xf32>
    %cst_67 = arith.constant 0.000000e+00 : f32
    %260 = vector.broadcast %cst_67 : f32 to vector<6x1x16xf32>
    %261 = tpu.concatenate %260, %259, %260 in 1 : vector<6x1x16xf32>, vector<6x4x16xf32>, vector<6x1x16xf32> -> vector<6x6x16xf32>
    %262 = vector.shape_cast %261 : vector<6x6x16xf32> to vector<3x2x6x16xf32>
    %263 = vector.extract_strided_slice %262 {offsets = [0, 0, 0, 0], sizes = [3, 1, 6, 16], strides = [1, 1, 1, 1]} : vector<3x2x6x16xf32> to vector<3x1x6x16xf32>
    %264 = vector.shape_cast %263 : vector<3x1x6x16xf32> to vector<3x6x16xf32>
    %265 = vector.shape_cast %264 : vector<3x6x16xf32> to vector<18x16xf32>
    %266 = vector.shape_cast %265 : vector<18x16xf32> to vector<9x2x16xf32>
    %267 = vector.extract_strided_slice %266 {offsets = [0, 0, 0], sizes = [9, 1, 16], strides = [1, 1, 1]} : vector<9x2x16xf32> to vector<9x1x16xf32>
    %268 = vector.shape_cast %267 : vector<9x1x16xf32> to vector<9x16xf32>
    %269 = vector.shape_cast %268 : vector<9x16xf32> to vector<3x3x16xf32>
    %270 = vector.shape_cast %261 : vector<6x6x16xf32> to vector<3x2x6x16xf32>
    %271 = vector.extract_strided_slice %270 {offsets = [0, 0, 0, 0], sizes = [3, 1, 6, 16], strides = [1, 1, 1, 1]} : vector<3x2x6x16xf32> to vector<3x1x6x16xf32>
    %272 = vector.shape_cast %271 : vector<3x1x6x16xf32> to vector<3x6x16xf32>
    %273 = vector.shape_cast %272 : vector<3x6x16xf32> to vector<18x16xf32>
    %274 = vector.shape_cast %273 : vector<18x16xf32> to vector<9x2x16xf32>
    %275 = vector.extract_strided_slice %274 {offsets = [0, 1, 0], sizes = [9, 1, 16], strides = [1, 1, 1]} : vector<9x2x16xf32> to vector<9x1x16xf32>
    %276 = vector.shape_cast %275 : vector<9x1x16xf32> to vector<9x16xf32>
    %277 = vector.shape_cast %276 : vector<9x16xf32> to vector<3x3x16xf32>
    %278 = vector.shape_cast %261 : vector<6x6x16xf32> to vector<3x2x6x16xf32>
    %279 = vector.extract_strided_slice %278 {offsets = [0, 1, 0, 0], sizes = [3, 1, 6, 16], strides = [1, 1, 1, 1]} : vector<3x2x6x16xf32> to vector<3x1x6x16xf32>
    %280 = vector.shape_cast %279 : vector<3x1x6x16xf32> to vector<3x6x16xf32>
    %281 = vector.shape_cast %280 : vector<3x6x16xf32> to vector<18x16xf32>
    %282 = vector.shape_cast %281 : vector<18x16xf32> to vector<9x2x16xf32>
    %283 = vector.extract_strided_slice %282 {offsets = [0, 0, 0], sizes = [9, 1, 16], strides = [1, 1, 1]} : vector<9x2x16xf32> to vector<9x1x16xf32>
    %284 = vector.shape_cast %283 : vector<9x1x16xf32> to vector<9x16xf32>
    %285 = vector.shape_cast %284 : vector<9x16xf32> to vector<3x3x16xf32>
    %286 = vector.shape_cast %261 : vector<6x6x16xf32> to vector<3x2x6x16xf32>
    %287 = vector.extract_strided_slice %286 {offsets = [0, 1, 0, 0], sizes = [3, 1, 6, 16], strides = [1, 1, 1, 1]} : vector<3x2x6x16xf32> to vector<3x1x6x16xf32>
    %288 = vector.shape_cast %287 : vector<3x1x6x16xf32> to vector<3x6x16xf32>
    %289 = vector.shape_cast %288 : vector<3x6x16xf32> to vector<18x16xf32>
    %290 = vector.shape_cast %289 : vector<18x16xf32> to vector<9x2x16xf32>
    %291 = vector.extract_strided_slice %290 {offsets = [0, 1, 0], sizes = [9, 1, 16], strides = [1, 1, 1]} : vector<9x2x16xf32> to vector<9x1x16xf32>
    %292 = vector.shape_cast %291 : vector<9x1x16xf32> to vector<9x16xf32>
    %293 = vector.shape_cast %292 : vector<9x16xf32> to vector<3x3x16xf32>
    %294 = vector.extract_strided_slice %269 {offsets = [0, 0, 0], sizes = [2, 2, 16], strides = [1, 1, 1]} : vector<3x3x16xf32> to vector<2x2x16xf32>
    %295 = vector.shape_cast %294 : vector<2x2x16xf32> to vector<4x16xf32>
    %296 = vector.extract_strided_slice %277 {offsets = [0, 0, 0], sizes = [2, 2, 16], strides = [1, 1, 1]} : vector<3x3x16xf32> to vector<2x2x16xf32>
    %297 = vector.shape_cast %296 : vector<2x2x16xf32> to vector<4x16xf32>
    %298 = vector.extract_strided_slice %269 {offsets = [0, 1, 0], sizes = [2, 2, 16], strides = [1, 1, 1]} : vector<3x3x16xf32> to vector<2x2x16xf32>
    %299 = vector.shape_cast %298 : vector<2x2x16xf32> to vector<4x16xf32>
    %300 = vector.extract_strided_slice %285 {offsets = [0, 0, 0], sizes = [2, 2, 16], strides = [1, 1, 1]} : vector<3x3x16xf32> to vector<2x2x16xf32>
    %301 = vector.shape_cast %300 : vector<2x2x16xf32> to vector<4x16xf32>
    %302 = vector.extract_strided_slice %293 {offsets = [0, 0, 0], sizes = [2, 2, 16], strides = [1, 1, 1]} : vector<3x3x16xf32> to vector<2x2x16xf32>
    %303 = vector.shape_cast %302 : vector<2x2x16xf32> to vector<4x16xf32>
    %304 = vector.extract_strided_slice %285 {offsets = [0, 1, 0], sizes = [2, 2, 16], strides = [1, 1, 1]} : vector<3x3x16xf32> to vector<2x2x16xf32>
    %305 = vector.shape_cast %304 : vector<2x2x16xf32> to vector<4x16xf32>
    %306 = vector.extract_strided_slice %269 {offsets = [1, 0, 0], sizes = [2, 2, 16], strides = [1, 1, 1]} : vector<3x3x16xf32> to vector<2x2x16xf32>
    %307 = vector.shape_cast %306 : vector<2x2x16xf32> to vector<4x16xf32>
    %308 = vector.extract_strided_slice %277 {offsets = [1, 0, 0], sizes = [2, 2, 16], strides = [1, 1, 1]} : vector<3x3x16xf32> to vector<2x2x16xf32>
    %309 = vector.shape_cast %308 : vector<2x2x16xf32> to vector<4x16xf32>
    %310 = vector.extract_strided_slice %269 {offsets = [1, 1, 0], sizes = [2, 2, 16], strides = [1, 1, 1]} : vector<3x3x16xf32> to vector<2x2x16xf32>
    %311 = vector.shape_cast %310 : vector<2x2x16xf32> to vector<4x16xf32>
    %312 = tpu.concatenate %295, %297, %299, %301, %303, %305, %307, %309, %311 in 1 : vector<4x16xf32>, vector<4x16xf32>, vector<4x16xf32>, vector<4x16xf32>, vector<4x16xf32>, vector<4x16xf32>, vector<4x16xf32>, vector<4x16xf32>, vector<4x16xf32> -> vector<4x144xf32>
    %313 = arith.truncf %312 : vector<4x144xf32> to vector<4x144xbf16>
    %cst_68 = arith.constant dense<0.000000e+00> : vector<4x32xf32>
    %314 = tpu.matmul %313, %252, %cst_68 {dimension_numbers = #tpu.dot_dimension_numbers<[1], [0], [0], [1], [0, 0, 1, 1], [], []>} : vector<4x144xbf16>, vector<144x32xbf16>, vector<4x32xf32> -> vector<4x32xf32>
    %315 = vector.broadcast %253 : vector<1x32xf32> to vector<4x32xf32>
    %316 = arith.addf %314, %315 : vector<4x32xf32>
    %cst_69 = arith.constant dense<0.000000e+00> : vector<32xf32>
    %317 = vector.multi_reduction <add>, %316, %cst_69 [0] : vector<4x32xf32> to vector<32xf32>
    %318 = vector.shape_cast %317 : vector<32xf32> to vector<1x32xf32>
    %cst_70 = arith.constant 4.000000e+00 : f32
    %319 = vector.broadcast %cst_70 : f32 to vector<1x32xf32>
    %320 = arith.divf %318, %319 : vector<1x32xf32>
    %321 = vector.broadcast %320 : vector<1x32xf32> to vector<4x32xf32>
    %322 = arith.subf %316, %321 : vector<4x32xf32>
    %323 = arith.mulf %322, %322 : vector<4x32xf32>
    %cst_71 = arith.constant dense<0.000000e+00> : vector<32xf32>
    %324 = vector.multi_reduction <add>, %323, %cst_71 [0] : vector<4x32xf32> to vector<32xf32>
    %325 = vector.shape_cast %324 : vector<32xf32> to vector<1x32xf32>
    %cst_72 = arith.constant 4.000000e+00 : f32
    %326 = vector.broadcast %cst_72 : f32 to vector<1x32xf32>
    %327 = arith.divf %325, %326 : vector<1x32xf32>
    %328 = vector.broadcast %320 : vector<1x32xf32> to vector<4x32xf32>
    %329 = arith.subf %316, %328 : vector<4x32xf32>
    %cst_73 = arith.constant 9.99999974E-6 : f32
    %330 = vector.broadcast %cst_73 : f32 to vector<1x32xf32>
    %331 = arith.addf %327, %330 : vector<1x32xf32>
    %332 = math.rsqrt %331 : vector<1x32xf32>
    %333 = vector.broadcast %332 : vector<1x32xf32> to vector<4x32xf32>
    %334 = arith.mulf %329, %333 : vector<4x32xf32>
    %cst_74 = arith.constant 2.000000e-01 : f32
    %335 = vector.broadcast %cst_74 : f32 to vector<4x32xf32>
    %336 = arith.mulf %335, %334 : vector<4x32xf32>
    %337 = arith.maximumf %334, %336 : vector<4x32xf32>
    %338 = vector.extract_strided_slice %293 {offsets = [0, 0, 0], sizes = [2, 2, 16], strides = [1, 1, 1]} : vector<3x3x16xf32> to vector<2x2x16xf32>
    %339 = vector.shape_cast %338 : vector<2x2x16xf32> to vector<4x16xf32>
    %340 = arith.truncf %339 : vector<4x16xf32> to vector<4x16xbf16>
    %cst_75 = arith.constant dense<0.000000e+00> : vector<4x32xf32>
    %341 = tpu.matmul %340, %254, %cst_75 {dimension_numbers = #tpu.dot_dimension_numbers<[1], [0], [0], [1], [0, 0, 1, 1], [], []>} : vector<4x16xbf16>, vector<16x32xbf16>, vector<4x32xf32> -> vector<4x32xf32>
    %342 = vector.broadcast %255 : vector<1x32xf32> to vector<4x32xf32>
    %343 = arith.addf %341, %342 : vector<4x32xf32>
    %344 = vector.shape_cast %337 : vector<4x32xf32> to vector<2x2x32xf32>
    %cst_76 = arith.constant 0.000000e+00 : f32
    %345 = vector.broadcast %cst_76 : f32 to vector<1x2x32xf32>
    %346 = tpu.concatenate %345, %344, %345 in 0 : vector<1x2x32xf32>, vector<2x2x32xf32>, vector<1x2x32xf32> -> vector<4x2x32xf32>
    %cst_77 = arith.constant 0.000000e+00 : f32
    %347 = vector.broadcast %cst_77 : f32 to vector<4x1x32xf32>
    %348 = tpu.concatenate %347, %346, %347 in 1 : vector<4x1x32xf32>, vector<4x2x32xf32>, vector<4x1x32xf32> -> vector<4x4x32xf32>
    %349 = vector.extract_strided_slice %348 {offsets = [0, 0, 0], sizes = [2, 2, 32], strides = [1, 1, 1]} : vector<4x4x32xf32> to vector<2x2x32xf32>
    %350 = vector.shape_cast %349 : vector<2x2x32xf32> to vector<4x32xf32>
    %351 = vector.extract_strided_slice %348 {offsets = [0, 1, 0], sizes = [2, 2, 32], strides = [1, 1, 1]} : vector<4x4x32xf32> to vector<2x2x32xf32>
    %352 = vector.shape_cast %351 : vector<2x2x32xf32> to vector<4x32xf32>
    %353 = vector.extract_strided_slice %348 {offsets = [0, 2, 0], sizes = [2, 2, 32], strides = [1, 1, 1]} : vector<4x4x32xf32> to vector<2x2x32xf32>
    %354 = vector.shape_cast %353 : vector<2x2x32xf32> to vector<4x32xf32>
    %355 = vector.extract_strided_slice %348 {offsets = [1, 0, 0], sizes = [2, 2, 32], strides = [1, 1, 1]} : vector<4x4x32xf32> to vector<2x2x32xf32>
    %356 = vector.shape_cast %355 : vector<2x2x32xf32> to vector<4x32xf32>
    %357 = vector.extract_strided_slice %348 {offsets = [1, 1, 0], sizes = [2, 2, 32], strides = [1, 1, 1]} : vector<4x4x32xf32> to vector<2x2x32xf32>
    %358 = vector.shape_cast %357 : vector<2x2x32xf32> to vector<4x32xf32>
    %359 = vector.extract_strided_slice %348 {offsets = [1, 2, 0], sizes = [2, 2, 32], strides = [1, 1, 1]} : vector<4x4x32xf32> to vector<2x2x32xf32>
    %360 = vector.shape_cast %359 : vector<2x2x32xf32> to vector<4x32xf32>
    %361 = vector.extract_strided_slice %348 {offsets = [2, 0, 0], sizes = [2, 2, 32], strides = [1, 1, 1]} : vector<4x4x32xf32> to vector<2x2x32xf32>
    %362 = vector.shape_cast %361 : vector<2x2x32xf32> to vector<4x32xf32>
    %363 = vector.extract_strided_slice %348 {offsets = [2, 1, 0], sizes = [2, 2, 32], strides = [1, 1, 1]} : vector<4x4x32xf32> to vector<2x2x32xf32>
    %364 = vector.shape_cast %363 : vector<2x2x32xf32> to vector<4x32xf32>
    %365 = vector.extract_strided_slice %348 {offsets = [2, 2, 0], sizes = [2, 2, 32], strides = [1, 1, 1]} : vector<4x4x32xf32> to vector<2x2x32xf32>
    %366 = vector.shape_cast %365 : vector<2x2x32xf32> to vector<4x32xf32>
    %367 = tpu.concatenate %350, %352, %354, %356, %358, %360, %362, %364, %366 in 1 : vector<4x32xf32>, vector<4x32xf32>, vector<4x32xf32>, vector<4x32xf32>, vector<4x32xf32>, vector<4x32xf32>, vector<4x32xf32>, vector<4x32xf32>, vector<4x32xf32> -> vector<4x288xf32>
    %368 = arith.truncf %367 : vector<4x288xf32> to vector<4x288xbf16>
    %cst_78 = arith.constant dense<0.000000e+00> : vector<4x32xf32>
    %369 = tpu.matmul %368, %256, %cst_78 {dimension_numbers = #tpu.dot_dimension_numbers<[1], [0], [0], [1], [0, 0, 1, 1], [], []>} : vector<4x288xbf16>, vector<288x32xbf16>, vector<4x32xf32> -> vector<4x32xf32>
    %370 = vector.broadcast %257 : vector<1x32xf32> to vector<4x32xf32>
    %371 = arith.addf %369, %370 : vector<4x32xf32>
    %cst_79 = arith.constant dense<0.000000e+00> : vector<32xf32>
    %372 = vector.multi_reduction <add>, %371, %cst_79 [0] : vector<4x32xf32> to vector<32xf32>
    %373 = vector.shape_cast %372 : vector<32xf32> to vector<1x32xf32>
    %cst_80 = arith.constant 4.000000e+00 : f32
    %374 = vector.broadcast %cst_80 : f32 to vector<1x32xf32>
    %375 = arith.divf %373, %374 : vector<1x32xf32>
    %376 = vector.broadcast %375 : vector<1x32xf32> to vector<4x32xf32>
    %377 = arith.subf %371, %376 : vector<4x32xf32>
    %378 = arith.mulf %377, %377 : vector<4x32xf32>
    %cst_81 = arith.constant dense<0.000000e+00> : vector<32xf32>
    %379 = vector.multi_reduction <add>, %378, %cst_81 [0] : vector<4x32xf32> to vector<32xf32>
    %380 = vector.shape_cast %379 : vector<32xf32> to vector<1x32xf32>
    %cst_82 = arith.constant 4.000000e+00 : f32
    %381 = vector.broadcast %cst_82 : f32 to vector<1x32xf32>
    %382 = arith.divf %380, %381 : vector<1x32xf32>
    %383 = vector.broadcast %375 : vector<1x32xf32> to vector<4x32xf32>
    %384 = arith.subf %371, %383 : vector<4x32xf32>
    %cst_83 = arith.constant 9.99999974E-6 : f32
    %385 = vector.broadcast %cst_83 : f32 to vector<1x32xf32>
    %386 = arith.addf %382, %385 : vector<1x32xf32>
    %387 = math.rsqrt %386 : vector<1x32xf32>
    %388 = vector.broadcast %387 : vector<1x32xf32> to vector<4x32xf32>
    %389 = arith.mulf %384, %388 : vector<4x32xf32>
    %390 = arith.addf %389, %343 : vector<4x32xf32>
    %cst_84 = arith.constant 2.000000e-01 : f32
    %391 = vector.broadcast %cst_84 : f32 to vector<4x32xf32>
    %392 = arith.mulf %391, %390 : vector<4x32xf32>
    %393 = arith.maximumf %390, %392 : vector<4x32xf32>
    %394 = vector.shape_cast %393 : vector<4x32xf32> to vector<2x2x32xf32>
    %c0_85 = arith.constant 0 : index
    %c0_86 = arith.constant 0 : index
    %395 = vector.load %arg20[%c0_85, %c0_86] : memref<288x1xbf16, #tpu.memory_space<vmem>>, vector<288x1xbf16>
    %c0_87 = arith.constant 0 : index
    %c0_88 = arith.constant 0 : index
    %396 = vector.load %arg21[%c0_87, %c0_88] : memref<1x1xf32, #tpu.memory_space<vmem>>, vector<1x1xf32>
    %cst_89 = arith.constant 0.000000e+00 : f32
    %397 = vector.broadcast %cst_89 : f32 to vector<1x2x32xf32>
    %398 = tpu.concatenate %397, %394, %397 in 0 : vector<1x2x32xf32>, vector<2x2x32xf32>, vector<1x2x32xf32> -> vector<4x2x32xf32>
    %cst_90 = arith.constant 0.000000e+00 : f32
    %399 = vector.broadcast %cst_90 : f32 to vector<4x1x32xf32>
    %400 = tpu.concatenate %399, %398, %399 in 1 : vector<4x1x32xf32>, vector<4x2x32xf32>, vector<4x1x32xf32> -> vector<4x4x32xf32>
    %401 = vector.extract_strided_slice %400 {offsets = [0, 0, 0], sizes = [2, 2, 32], strides = [1, 1, 1]} : vector<4x4x32xf32> to vector<2x2x32xf32>
    %402 = vector.shape_cast %401 : vector<2x2x32xf32> to vector<4x32xf32>
    %403 = vector.extract_strided_slice %400 {offsets = [0, 1, 0], sizes = [2, 2, 32], strides = [1, 1, 1]} : vector<4x4x32xf32> to vector<2x2x32xf32>
    %404 = vector.shape_cast %403 : vector<2x2x32xf32> to vector<4x32xf32>
    %405 = vector.extract_strided_slice %400 {offsets = [0, 2, 0], sizes = [2, 2, 32], strides = [1, 1, 1]} : vector<4x4x32xf32> to vector<2x2x32xf32>
    %406 = vector.shape_cast %405 : vector<2x2x32xf32> to vector<4x32xf32>
    %407 = vector.extract_strided_slice %400 {offsets = [1, 0, 0], sizes = [2, 2, 32], strides = [1, 1, 1]} : vector<4x4x32xf32> to vector<2x2x32xf32>
    %408 = vector.shape_cast %407 : vector<2x2x32xf32> to vector<4x32xf32>
    %409 = vector.extract_strided_slice %400 {offsets = [1, 1, 0], sizes = [2, 2, 32], strides = [1, 1, 1]} : vector<4x4x32xf32> to vector<2x2x32xf32>
    %410 = vector.shape_cast %409 : vector<2x2x32xf32> to vector<4x32xf32>
    %411 = vector.extract_strided_slice %400 {offsets = [1, 2, 0], sizes = [2, 2, 32], strides = [1, 1, 1]} : vector<4x4x32xf32> to vector<2x2x32xf32>
    %412 = vector.shape_cast %411 : vector<2x2x32xf32> to vector<4x32xf32>
    %413 = vector.extract_strided_slice %400 {offsets = [2, 0, 0], sizes = [2, 2, 32], strides = [1, 1, 1]} : vector<4x4x32xf32> to vector<2x2x32xf32>
    %414 = vector.shape_cast %413 : vector<2x2x32xf32> to vector<4x32xf32>
    %415 = vector.extract_strided_slice %400 {offsets = [2, 1, 0], sizes = [2, 2, 32], strides = [1, 1, 1]} : vector<4x4x32xf32> to vector<2x2x32xf32>
    %416 = vector.shape_cast %415 : vector<2x2x32xf32> to vector<4x32xf32>
    %417 = vector.extract_strided_slice %400 {offsets = [2, 2, 0], sizes = [2, 2, 32], strides = [1, 1, 1]} : vector<4x4x32xf32> to vector<2x2x32xf32>
    %418 = vector.shape_cast %417 : vector<2x2x32xf32> to vector<4x32xf32>
    %419 = tpu.concatenate %402, %404, %406, %408, %410, %412, %414, %416, %418 in 1 : vector<4x32xf32>, vector<4x32xf32>, vector<4x32xf32>, vector<4x32xf32>, vector<4x32xf32>, vector<4x32xf32>, vector<4x32xf32>, vector<4x32xf32>, vector<4x32xf32> -> vector<4x288xf32>
    %420 = arith.truncf %419 : vector<4x288xf32> to vector<4x288xbf16>
    %cst_91 = arith.constant dense<0.000000e+00> : vector<4x1xf32>
    %421 = tpu.matmul %420, %395, %cst_91 {dimension_numbers = #tpu.dot_dimension_numbers<[1], [0], [0], [1], [0, 0, 1, 1], [], []>} : vector<4x288xbf16>, vector<288x1xbf16>, vector<4x1xf32> -> vector<4x1xf32>
    %422 = vector.broadcast %396 : vector<1x1xf32> to vector<4x1xf32>
    %423 = arith.addf %421, %422 : vector<4x1xf32>
    %424 = vector.shape_cast %423 : vector<4x1xf32> to vector<2x2x1xf32>
    %c0_92 = arith.constant 0 : index
    %c0_93 = arith.constant 0 : index
    %c0_94 = arith.constant 0 : index
    %c0_95 = arith.constant 0 : index
    %425 = vector.load %arg22[%c0_92, %c0_93, %c0_94, %c0_95] : memref<1x2x2x1xf32, #tpu.memory_space<vmem>>, vector<1x2x2x1xf32>
    %426 = vector.shape_cast %425 : vector<1x2x2x1xf32> to vector<2x2x1xf32>
    %427 = vector.shape_cast %424 : vector<2x2x1xf32> to vector<1x2x2x1xf32>
    tpu.vector_store %arg22[%c0_92, %c0_93, %c0_94, %c0_95], %427 {strides = array<i32>} : memref<1x2x2x1xf32, #tpu.memory_space<vmem>>, vector<1x2x2x1xf32>,
    return
  }
  func.func @transform_0(%arg0: i32) -> (i32, i32, i32, i32) {
    %c0_i32 = arith.constant 0 : i32
    %c0_i32_0 = arith.constant 0 : i32
    %c0_i32_1 = arith.constant 0 : i32
    %c0_i32_2 = arith.constant 0 : i32
    return %arg0, %c0_i32, %c0_i32_0, %c0_i32_1 : i32, i32, i32, i32
  }
  func.func @transform_1(%arg0: i32) -> (i32, i32) {
    %c0_i32 = arith.constant 0 : i32
    %c0_i32_0 = arith.constant 0 : i32
    %c0_i32_1 = arith.constant 0 : i32
    return %c0_i32, %c0_i32_0 : i32, i32
  }
  func.func @transform_2(%arg0: i32) -> (i32, i32) {
    %c0_i32 = arith.constant 0 : i32
    %c0_i32_0 = arith.constant 0 : i32
    %c0_i32_1 = arith.constant 0 : i32
    return %c0_i32, %c0_i32_0 : i32, i32
  }
  func.func @transform_3(%arg0: i32) -> (i32, i32) {
    %c0_i32 = arith.constant 0 : i32
    %c0_i32_0 = arith.constant 0 : i32
    %c0_i32_1 = arith.constant 0 : i32
    return %c0_i32, %c0_i32_0 : i32, i32
  }
  func.func @transform_4(%arg0: i32) -> (i32, i32) {
    %c0_i32 = arith.constant 0 : i32
    %c0_i32_0 = arith.constant 0 : i32
    %c0_i32_1 = arith.constant 0 : i32
    return %c0_i32, %c0_i32_0 : i32, i32
  }
  func.func @transform_5(%arg0: i32) -> (i32, i32) {
    %c0_i32 = arith.constant 0 : i32
    %c0_i32_0 = arith.constant 0 : i32
    %c0_i32_1 = arith.constant 0 : i32
    return %c0_i32, %c0_i32_0 : i32, i32
  }
  func.func @transform_6(%arg0: i32) -> (i32, i32) {
    %c0_i32 = arith.constant 0 : i32
    %c0_i32_0 = arith.constant 0 : i32
    %c0_i32_1 = arith.constant 0 : i32
    return %c0_i32, %c0_i32_0 : i32, i32
  }
  func.func @transform_7(%arg0: i32) -> (i32, i32) {
    %c0_i32 = arith.constant 0 : i32
    %c0_i32_0 = arith.constant 0 : i32
    %c0_i32_1 = arith.constant 0 : i32
    return %c0_i32, %c0_i32_0 : i32, i32
  }
  func.func @transform_8(%arg0: i32) -> (i32, i32) {
    %c0_i32 = arith.constant 0 : i32
    %c0_i32_0 = arith.constant 0 : i32
    %c0_i32_1 = arith.constant 0 : i32
    return %c0_i32, %c0_i32_0 : i32, i32
  }
  func.func @transform_9(%arg0: i32) -> (i32, i32) {
    %c0_i32 = arith.constant 0 : i32
    %c0_i32_0 = arith.constant 0 : i32
    %c0_i32_1 = arith.constant 0 : i32
    return %c0_i32, %c0_i32_0 : i32, i32
  }
  func.func @transform_10(%arg0: i32) -> (i32, i32) {
    %c0_i32 = arith.constant 0 : i32
    %c0_i32_0 = arith.constant 0 : i32
    %c0_i32_1 = arith.constant 0 : i32
    return %c0_i32, %c0_i32_0 : i32, i32
  }
  func.func @transform_11(%arg0: i32) -> (i32, i32) {
    %c0_i32 = arith.constant 0 : i32
    %c0_i32_0 = arith.constant 0 : i32
    %c0_i32_1 = arith.constant 0 : i32
    return %c0_i32, %c0_i32_0 : i32, i32
  }
  func.func @transform_12(%arg0: i32) -> (i32, i32) {
    %c0_i32 = arith.constant 0 : i32
    %c0_i32_0 = arith.constant 0 : i32
    %c0_i32_1 = arith.constant 0 : i32
    return %c0_i32, %c0_i32_0 : i32, i32
  }
  func.func @transform_13(%arg0: i32) -> (i32, i32) {
    %c0_i32 = arith.constant 0 : i32
    %c0_i32_0 = arith.constant 0 : i32
    %c0_i32_1 = arith.constant 0 : i32
    return %c0_i32, %c0_i32_0 : i32, i32
  }
  func.func @transform_14(%arg0: i32) -> (i32, i32) {
    %c0_i32 = arith.constant 0 : i32
    %c0_i32_0 = arith.constant 0 : i32
    %c0_i32_1 = arith.constant 0 : i32
    return %c0_i32, %c0_i32_0 : i32, i32
  }
  func.func @transform_15(%arg0: i32) -> (i32, i32) {
    %c0_i32 = arith.constant 0 : i32
    %c0_i32_0 = arith.constant 0 : i32
    %c0_i32_1 = arith.constant 0 : i32
    return %c0_i32, %c0_i32_0 : i32, i32
  }
  func.func @transform_16(%arg0: i32) -> (i32, i32) {
    %c0_i32 = arith.constant 0 : i32
    %c0_i32_0 = arith.constant 0 : i32
    %c0_i32_1 = arith.constant 0 : i32
    return %c0_i32, %c0_i32_0 : i32, i32
  }
  func.func @transform_17(%arg0: i32) -> (i32, i32) {
    %c0_i32 = arith.constant 0 : i32
    %c0_i32_0 = arith.constant 0 : i32
    %c0_i32_1 = arith.constant 0 : i32
    return %c0_i32, %c0_i32_0 : i32, i32
  }
  func.func @transform_18(%arg0: i32) -> (i32, i32) {
    %c0_i32 = arith.constant 0 : i32
    %c0_i32_0 = arith.constant 0 : i32
    %c0_i32_1 = arith.constant 0 : i32
    return %c0_i32, %c0_i32_0 : i32, i32
  }
  func.func @transform_19(%arg0: i32) -> (i32, i32) {
    %c0_i32 = arith.constant 0 : i32
    %c0_i32_0 = arith.constant 0 : i32
    %c0_i32_1 = arith.constant 0 : i32
    return %c0_i32, %c0_i32_0 : i32, i32
  }
  func.func @transform_20(%arg0: i32) -> (i32, i32) {
    %c0_i32 = arith.constant 0 : i32
    %c0_i32_0 = arith.constant 0 : i32
    %c0_i32_1 = arith.constant 0 : i32
    return %c0_i32, %c0_i32_0 : i32, i32
  }
  func.func @transform_21(%arg0: i32) -> (i32, i32, i32, i32) {
    %c0_i32 = arith.constant 0 : i32
    %c0_i32_0 = arith.constant 0 : i32
    %c0_i32_1 = arith.constant 0 : i32
    %c0_i32_2 = arith.constant 0 : i32
    return %arg0, %c0_i32, %c0_i32_0, %c0_i32_1 : i32, i32, i32, i32
  }
}

</mosaic_0001>

<bundles_post_ra>
// kernel: multi_scale_patch_discriminator.1
= control target key start
LH: loop header
LB: loop body
LE: loop exit
PB: predicated region body
PF: predicated region fallthrough
CT: control target
= control target key end

     0   :  { %s8138_s26 = smov 0   ;;  %s12241_s0 = inlined_call_operand.vmem [shape: f32[2,16,16,3], index: 0, kind: input, shape index: {}]   ;;  %s12242_s1 = inlined_call_operand.vmem [shape: bf16[27,8], index: 1, kind: input, shape index: {}]   ;;  %s12243_s2 = inlined_call_operand.vmem [shape: f32[1,8], index: 2, kind: input, shape index: {}]   ;;  %s12244_s3 = inlined_call_operand.vmem [shape: bf16[3,8], index: 3, kind: input, shape index: {}]   ;;  %s12245_s4 = inlined_call_operand.vmem [shape: f32[1,8], index: 4, kind: input, shape index: {}]   ;;  %s12246_s5 = inlined_call_operand.vmem [shape: bf16[72,8], index: 5, kind: input, shape index: {}]   ;;  %s12247_s6 = inlined_call_operand.vmem [shape: f32[1,8], index: 6, kind: input, shape index: {}]   ;;  %s12248_s7 = inlined_call_operand.vmem [shape: bf16[72,16], index: 7, kind: input, shape index: {}]   ;;  %s12249_s8 = inlined_call_operand.vmem [shape: f32[1,16], index: 8, kind: input, shape index: {}]   ;;  %s12250_s9 = inlined_call_operand.vmem [shape: bf16[8,16], index: 9, kind: input, shape index: {}]   ;;  %s12251_s10 = inlined_call_operand.vmem [shape: f32[1,16], index: 10, kind: input, shape index: {}]   ;;  %s12252_s11 = inlined_call_operand.vmem [shape: bf16[144,16], index: 11, kind: input, shape index: {}]   ;;  %s12253_s12 = inlined_call_operand.vmem [shape: f32[1,16], index: 12, kind: input, shape index: {}]   ;;  %s12254_s13 = inlined_call_operand.vmem [shape: bf16[144,32], index: 13, kind: input, shape index: {}]   ;;  %s12255_s14 = inlined_call_operand.vmem [shape: f32[1,32], index: 14, kind: input, shape index: {}]   ;;  %s12256_s15 = inlined_call_operand.vmem [shape: bf16[16,32], index: 15, kind: input, shape index: {}]   ;;  %s12257_s16 = inlined_call_operand.vmem [shape: f32[1,32], index: 16, kind: input, shape index: {}]   ;;  %s12258_s17 = inlined_call_operand.vmem [shape: bf16[288,32], index: 17, kind: input, shape index: {}]   ;;  %s12259_s18 = inlined_call_operand.vmem [shape: f32[1,32], index: 18, kind: input, shape index: {}]   ;;  %s12260_s19 = inlined_call_operand.vmem [shape: bf16[288,1], index: 19, kind: input, shape index: {}]   ;;  %s12261_s20 = inlined_call_operand.<no memory space> [shape: f32[1,1], index: 20, kind: input, shape index: {}]   ;;  %s12262_s21 = inlined_call_operand.vmem [shape: f32[2,2,2,1], index: 21, kind: output, shape index: {}]  }
   0x1   :  { %12485 = sst [smem:[#allocation114_spill]] %s12241_s0  ;;  %v26_v0 = vstv %s12261_s20 }
   0x2   :  { %12486 = sst [smem:[#allocation115_spill]] %s12242_s1  ;;  %27 = vst [vmem:[#allocation2] sm:$0x1] %v26_v0 }
   0x3   :  { %12487 = sst [smem:[#allocation116_spill]] %s12243_s2 }
   0x4   :  { %12488 = sst [smem:[#allocation117_spill]] %s12244_s3 }
   0x5   :  { %12489 = sst [smem:[#allocation118_spill]] %s12245_s4 }
   0x6   :  { %12490 = sst [smem:[#allocation119_spill]] %s12246_s5 }
   0x7 LB: > { %s7146_s27 = sadd.s32 4294967295, %s8000_s26   ;;  %p7150_p0 = scmp.ge.s32.totalorder %s8000_s26, 1  ;;  %s8000_s26 = sphi %s8138_s26, %s33_s26  }
   0x8   : > { %p589_p1 = scmp.lt.s32.totalorder %s8000_s26, 3 }
   0xa   : > { %p590_p2 = pnand %p7150_p0, %p589_p1 }
   0xc   : > { %593 = sbr.rel (%p590_p2) target bundleno = 3087 (0xc0f), region = 104 }
  0x13   : > { %p649_p3 = scmp.lt.s32.totalorder %s7146_s27, 1  ;;  %v882_v1 = vlaneseq  ;;  %v8002_v2 = vmov 1983009808   ;;  %vm12470_vm0 = vcmask 1040384   ;;  %v12265_v6 = vmov 0.0   ;;  %s12491_s29 = sld [smem:[#allocation114_spill]] }
  0x14   : > { %v880_v3 = vunpack.c.l.s4 %v8002_v2  ;;  %v8150_v7 = vrot.slane %v12265_v6, 7  ;;  %vm1911_vm1 = vcmask 1041409   ;;  %vm12480_vm2 = vcmask 1042434   ;;  %s8004_s4 = smov 9   ;;  %s8005_s30 = smov 3  }
  0x15   : > { %s13038_s27 = smov (!%p649_p3, %s7146_s27), 1  ;;  %v883_v4 = vshrl.u32 %v882_v1, 7  ;;  %vm1915_vm3 = vcmask 1043459   ;;  %vm1917_vm4 = vcmask 1044484   ;;  %vm12442_vm5 = vcmask 1045509   ;;  %s8006_s5 = smov 12  }
  0x16   : > { %v881_v5 = vunpack.c.0.s8 %v880_v3  ;;  %s7274_s20 = sshll.u32 %s13038_s27, 8  ;;  %v8170_v14 = vsel %vm12470_vm0, 0.0, %v8150_v7  ;;  %v895_v15 = vcombine.high %v8150_v7, %v8150_v7  ;;  %v8176_v16 = vsel %vm12470_vm0, %v8150_v7, 0.0  ;;  %s8007_s22 = smov 18  }
  0x17   : > { %v8159_v9 = vsub.s32 0, %v883_v4  ;;  %v8166_v13 = vsub.s32 1, %v883_v4  ;;  %12496 = vst [vmem:[#allocation7_spill] sm:$0xff] %v8170_v14  ;;  %12497 = vst [vmem:[#allocation8_spill] sm:$0xff] %v8176_v16  ;;  %v878_v23 = vcombine.high %v8170_v14, %v8170_v14  ;;  %vm12441_vm6 = vcmask 1046534   ;;  %s8008_s23 = smov 21  }
  0x18   : > { %v8157_v8 = vsub.s32 %v881_v5, %v883_v4  ;;  %vm12440_vm7 = vcmask 1047559   ;;  %s8009_s1 = smov 6   ;;  %s8010_s24 = smov 15   ;;  %vm3375_vm8 = vcmask 23552   ;;  %vm3384_vm9 = vcmask 48128  }
  0x19   : > { %s8155_s0 = scalar_lea.vmem %s12491_s29, %s7274_s20  ;;  %12493 = vst [vmem:[#allocation4_spill] sm:$0xff] %v8159_v9  ;;  %12495 = vst [vmem:[#allocation6_spill] sm:$0xff] %v8166_v13  ;;  %s12643_s20 = sld [smem:[#allocation115_spill]]  ;;  %vm3393_vm10 = vcmask 72704   ;;  %vm3402_vm11 = vcmask 97280   ;;  %vm3411_vm12 = vcmask 121856  }
  0x1a   : > { %12492 = vst [vmem:[#allocation3_spill] sm:$0xff] %v8157_v8  ;;  %v668_v10 = vld [vmem:[%s8155_s0 + $0x40] sm:$0xff]  ;;  %v8163_v11 = vld [vmem:[%s8155_s0 + $0x48] sm:$0xff]  ;;  %v8183_v21 = vld [vmem:[%s8155_s0 + $0x10] sm:$0xff]  ;;  %v8198_v28 = vrot.slane %v8170_v14, %v8157_v8  ;;  %s8011_s3 = smov 24   ;;  %vm3420_vm13 = vcmask 146432  }
  0x1b   : > { %12494 = vst [vmem:[#allocation5_spill] sm:$0xff] %v8163_v11  ;;  %v672_v12 = vld [vmem:[%s8155_s0 + $0x60] sm:$0xff]  ;;  %v8179_v17 = vld [vmem:[%s8155_s0 + $0x68] sm:$0xff]  ;;  %v757_v18 = vrot.slane %v668_v10, 7  ;;  %v12268_v19 = vrot.slane %v8163_v11, 7  ;;  %v8186_v22 = vld [vmem:[%s8155_s0 + $0x18] sm:$0xff] }
  0x1c   : > { %12498 = vst [vmem:[#allocation9_spill] sm:$0xff] %v8179_v17  ;;  %v763_v20 = vrot.slane %v672_v12, 7  ;;  %v12267_v24 = vrot.slane %v8179_v17, 7  ;;  %v8192_v25 = vld [vmem:[%s8155_s0 + $0x30] sm:$0xff]  ;;  %v748_v26 = vrot.slane %v8183_v21, 7  ;;  %v12270_v27 = vrot.slane %v8186_v22, 7 }
  0x1d   : > { %12499 = vst [vmem:[#allocation10_spill] sm:$0xff] %v8198_v28  ;;  %v759_v29 = vsel %vm12470_vm0, %v757_v18, %v12268_v19  ;;  %v831_v30 = vsel %vm12470_vm0, 0.0, %v757_v18  ;;  %v754_v32 = vrot.slane %v8192_v25, 7  ;;  %v8276_v57 = vld [vmem:[%s8155_s0 + $0x38] sm:$0xff]  ;;  %vm3429_vm14 = vcmask 171008   ;;  %s12778_s25 = sld [smem:[#allocation117_spill]] }
  0x1e   : > { %v833_v31 = vsel %vm12470_vm0, 0.0, %v763_v20  ;;  %v765_v33 = vsel %vm12470_vm0, %v763_v20, %v12267_v24  ;;  %v1345_v34 = vcombine.high %v831_v30, %v831_v30  ;;  %v8210_v35 = vrot.slane %v831_v30, %v8157_v8  ;;  %12518 = vst [vmem:[#allocation29_spill] sm:$0xff] %v8276_v57  ;;  %s8017_s28 = smov 16   ;;  %s8022_s29 = smov 80  }
  0x1f   : > { %v1362_v36 = vcombine.high %v759_v29, %v759_v29  ;;  %v8213_v37 = vrot.slane %v759_v29, %v8157_v8  ;;  %v1386_v38 = vcombine.high %v833_v31, %v833_v31  ;;  %v8216_v39 = vrot.slane %v833_v31, %v8157_v8 }
  0x20   : > { %12500 = vst [vmem:[#allocation11_spill] sm:$0xff] %v8210_v35  ;;  %v1403_v40 = vcombine.high %v765_v33, %v765_v33  ;;  %v8219_v41 = vrot.slane %v1345_v34, %v8157_v8  ;;  %v8223_v42 = vcombine.high %v8210_v35, %v8210_v35  ;;  %v8229_v44 = vrot.slane %v765_v33, %v8157_v8 }
  0x21   : > { %12501 = vst [vmem:[#allocation12_spill] sm:$0xff] %v8213_v37  ;;  %12502 = vst [vmem:[#allocation13_spill] sm:$0xff] %v8216_v39  ;;  %v8226_v43 = vrot.slane %v1362_v36, %v8157_v8  ;;  %v8233_v45 = vcombine.high %v8213_v37, %v8213_v37  ;;  %v8236_v46 = vrot.slane %v1386_v38, %v8157_v8  ;;  %v12269_v29 = vrot.slane %v8276_v57, 7 }
  0x22   : > { %12503 = vst [vmem:[#allocation14_spill] sm:$0xff] %v8219_v41  ;;  %12504 = vst [vmem:[#allocation15_spill] sm:$0xff] %v8223_v42  ;;  %v8240_v47 = vcombine.high %v8216_v39, %v8216_v39  ;;  %v8243_v48 = vrot.slane %v1403_v40, %v8157_v8  ;;  %v8247_v49 = vcombine.high %v8219_v41, %v8219_v41  ;;  %v828_v30 = vsel %vm12470_vm0, 0.0, %v748_v26 }
  0x23   : > { %12505 = vst [vmem:[#allocation16_spill] sm:$0xff] %v8226_v43  ;;  %12506 = vst [vmem:[#allocation17_spill] sm:$0xff] %v8229_v44  ;;  %v8251_v50 = vcombine.high %v8226_v43, %v8226_v43  ;;  %v8255_v51 = vcombine.high %v8229_v44, %v8229_v44  ;;  %v2497_v52 = vrot.slane %v8210_v35, %v8159_v9  ;;  %v830_v34 = vsel %vm12470_vm0, 0.0, %v754_v32 }
  0x24   : > { %12507 = vst [vmem:[#allocation18_spill] sm:$0xff] %v8233_v45  ;;  %12508 = vst [vmem:[#allocation19_spill] sm:$0xff] %v8236_v46  ;;  %v8261_v53 = vcombine.high %v8236_v46, %v8236_v46  ;;  %v8265_v54 = vcombine.high %v8243_v48, %v8243_v48  ;;  %v8269_v55 = vrot.slane %v8223_v42, %v8159_v9  ;;  %vm12467_vm15 = vcmask 1044480  }
  0x25   : > { %12509 = vst [vmem:[#allocation20_spill] sm:$0xff] %v8240_v47  ;;  %12510 = vst [vmem:[#allocation21_spill] sm:$0xff] %v8243_v48  ;;  %v8273_v56 = vrot.slane %v8219_v41, %v8159_v9  ;;  %v8280_v58 = vrot.slane %v8247_v49, %v8159_v9  ;;  %v8284_v59 = vrot.slane %v8213_v37, %v8159_v9 }
  0x26   : > { %12511 = vst [vmem:[#allocation22_spill] sm:$0xff] %v8247_v49  ;;  %12512 = vst [vmem:[#allocation23_spill] sm:$0xff] %v8251_v50  ;;  %v8288_v60 = vrot.slane %v8233_v45, %v8159_v9  ;;  %v8292_v61 = vrot.slane %v8226_v43, %v8159_v9  ;;  %v8296_v62 = vrot.slane %v8251_v50, %v8159_v9 }
  0x27   : > { %12513 = vst [vmem:[#allocation24_spill] sm:$0xff] %v8255_v51  ;;  %12514 = vst [vmem:[#allocation25_spill] sm:$0xff] %v8261_v53  ;;  %v2529_v63 = vrot.slane %v8216_v39, %v8159_v9  ;;  %v8302_v0 = vrot.slane %v8240_v47, %v8159_v9  ;;  %v8306_v1 = vrot.slane %v8236_v46, %v8159_v9 }
  0x28   : > { %12515 = vst [vmem:[#allocation26_spill] sm:$0xff] %v8265_v54  ;;  %12516 = vst [vmem:[#allocation27_spill] sm:$0xff] %v8269_v55  ;;  %v8310_v2 = vrot.slane %v8261_v53, %v8159_v9  ;;  %v8314_v3 = vrot.slane %v8229_v44, %v8159_v9  ;;  %v8318_v4 = vrot.slane %v8255_v51, %v8159_v9 }
  0x29   : > { %12517 = vst [vmem:[#allocation28_spill] sm:$0xff] %v8273_v56  ;;  %12519 = vst [vmem:[#allocation30_spill] sm:$0xff] %v8280_v58  ;;  %v8322_v5 = vrot.slane %v8243_v48, %v8159_v9  ;;  %v8326_v10 = vrot.slane %v8265_v54, %v8159_v9  ;;  %v2700_v12 = vsel %vm1911_vm1, %v8269_v55, %v2497_v52 }
  0x2a   : > { %12520 = vst [vmem:[#allocation31_spill] sm:$0xff] %v8284_v59  ;;  %12521 = vst [vmem:[#allocation32_spill] sm:$0xff] %v8288_v60  ;;  %v2707_v18 = vsel %vm1911_vm1, %v8302_v0, %v2529_v63  ;;  %v750_v20 = vsel %vm12470_vm0, %v748_v26, %v12270_v27  ;;  %v2701_v21 = vsel %vm12480_vm2, %v8273_v56, %v2700_v12 }
  0x2b   : > { %12522 = vst [vmem:[#allocation33_spill] sm:$0xff] %v8292_v61  ;;  %12523 = vst [vmem:[#allocation34_spill] sm:$0xff] %v8296_v62  ;;  %v2708_v25 = vsel %vm12480_vm2, %v8306_v1, %v2707_v18  ;;  %v2702_v31 = vsel %vm1915_vm3, %v8280_v58, %v2701_v21  ;;  %v8350_v36 = vrot.slane %v878_v23, %v8157_v8 }
  0x2c   : > { %12524 = vst [vmem:[#allocation35_spill] sm:$0xff] %v8302_v0  ;;  %12525 = vst [vmem:[#allocation36_spill] sm:$0xff] %v8306_v1  ;;  %v2709_v33 = vsel %vm1915_vm3, %v8310_v2, %v2708_v25  ;;  %v2703_v38 = vsel %vm1917_vm4, %v8284_v59, %v2702_v31  ;;  %v756_v40 = vsel %vm12470_vm0, %v754_v32, %v12269_v29 }
  0x2d   : > { %12526 = vst [vmem:[#allocation37_spill] sm:$0xff] %v8310_v2  ;;  %12527 = vst [vmem:[#allocation38_spill] sm:$0xff] %v8314_v3  ;;  %v2710_v26 = vsel %vm1917_vm4, %v8314_v3, %v2709_v33  ;;  %v8361_v52 = vcombine.high %v8198_v28, %v8198_v28  ;;  %v2704_v63 = vsel %vm12442_vm5, %v8288_v60, %v2703_v38 }
  0x2e   : > { %12528 = vst [vmem:[#allocation39_spill] sm:$0xff] %v8318_v4  ;;  %12529 = vst [vmem:[#allocation40_spill] sm:$0xff] %v8322_v5  ;;  %v2711_v23 = vsel %vm12442_vm5, %v8318_v4, %v2710_v26  ;;  %v8369_v12 = vcombine.high %v8350_v36, %v8350_v36  ;;  %v8373_v18 = vrot.slane %v8150_v7, %v8157_v8 }
  0x2f   : > { %12530 = vst [vmem:[#allocation41_spill] sm:$0xff] %v8326_v10  ;;  %v2705_v32 = vsel %vm12441_vm6, %v8292_v61, %v2704_v63  ;;  %v2712_v21 = vsel %vm12441_vm6, %v8322_v5, %v2711_v23  ;;  %v8383_v25 = vrot.slane %v895_v15, %v8157_v8  ;;  %v919_v31 = vcombine.high %v828_v30, %v828_v30 }
  0x30   : > { %v2706_v33 = vsel %vm12440_vm7, %v8296_v62, %v2705_v32  ;;  %v2713_v38 = vsel %vm12440_vm7, %v8326_v10, %v2712_v21  ;;  %v8391_v26 = vcombine.high %v8373_v18, %v8373_v18  ;;  %v8394_v63 = vrot.slane %v828_v30, %v8157_v8 }
  0x31   : > { %v7509_v23 = vpack.i.bf16 %v2713_v38, %v2706_v33  ;;  %v8398_v7 = vcombine.high %v8383_v25, %v8383_v25  ;;  %v8401_v15 = vrot.slane %v919_v31, %v8157_v8  ;;  %v936_v6 = vcombine.high %v750_v20, %v750_v20 }
  0x32   : > { %12531 = vst [vmem:[#allocation42_spill] sm:$0xff] %v8394_v63  ;;  %v8405_v32 = vcombine.high %v8394_v63, %v8394_v63  ;;  %v8408_v21 = vrot.slane %v750_v20, %v8157_v8  ;;  %v960_v24 = vcombine.high %v830_v34, %v830_v34  ;;  %v8411_v30 = vrot.slane %v830_v34, %v8157_v8 }
  0x33   : > { %7510 = vrot.lane.b32.xlu1 %v7509_v23, %s8004_s4  ;;  %v935_v33 = vcombine.high %v8401_v15, %v8401_v15  ;;  %v8417_v31 = vrot.slane %v936_v6, %v8157_v8  ;;  %v977_v38 = vcombine.high %v756_v40, %v756_v40  ;;  %v8420_v19 = vrot.slane %v756_v40, %v8157_v8 }
  0x34   : > { %12532 = vst [vmem:[#allocation43_spill] sm:$0xff] %v8411_v30  ;;  %v951_v20 = vcombine.high %v8408_v21, %v8408_v21  ;;  %v8425_v29 = vrot.slane %v960_v24, %v8157_v8  ;;  %v8429_v34 = vcombine.high %v8411_v30, %v8411_v30  ;;  %v8433_v23 = vrot.slane %v8369_v12, %v8159_v9 }
  0x35   : > { %12533 = vst [vmem:[#allocation44_spill] sm:$0xff] %v8420_v19  ;;  %v952_v6 = vcombine.high %v8417_v31, %v8417_v31  ;;  %v8438_v40 = vrot.slane %v977_v38, %v8157_v8  ;;  %v8442_v27 = vcombine.high %v8420_v19, %v8420_v19  ;;  %v8446_v24 = vrot.slane %v8391_v26, %v8159_v9 }
  0x36   : > { %12534 = vst [vmem:[#allocation45_spill] sm:$0xff] %v8425_v29  ;;  %12535 = vst [vmem:[#allocation46_spill] sm:$0xff] %v8429_v34  ;;  %v8450_v14 = vcombine.high %v8425_v29, %v8425_v29  ;;  %v8454_v10 = vrot.slane %v8398_v7, %v8159_v9  ;;  %v8457_v5 = vrot.slane %v935_v33, %v8159_v9 }
  0x37   : > { %12536 = vst [vmem:[#allocation47_spill] sm:$0xff] %v8433_v23  ;;  %12537 = vst [vmem:[#allocation48_spill] sm:$0xff] %v8438_v40  ;;  %v8460_v38 = vrot.slane %v951_v20, %v8159_v9  ;;  %v8464_v62 = vcombine.high %v8438_v40, %v8438_v40  ;;  %v1985_v4 = vrot.slane %v8198_v28, %v8166_v13 }
  0x38   : > { %12538 = vst [vmem:[#allocation49_spill] sm:$0xff] %v8442_v27  ;;  %12539 = vst [vmem:[#allocation50_spill] sm:$0xff] %v8446_v24  ;;  %v1989_v61 = vrot.slane %v8361_v52, %v8166_v13  ;;  %v1993_v3 = vrot.slane %v8350_v36, %v8166_v13  ;;  %v1997_v60 = vrot.slane %v8369_v12, %v8166_v13 }
  0x39   : > { %12540 = vst [vmem:[#allocation51_spill] sm:$0xff] %v8450_v14  ;;  %12541 = vst [vmem:[#allocation52_spill] sm:$0xff] %v8454_v10  ;;  %v2001_v2 = vrot.slane %v8373_v18, %v8166_v13  ;;  %v2005_v59 = vrot.slane %v8391_v26, %v8166_v13  ;;  %v2009_v58 = vrot.slane %v8383_v25, %v8166_v13 }
  0x3a   : > { %12542 = vst [vmem:[#allocation53_spill] sm:$0xff] %v8457_v5  ;;  %12543 = vst [vmem:[#allocation54_spill] sm:$0xff] %v8460_v38  ;;  %v2013_v28 = vrot.slane %v8398_v7, %v8166_v13  ;;  %v2017_v1 = vrot.slane %v8394_v63, %v8166_v13  ;;  %v2021_v0 = vrot.slane %v8405_v32, %v8166_v13 }
  0x3b   : > { %12544 = vst [vmem:[#allocation55_spill] sm:$0xff] %v8464_v62  ;;  %v2025_v12 = vrot.slane %v8401_v15, %v8166_v13  ;;  %v2029_v56 = vrot.slane %v935_v33, %v8166_v13  ;;  %v2033_v26 = vrot.slane %v8408_v21, %v8166_v13  ;;  %v2037_v55 = vrot.slane %v951_v20, %v8166_v13 }
  0x3c   : > { %v2041_v17 = vrot.slane %v8417_v31, %v8166_v13  ;;  %v2045_v7 = vrot.slane %v952_v6, %v8166_v13  ;;  %v2049_v11 = vrot.slane %v8411_v30, %v8166_v13  ;;  %v2053_v57 = vrot.slane %v8429_v34, %v8166_v13 }
  0x3d   : > { %v2057_v10 = vrot.slane %v8425_v29, %v8166_v13  ;;  %v2061_v33 = vrot.slane %v8450_v14, %v8166_v13  ;;  %v2065_v20 = vrot.slane %v8420_v19, %v8166_v13  ;;  %v2069_v38 = vrot.slane %v8442_v27, %v8166_v13 }
  0x3e   : > { %v2073_v24 = vrot.slane %v8438_v40, %v8166_v13  ;;  %v2077_v30 = vrot.slane %v8464_v62, %v8166_v13  ;;  %v2238_v34 = vsel %vm1911_vm1, %v1989_v61, %v1985_v4  ;;  %v2245_v63 = vsel %vm1911_vm1, %v2021_v0, %v2017_v1 }
  0x3f   : > { %v2252_v29 = vsel %vm1911_vm1, %v2053_v57, %v2049_v11  ;;  %v2239_v14 = vsel %vm12480_vm2, %v1993_v3, %v2238_v34  ;;  %v2246_v5 = vsel %vm12480_vm2, %v2025_v12, %v2245_v63  ;;  %v8518_v27 = vrot.slane %v952_v6, %v8159_v9 }
  0x40   : > { %v2253_v19 = vsel %vm12480_vm2, %v2057_v10, %v2252_v29  ;;  %v8521_v40 = vsel %vm1915_vm3, %v1997_v60, %v2239_v14  ;;  %v2247_v62 = vsel %vm1915_vm3, %v2029_v56, %v2246_v5  ;;  %v2833_v11 = vrot.slane %v8210_v35, %v8166_v13  ;;  %v670_v10 = vld [vmem:[%s8155_s0 + $0x50] sm:$0xff] }
  0x41   : > { %12545 = vst [vmem:[#allocation56_spill] sm:$0xff] %v8521_v40  ;;  %v2254_v61 = vsel %vm1915_vm3, %v2061_v33, %v2253_v19  ;;  %v2241_v57 = vsel %vm1917_vm4, %v2001_v2, %v8521_v40  ;;  %v2248_v0 = vsel %vm1917_vm4, %v2033_v26, %v2247_v62  ;;  %v2837_v14 = vrot.slane %v8223_v42, %v8166_v13 }
  0x42   : > { %v2255_v1 = vsel %vm1917_vm4, %v2065_v20, %v2254_v61  ;;  %v2242_v60 = vsel %vm12442_vm5, %v2005_v59, %v2241_v57  ;;  %v2249_v56 = vsel %vm12442_vm5, %v2037_v55, %v2248_v0  ;;  %v2841_v3 = vrot.slane %v8219_v41, %v8166_v13 }
  0x43   : > { %v2256_v19 = vsel %vm12442_vm5, %v2069_v38, %v2255_v1  ;;  %v2243_v2 = vsel %vm12441_vm6, %v2009_v58, %v2242_v60  ;;  %v2250_v62 = vsel %vm12441_vm6, %v2041_v17, %v2249_v56  ;;  %v2845_v5 = vrot.slane %v8247_v49, %v8166_v13  ;;  %v8554_v58 = vld [vmem:[%s8155_s0 + $0x58] sm:$0xff]  ;;  %v674_v17 = vld [vmem:[%s8155_s0 + $0x70] sm:$0xff] }
  0x44   : > { %v2257_v4 = vsel %vm12441_vm6, %v2073_v24, %v2256_v19  ;;  %v2244_v59 = vsel %vm12440_vm7, %v2013_v28, %v2243_v2  ;;  %v8546_v55 = vsel %vm12440_vm7, %v2045_v7, %v2250_v62  ;;  %v2849_v63 = vrot.slane %v8213_v37, %v8166_v13  ;;  %v8565_v38 = vld [vmem:[%s8155_s0 + $0x78] sm:$0xff] }
  0x45   : > { %12546 = vst [vmem:[#allocation57_spill] sm:$0xff] %v8546_v55  ;;  %v8549_v29 = vsel %vm12440_vm7, %v2077_v30, %v2257_v4  ;;  %v7494_v6 = vpack.i.bf16 %v8546_v55, %v2244_v59  ;;  %v2853_v28 = vrot.slane %v8233_v45, %v8166_v13  ;;  %v2857_v24 = vrot.slane %v8226_v43, %v8166_v13 }
  0x46   : > { %12547 = vst [vmem:[#allocation58_spill] sm:$0xff] %v8549_v29  ;;  %12548 = vst [vmem:[#allocation59_spill] sm:$0xff] %v8565_v38  ;;  %v2861_v30 = vrot.slane %v8251_v50, %v8166_v13  ;;  %v2865_v12 = vrot.slane %v8216_v39, %v8166_v13  ;;  %v2869_v26 = vrot.slane %v8240_v47, %v8166_v13  ;;  %v760_v56 = vrot.slane %v670_v10, 7 }
  0x47   : > { %v2873_v7 = vrot.slane %v8236_v46, %v8166_v13  ;;  %7495 = vrot.lane.b32.xlu0 %v7494_v6, %s8005_s30  ;;  %v2877_v33 = vrot.slane %v8261_v53, %v8166_v13  ;;  %v2881_v20 = vrot.slane %v8229_v44, %v8166_v13  ;;  %v2885_v61 = vrot.slane %v8255_v51, %v8166_v13 }
  0x48   : > { %v2889_v57 = vrot.slane %v8243_v48, %v8166_v13  ;;  %v2893_v0 = vrot.slane %v8265_v54, %v8166_v13  ;;  %v3036_v1 = vsel %vm1911_vm1, %v2837_v14, %v2833_v11  ;;  %v3043_v60 = vsel %vm1911_vm1, %v2869_v26, %v2865_v12 }
  0x49   : > { %v3037_v19 = vsel %vm12480_vm2, %v2841_v3, %v3036_v1  ;;  %v3044_v2 = vsel %vm12480_vm2, %v2873_v7, %v3043_v60  ;;  %v12306_v62 = vrot.slane %v8554_v58, 7  ;;  %v766_v4 = vrot.slane %v674_v17, 7 }
  0x4a   : > { %v3038_v59 = vsel %vm1915_vm3, %v2845_v5, %v3037_v19  ;;  %v3045_v6 = vsel %vm1915_vm3, %v2877_v33, %v3044_v2  ;;  %v832_v34 = vsel %vm12470_vm0, 0.0, %v760_v56  ;;  %v12305_v40 = vrot.slane %v8565_v38, 7 }
  0x4b   : > { %v3039_v11 = vsel %vm1917_vm4, %v2849_v63, %v3038_v59  ;;  %v3046_v14 = vsel %vm1917_vm4, %v2881_v20, %v3045_v6  ;;  %v762_v3 = vsel %vm12470_vm0, %v760_v56, %v12306_v62  ;;  %v1001_v10 = vcombine.high %v832_v34, %v832_v34 }
  0x4c   : > { %v3040_v12 = vsel %vm12442_vm5, %v2853_v28, %v3039_v11  ;;  %v3047_v17 = vsel %vm12442_vm5, %v2885_v61, %v3046_v14  ;;  %v8603_v5 = vrot.slane %v832_v34, %v8157_v8  ;;  %v1018_v26 = vcombine.high %v762_v3, %v762_v3 }
  0x4d   : > { %v3041_v7 = vsel %vm12441_vm6, %v2857_v24, %v3040_v12  ;;  %v3048_v33 = vsel %vm12441_vm6, %v2889_v57, %v3047_v17  ;;  %v1015_v63 = vrot.slane %v1001_v10, %v8157_v8  ;;  %v1025_v20 = vrot.slane %v762_v3, %v8157_v8 }
  0x4e   : > { %v3042_v1 = vsel %vm12440_vm7, %v2861_v30, %v3041_v7  ;;  %v3049_v60 = vsel %vm12440_vm7, %v2893_v0, %v3048_v33  ;;  %v1016_v28 = vcombine.high %v8603_v5, %v8603_v5  ;;  %v1032_v61 = vrot.slane %v1018_v26, %v8157_v8 }
  0x4f   : > { %v7519_v34 = vpack.i.bf16 %v3049_v60, %v3042_v1  ;;  %v1017_v56 = vcombine.high %v1015_v63, %v1015_v63  ;;  %v1033_v19 = vcombine.high %v1025_v20, %v1025_v20  ;;  %v2081_v24 = vrot.slane %v8603_v5, %v8166_v13 }
  0x50   : > { %v1034_v57 = vcombine.high %v1032_v61, %v1032_v61  ;;  %v2085_v2 = vrot.slane %v1016_v28, %v8166_v13  ;;  %v2089_v59 = vrot.slane %v1015_v63, %v8166_v13  ;;  %v2097_v30 = vrot.slane %v1025_v20, %v8166_v13 }
  0x51   : > { %7520 = vrot.lane.b32.xlu1 %v7519_v34, %s8006_s5  ;;  %v2093_v0 = vrot.slane %v1017_v56, %v8166_v13  ;;  %v2101_v6 = vrot.slane %v1033_v19, %v8166_v13  ;;  %v2105_v11 = vrot.slane %v1032_v61, %v8166_v13  ;;  %v768_v14 = vsel %vm12470_vm0, %v766_v4, %v12305_v40 }
  0x52   : > { %v2109_v3 = vrot.slane %v1034_v57, %v8166_v13  ;;  %v2259_v10 = vsel %vm1911_vm1, %v2085_v2, %v2081_v24  ;;  %v834_v12 = vsel %vm12470_vm0, 0.0, %v766_v4  ;;  %v1059_v17 = vcombine.high %v768_v14, %v768_v14 }
  0x53   : > { %v2260_v26 = vsel %vm12480_vm2, %v2089_v59, %v2259_v10  ;;  %v1042_v7 = vcombine.high %v834_v12, %v834_v12  ;;  %v8631_v33 = vrot.slane %v834_v12, %v8157_v8  ;;  %v8634_v1 = vrot.slane %v768_v14, %v8157_v8 }
  0x54   : > { %v2261_v60 = vsel %vm1915_vm3, %v2093_v0, %v2260_v26  ;;  %v8638_v34 = vrot.slane %v1059_v17, %v8157_v8  ;;  %v1754_v24 = vrot.slane %v8603_v5, %v8159_v9  ;;  %v8643_v4 = vrot.slane %v1016_v28, %v8159_v9 }
  0x55   : > { %v2262_v2 = vsel %vm1917_vm4, %v2097_v30, %v2261_v60  ;;  %v8647_v59 = vrot.slane %v1042_v7, %v8157_v8  ;;  %v8651_v14 = vcombine.high %v8631_v33, %v8631_v33  ;;  %v8655_v0 = vcombine.high %v8634_v1, %v8634_v1  ;;  %v660_v60 = vld [vmem:[%s8155_s0] sm:$0xff] }
  0x56   : > { %12549 = vst [vmem:[#allocation60_spill] sm:$0xff] %v8643_v4  ;;  %v2263_v5 = vsel %vm12442_vm5, %v2101_v6, %v2262_v2  ;;  %v8660_v28 = vcombine.high %v8638_v34, %v8638_v34  ;;  %v8663_v30 = vrot.slane %v1015_v63, %v8159_v9  ;;  %v8666_v10 = vrot.slane %v1017_v56, %v8159_v9  ;;  %v8692_v2 = vld [vmem:[%s8155_s0 + $0x8] sm:$0xff] }
  0x57   : > { %v2264_v12 = vsel %vm12441_vm6, %v2105_v11, %v2263_v5  ;;  %v8671_v17 = vcombine.high %v8647_v59, %v8647_v59  ;;  %v8674_v6 = vrot.slane %v1025_v20, %v8159_v9  ;;  %v8677_v26 = vrot.slane %v1033_v19, %v8159_v9  ;;  %12556 = vst [vmem:[#allocation67_spill] sm:$0xff] %v8692_v2  ;;  %v8710_v5 = vld [vmem:[%s8155_s0 + $0x28] sm:$0xff] }
  0x58   : > { %12550 = vst [vmem:[#allocation61_spill] sm:$0xff] %v8663_v30  ;;  %12551 = vst [vmem:[#allocation62_spill] sm:$0xff] %v8666_v10  ;;  %v8680_v63 = vsel %vm12440_vm7, %v2109_v3, %v2264_v12  ;;  %v8683_v7 = vrot.slane %v1032_v61, %v8159_v9  ;;  %v8686_v56 = vrot.slane %v1034_v57, %v8159_v9  ;;  %v664_v3 = vld [vmem:[%s8155_s0 + $0x20] sm:$0xff]  ;;  %v745_v44 = vrot.slane %v660_v60, 7 }
  0x59   : > { %12552 = vst [vmem:[#allocation63_spill] sm:$0xff] %v8674_v6  ;;  %12553 = vst [vmem:[#allocation64_spill] sm:$0xff] %v8677_v26  ;;  %v1786_v11 = vrot.slane %v8631_v33, %v8159_v9  ;;  %v7499_v20 = vpack.i.bf16 %v8680_v63, %v8549_v29  ;;  %v8698_v19 = vrot.slane %v8651_v14, %v8159_v9  ;;  %v12316_v47 = vrot.slane %v8692_v2, 7 }
  0x5a   : > { %12554 = vst [vmem:[#allocation65_spill] sm:$0xff] %v8683_v7  ;;  %12555 = vst [vmem:[#allocation66_spill] sm:$0xff] %v8686_v56  ;;  %v8702_v61 = vrot.slane %v8647_v59, %v8159_v9  ;;  %v8706_v57 = vrot.slane %v8671_v17, %v8159_v9  ;;  %v8714_v12 = vrot.slane %v8634_v1, %v8159_v9  ;;  %v751_v39 = vrot.slane %v664_v3, 7 }
  0x5b   : > { %12557 = vst [vmem:[#allocation68_spill] sm:$0xff] %v8698_v19  ;;  %12560 = vst [vmem:[#allocation71_spill] sm:$0xff] %v8710_v5  ;;  %v8718_v40 = vrot.slane %v8655_v0, %v8159_v9  ;;  %v8722_v62 = vrot.slane %v8638_v34, %v8159_v9  ;;  %v8726_v54 = vrot.slane %v8660_v28, %v8159_v9  ;;  %7500 = vrot.lane.b32.xlu0 %v7499_v20, %s8005_s30 }
  0x5c   : > { %12558 = vst [vmem:[#allocation69_spill] sm:$0xff] %v8702_v61  ;;  %12559 = vst [vmem:[#allocation70_spill] sm:$0xff] %v8706_v57  ;;  %v1939_v48 = vsel %vm1911_vm1, %v8643_v4, %v1754_v24  ;;  %v1946_v51 = vsel %vm1911_vm1, %v8698_v19, %v1786_v11  ;;  %v12319_v50 = vrot.slane %v8710_v5, 7  ;;  %v747_v11 = vsel %vm12470_vm0, %v745_v44, %v12316_v47 }
  0x5d   : > { %12561 = vst [vmem:[#allocation72_spill] sm:$0xff] %v8714_v12  ;;  %12562 = vst [vmem:[#allocation73_spill] sm:$0xff] %v8718_v40  ;;  %v1940_v53 = vsel %vm12480_vm2, %v8663_v30, %v1939_v48  ;;  %v1947_v46 = vsel %vm12480_vm2, %v8702_v61, %v1946_v51  ;;  %v827_v60 = vsel %vm12470_vm0, 0.0, %v745_v44  ;;  %v1280_v45 = vcombine.high %v747_v11, %v747_v11 }
  0x5e   : > { %12563 = vst [vmem:[#allocation74_spill] sm:$0xff] %v8722_v62  ;;  %12564 = vst [vmem:[#allocation75_spill] sm:$0xff] %v8726_v54  ;;  %v1941_v20 = vsel %vm1915_vm3, %v8666_v10, %v1940_v53  ;;  %v1948_v24 = vsel %vm1915_vm3, %v8706_v57, %v1947_v46  ;;  %v753_v3 = vsel %vm12470_vm0, %v751_v39, %v12319_v50  ;;  %v829_v53 = vsel %vm12470_vm0, 0.0, %v751_v39 }
  0x5f   : > { %v1942_v48 = vsel %vm1917_vm4, %v8674_v6, %v1941_v20  ;;  %v1949_v51 = vsel %vm1917_vm4, %v8714_v12, %v1948_v24  ;;  %v1263_v43 = vcombine.high %v827_v60, %v827_v60  ;;  %v8760_v44 = vrot.slane %v827_v60, %v8157_v8 }
  0x60   : > { %v1943_v46 = vsel %vm12442_vm5, %v8677_v26, %v1942_v48  ;;  %v1950_v47 = vsel %vm12442_vm5, %v8718_v40, %v1949_v51  ;;  %v8767_v50 = vrot.slane %v747_v11, %v8157_v8  ;;  %v8787_v11 = vrot.slane %v1280_v45, %v8157_v8 }
  0x61   : > { %12565 = vst [vmem:[#allocation76_spill] sm:$0xff] %v8760_v44  ;;  %v1944_v20 = vsel %vm12441_vm6, %v8683_v7, %v1943_v46  ;;  %v1951_v24 = vsel %vm12441_vm6, %v8722_v62, %v1950_v47  ;;  %v8778_v60 = vrot.slane %v1263_v43, %v8157_v8  ;;  %v8782_v51 = vcombine.high %v8760_v44, %v8760_v44 }
  0x62   : > { %12566 = vst [vmem:[#allocation77_spill] sm:$0xff] %v8767_v50  ;;  %v8771_v39 = vsel %vm12440_vm7, %v8686_v56, %v1944_v20  ;;  %v8775_v48 = vsel %vm12440_vm7, %v8726_v54, %v1951_v24  ;;  %12571 = vst [vmem:[#allocation82_spill] sm:$0xff] %v8787_v11  ;;  %v8791_v46 = vcombine.high %v8767_v50, %v8767_v50 }
  0x63   : > { %12567 = vst [vmem:[#allocation78_spill] sm:$0xff] %v8771_v39  ;;  %12568 = vst [vmem:[#allocation79_spill] sm:$0xff] %v8775_v48  ;;  %v7529_v47 = vpack.i.bf16 %v8775_v48, %v8771_v39  ;;  %v1304_v20 = vcombine.high %v829_v53, %v829_v53  ;;  %v8795_v24 = vcombine.high %v8778_v60, %v8778_v60 }
  0x64   : > { %12569 = vst [vmem:[#allocation80_spill] sm:$0xff] %v8778_v60  ;;  %12570 = vst [vmem:[#allocation81_spill] sm:$0xff] %v8782_v51  ;;  %v8798_v43 = vrot.slane %v829_v53, %v8157_v8  ;;  %v1321_v37 = vcombine.high %v753_v3, %v753_v3  ;;  %v8801_v49 = vrot.slane %v753_v3, %v8157_v8 }
  0x65   : > { %12572 = vst [vmem:[#allocation83_spill] sm:$0xff] %v8791_v46  ;;  %12573 = vst [vmem:[#allocation84_spill] sm:$0xff] %v8795_v24  ;;  %7530 = vrot.lane.b32.xlu1 %v7529_v47, %s8007_s22  ;;  %v8806_v45 = vcombine.high %v8787_v11, %v8787_v11  ;;  %v8809_v41 = vrot.slane %v1304_v20, %v8157_v8  ;;  %v2433_v42 = vrot.slane %v8760_v44, %v8159_v9 }
  0x66   : > { %12574 = vst [vmem:[#allocation85_spill] sm:$0xff] %v8798_v43  ;;  %12575 = vst [vmem:[#allocation86_spill] sm:$0xff] %v8801_v49  ;;  %v8815_v53 = vrot.slane %v8782_v51, %v8159_v9  ;;  %v8819_v3 = vcombine.high %v8798_v43, %v8798_v43  ;;  %v8822_v47 = vrot.slane %v1321_v37, %v8157_v8 }
  0x67   : > { %12576 = vst [vmem:[#allocation87_spill] sm:$0xff] %v8806_v45  ;;  %12577 = vst [vmem:[#allocation88_spill] sm:$0xff] %v8809_v41  ;;  %v8826_v35 = vcombine.high %v8801_v49, %v8801_v49  ;;  %v8830_v20 = vrot.slane %v8778_v60, %v8159_v9  ;;  %v8834_v48 = vcombine.high %v8809_v41, %v8809_v41 }
  0x68   : > { %12578 = vst [vmem:[#allocation89_spill] sm:$0xff] %v8819_v3  ;;  %12579 = vst [vmem:[#allocation90_spill] sm:$0xff] %v8822_v47  ;;  %v8838_v39 = vrot.slane %v8795_v24, %v8159_v9  ;;  %v8842_v37 = vrot.slane %v8767_v50, %v8159_v9  ;;  %v8846_v54 = vrot.slane %v8791_v46, %v8159_v9 }
  0x69   : > { %12580 = vst [vmem:[#allocation91_spill] sm:$0xff] %v8826_v35  ;;  %12581 = vst [vmem:[#allocation92_spill] sm:$0xff] %v8834_v48  ;;  %v8850_v62 = vcombine.high %v8822_v47, %v8822_v47  ;;  %v8854_v40 = vrot.slane %v8787_v11, %v8159_v9  ;;  %v8858_v12 = vrot.slane %v8806_v45, %v8159_v9 }
  0x6a   : > { %v2465_v57 = vrot.slane %v8798_v43, %v8159_v9  ;;  %v8864_v61 = vrot.slane %v8819_v3, %v8159_v9  ;;  %v8868_v19 = vrot.slane %v8809_v41, %v8159_v9  ;;  %v8872_v38 = vrot.slane %v8834_v48, %v8159_v9 }
  0x6b   : > { %12582 = vst [vmem:[#allocation93_spill] sm:$0xff] %v8850_v62  ;;  %v8876_v55 = vrot.slane %v8801_v49, %v8159_v9  ;;  %v8880_v29 = vrot.slane %v8826_v35, %v8159_v9  ;;  %v8884_v5 = vrot.slane %v8822_v47, %v8159_v9  ;;  %v8888_v2 = vrot.slane %v8850_v62, %v8159_v9 }
  0x6c   : > { %v2686_v56 = vsel %vm1911_vm1, %v8815_v53, %v2433_v42  ;;  %v2693_v26 = vsel %vm1911_vm1, %v8864_v61, %v2465_v57  ;;  %v2113_v6 = vrot.slane %v8631_v33, %v8166_v13  ;;  %v2117_v10 = vrot.slane %v8651_v14, %v8166_v13 }
  0x6d   : > { %12583 = vst [vmem:[#allocation94_spill] sm:$0xff] %v8876_v55  ;;  %v2687_v7 = vsel %vm12480_vm2, %v8830_v20, %v2686_v56  ;;  %v2694_v4 = vsel %vm12480_vm2, %v8868_v19, %v2693_v26  ;;  %v2121_v42 = vrot.slane %v8647_v59, %v8166_v13  ;;  %v2125_v56 = vrot.slane %v8671_v17, %v8166_v13 }
  0x6e   : > { %v2688_v30 = vsel %vm1915_vm3, %v8838_v39, %v2687_v7  ;;  %v2695_v33 = vsel %vm1915_vm3, %v8872_v38, %v2694_v4  ;;  %v2129_v14 = vrot.slane %v8634_v1, %v8166_v13  ;;  %v2133_v7 = vrot.slane %v8655_v0, %v8166_v13 }
  0x6f   : > { %v2689_v57 = vsel %vm1917_vm4, %v8842_v37, %v2688_v30  ;;  %v2696_v59 = vsel %vm1917_vm4, %v8876_v55, %v2695_v33  ;;  %v2137_v17 = vrot.slane %v8638_v34, %v8166_v13  ;;  %v2141_v30 = vrot.slane %v8660_v28, %v8166_v13 }
  0x70   : > { %v2690_v26 = vsel %vm12442_vm5, %v8846_v54, %v2689_v57  ;;  %v2697_v1 = vsel %vm12442_vm5, %v8880_v29, %v2696_v59  ;;  %v2266_v0 = vsel %vm1911_vm1, %v2117_v10, %v2113_v6  ;;  %v2769_v57 = vrot.slane %v8760_v44, %v8166_v13 }
  0x71   : > { %v2691_v4 = vsel %vm12441_vm6, %v8854_v40, %v2690_v26  ;;  %v2698_v34 = vsel %vm12441_vm6, %v8884_v5, %v2697_v1  ;;  %v2267_v55 = vsel %vm12480_vm2, %v2121_v42, %v2266_v0  ;;  %v2773_v28 = vrot.slane %v8782_v51, %v8166_v13 }
  0x72   : > { %v2692_v33 = vsel %vm12440_vm7, %v8858_v12, %v2691_v4  ;;  %v2699_v26 = vsel %vm12440_vm7, %v8888_v2, %v2698_v34  ;;  %v2268_v59 = vsel %vm1915_vm3, %v2125_v56, %v2267_v55  ;;  %v2777_v10 = vrot.slane %v8778_v60, %v8166_v13 }
  0x73   : > { %v2781_v6 = vrot.slane %v8795_v24, %v8166_v13  ;;  %v7504_v4 = vpack.i.bf16 %v2699_v26, %v2692_v33  ;;  %v2269_v44 = vsel %vm1917_vm4, %v2129_v14, %v2268_v59  ;;  %v2785_v42 = vrot.slane %v8767_v50, %v8166_v13  ;;  %v12647_v50 = vld [vmem:[#allocation59_spill] sm:$0xff] }
  0x74   : > { %v2789_v1 = vrot.slane %v8791_v46, %v8166_v13  ;;  %v2270_v0 = vsel %vm12442_vm5, %v2133_v7, %v2269_v44  ;;  %v2793_v55 = vrot.slane %v8787_v11, %v8166_v13  ;;  %v2797_v56 = vrot.slane %v8806_v45, %v8166_v13 }
  0x75   : > { %v2801_v34 = vrot.slane %v8798_v43, %v8166_v13  ;;  %7505 = vrot.lane.b32.xlu0 %v7504_v4, %s8004_s4  ;;  %v2271_v14 = vsel %vm12441_vm6, %v2137_v17, %v2270_v0  ;;  %v2805_v33 = vrot.slane %v8819_v3, %v8166_v13  ;;  %v2809_v26 = vrot.slane %v8809_v41, %v8166_v13 }
  0x76   : > { %v2813_v44 = vrot.slane %v8834_v48, %v8166_v13  ;;  %v8966_v7 = vsel %vm12440_vm7, %v2141_v30, %v2271_v14  ;;  %v2817_v59 = vrot.slane %v8801_v49, %v8166_v13  ;;  %v2821_v4 = vrot.slane %v8826_v35, %v8166_v13 }
  0x77   : > { %v2825_v17 = vrot.slane %v8822_v47, %v8166_v13  ;;  %v7539_v0 = vpack.i.bf16 %v8966_v7, %v8680_v63  ;;  %v2829_v3 = vrot.slane %v8850_v62, %v8166_v13  ;;  %v3022_v48 = vsel %vm1911_vm1, %v2773_v28, %v2769_v57 }
  0x78   : > { %v3029_v30 = vsel %vm1911_vm1, %v2805_v33, %v2801_v34  ;;  %v3023_v14 = vsel %vm12480_vm2, %v2777_v10, %v3022_v48  ;;  %v12584_v45 = vrot.slane %v8186_v22, 7  ;;  %v918_v47 = vrot.slane %v8176_v16, %v8157_v8  ;;  %v12649_v16 = vld [vmem:[#allocation68_spill] sm:$0xff] }
  0x79   : > { %v3030_v49 = vsel %vm12480_vm2, %v2809_v26, %v3029_v30  ;;  %7540 = vrot.lane.b32.xlu1 %v7539_v0, %s8008_s23  ;;  %v3024_v63 = vsel %vm1915_vm3, %v2781_v6, %v3023_v14  ;;  %v8993_v48 = vrot.slane %v8361_v52, %v8159_v9  ;;  %v8999_v10 = vrot.slane %v8350_v36, %v8159_v9  ;;  %v12594_v14 = vld [vmem:[#allocation46_spill] sm:$0xff] }
  0x7a   : > { %v845_v35 = vsel %vm12470_vm0, %v12584_v45, 0.0  ;;  %v3031_v57 = vsel %vm1915_vm3, %v2813_v44, %v3030_v49  ;;  %v3025_v22 = vsel %vm1917_vm4, %v2785_v42, %v3024_v63  ;;  %v9003_v34 = vrot.slane %v8373_v18, %v8159_v9 }
  0x7b   : > { %v959_v28 = vrot.slane %v845_v35, %v8157_v8  ;;  %12585 = vst [vmem:[#allocation95_spill] sm:$0xff] %v8993_v48  ;;  %v3032_v45 = vsel %vm1917_vm4, %v2817_v59, %v3031_v57  ;;  %12586 = vst [vmem:[#allocation96_spill] sm:$0xff] %v8999_v10  ;;  %v3026_v49 = vsel %vm12442_vm5, %v2789_v1, %v3025_v22  ;;  %v12595_v57 = vld [vmem:[#allocation45_spill] sm:$0xff]  ;;  %v12596_v22 = vld [vmem:[#allocation50_spill] sm:$0xff]  ;;  %v12648_v24 = vrot.slane %v12647_v50, 7 }
  0x7c   : > { %12587 = vst [vmem:[#allocation97_spill] sm:$0xff] %v9003_v34  ;;  %v3033_v35 = vsel %vm12442_vm5, %v2821_v4, %v3032_v45  ;;  %v9009_v52 = vrot.slane %v8383_v25, %v8159_v9  ;;  %v1694_v6 = vrot.slane %v8405_v32, %v8159_v9  ;;  %v3027_v42 = vsel %vm12441_vm6, %v2793_v55, %v3026_v49  ;;  %v12593_v4 = vld [vmem:[#allocation43_spill] sm:$0xff]  ;;  %v12597_v49 = vld [vmem:[#allocation54_spill] sm:$0xff]  ;;  %v12652_v50 = vld [vmem:[#allocation72_spill] sm:$0xff] }
  0x7d   : > { %v3034_v36 = vsel %vm12441_vm6, %v2825_v17, %v3033_v35  ;;  %v1698_v33 = vrot.slane %v8401_v15, %v8159_v9  ;;  %v1706_v18 = vrot.slane %v8408_v21, %v8159_v9  ;;  %v3028_v1 = vsel %vm12440_vm7, %v2797_v56, %v3027_v42  ;;  %v12598_v42 = vld [vmem:[#allocation51_spill] sm:$0xff] }
  0x7e   : > { %12588 = vst [vmem:[#allocation98_spill] sm:$0xff] %v9009_v52  ;;  %v3035_v26 = vsel %vm12440_vm7, %v2829_v3, %v3034_v36  ;;  %v1714_v25 = vrot.slane %v8417_v31, %v8159_v9  ;;  %v9024_v44 = vrot.slane %v918_v47, %v8159_v9  ;;  %v2325_v55 = vrot.slane %v959_v28, %v8159_v9  ;;  %v12591_v3 = vld [vmem:[#allocation53_spill] sm:$0xff]  ;;  %v12592_v31 = vld [vmem:[#allocation42_spill] sm:$0xff] }
  0x7f   : > { %v7514_v32 = vpack.i.bf16 %v3035_v26, %v3028_v1  ;;  %v2350_v15 = vsel %vm1911_vm1, %v8999_v10, %v8993_v48  ;;  %v2357_v59 = vsel %vm1911_vm1, %v1698_v33, %v1694_v6  ;;  %v1690_v47 = vrot.slane %v12592_v31, %v8159_v9  ;;  %v12599_v1 = vld [vmem:[#allocation44_spill] sm:$0xff] }
  0x80   : > { %12589 = vst [vmem:[#allocation99_spill] sm:$0xff] %v9024_v44  ;;  %v9033_v21 = vsel %vm12480_vm2, %v8433_v23, %v2350_v15  ;;  %v2358_v56 = vsel %vm12480_vm2, %v12591_v3, %v2357_v59  ;;  %v1722_v17 = vrot.slane %v12593_v4, %v8159_v9  ;;  %v1726_v63 = vrot.slane %v12594_v14, %v8159_v9  ;;  %v12600_v59 = vld [vmem:[#allocation49_spill] sm:$0xff]  ;;  %v12601_v31 = vld [vmem:[#allocation48_spill] sm:$0xff]  ;;  %v680_v23 = vld [vmem:[%s8155_s0 + $0xa0] sm:$0xff] }
  0x81   : > { %12590 = vst [vmem:[#allocation100_spill] sm:$0xff] %v9033_v21  ;;  %7515 = vrot.lane.b32.xlu0 %v7514_v32, %s8006_s5  ;;  %v2352_v0 = vsel %vm1915_vm3, %v9003_v34, %v9033_v21  ;;  %v2359_v30 = vsel %vm1915_vm3, %v1706_v18, %v2358_v56  ;;  %v1730_v28 = vrot.slane %v12595_v57, %v8159_v9  ;;  %v12603_v57 = vld [vmem:[#allocation55_spill] sm:$0xff]  ;;  %v851_v60 = vsel %vm12470_vm0, %v12648_v24, 0.0  ;;  %v12651_v34 = vld [vmem:[#allocation70_spill] sm:$0xff] }
  0x82   : > { %v2353_v45 = vsel %vm1917_vm4, %v12596_v22, %v2352_v0  ;;  %v2360_v35 = vsel %vm1917_vm4, %v12597_v49, %v2359_v30  ;;  %v1734_v36 = vrot.slane %v12598_v42, %v8159_v9  ;;  %v1738_v26 = vrot.slane %v12599_v1, %v8159_v9  ;;  %v12602_v0 = vld [vmem:[#allocation52_spill] sm:$0xff] }
  0x83   : > { %v2354_v32 = vsel %vm12442_vm5, %v9009_v52, %v2353_v45  ;;  %v2361_v15 = vsel %vm12442_vm5, %v1714_v25, %v2360_v35  ;;  %v1742_v56 = vrot.slane %v12600_v59, %v8159_v9  ;;  %v1746_v4 = vrot.slane %v12601_v31, %v8159_v9  ;;  %v9720_v48 = vld [vmem:[%s8155_s0 + $0xa8] sm:$0xff] }
  0x84   : > { %v2355_v30 = vsel %vm12441_vm6, %v12602_v0, %v2354_v32  ;;  %v2362_v14 = vsel %vm12441_vm6, %v8518_v27, %v2361_v15  ;;  %v1750_v42 = vrot.slane %v12603_v57, %v8159_v9  ;;  %v1925_v1 = vsel %vm1911_vm1, %v1694_v6, %v1690_v47  ;;  %v12604_v57 = vld [vmem:[#allocation29_spill] sm:$0xff]  ;;  %12709 = vst [vmem:[#allocation109_spill] sm:$0xff] %v9720_v48 }
  0x85   : > { %v2356_v45 = vsel %vm12440_vm7, %v9024_v44, %v2355_v30  ;;  %v9075_v35 = vsel %vm12440_vm7, %v2325_v55, %v2362_v14  ;;  %v1926_v59 = vsel %vm12480_vm2, %v1698_v33, %v1925_v1  ;;  %v1932_v31 = vsel %vm1911_vm1, %v1726_v63, %v1722_v17 }
  0x86   : > { %v7544_v32 = vpack.i.bf16 %v9075_v35, %v2356_v45  ;;  %v1927_v15 = vsel %vm1915_vm3, %v12591_v3, %v1926_v59  ;;  %v1933_v21 = vsel %vm12480_vm2, %v1730_v28, %v1932_v31  ;;  %v12605_v62 = vrot.slane %v12604_v57, 7 }
  0x87   : > { %v1928_v47 = vsel %vm1917_vm4, %v1706_v18, %v1927_v15  ;;  %v1934_v55 = vsel %vm1915_vm3, %v1734_v36, %v1933_v21  ;;  %v12606_v30 = vrot.slane %v8554_v58, 7  ;;  %v2364_v18 = vsel %vm1911_vm1, %v1730_v28, %v1726_v63  ;;  %v12609_v28 = vld [vmem:[#allocation60_spill] sm:$0xff]  ;;  %v12610_v15 = vld [vmem:[#allocation61_spill] sm:$0xff] }
  0x88   : > { %v847_v6 = vsel %vm12470_vm0, %v12605_v62, 0.0  ;;  %7545 = vrot.lane.b32.xlu1 %v7544_v32, %s8009_s1  ;;  %v1929_v3 = vsel %vm12442_vm5, %v12597_v49, %v1928_v47  ;;  %v1935_v14 = vsel %vm1917_vm4, %v1738_v26, %v1934_v55  ;;  %v2365_v45 = vsel %vm12480_vm2, %v1734_v36, %v2364_v18  ;;  %v12611_v36 = vld [vmem:[#allocation5_spill] sm:$0xff] }
  0x89   : > { %v849_v33 = vsel %vm12470_vm0, %v12606_v30, 0.0  ;;  %v1000_v17 = vrot.slane %v847_v6, %v8157_v8  ;;  %v1930_v21 = vsel %vm12441_vm6, %v1714_v25, %v1929_v3  ;;  %v1936_v58 = vsel %vm12442_vm5, %v1742_v56, %v1935_v14  ;;  %v12613_v30 = vld [vmem:[#allocation62_spill] sm:$0xff]  ;;  %v12616_v14 = vld [vmem:[#allocation63_spill] sm:$0xff] }
  0x8a   : > { %v1041_v62 = vrot.slane %v849_v33, %v8157_v8  ;;  %v9104_v59 = vsel %vm12440_vm7, %v8518_v27, %v1930_v21  ;;  %v1937_v49 = vsel %vm12441_vm6, %v1746_v4, %v1936_v58  ;;  %v2366_v32 = vsel %vm1915_vm3, %v1738_v26, %v2365_v45  ;;  %v12614_v33 = vld [vmem:[#allocation9_spill] sm:$0xff]  ;;  %v12617_v58 = vld [vmem:[#allocation64_spill] sm:$0xff] }
  0x8b   : > { %v2329_v1 = vrot.slane %v1000_v17, %v8159_v9  ;;  %12607 = vst [vmem:[#allocation53_spill] sm:$0xff] %v9104_v59  ;;  %v9110_v63 = vsel %vm12440_vm7, %v1750_v42, %v1937_v49  ;;  %v2367_v25 = vsel %vm1917_vm4, %v1742_v56, %v2366_v32  ;;  %v2371_v57 = vsel %vm1911_vm1, %v12610_v15, %v12609_v28  ;;  %v12618_v49 = vld [vmem:[#allocation27_spill] sm:$0xff]  ;;  %v12619_v32 = vld [vmem:[#allocation28_spill] sm:$0xff] }
  0x8c   : > { %v2333_v31 = vrot.slane %v1041_v62, %v8159_v9  ;;  %12608 = vst [vmem:[#allocation42_spill] sm:$0xff] %v9110_v63  ;;  %v12612_v6 = vrot.slane %v12611_v36, 7  ;;  %v7524_v47 = vpack.i.bf16 %v9110_v63, %v9104_v59  ;;  %v2368_v55 = vsel %vm12442_vm5, %v1746_v4, %v2367_v25  ;;  %v12621_v28 = vld [vmem:[#allocation36_spill] sm:$0xff]  ;;  %v12650_v63 = vld [vmem:[#allocation69_spill] sm:$0xff] }
  0x8d   : > { %v2372_v26 = vsel %vm12480_vm2, %v12613_v30, %v2371_v57  ;;  %v12615_v17 = vrot.slane %v12614_v33, 7  ;;  %v2369_v3 = vsel %vm12441_vm6, %v1750_v42, %v2368_v55  ;;  %v3148_v25 = vsel %vm1911_vm1, %v12619_v32, %v12618_v49  ;;  %v12620_v42 = vld [vmem:[#allocation35_spill] sm:$0xff]  ;;  %v12622_v57 = vld [vmem:[#allocation65_spill] sm:$0xff]  ;;  %v12624_v55 = vld [vmem:[#allocation66_spill] sm:$0xff] }
  0x8e   : > { %v848_v27 = vsel %vm12470_vm0, %v12612_v6, 0.0  ;;  %v2373_v62 = vsel %vm1915_vm3, %v12616_v14, %v2372_v26  ;;  %7525 = vrot.lane.b32.xlu0 %v7524_v47, %s8007_s22  ;;  %v9134_v4 = vsel %vm12440_vm7, %v2329_v1, %v2369_v3  ;;  %v3155_v15 = vsel %vm1911_vm1, %v12621_v28, %v12620_v42  ;;  %v12623_v1 = vld [vmem:[#allocation30_spill] sm:$0xff]  ;;  %v12625_v26 = vld [vmem:[#allocation31_spill] sm:$0xff] }
  0x8f   : > { %v850_v56 = vsel %vm12470_vm0, %v12615_v17, 0.0  ;;  %v1385_v18 = vrot.slane %v848_v27, %v8157_v8  ;;  %v2374_v45 = vsel %vm1917_vm4, %v12617_v58, %v2373_v62  ;;  %v3149_v47 = vsel %vm12480_vm2, %v12623_v1, %v3148_v25  ;;  %v12626_v17 = vld [vmem:[#allocation37_spill] sm:$0xff]  ;;  %v12627_v3 = vld [vmem:[#allocation67_spill] sm:$0xff] }
  0x90   : > { %v1426_v21 = vrot.slane %v850_v56, %v8157_v8  ;;  %v2375_v36 = vsel %vm12442_vm5, %v12622_v57, %v2374_v45  ;;  %v3150_v33 = vsel %vm1915_vm3, %v12625_v26, %v3149_v47  ;;  %v3156_v56 = vsel %vm12480_vm2, %v12626_v17, %v3155_v15  ;;  %v12630_v45 = vld [vmem:[#allocation38_spill] sm:$0xff]  ;;  %v12631_v32 = vld [vmem:[#allocation71_spill] sm:$0xff]  ;;  %v12634_v57 = vld [vmem:[#allocation57_spill] sm:$0xff] }
  0x91   : > { %v3113_v6 = vrot.slane %v1385_v18, %v8159_v9  ;;  %v2376_v30 = vsel %vm12441_vm6, %v12624_v55, %v2375_v36  ;;  %v12628_v14 = vrot.slane %v12627_v3, 7  ;;  %v3157_v49 = vsel %vm1915_vm3, %v12630_v45, %v3156_v56  ;;  %v12633_v15 = vld [vmem:[#allocation58_spill] sm:$0xff]  ;;  %v12637_v47 = vld [vmem:[#allocation39_spill] sm:$0xff]  ;;  %v12639_v17 = vld [vmem:[#allocation40_spill] sm:$0xff] }
  0x92   : > { %v3117_v27 = vrot.slane %v1426_v21, %v8159_v9  ;;  %v9160_v18 = vsel %vm12440_vm7, %v2333_v31, %v2376_v30  ;;  %v12629_v21 = vld [vmem:[#allocation32_spill] sm:$0xff]  ;;  %v12632_v25 = vrot.slane %v12631_v32, 7  ;;  %v12635_v36 = vpack.i.bf16 %v12633_v15, %v12634_v57  ;;  %v12636_v31 = vld [vmem:[#allocation33_spill] sm:$0xff]  ;;  %v12638_v26 = vld [vmem:[#allocation34_spill] sm:$0xff] }
  0x93   : > { %v844_v62 = vsel %vm12470_vm0, %v12628_v14, 0.0  ;;  %v3151_v58 = vsel %vm1917_vm4, %v12629_v21, %v3150_v33  ;;  %v7549_v28 = vpack.i.bf16 %v9160_v18, %v9134_v4  ;;  %v3158_v55 = vsel %vm1917_vm4, %v12637_v47, %v3157_v49  ;;  %v678_v21 = vld [vmem:[%s8155_s0 + $0x90] sm:$0xff] }
  0x94   : > { %v846_v42 = vsel %vm12470_vm0, %v12632_v25, 0.0  ;;  %7535 = vrot.lane.b32.xlu0 %v12635_v36, %s8008_s23  ;;  %v3152_v1 = vsel %vm12442_vm5, %v12636_v31, %v3151_v58  ;;  %v1303_v30 = vrot.slane %v844_v62, %v8157_v8  ;;  %v3159_v56 = vsel %vm12442_vm5, %v12639_v17, %v3158_v55  ;;  %v12640_v45 = vld [vmem:[#allocation41_spill] sm:$0xff]  ;;  %v12641_v31 = vld [vmem:[#allocation94_spill] sm:$0xff] }
  0x95   : > { %v3153_v33 = vsel %vm12441_vm6, %v12638_v26, %v3152_v1  ;;  %v1344_v3 = vrot.slane %v846_v42, %v8157_v8  ;;  %v3134_v14 = vsel %vm1911_vm1, %v8830_v20, %v8815_v53  ;;  %7550 = vrot.lane.b32.xlu1 %v7549_v28, %s8009_s1  ;;  %v3160_v62 = vsel %vm12441_vm6, %v12640_v45, %v3159_v56  ;;  %v9197_v25 = vld [vmem:[%s8155_s0 + $0x98] sm:$0xff]  ;;  %v686_v47 = vld [vmem:[%s8155_s0 + $0xd0] sm:$0xff] }
  0x96   : > { %v3154_v58 = vsel %vm12440_vm7, %v3113_v6, %v3153_v33  ;;  %v3105_v49 = vrot.slane %v1303_v30, %v8159_v9  ;;  %v3135_v32 = vsel %vm12480_vm2, %v8838_v39, %v3134_v14  ;;  %v3161_v42 = vsel %vm12440_vm7, %v3117_v27, %v3160_v62  ;;  %v682_v6 = vld [vmem:[%s8155_s0 + $0xb0] sm:$0xff]  ;;  %v9259_v62 = vld [vmem:[%s8155_s0 + $0xd8] sm:$0xff] }
  0x97   : > { %v3109_v15 = vrot.slane %v1344_v3, %v8159_v9  ;;  %v3136_v53 = vsel %vm1915_vm3, %v8842_v37, %v3135_v32  ;;  %v3141_v20 = vsel %vm1911_vm1, %v8868_v19, %v8864_v61  ;;  %v7559_v28 = vpack.i.bf16 %v3161_v42, %v3154_v58 }
  0x98   : > { %v3137_v39 = vsel %vm1917_vm4, %v8846_v54, %v3136_v53  ;;  %v3142_v57 = vsel %vm12480_vm2, %v8872_v38, %v3141_v20  ;;  %v772_v27 = vrot.slane %v678_v21, 7  ;;  %v12356_v1 = vrot.slane %v9197_v25, 7 }
  0x99   : > { %v3138_v36 = vsel %vm12442_vm5, %v8854_v40, %v3137_v39  ;;  %v3143_v37 = vsel %vm1915_vm3, %v12641_v31, %v3142_v57  ;;  %v7564_v19 = vpack.i.bf16 %v9134_v4, %v9075_v35  ;;  %7560 = vrot.lane.b32.xlu1 %v7559_v28, %s8010_s24  ;;  %v9225_v40 = vld [vmem:[%s8155_s0 + $0xb8] sm:$0xff]  ;;  %v778_v55 = vrot.slane %v682_v6, 7  ;;  %v7919_v39 = vld [vmem:[%s12643_s20] sm:$0xff]  }
  0x9a   : > { %v3139_v54 = vsel %vm12441_vm6, %v8858_v12, %v3138_v36  ;;  %v3144_v38 = vsel %vm1917_vm4, %v8880_v29, %v3143_v37  ;;  %v836_v61 = vsel %vm12470_vm0, 0.0, %v772_v27  ;;  %v774_v4 = vsel %vm12470_vm0, %v772_v27, %v12356_v1  ;;  %7356 = vmatprep.subr.bf16.mxu0 %v7919_v39 }
  0x9b   : > { %v3140_v30 = vsel %vm12440_vm7, %v3105_v49, %v3139_v54  ;;  %v3145_v35 = vsel %vm12442_vm5, %v8884_v5, %v3144_v38  ;;  %v1083_v12 = vcombine.high %v836_v61, %v836_v61  ;;  %v9237_v26 = vrot.slane %v836_v61, %v8157_v8  ;;  %7357 = vmatpush3.bf16.msra.mxu0 %v7919_v39 }
  0x9c   : > { %v3146_v29 = vsel %vm12441_vm6, %v8888_v2, %v3145_v35  ;;  %v1100_v33 = vcombine.high %v774_v4, %v774_v4  ;;  %v9240_v17 = vrot.slane %v774_v4, %v8157_v8  ;;  %v12358_v5 = vrot.slane %v9225_v40, 7 }
  0x9d   : > { %12642 = vst [vmem:[#allocation43_spill] sm:$0xff] %v9237_v26  ;;  %v3147_v56 = vsel %vm12440_vm7, %v3109_v15, %v3146_v29  ;;  %v9244_v3 = vrot.slane %v1083_v12, %v8157_v8  ;;  %v784_v14 = vrot.slane %v686_v47, 7  ;;  %v9249_v58 = vcombine.high %v9237_v26, %v9237_v26 }
  0x9e   : > { %v7554_v21 = vpack.i.bf16 %v3147_v56, %v3140_v30  ;;  %v9252_v2 = vrot.slane %v1100_v33, %v8157_v8  ;;  %v9256_v45 = vcombine.high %v9240_v17, %v9240_v17  ;;  %v2145_v32 = vrot.slane %v9237_v26, %v8166_v13 }
  0x9f   : > { %v9263_v49 = vcombine.high %v9244_v3, %v9244_v3  ;;  %v2153_v42 = vrot.slane %v9244_v3, %v8166_v13  ;;  %v2161_v15 = vrot.slane %v9240_v17, %v8166_v13  ;;  %v2149_v20 = vrot.slane %v9249_v58, %v8166_v13 }
  0xa0   : > { %7555 = vrot.lane.b32.xlu0 %v7554_v21, %s8010_s24  ;;  %v9274_v53 = vcombine.high %v9252_v2, %v9252_v2  ;;  %v2165_v6 = vrot.slane %v9256_v45, %v8166_v13  ;;  %v2169_v28 = vrot.slane %v9252_v2, %v8166_v13  ;;  %v780_v27 = vsel %vm12470_vm0, %v778_v55, %v12358_v5 }
  0xa1   : > { %v2157_v57 = vrot.slane %v9263_v49, %v8166_v13  ;;  %v12357_v36 = vrot.slane %v9259_v62, 7  ;;  %v838_v31 = vsel %vm12470_vm0, 0.0, %v778_v55  ;;  %v2273_v54 = vsel %vm1911_vm1, %v2149_v20, %v2145_v32 }
  0xa2   : > { %v2173_v37 = vrot.slane %v9274_v53, %v8166_v13  ;;  %v840_v38 = vsel %vm12470_vm0, 0.0, %v784_v14  ;;  %v1124_v61 = vcombine.high %v838_v31, %v838_v31  ;;  %v2274_v47 = vsel %vm12480_vm2, %v2153_v42, %v2273_v54 }
  0xa3   : > { %v786_v30 = vsel %vm12470_vm0, %v784_v14, %v12357_v36  ;;  %v9301_v35 = vrot.slane %v838_v31, %v8157_v8  ;;  %v1141_v4 = vcombine.high %v780_v27, %v780_v27  ;;  %v2275_v55 = vsel %vm1915_vm3, %v2157_v57, %v2274_v47 }
  0xa4   : > { %7565 = vrot.lane.b32.xlu0 %v7564_v19, %s8011_s3  ;;  %v9306_v12 = vrot.slane %v1124_v61, %v8157_v8  ;;  %v9309_v29 = vrot.slane %v780_v27, %v8157_v8  ;;  %v1165_v33 = vcombine.high %v840_v38, %v840_v38  ;;  %v2276_v56 = vsel %vm1917_vm4, %v2161_v15, %v2275_v55 }
  0xa5   : > { %12644 = vst [vmem:[#allocation46_spill] sm:$0xff] %v9301_v35  ;;  %v9314_v14 = vcombine.high %v9301_v35, %v9301_v35  ;;  %v9317_v21 = vrot.slane %v1141_v4, %v8157_v8  ;;  %v9320_v32 = vrot.slane %v840_v38, %v8157_v8  ;;  %v2277_v19 = vsel %vm12442_vm5, %v2165_v6, %v2276_v56 }
  0xa6   : > { %v9325_v42 = vcombine.high %v9306_v12, %v9306_v12  ;;  %v9329_v20 = vcombine.high %v9309_v29, %v9309_v29  ;;  %v9332_v15 = vrot.slane %v1165_v33, %v8157_v8  ;;  %v2278_v39 = vsel %vm12441_vm6, %v2169_v28, %v2277_v19 }
  0xa7   : > { %12645 = vst [vmem:[#allocation45_spill] sm:$0xff] %v9320_v32  ;;  %v9337_v57 = vcombine.high %v9317_v21, %v9317_v21  ;;  %v9341_v6 = vcombine.high %v9320_v32, %v9320_v32  ;;  %v1182_v27 = vcombine.high %v786_v30, %v786_v30  ;;  %v9344_v31 = vsel %vm12440_vm7, %v2173_v37, %v2278_v39 }
  0xa8   : > { %12646 = vst [vmem:[#allocation54_spill] sm:$0xff] %v9344_v31  ;;  %v9348_v54 = vcombine.high %v9332_v15, %v9332_v15  ;;  %v9351_v38 = vrot.slane %v786_v30, %v8157_v8  ;;  %v2177_v28 = vrot.slane %v9301_v35, %v8166_v13  ;;  %v7569_v61 = vpack.i.bf16 %v9344_v31, %v8966_v7 }
  0xa9   : > { %v9358_v47 = vrot.slane %v1182_v27, %v8157_v8  ;;  %v2181_v37 = vrot.slane %v9314_v14, %v8166_v13  ;;  %v2185_v4 = vrot.slane %v9306_v12, %v8166_v13  ;;  %v2189_v30 = vrot.slane %v9325_v42, %v8166_v13 }
  0xaa   : > { %v1197_v55 = vcombine.high %v9351_v38, %v9351_v38  ;;  %v2193_v33 = vrot.slane %v9309_v29, %v8166_v13  ;;  %v2197_v7 = vrot.slane %v9329_v20, %v8166_v13  ;;  %7570 = vrot.lane.b32.xlu1 %v7569_v61, %s8005_s30  ;;  %v2201_v19 = vrot.slane %v9317_v21, %v8166_v13 }
  0xab   : > { %v1198_v56 = vcombine.high %v9358_v47, %v9358_v47  ;;  %v2205_v39 = vrot.slane %v9337_v57, %v8166_v13  ;;  %v2209_v27 = vrot.slane %v9320_v32, %v8166_v13  ;;  %v2213_v1 = vrot.slane %v9341_v6, %v8166_v13 }
  0xac   : > { %v2217_v36 = vrot.slane %v9332_v15, %v8166_v13  ;;  %v2221_v61 = vrot.slane %v9348_v54, %v8166_v13  ;;  %v2225_v5 = vrot.slane %v9351_v38, %v8166_v13  ;;  %v2229_v44 = vrot.slane %v1197_v55, %v8166_v13 }
  0xad   : > { %v2233_v41 = vrot.slane %v9358_v47, %v8166_v13  ;;  %v2237_v43 = vrot.slane %v1198_v56, %v8166_v13  ;;  %v2280_v11 = vsel %vm1911_vm1, %v2181_v37, %v2177_v28  ;;  %v2287_v46 = vsel %vm1911_vm1, %v2213_v1, %v2209_v27 }
  0xae   : > { %v2281_v51 = vsel %vm12480_vm2, %v2185_v4, %v2280_v11  ;;  %v2378_v59 = vsel %vm1911_vm1, %v12650_v63, %v12649_v16  ;;  %v2288_v52 = vsel %vm12480_vm2, %v2217_v36, %v2287_v46  ;;  %v1082_v22 = vrot.slane %v851_v60, %v8157_v8  ;;  %v12654_v63 = vld [vmem:[#allocation73_spill] sm:$0xff] }
  0xaf   : > { %v2282_v0 = vsel %vm1915_vm3, %v2189_v30, %v2281_v51  ;;  %v2379_v28 = vsel %vm12480_vm2, %v12651_v34, %v2378_v59  ;;  %v2289_v1 = vsel %vm1915_vm3, %v2221_v61, %v2288_v52  ;;  %v12653_v37 = vrot.slane %v9225_v40, 7  ;;  %v12655_v59 = vld [vmem:[#allocation74_spill] sm:$0xff] }
  0xb0   : > { %v2283_v11 = vsel %vm1917_vm4, %v2193_v33, %v2282_v0  ;;  %v2380_v24 = vsel %vm1915_vm3, %v12652_v50, %v2379_v28  ;;  %v2290_v46 = vsel %vm1917_vm4, %v2225_v5, %v2289_v1  ;;  %v2337_v60 = vrot.slane %v1082_v22, %v8159_v9  ;;  %v12658_v22 = vld [vmem:[#allocation75_spill] sm:$0xff] }
  0xb1   : > { %v855_v16 = vsel %vm12470_vm0, %v12653_v37, 0.0  ;;  %v2284_v51 = vsel %vm12442_vm5, %v2197_v7, %v2283_v11  ;;  %v2381_v34 = vsel %vm1917_vm4, %v12654_v63, %v2380_v24  ;;  %v2291_v52 = vsel %vm12442_vm5, %v2229_v44, %v2290_v46 }
  0xb2   : > { %v2285_v0 = vsel %vm12441_vm6, %v2201_v19, %v2284_v51  ;;  %v2382_v36 = vsel %vm12442_vm5, %v12655_v59, %v2381_v34  ;;  %v12656_v40 = vrot.slane %v9259_v62, 7  ;;  %v2292_v5 = vsel %vm12441_vm6, %v2233_v41, %v2291_v52  ;;  %v684_v34 = vld [vmem:[%s8155_s0 + $0xc0] sm:$0xff] }
  0xb3   : > { %v9427_v30 = vsel %vm12440_vm7, %v2205_v39, %v2285_v0  ;;  %v2383_v33 = vsel %vm12441_vm6, %v12658_v22, %v2382_v36  ;;  %v1164_v7 = vrot.slane %v855_v16, %v8157_v8  ;;  %v9434_v19 = vsel %vm12440_vm7, %v2237_v43, %v2292_v5  ;;  %v688_v36 = vld [vmem:[%s8155_s0 + $0xe0] sm:$0xff]  ;;  %v9570_v5 = vld [vmem:[%s8155_s0 + $0xe8] sm:$0xff] }
  0xb4   : > { %v857_v4 = vsel %vm12470_vm0, %v12656_v40, 0.0  ;;  %12657 = vst [vmem:[#allocation51_spill] sm:$0xff] %v9427_v30  ;;  %12659 = vst [vmem:[#allocation44_spill] sm:$0xff] %v9434_v19  ;;  %v9437_v44 = vsel %vm12440_vm7, %v2337_v60, %v2383_v33  ;;  %v9442_v27 = vrot.slane %v9314_v14, %v8159_v9  ;;  %v7579_v41 = vpack.i.bf16 %v9434_v19, %v9427_v30  ;;  %v9573_v22 = vld [vmem:[%s8155_s0 + $0x80] sm:$0xff] }
  0xb5   : > { %v1205_v62 = vrot.slane %v857_v4, %v8157_v8  ;;  %v7574_v39 = vpack.i.bf16 %v9437_v44, %v9160_v18  ;;  %v9450_v61 = vrot.slane %v9306_v12, %v8159_v9  ;;  %v9454_v43 = vrot.slane %v9325_v42, %v8159_v9 }
  0xb6   : > { %12660 = vst [vmem:[#allocation49_spill] sm:$0xff] %v9442_v27  ;;  %v9458_v28 = vrot.slane %v9309_v29, %v8159_v9  ;;  %v9462_v14 = vrot.slane %v9329_v20, %v8159_v9  ;;  %v9466_v11 = vrot.slane %v9317_v21, %v8159_v9  ;;  %v9470_v18 = vrot.slane %v9337_v57, %v8159_v9 }
  0xb7   : > { %12661 = vst [vmem:[#allocation48_spill] sm:$0xff] %v9450_v61  ;;  %12662 = vst [vmem:[#allocation55_spill] sm:$0xff] %v9454_v43  ;;  %7580 = vrot.lane.b32.xlu1 %v7579_v41, %s8005_s30  ;;  %7575 = vrot.lane.b32.xlu0 %v7574_v39, %s8011_s3  ;;  %v9476_v12 = vrot.slane %v9341_v6, %v8159_v9  ;;  %v9480_v29 = vrot.slane %v9332_v15, %v8159_v9  ;;  %v12670_v42 = vrot.slane %v9197_v25, 7  ;;  %s12775_s30 = sld [smem:[#allocation116_spill]] }
  0xb8   : > { %12663 = vst [vmem:[#allocation29_spill] sm:$0xff] %v9458_v28  ;;  %12664 = vst [vmem:[#allocation60_spill] sm:$0xff] %v9462_v14  ;;  %v9484_v21 = vrot.slane %v9348_v54, %v8159_v9  ;;  %v9491_v57 = vrot.slane %v9351_v38, %v8159_v9  ;;  %v9494_v1 = vrot.slane %v1197_v55, %v8159_v9 }
  0xb9   : > { %12665 = vst [vmem:[#allocation61_spill] sm:$0xff] %v9466_v11  ;;  %12666 = vst [vmem:[#allocation5_spill] sm:$0xff] %v9470_v18  ;;  %v853_v20 = vsel %vm12470_vm0, %v12670_v42, 0.0  ;;  %v9498_v6 = vrot.slane %v9358_v47, %v8159_v9  ;;  %v9501_v15 = vrot.slane %v1198_v56, %v8159_v9  ;;  %v2345_v54 = vrot.slane %v1164_v7, %v8159_v9 }
  0xba   : > { %12667 = vst [vmem:[#allocation62_spill] sm:$0xff] %v9476_v12  ;;  %12668 = vst [vmem:[#allocation9_spill] sm:$0xff] %v9480_v29  ;;  %v2349_v25 = vrot.slane %v1205_v62, %v8159_v9  ;;  %v2392_v38 = vsel %vm1911_vm1, %v9450_v61, %v9442_v27  ;;  %v2399_v55 = vsel %vm1911_vm1, %v9480_v29, %v9476_v12  ;;  %v781_v62 = vrot.slane %v684_v34, 7 }
  0xbb   : > { %12669 = vst [vmem:[#allocation63_spill] sm:$0xff] %v9484_v21  ;;  %12671 = vst [vmem:[#allocation64_spill] sm:$0xff] %v9491_v57  ;;  %v2393_v47 = vsel %vm12480_vm2, %v9454_v43, %v2392_v38  ;;  %v2400_v56 = vsel %vm12480_vm2, %v9484_v21, %v2399_v55  ;;  %v1123_v50 = vrot.slane %v853_v20, %v8157_v8  ;;  %v787_v20 = vrot.slane %v688_v36, 7 }
  0xbc   : > { %12672 = vst [vmem:[#allocation27_spill] sm:$0xff] %v9494_v1  ;;  %12673 = vst [vmem:[#allocation28_spill] sm:$0xff] %v9498_v6  ;;  %v9518_v24 = vrot.slane %v9249_v58, %v8159_v9  ;;  %v2394_v37 = vsel %vm1915_vm3, %v9458_v28, %v2393_v47  ;;  %v2401_v16 = vsel %vm1915_vm3, %v9491_v57, %v2400_v56  ;;  %v12374_v38 = vrot.slane %v9570_v5, 7 }
  0xbd   : > { %12674 = vst [vmem:[#allocation35_spill] sm:$0xff] %v9501_v15  ;;  %v9526_v51 = vrot.slane %v9244_v3, %v8159_v9  ;;  %v9530_v46 = vrot.slane %v9263_v49, %v8159_v9  ;;  %v2395_v60 = vsel %vm1917_vm4, %v9462_v14, %v2394_v37  ;;  %v2402_v58 = vsel %vm1917_vm4, %v9494_v1, %v2401_v16 }
  0xbe   : > { %12675 = vst [vmem:[#allocation36_spill] sm:$0xff] %v9518_v24  ;;  %v9538_v63 = vrot.slane %v9240_v17, %v8159_v9  ;;  %v9542_v3 = vrot.slane %v9256_v45, %v8159_v9  ;;  %v2396_v49 = vsel %vm12442_vm5, %v9466_v11, %v2395_v60  ;;  %v2403_v0 = vsel %vm12442_vm5, %v9498_v6, %v2402_v58  ;;  %v9558_v17 = vld [vmem:[%s8155_s0 + $0xc8] sm:$0xff] }
  0xbf   : > { %12676 = vst [vmem:[#allocation65_spill] sm:$0xff] %v9526_v51  ;;  %12677 = vst [vmem:[#allocation30_spill] sm:$0xff] %v9530_v46  ;;  %v9551_v52 = vrot.slane %v9252_v2, %v8159_v9  ;;  %v9555_v59 = vrot.slane %v9274_v53, %v8159_v9  ;;  %v2397_v45 = vsel %vm12441_vm6, %v9470_v18, %v2396_v49  ;;  %v12375_v42 = vrot.slane %v9558_v17, 7 }
  0xc0   : > { %12678 = vst [vmem:[#allocation66_spill] sm:$0xff] %v9538_v63  ;;  %12679 = vst [vmem:[#allocation31_spill] sm:$0xff] %v9542_v3  ;;  %v2404_v40 = vsel %vm12441_vm6, %v9501_v15, %v2403_v0  ;;  %v2341_v4 = vrot.slane %v1123_v50, %v8159_v9  ;;  %v2385_v2 = vsel %vm1911_vm1, %v9526_v51, %v9518_v24  ;;  %v769_v55 = vrot.slane %v9573_v22, 7 }
  0xc1   : > { %12680 = vst [vmem:[#allocation37_spill] sm:$0xff] %v9551_v52  ;;  %12681 = vst [vmem:[#allocation67_spill] sm:$0xff] %v9555_v59  ;;  %v9576_v53 = vsel %vm12440_vm7, %v2345_v54, %v2397_v45  ;;  %v9579_v33 = vsel %vm12440_vm7, %v2349_v25, %v2404_v40  ;;  %v2386_v7 = vsel %vm12480_vm2, %v9530_v46, %v2385_v2  ;;  %v839_v25 = vsel %vm12470_vm0, 0.0, %v781_v62 }
  0xc2   : > { %12682 = vst [vmem:[#allocation32_spill] sm:$0xff] %v9576_v53  ;;  %12683 = vst [vmem:[#allocation38_spill] sm:$0xff] %v9579_v33  ;;  %v7589_v41 = vpack.i.bf16 %v9579_v33, %v9576_v53  ;;  %v2387_v39 = vsel %vm1915_vm3, %v9538_v63, %v2386_v7  ;;  %v783_v56 = vsel %vm12470_vm0, %v781_v62, %v12375_v42  ;;  %v841_v50 = vsel %vm12470_vm0, 0.0, %v787_v20  ;;  %v9700_v33 = vld [vmem:[%s8155_s0 + $0x88] sm:$0xff] }
  0xc3   : > { %v2388_v54 = vsel %vm1917_vm4, %v9542_v3, %v2387_v39  ;;  %v1509_v37 = vcombine.high %v839_v25, %v839_v25  ;;  %v789_v60 = vsel %vm12470_vm0, %v787_v20, %v12374_v38  ;;  %v9606_v58 = vrot.slane %v839_v25, %v8157_v8  ;;  %12706 = vst [vmem:[#allocation106_spill] sm:$0xff] %v9700_v33 }
  0xc4   : > { %7590 = vrot.lane.b32.xlu1 %v7589_v41, %s8009_s1  ;;  %v2389_v47 = vsel %vm12442_vm5, %v9551_v52, %v2388_v54  ;;  %v1526_v34 = vcombine.high %v783_v56, %v783_v56  ;;  %v9615_v36 = vrot.slane %v783_v56, %v8157_v8  ;;  %v1550_v45 = vcombine.high %v841_v50, %v841_v50 }
  0xc5   : > { %v2390_v16 = vsel %vm12441_vm6, %v9555_v59, %v2389_v47  ;;  %12684 = vst [vmem:[#allocation71_spill] sm:$0xff] %v9606_v58  ;;  %v9612_v0 = vrot.slane %v1509_v37, %v8157_v8  ;;  %v9621_v2 = vcombine.high %v9606_v58, %v9606_v58  ;;  %v1567_v41 = vcombine.high %v789_v60, %v789_v60 }
  0xc6   : > { %v9609_v49 = vsel %vm12440_vm7, %v2341_v4, %v2390_v16  ;;  %12687 = vst [vmem:[#allocation33_spill] sm:$0xff] %v9615_v36  ;;  %v9624_v22 = vrot.slane %v1526_v34, %v8157_v8  ;;  %v9627_v4 = vrot.slane %v841_v50, %v8157_v8  ;;  %v9635_v62 = vcombine.high %v9615_v36, %v9615_v36 }
  0xc7   : > { %12685 = vst [vmem:[#allocation58_spill] sm:$0xff] %v9609_v49  ;;  %12686 = vst [vmem:[#allocation57_spill] sm:$0xff] %v9612_v0  ;;  %v7584_v40 = vpack.i.bf16 %v9609_v49, %v9437_v44  ;;  %v9631_v7 = vcombine.high %v9612_v0, %v9612_v0  ;;  %v9638_v44 = vrot.slane %v1550_v45, %v8157_v8  ;;  %v12397_v52 = vrot.slane %v9700_v33, 7 }
  0xc8   : > { %12688 = vst [vmem:[#allocation39_spill] sm:$0xff] %v9621_v2  ;;  %12689 = vst [vmem:[#allocation34_spill] sm:$0xff] %v9624_v22  ;;  %v9643_v39 = vcombine.high %v9624_v22, %v9624_v22  ;;  %v9647_v20 = vcombine.high %v9627_v4, %v9627_v4  ;;  %v9650_v54 = vrot.slane %v789_v60, %v8157_v8  ;;  %v775_v28 = vrot.slane %v680_v23, 7 }
  0xc9   : > { %12690 = vst [vmem:[#allocation40_spill] sm:$0xff] %v9627_v4  ;;  %12691 = vst [vmem:[#allocation41_spill] sm:$0xff] %v9631_v7  ;;  %7585 = vrot.lane.b32.xlu0 %v7584_v40, %s8009_s1  ;;  %v2625_v25 = vrot.slane %v9606_v58, %v8159_v9  ;;  %v9656_v47 = vcombine.high %v9638_v44, %v9638_v44  ;;  %v9659_v56 = vrot.slane %v1567_v41, %v8157_v8  ;;  %s8016_s1 = smov 8  }
  0xca   : > { %12692 = vst [vmem:[#allocation94_spill] sm:$0xff] %v9635_v62  ;;  %12693 = vst [vmem:[#allocation59_spill] sm:$0xff] %v9638_v44  ;;  %v9663_v50 = vrot.slane %v9621_v2, %v8159_v9  ;;  %v9667_v37 = vrot.slane %v9612_v0, %v8159_v9  ;;  %v9671_v16 = vcombine.high %v9650_v54, %v9650_v54  ;;  %v12399_v63 = vrot.slane %v9720_v48, 7 }
  0xcb   : > { %12694 = vst [vmem:[#allocation68_spill] sm:$0xff] %v9643_v39  ;;  %12695 = vst [vmem:[#allocation69_spill] sm:$0xff] %v9647_v20  ;;  %v9675_v60 = vrot.slane %v9631_v7, %v8159_v9  ;;  %v9679_v34 = vrot.slane %v9615_v36, %v8159_v9  ;;  %v9683_v45 = vrot.slane %v9635_v62, %v8159_v9  ;;  %v835_v61 = vsel %vm12470_vm0, 0.0, %v769_v55 }
  0xcc   : > { %12696 = vst [vmem:[#allocation70_spill] sm:$0xff] %v9650_v54  ;;  %12697 = vst [vmem:[#allocation72_spill] sm:$0xff] %v9656_v47  ;;  %v9687_v40 = vcombine.high %v9659_v56, %v9659_v56  ;;  %v9691_v41 = vrot.slane %v9624_v22, %v8159_v9  ;;  %v9695_v38 = vrot.slane %v9643_v39, %v8159_v9 }
  0xcd   : > { %12698 = vst [vmem:[#allocation73_spill] sm:$0xff] %v9659_v56  ;;  %12699 = vst [vmem:[#allocation74_spill] sm:$0xff] %v9671_v16  ;;  %v2657_v42 = vrot.slane %v9627_v4, %v8159_v9  ;;  %v9705_v10 = vrot.slane %v9647_v20, %v8159_v9  ;;  %v9709_v53 = vrot.slane %v9638_v44, %v8159_v9 }
  0xce   : > { %12700 = vst [vmem:[#allocation75_spill] sm:$0xff] %v9675_v60  ;;  %12701 = vst [vmem:[#allocation101_spill] sm:$0xff] %v9679_v34  ;;  %v9713_v49 = vrot.slane %v9656_v47, %v8159_v9  ;;  %v9717_v19 = vrot.slane %v9650_v54, %v8159_v9  ;;  %v9724_v30 = vrot.slane %v9671_v16, %v8159_v9 }
  0xcf   : > { %12702 = vst [vmem:[#allocation102_spill] sm:$0xff] %v9683_v45  ;;  %12703 = vst [vmem:[#allocation103_spill] sm:$0xff] %v9687_v40  ;;  %v9728_v31 = vrot.slane %v9659_v56, %v8159_v9  ;;  %v9732_v18 = vrot.slane %v9687_v40, %v8159_v9  ;;  %v2728_v11 = vsel %vm1911_vm1, %v9663_v50, %v2625_v25 }
  0xd0   : > { %12704 = vst [vmem:[#allocation104_spill] sm:$0xff] %v9691_v41  ;;  %12705 = vst [vmem:[#allocation105_spill] sm:$0xff] %v9695_v38  ;;  %v2729_v59 = vsel %vm12480_vm2, %v9667_v37, %v2728_v11  ;;  %v2735_v14 = vsel %vm1911_vm1, %v9705_v10, %v2657_v42  ;;  %v771_v23 = vsel %vm12470_vm0, %v769_v55, %v12397_v52  ;;  %v837_v42 = vsel %vm12470_vm0, 0.0, %v775_v28 }
  0xd1   : > { %12707 = vst [vmem:[#allocation107_spill] sm:$0xff] %v9713_v49  ;;  %12708 = vst [vmem:[#allocation108_spill] sm:$0xff] %v9717_v19  ;;  %v2730_v3 = vsel %vm1915_vm3, %v9675_v60, %v2729_v59  ;;  %v2736_v43 = vsel %vm12480_vm2, %v9709_v53, %v2735_v14  ;;  %v777_v46 = vsel %vm12470_vm0, %v775_v28, %v12399_v63 }
  0xd2   : > { %12710 = vst [vmem:[#allocation110_spill] sm:$0xff] %v9724_v30  ;;  %12711 = vst [vmem:[#allocation111_spill] sm:$0xff] %v9728_v31  ;;  %v2731_v25 = vsel %vm1917_vm4, %v9679_v34, %v2730_v3  ;;  %v2737_v11 = vsel %vm1915_vm3, %v9713_v49, %v2736_v43  ;;  %v1427_v3 = vcombine.high %v835_v61, %v835_v61 }
  0xd3   : > { %12712 = vst [vmem:[#allocation112_spill] sm:$0xff] %v9732_v18  ;;  %v2732_v59 = vsel %vm12442_vm5, %v9683_v45, %v2731_v25  ;;  %v2738_v14 = vsel %vm1917_vm4, %v9717_v19, %v2737_v11  ;;  %v9767_v55 = vrot.slane %v835_v61, %v8157_v8  ;;  %v1444_v52 = vcombine.high %v771_v23, %v771_v23 }
  0xd4   : > { %v2733_v43 = vsel %vm12441_vm6, %v9691_v41, %v2732_v59  ;;  %v2739_v27 = vsel %vm12442_vm5, %v9724_v30, %v2738_v14  ;;  %v9774_v51 = vrot.slane %v1427_v3, %v8157_v8  ;;  %v9777_v28 = vrot.slane %v771_v23, %v8157_v8 }
  0xd5   : > { %v2734_v25 = vsel %vm12440_vm7, %v9695_v38, %v2733_v43  ;;  %v2740_v11 = vsel %vm12441_vm6, %v9728_v31, %v2739_v27  ;;  %v9783_v61 = vcombine.high %v9767_v55, %v9767_v55  ;;  %v9786_v14 = vrot.slane %v1444_v52, %v8157_v8 }
  0xd6   : > { %v2741_v59 = vsel %vm12440_vm7, %v9732_v18, %v2740_v11  ;;  %v1468_v43 = vcombine.high %v837_v42, %v837_v42  ;;  %v9790_v27 = vcombine.high %v9774_v51, %v9774_v51  ;;  %v9794_v23 = vcombine.high %v9777_v28, %v9777_v28 }
  0xd7   : > { %v7599_v63 = vpack.i.bf16 %v2741_v59, %v2734_v25  ;;  %v9797_v3 = vrot.slane %v837_v42, %v8157_v8  ;;  %v9801_v11 = vcombine.high %v9786_v14, %v9786_v14  ;;  %v1485_v15 = vcombine.high %v777_v46, %v777_v46 }
  0xd8   : > { %v9804_v52 = vrot.slane %v1468_v43, %v8157_v8  ;;  %v9807_v25 = vrot.slane %v777_v46, %v8157_v8  ;;  %v2561_v42 = vrot.slane %v9767_v55, %v8159_v9  ;;  %v9818_v24 = vrot.slane %v9783_v61, %v8159_v9 }
  0xd9   : > { %7600 = vrot.lane.b32.xlu1 %v7599_v63, %s8004_s4  ;;  %v9812_v59 = vcombine.high %v9797_v3, %v9797_v3  ;;  %v9822_v43 = vrot.slane %v9774_v51, %v8159_v9  ;;  %v9829_v63 = vrot.slane %v1485_v15, %v8157_v8  ;;  %v9837_v6 = vrot.slane %v9790_v27, %v8159_v9 }
  0xda   : > { %v9826_v46 = vcombine.high %v9804_v52, %v9804_v52  ;;  %v9833_v35 = vcombine.high %v9807_v25, %v9807_v25  ;;  %v9841_v1 = vrot.slane %v9777_v28, %v8159_v9  ;;  %v9845_v57 = vrot.slane %v9794_v23, %v8159_v9 }
  0xdb   : > { %v9849_v15 = vrot.slane %v9786_v14, %v8159_v9  ;;  %v9853_v21 = vrot.slane %v9801_v11, %v8159_v9  ;;  %v9857_v29 = vcombine.high %v9829_v63, %v9829_v63  ;;  %v2593_v12 = vrot.slane %v9797_v3, %v8159_v9 }
  0xdc   : > { %v9863_v26 = vrot.slane %v9812_v59, %v8159_v9  ;;  %v9867_v32 = vrot.slane %v9804_v52, %v8159_v9  ;;  %v9871_v18 = vrot.slane %v9826_v46, %v8159_v9  ;;  %v9875_v38 = vrot.slane %v9807_v25, %v8159_v9 }
  0xdd   : > { %v9879_v48 = vrot.slane %v9833_v35, %v8159_v9  ;;  %v9883_v31 = vrot.slane %v9829_v63, %v8159_v9  ;;  %v9887_v41 = vrot.slane %v9857_v29, %v8159_v9  ;;  %v2714_v33 = vsel %vm1911_vm1, %v9818_v24, %v2561_v42 }
  0xde   : > { %v2721_v30 = vsel %vm1911_vm1, %v9863_v26, %v2593_v12  ;;  %v2961_v45 = vrot.slane %v9606_v58, %v8166_v13  ;;  %v2715_v19 = vsel %vm12480_vm2, %v9822_v43, %v2714_v33  ;;  %v2965_v49 = vrot.slane %v9621_v2, %v8166_v13 }
  0xdf   : > { %12713 = vst [vmem:[#allocation113_spill] sm:$0xff] %v9879_v48  ;;  %v2722_v34 = vsel %vm12480_vm2, %v9867_v32, %v2721_v30  ;;  %v2969_v60 = vrot.slane %v9612_v0, %v8166_v13  ;;  %v2716_v42 = vsel %vm1915_vm3, %v9837_v6, %v2715_v19  ;;  %v2973_v58 = vrot.slane %v9631_v7, %v8166_v13 }
  0xe0   : > { %v2723_v12 = vsel %vm1915_vm3, %v9871_v18, %v2722_v34  ;;  %v2977_v33 = vrot.slane %v9615_v36, %v8166_v13  ;;  %v2717_v30 = vsel %vm1917_vm4, %v9841_v1, %v2716_v42  ;;  %v2981_v0 = vrot.slane %v9635_v62, %v8166_v13 }
  0xe1   : > { %v2724_v2 = vsel %vm1917_vm4, %v9875_v38, %v2723_v12  ;;  %v2985_v19 = vrot.slane %v9624_v22, %v8166_v13  ;;  %v2718_v34 = vsel %vm12442_vm5, %v9845_v57, %v2717_v30  ;;  %v2989_v36 = vrot.slane %v9643_v39, %v8166_v13 }
  0xe2   : > { %v2725_v7 = vsel %vm12442_vm5, %v9879_v48, %v2724_v2  ;;  %v2993_v42 = vrot.slane %v9627_v4, %v8166_v13  ;;  %v2719_v12 = vsel %vm12441_vm6, %v9849_v15, %v2718_v34  ;;  %v2997_v22 = vrot.slane %v9647_v20, %v8166_v13 }
  0xe3   : > { %v2726_v62 = vsel %vm12441_vm6, %v9883_v31, %v2725_v7  ;;  %v3001_v30 = vrot.slane %v9638_v44, %v8166_v13  ;;  %v2720_v2 = vsel %vm12440_vm7, %v9853_v21, %v2719_v12  ;;  %v3005_v4 = vrot.slane %v9656_v47, %v8166_v13 }
  0xe4   : > { %v2727_v39 = vsel %vm12440_vm7, %v9887_v41, %v2726_v62  ;;  %v3009_v34 = vrot.slane %v9650_v54, %v8166_v13  ;;  %v3013_v7 = vrot.slane %v9671_v16, %v8166_v13  ;;  %v3017_v20 = vrot.slane %v9659_v56, %v8166_v13 }
  0xe5   : > { %v7594_v48 = vpack.i.bf16 %v2727_v39, %v2720_v2  ;;  %v3021_v44 = vrot.slane %v9687_v40, %v8166_v13  ;;  %v3064_v12 = vsel %vm1911_vm1, %v2965_v49, %v2961_v45  ;;  %v3071_v62 = vsel %vm1911_vm1, %v2997_v22, %v2993_v42 }
  0xe6   : > { %v2897_v47 = vrot.slane %v9767_v55, %v8166_v13  ;;  %v2901_v54 = vrot.slane %v9783_v61, %v8166_v13  ;;  %v3065_v39 = vsel %vm12480_vm2, %v2969_v60, %v3064_v12  ;;  %v3072_v2 = vsel %vm12480_vm2, %v3001_v30, %v3071_v62 }
  0xe7   : > { %7595 = vrot.lane.b32.xlu0 %v7594_v48, %s8004_s4  ;;  %v2905_v56 = vrot.slane %v9774_v51, %v8166_v13  ;;  %v2909_v49 = vrot.slane %v9790_v27, %v8166_v13  ;;  %v3066_v22 = vsel %vm1915_vm3, %v2973_v58, %v3065_v39  ;;  %v3073_v45 = vsel %vm1915_vm3, %v3005_v4, %v3072_v2  ;;  %s12792_s4 = sld [smem:[#allocation119_spill]] }
  0xe8   : > { %v2913_v42 = vrot.slane %v9777_v28, %v8166_v13  ;;  %v2917_v48 = vrot.slane %v9794_v23, %v8166_v13  ;;  %v3067_v60 = vsel %vm1917_vm4, %v2977_v33, %v3066_v22  ;;  %v3074_v30 = vsel %vm1917_vm4, %v3009_v34, %v3073_v45 }
  0xe9   : > { %v2921_v12 = vrot.slane %v9786_v14, %v8166_v13  ;;  %v2925_v62 = vrot.slane %v9801_v11, %v8166_v13  ;;  %v3068_v58 = vsel %vm12442_vm5, %v2981_v0, %v3067_v60  ;;  %v3075_v4 = vsel %vm12442_vm5, %v3013_v7, %v3074_v30 }
  0xea   : > { %v2929_v39 = vrot.slane %v9797_v3, %v8166_v13  ;;  %v2933_v2 = vrot.slane %v9812_v59, %v8166_v13  ;;  %v3069_v33 = vsel %vm12441_vm6, %v2985_v19, %v3068_v58  ;;  %v3076_v34 = vsel %vm12441_vm6, %v3017_v20, %v3075_v4 }
  0xeb   : > { %v2937_v22 = vrot.slane %v9804_v52, %v8166_v13  ;;  %v2941_v45 = vrot.slane %v9826_v46, %v8166_v13  ;;  %v3070_v0 = vsel %vm12440_vm7, %v2989_v36, %v3069_v33  ;;  %v3077_v7 = vsel %vm12440_vm7, %v3021_v44, %v3076_v34 }
  0xec   : > { %v2945_v60 = vrot.slane %v9807_v25, %v8166_v13  ;;  %v2949_v30 = vrot.slane %v9833_v35, %v8166_v13  ;;  %v7609_v40 = vpack.i.bf16 %v3077_v7, %v3070_v0  ;;  %v2953_v20 = vrot.slane %v9829_v63, %v8166_v13 }
  0xed   : > { %v2957_v19 = vrot.slane %v9857_v29, %v8166_v13  ;;  %v3050_v58 = vsel %vm1911_vm1, %v2901_v54, %v2897_v47  ;;  %v3057_v36 = vsel %vm1911_vm1, %v2933_v2, %v2929_v39  ;;  %v12714_v44 = vrot.slane %v9558_v17, 7 }
  0xee   : > { %v3051_v4 = vsel %vm12480_vm2, %v2905_v56, %v3050_v58  ;;  %v12715_v34 = vrot.slane %v9570_v5, 7  ;;  %7610 = vrot.lane.b32.xlu1 %v7609_v40, %s8006_s5  ;;  %v3058_v16 = vsel %vm12480_vm2, %v2937_v22, %v3057_v36  ;;  %v3176_v5 = vsel %vm1911_vm1, %v9667_v37, %v9663_v50  ;;  %v12717_v50 = vld [vmem:[#allocation107_spill] sm:$0xff]  ;;  %v12720_v36 = vld [vmem:[#allocation102_spill] sm:$0xff] }
  0xef   : > { %v856_v33 = vsel %vm12470_vm0, %v12714_v44, 0.0  ;;  %v3052_v7 = vsel %vm1915_vm3, %v2909_v49, %v3051_v4  ;;  %v3059_v17 = vsel %vm1915_vm3, %v2941_v45, %v3058_v16  ;;  %v3183_v40 = vsel %vm1911_vm1, %v9709_v53, %v9705_v10  ;;  %v12716_v45 = vld [vmem:[#allocation75_spill] sm:$0xff]  ;;  %v12719_v4 = vld [vmem:[#allocation108_spill] sm:$0xff] }
  0xf0   : > { %v858_v0 = vsel %vm12470_vm0, %v12715_v34, 0.0  ;;  %v1549_v54 = vrot.slane %v856_v33, %v8157_v8  ;;  %v3053_v56 = vsel %vm1917_vm4, %v2913_v42, %v3052_v7  ;;  %v3060_v39 = vsel %vm1917_vm4, %v2945_v60, %v3059_v17  ;;  %v12721_v33 = vld [vmem:[#allocation110_spill] sm:$0xff] }
  0xf1   : > { %v1590_v47 = vrot.slane %v858_v0, %v8157_v8  ;;  %v3054_v49 = vsel %vm12442_vm5, %v2917_v48, %v3053_v56  ;;  %v3061_v16 = vsel %vm12442_vm5, %v2949_v30, %v3060_v39  ;;  %v3177_v58 = vsel %vm12480_vm2, %v12716_v45, %v3176_v5  ;;  %v12718_v48 = vld [vmem:[#allocation101_spill] sm:$0xff]  ;;  %v12722_v0 = vld [vmem:[#allocation106_spill] sm:$0xff]  ;;  %v12725_v56 = vld [vmem:[#allocation111_spill] sm:$0xff] }
  0xf2   : > { %v3129_v2 = vrot.slane %v1549_v54, %v8159_v9  ;;  %v3055_v42 = vsel %vm12441_vm6, %v2921_v12, %v3054_v49  ;;  %v3184_v37 = vsel %vm12480_vm2, %v12717_v50, %v3183_v40  ;;  %v3062_v53 = vsel %vm12441_vm6, %v2953_v20, %v3061_v16  ;;  %v12724_v54 = vld [vmem:[#allocation104_spill] sm:$0xff]  ;;  %v12726_v5 = vld [vmem:[#allocation109_spill] sm:$0xff]  ;;  %v10049_v49 = vpop.permute.xlu0 %7495 }
  0xf3   : > { %v3133_v22 = vrot.slane %v1590_v47, %v8159_v9  ;;  %v3056_v10 = vsel %vm12440_vm7, %v2925_v62, %v3055_v42  ;;  %v3178_v60 = vsel %vm1915_vm3, %v12718_v48, %v3177_v58  ;;  %v3185_v12 = vsel %vm1915_vm3, %v12719_v4, %v3184_v37  ;;  %v12728_v39 = vld [vmem:[#allocation105_spill] sm:$0xff]  ;;  %v12729_v16 = vld [vmem:[#allocation112_spill] sm:$0xff] }
  0xf4   : > { %v3063_v30 = vsel %vm12440_vm7, %v2957_v19, %v3062_v53  ;;  %v3179_v44 = vsel %vm1917_vm4, %v12720_v36, %v3178_v60  ;;  %v3186_v34 = vsel %vm1917_vm4, %v12721_v33, %v3185_v12  ;;  %v12723_v62 = vrot.slane %v12722_v0, 7  ;;  %v690_v37 = vld [vmem:[%s8155_s0 + $0xf0] sm:$0xff]  ;;  %v10074_v33 = vpop.permute.xlu1 %7510  ;;  %v12731_v0 = vld [vmem:[#allocation43_spill] sm:$0xff] }
  0xf5   : > { %v7604_v7 = vpack.i.bf16 %v3063_v30, %v3056_v10  ;;  %v3180_v47 = vsel %vm12442_vm5, %v12724_v54, %v3179_v44  ;;  %v3187_v17 = vsel %vm12442_vm5, %v12725_v56, %v3186_v34  ;;  %v12727_v40 = vrot.slane %v12726_v5, 7  ;;  %v10059_v10 = vld [vmem:[%s8155_s0 + $0xf8] sm:$0xff]  ;;  %s12946_s0 = smov 56  }
  0xf6   : > { %v852_v20 = vsel %vm12470_vm0, %v12723_v62, 0.0  ;;  %v3181_v42 = vsel %vm12441_vm6, %v12728_v39, %v3180_v47  ;;  %v3188_v45 = vsel %vm12441_vm6, %v12729_v16, %v3187_v17  ;;  %v3162_v60 = vsel %vm1911_vm1, %v9822_v43, %v9818_v24  ;;  %v12732_v62 = vld [vmem:[#allocation113_spill] sm:$0xff]  ;;  %v10098_v54 = vpop.permute.xlu0 %7500 }
  0xf7   : > { %v854_v19 = vsel %vm12470_vm0, %v12727_v40, 0.0  ;;  %v1467_v58 = vrot.slane %v852_v20, %v8157_v8  ;;  %7605 = vrot.lane.b32.xlu0 %v7604_v7, %s8006_s5  ;;  %v3182_v53 = vsel %vm12440_vm7, %v3129_v2, %v3181_v42  ;;  %v3189_v48 = vsel %vm12440_vm7, %v3133_v22, %v3188_v45  ;;  %v12733_v42 = vld [vmem:[#allocation62_spill] sm:$0xff]  ;;  %s12484_s5 = smov 32  }
  0xf8   : > { %v1508_v50 = vrot.slane %v854_v19, %v8157_v8  ;;  %v3169_v4 = vsel %vm1911_vm1, %v9867_v32, %v9863_v26  ;;  %v7619_v12 = vpack.i.bf16 %v3189_v48, %v3182_v53  ;;  %v3163_v44 = vsel %vm12480_vm2, %v9837_v6, %v3162_v60  ;;  %v12730_v6 = vld [vmem:[#allocation45_spill] sm:$0xff]  ;;  %v10121_v45 = vpop.permute.xlu1 %7520  ;;  %v12735_v60 = vld [vmem:[#allocation63_spill] sm:$0xff] }
  0xf9   : > { %v3121_v30 = vrot.slane %v1467_v58, %v8159_v9  ;;  %v3164_v2 = vsel %vm1915_vm3, %v9841_v1, %v3163_v44  ;;  %v3170_v24 = vsel %vm12480_vm2, %v9871_v18, %v3169_v4  ;;  %v790_v43 = vrot.slane %v690_v37, 7  ;;  %v12734_v37 = vld [vmem:[#allocation9_spill] sm:$0xff]  ;;  %v12736_v44 = vld [vmem:[#allocation64_spill] sm:$0xff] }
  0xfa   : > { %v3125_v36 = vrot.slane %v1508_v50, %v8159_v9  ;;  %v791_v22 = vrot.slane %v10059_v10, 7  ;;  %7620 = vrot.lane.b32.xlu1 %v7619_v12, %s8010_s24  ;;  %v3165_v26 = vsel %vm1917_vm4, %v9845_v57, %v3164_v2  ;;  %v3171_v32 = vsel %vm1915_vm3, %v9875_v38, %v3170_v24  ;;  %v12755_v10 = vld [vmem:[#allocation54_spill] sm:$0xff] }
  0xfb   : > { %v1882_v34 = vrot.slane %v12730_v6, %v8159_v9  ;;  %v1818_v1 = vrot.slane %v12731_v0, %v8159_v9  ;;  %v3166_v18 = vsel %vm12442_vm5, %v9849_v15, %v3165_v26  ;;  %v3172_v20 = vsel %vm1917_vm4, %v12732_v62, %v3171_v32  ;;  %v12737_v26 = vld [vmem:[#allocation27_spill] sm:$0xff]  ;;  %v12738_v0 = vld [vmem:[#allocation28_spill] sm:$0xff] }
  0xfc   : > { %v792_v7 = vsel %vm12470_vm0, %v790_v43, %v791_v22  ;;  %v842_v57 = vsel %vm12470_vm0, 0.0, %v790_v43  ;;  %v3167_v38 = vsel %vm12441_vm6, %v9853_v21, %v3166_v18  ;;  %v3173_v47 = vsel %vm12442_vm5, %v9883_v31, %v3172_v20  ;;  %v10148_v43 = vpop.permute.xlu0 %7505 }
  0xfd   : > { %v1206_v56 = vcombine.high %v842_v57, %v842_v57  ;;  %v10105_v15 = vrot.slane %v842_v57, %v8157_v8  ;;  %v3168_v17 = vsel %vm12440_vm7, %v3121_v30, %v3167_v38  ;;  %v3174_v5 = vsel %vm12441_vm6, %v9887_v41, %v3173_v47 }
  0xfe   : > { %v1223_v40 = vcombine.high %v792_v7, %v792_v7  ;;  %v10111_v19 = vrot.slane %v792_v7, %v8157_v8  ;;  %v3175_v39 = vsel %vm12440_vm7, %v3125_v36, %v3174_v5  ;;  %v1967_v16 = vsel %vm1911_vm1, %v12733_v42, %v1882_v34  ;;  %v12739_v7 = vld [vmem:[#allocation46_spill] sm:$0xff] }
  0xff   : > { %v10115_v21 = vrot.slane %v1206_v56, %v8157_v8  ;;  %v1221_v31 = vcombine.high %v10105_v15, %v10105_v15  ;;  %v7614_v58 = vpack.i.bf16 %v3175_v39, %v3168_v17  ;;  %v1968_v53 = vsel %vm12480_vm2, %v12734_v37, %v1967_v16  ;;  %v12740_v17 = vld [vmem:[#allocation36_spill] sm:$0xff]  ;;  %v12741_v39 = vld [vmem:[#allocation35_spill] sm:$0xff] }
 0x100   : > { %v10124_v41 = vrot.slane %v1223_v40, %v8157_v8  ;;  %v10128_v50 = vcombine.high %v10111_v19, %v10111_v19  ;;  %v1969_v4 = vsel %vm1915_vm3, %v12735_v60, %v1968_v53  ;;  %v3217_v12 = vrot.slane %v10105_v15, %v8159_v9  ;;  %v10169_v40 = vpop.permute.xlu1 %7530  ;;  %v12743_v53 = vld [vmem:[#allocation49_spill] sm:$0xff] }
 0x101   : > { %v1222_v48 = vcombine.high %v10115_v21, %v10115_v21  ;;  %v3221_v30 = vrot.slane %v1221_v31, %v8159_v9  ;;  %7615 = vrot.lane.b32.xlu0 %v7614_v58, %s8010_s24  ;;  %v1970_v2 = vsel %vm1917_vm4, %v12736_v44, %v1969_v4  ;;  %v3225_v24 = vrot.slane %v10115_v21, %v8159_v9  ;;  %v12742_v58 = vld [vmem:[#allocation65_spill] sm:$0xff]  ;;  %s12451_s24 = smov 64  }
 0x102   : > { %v10142_v36 = vcombine.high %v10124_v41, %v10124_v41  ;;  %v1971_v32 = vsel %vm12442_vm5, %v12737_v26, %v1970_v2  ;;  %v3233_v34 = vrot.slane %v10111_v19, %v8159_v9  ;;  %v3237_v62 = vrot.slane %v10128_v50, %v8159_v9 }
 0x103   : > { %v3229_v6 = vrot.slane %v1222_v48, %v8159_v9  ;;  %v1972_v18 = vsel %vm12441_vm6, %v12738_v0, %v1971_v32  ;;  %v3246_v20 = vsel %vm1911_vm1, %v3221_v30, %v3217_v12  ;;  %v1850_v57 = vrot.slane %v12739_v7, %v8159_v9  ;;  %v12744_v12 = vld [vmem:[#allocation30_spill] sm:$0xff] }
 0x104   : > { %v3241_v38 = vrot.slane %v10124_v41, %v8159_v9  ;;  %v3245_v47 = vrot.slane %v10142_v36, %v8159_v9  ;;  %v3247_v56 = vsel %vm12480_vm2, %v3225_v24, %v3246_v20  ;;  %v1953_v5 = vsel %vm1911_vm1, %v12740_v17, %v1818_v1  ;;  %v12745_v1 = vld [vmem:[#allocation48_spill] sm:$0xff]  ;;  %v12746_v0 = vld [vmem:[#allocation66_spill] sm:$0xff]  ;;  %v12747_v20 = vld [vmem:[#allocation55_spill] sm:$0xff] }
 0x105   : > { %v10173_v42 = vsel %vm12440_vm7, %v12741_v39, %v1972_v18  ;;  %v3248_v16 = vsel %vm1915_vm3, %v3229_v6, %v3247_v56  ;;  %v1954_v37 = vsel %vm12480_vm2, %v12742_v58, %v1953_v5  ;;  %v1960_v60 = vsel %vm1911_vm1, %v12743_v53, %v1850_v57  ;;  %v10193_v56 = vpop.permute.xlu0 %7515  ;;  %v12748_v5 = vld [vmem:[#allocation31_spill] sm:$0xff]  ;;  %v12750_v53 = vld [vmem:[#allocation37_spill] sm:$0xff] }
 0x106   : > { %v3249_v4 = vsel %vm1917_vm4, %v3233_v34, %v3248_v16  ;;  %v1955_v44 = vsel %vm1915_vm3, %v12744_v12, %v1954_v37  ;;  %v1961_v2 = vsel %vm12480_vm2, %v12745_v1, %v1960_v60  ;;  %v3280_v26 = vrot.slane %v10105_v15, %v8166_v13  ;;  %v12749_v16 = vld [vmem:[#allocation29_spill] sm:$0xff]  ;;  %v12752_v1 = vld [vmem:[#allocation67_spill] sm:$0xff] }
 0x107   : > { %v3250_v32 = vsel %vm12442_vm5, %v3237_v62, %v3249_v4  ;;  %v1956_v18 = vsel %vm1917_vm4, %v12746_v0, %v1955_v44  ;;  %v1962_v7 = vsel %vm1915_vm3, %v12747_v20, %v1961_v2  ;;  %v3284_v57 = vrot.slane %v1221_v31, %v8166_v13  ;;  %v12751_v4 = vld [vmem:[#allocation60_spill] sm:$0xff]  ;;  %v12754_v20 = vld [vmem:[#allocation5_spill] sm:$0xff] }
 0x108   : > { %v3251_v17 = vsel %vm12441_vm6, %v3241_v38, %v3250_v32  ;;  %v1957_v39 = vsel %vm12442_vm5, %v12748_v5, %v1956_v18  ;;  %v1963_v15 = vsel %vm1917_vm4, %v12749_v16, %v1962_v7  ;;  %v3288_v58 = vrot.slane %v10115_v21, %v8166_v13  ;;  %v12753_v32 = vld [vmem:[#allocation61_spill] sm:$0xff]  ;;  %v10217_v18 = vpop.permute.xlu1 %7540 }
 0x109   : > { %v3252_v37 = vsel %vm12440_vm7, %v3245_v47, %v3251_v17  ;;  %v1958_v60 = vsel %vm12441_vm6, %v12750_v53, %v1957_v39  ;;  %v1964_v31 = vsel %vm12442_vm5, %v12751_v4, %v1963_v15  ;;  %v3292_v12 = vrot.slane %v1222_v48, %v8166_v13  ;;  %v12756_v53 = vld [vmem:[#allocation51_spill] sm:$0xff]  ;;  %v12757_v4 = vld [vmem:[#allocation10_spill] sm:$0xff] }
 0x10a   : > { %v7629_v44 = vpack.i.bf16 %v3252_v37, %v10173_v42  ;;  %v10211_v2 = vsel %vm12440_vm7, %v12752_v1, %v1958_v60  ;;  %v1965_v0 = vsel %vm12441_vm6, %v12753_v32, %v1964_v31  ;;  %v3296_v21 = vrot.slane %v10111_v19, %v8166_v13  ;;  %v10241_v37 = vpop.permute.xlu0 %7525 }
 0x10b   : > { %v10221_v7 = vsel %vm12440_vm7, %v12754_v20, %v1965_v0  ;;  %v3300_v48 = vrot.slane %v10128_v50, %v8166_v13  ;;  %v3304_v17 = vrot.slane %v10124_v41, %v8166_v13  ;;  %v3309_v5 = vsel %vm1911_vm1, %v3284_v57, %v3280_v26  ;;  %v12758_v0 = vld [vmem:[#allocation95_spill] sm:$0xff] }
 0x10c   : > { %7630 = vrot.lane.b32.xlu1 %v7629_v44, %s8007_s22  ;;  %v7624_v39 = vpack.i.bf16 %v10221_v7, %v10211_v2  ;;  %v3310_v19 = vsel %vm12480_vm2, %v3288_v58, %v3309_v5  ;;  %v859_v16 = vsel %vm12470_vm0, %v791_v22, 0.0  ;;  %v3344_v15 = vsel %vm1911_vm1, %v3225_v24, %v3221_v30  ;;  %v7546_v44 = vpop.permute.xlu1 %7545  ;;  %v12761_v5 = vld [vmem:[#allocation32_spill] sm:$0xff] }
 0x10d   : > { %v3308_v50 = vrot.slane %v10142_v36, %v8166_v13  ;;  %v3311_v41 = vsel %vm1915_vm3, %v3292_v12, %v3310_v19  ;;  %v1246_v26 = vrot.slane %v859_v16, %v8157_v8  ;;  %v3345_v57 = vsel %vm12480_vm2, %v3229_v6, %v3344_v15  ;;  %v12763_v19 = vld [vmem:[#allocation47_spill] sm:$0xff]  ;;  %v12765_v15 = vld [vmem:[#allocation38_spill] sm:$0xff] }
 0x10e   : > { %7625 = vrot.lane.b32.xlu0 %v7624_v39, %s8007_s22  ;;  %v3312_v58 = vsel %vm1917_vm4, %v3296_v21, %v3311_v41  ;;  %v7634_v22 = vpack.i.bf16 %v12756_v53, %v12755_v10  ;;  %v3346_v30 = vsel %vm1915_vm3, %v3233_v34, %v3345_v57  ;;  %v1658_v6 = vrot.slane %v12757_v4, %v8159_v9  ;;  %v12759_v21 = vld [vmem:[#allocation44_spill] sm:$0xff]  ;;  %v12766_v41 = vld [vmem:[#allocation97_spill] sm:$0xff]  ;;  %v12767_v57 = vld [vmem:[#allocation50_spill] sm:$0xff]  ;;  %s12454_s22 = smov 48  }
 0x10f   : > { %v3313_v24 = vsel %vm12442_vm5, %v3300_v48, %v3312_v58  ;;  %v3343_v36 = vrot.slane %v1246_v26, %v8159_v9  ;;  %v3347_v60 = vsel %vm1917_vm4, %v3237_v62, %v3346_v30  ;;  %v12760_v48 = vld [vmem:[#allocation58_spill] sm:$0xff]  ;;  %v7498_v10 = vunpack.i.h.bf16 %v10049_v49 }
 0x110   : > { %v3314_v31 = vsel %vm12441_vm6, %v3304_v17, %v3313_v24  ;;  %v3348_v12 = vsel %vm12442_vm5, %v3241_v38, %v3347_v60  ;;  %v1912_v34 = vsel %vm1911_vm1, %v12758_v0, %v1658_v6  ;;  %v7644_v39 = vpack.i.bf16 %v12761_v5, %v12760_v48  ;;  %v12762_v17 = vld [vmem:[#allocation96_spill] sm:$0xff]  ;;  %v12768_v53 = vld [vmem:[#allocation98_spill] sm:$0xff]  ;;  %v7551_v24 = vpop.permute.xlu1 %7550 }
 0x111   : > { %v3315_v1 = vsel %vm12440_vm7, %v3308_v50, %v3314_v31  ;;  %v3349_v32 = vsel %vm12441_vm6, %v3245_v47, %v3348_v12  ;;  %v1914_v38 = vsel %vm12480_vm2, %v12762_v17, %v1912_v34  ;;  %v10270_v47 = vpop.permute.xlu0 %7535  ;;  %v7497_v30 = vunpack.i.l.bf16 %v10049_v49  ;;  %v12769_v60 = vld [vmem:[#allocation52_spill] sm:$0xff]  ;;  %v12771_v17 = vld [vmem:[#allocation78_spill] sm:$0xff] }
 0x112   : > { %v7639_v20 = vpack.i.bf16 %v3315_v1, %v12759_v21  ;;  %7635 = vrot.lane.b32.xlu0 %v7634_v22, %s8008_s23  ;;  %v3350_v62 = vsel %vm12440_vm7, %v3343_v36, %v3349_v32  ;;  %v10268_v16 = vsel %vm1915_vm3, %v12763_v19, %v1914_v38  ;;  %v7513_v36 = vunpack.i.h.bf16 %v10074_v33  ;;  %v12770_v32 = vld [vmem:[#allocation53_spill] sm:$0xff] }
 0x113   : > { %12764 = vst [vmem:[#allocation75_spill] sm:$0xff] %v10268_v16  ;;  %v7649_v50 = vpack.i.bf16 %v3350_v62, %v12765_v15  ;;  %v1918_v26 = vsel %vm1917_vm4, %v12766_v41, %v10268_v16  ;;  %v7503_v6 = vunpack.i.h.bf16 %v10098_v54  ;;  %v7502_v31 = vunpack.i.l.bf16 %v10098_v54 }
 0x114   : > { %7640 = vrot.lane.b32.xlu1 %v7639_v20, %s8008_s23  ;;  %v1920_v58 = vsel %vm12442_vm5, %v12767_v57, %v1918_v26  ;;  %v7548_v12 = vunpack.i.h.bf16 %v7546_v44  ;;  %v7512_v1 = vunpack.i.l.bf16 %v10074_v33  ;;  %v3377_v0 = vsel %vm3375_vm8, %v12770_v32, %v7498_v10  ;;  %s8015_s23 = smov 40  }
 0x115   : > { %v1922_v22 = vsel %vm12441_vm6, %v12768_v53, %v1920_v58  ;;  %v7547_v49 = vunpack.i.l.bf16 %v7546_v44  ;;  %v7553_v34 = vunpack.i.h.bf16 %v7551_v24  ;;  %v7556_v21 = vpop.permute.xlu0 %7555  ;;  %v7552_v48 = vunpack.i.l.bf16 %v7551_v24  ;;  %v12772_v44 = vld [vmem:[#allocation42_spill] sm:$0xff] }
 0x116   : > { %7645 = vrot.lane.b32.xlu0 %v7644_v39, %s8011_s3  ;;  %v1924_v4 = vsel %vm12440_vm7, %v12769_v60, %v1922_v22  ;;  %v3386_v62 = vsel %vm3384_vm9, %v3377_v0, %v7548_v12  ;;  %v7523_v5 = vunpack.i.h.bf16 %v10121_v45  ;;  %v7508_v54 = vunpack.i.h.bf16 %v10148_v43 }
 0x117   : > { %v3376_v20 = vsel %vm3375_vm8, %v1924_v4, %v7497_v30  ;;  %v7507_v39 = vunpack.i.l.bf16 %v10148_v43  ;;  %v3379_v38 = vsel %vm3375_vm8, %v12771_v17, %v7503_v6  ;;  %v3378_v19 = vsel %vm3375_vm8, %v12772_v44, %v7502_v31  ;;  %v7561_v6 = vpop.permute.xlu1 %7560 }
 0x118   : > { %7650 = vrot.lane.b32.xlu1 %v7649_v50, %s8011_s3  ;;  %v3385_v33 = vsel %vm3384_vm9, %v3376_v20, %v7547_v49  ;;  %v7518_v15 = vunpack.i.h.bf16 %v10193_v56  ;;  %v7517_v50 = vunpack.i.l.bf16 %v10193_v56  ;;  %v3395_v26 = vsel %vm3393_vm10, %v3386_v62, %v7508_v54 }
 0x119   : > { %v3394_v41 = vsel %vm3393_vm10, %v3385_v33, %v7507_v39  ;;  %v3388_v57 = vsel %vm3384_vm9, %v3379_v38, %v7553_v34  ;;  %v3387_v43 = vsel %vm3384_vm9, %v3378_v19, %v7552_v48  ;;  %v7558_v58 = vunpack.i.h.bf16 %v7556_v21  ;;  %v7566_v24 = vpop.permute.xlu0 %7565 }
 0x11a   : > { %v7557_v10 = vunpack.i.l.bf16 %v7556_v21  ;;  %v7522_v53 = vunpack.i.l.bf16 %v10121_v45  ;;  %v7528_v22 = vunpack.i.h.bf16 %v10241_v37  ;;  %v7527_v30 = vunpack.i.l.bf16 %v10241_v37 }
 0x11b   : > { %v7538_v56 = vunpack.i.h.bf16 %v10270_v47  ;;  %v3397_v60 = vsel %vm3393_vm10, %v3388_v57, %v7513_v36  ;;  %v7537_v4 = vunpack.i.l.bf16 %v10270_v47  ;;  %v3403_v31 = vsel %vm3402_vm11, %v3394_v41, %v7517_v50  ;;  %v7920_v47 = vld [vmem:[%s12643_s20 + $0x8] sm:$0x3f]  }
 0x11c   : > { %v3404_v12 = vsel %vm3402_vm11, %v3395_v26, %v7518_v15  ;;  %v3396_v32 = vsel %vm3393_vm10, %v3387_v43, %v7512_v1  ;;  %v3412_v45 = vsel %vm3411_vm12, %v3403_v31, %v7557_v10  ;;  %v7568_v37 = vunpack.i.h.bf16 %v7566_v24 }
 0x11d   : > { %v3413_v0 = vsel %vm3411_vm12, %v3404_v12, %v7558_v58  ;;  %v7567_v49 = vunpack.i.l.bf16 %v7566_v24  ;;  %v7563_v34 = vunpack.i.h.bf16 %v7561_v6  ;;  %v7562_v36 = vunpack.i.l.bf16 %v7561_v6  ;;  %v7571_v58 = vpop.permute.xlu1 %7570 }
 0x11e   : > { %vm3438_vm7 = vcmask 195584   ;;  %vm3482_vm6 = vcmask 1045504   ;;  %v3405_v21 = vsel %vm3402_vm11, %v3396_v32, %v7522_v53  ;;  %v3421_v1 = vsel %vm3420_vm13, %v3412_v45, %v7527_v30 }
 0x11f   : > { %v3422_v20 = vsel %vm3420_vm13, %v3413_v0, %v7528_v22  ;;  %v3406_v62 = vsel %vm3402_vm11, %v3397_v60, %v7523_v5  ;;  %v8012_v48 = vmov 65535   ;;  %v3430_v39 = vsel %vm3429_vm14, %v3421_v1, %v7537_v4 }
 0x120   : > { %v3483_v54 = vsel %vm12467_vm15, 4294967295, %v8012_v48  ;;  %v3431_v33 = vsel %vm3429_vm14, %v3422_v20, %v7538_v56  ;;  %v3439_v38 = vsel %vm3438_vm7, %v3430_v39, %v7567_v49  ;;  %vm3468_vm5 = vcmask 220160  }
 0x121   : > { %v3484_v17 = vsel %vm3482_vm6, %v3483_v54, 0  ;;  %v3440_v44 = vsel %vm3438_vm7, %v3431_v33, %v7568_v37  ;;  %v3414_v50 = vsel %vm3411_vm12, %v3405_v21, %v7562_v36  ;;  %v3415_v5 = vsel %vm3411_vm12, %v3406_v62, %v7563_v34 }
 0x122   : > { %v3486_v19 = vand.u32 %v7920_v47, %v3484_v17  ;;  %v3447_v15 = vpack.c.bf16 %v3440_v44, %v3439_v38  ;;  %v7533_v41 = vunpack.i.h.bf16 %v10169_v40  ;;  %v7532_v26 = vunpack.i.l.bf16 %v10169_v40 }
 0x123   : > { %v12773_v10 = vmov 0.0   ;;  %v7543_v53 = vunpack.i.h.bf16 %v10217_v18  ;;  %v7542_v22 = vunpack.i.l.bf16 %v10217_v18  ;;  %v7573_v36 = vunpack.i.h.bf16 %v7571_v58 }
 0x124   : > { %7358 = vmatprep.subr.bf16.mxu0 %v3486_v19  ;;  %7360 = vmatprep.mubr.msk.bf16.mxu0 %vm3468_vm5, %v3447_v15  ;;  %v3423_v57 = vsel %vm3420_vm13, %v3414_v50, %v7532_v26  ;;  %v3424_v43 = vsel %vm3420_vm13, %v3415_v5, %v7533_v41  ;;  %vm12877_vm15 = vcmask 1045509  }
 0x125   : > { %7359 = vmatpush3.bf16.msra.mxu0 %v3486_v19  ;;  %v3432_v40 = vsel %vm3429_vm14, %v3423_v57, %v7542_v22  ;;  %v3433_v60 = vsel %vm3429_vm14, %v3424_v43, %v7543_v53  ;;  %v3381_v62 = vsel %vm3375_vm8, %v10211_v2, %v7573_v36  ;;  %v7572_v19 = vunpack.i.l.bf16 %v7571_v58  ;;  %v12774_v43 = vld [vmem:[#allocation79_spill] sm:$0xff] }
 0x126   : > { %7396 = vmatprep.subr.bf16.mxu0 %v12773_v10 }
 0x127   : > { %v3380_v53 = vsel %vm3375_vm8, %v12774_v43, %v7572_v19 }
 0x129   : > { %v7576_v30 = vpop.permute.xlu0 %7575  ;;  %v7581_v12 = vpop.permute.xlu1 %7580 }
 0x12a   : > { %v7578_v56 = vunpack.i.h.bf16 %v7576_v30  ;;  %v7577_v24 = vunpack.i.l.bf16 %v7576_v30  ;;  %v7583_v32 = vunpack.i.h.bf16 %v7581_v12  ;;  %v7582_v45 = vunpack.i.l.bf16 %v7581_v12 }
 0x12c   : > { %v3442_v4 = vsel %vm3438_vm7, %v3433_v60, %v7578_v56  ;;  %v3441_v6 = vsel %vm3438_vm7, %v3432_v40, %v7577_v24  ;;  %v3383_v49 = vsel %vm3375_vm8, %v10173_v42, %v7583_v32  ;;  %v3382_v34 = vsel %vm3375_vm8, %v10221_v7, %v7582_v45 }
 0x12d   : > { %v3448_v31 = vpack.c.bf16 %v3442_v4, %v3441_v6 }
 0x12f   : > { %7361 = vmatmul.mubr.msk.bf16.vlgmr.msra.gmra.mrb[0].mxu0 %vm3468_vm5, %v3448_v31 }
 0x136   : > { %v7591_v0 = vpop.permute.xlu1 %7590 }
 0x137   : > { %v7593_v37 = vunpack.i.h.bf16 %v7591_v0  ;;  %v7592_v18 = vunpack.i.l.bf16 %v7591_v0 }
 0x139   : > { %v3391_v47 = vsel %vm3384_vm9, %v3382_v34, %v7592_v18  ;;  %v3392_v21 = vsel %vm3384_vm9, %v3383_v49, %v7593_v37 }
 0x13b   : > { %v7586_v1 = vpop.permute.xlu0 %7585 }
 0x13c   : > { %v7588_v20 = vunpack.i.h.bf16 %v7586_v1  ;;  %v7587_v7 = vunpack.i.l.bf16 %v7586_v1 }
 0x13e   : > { %v3390_v54 = vsel %vm3384_vm9, %v3381_v62, %v7588_v20  ;;  %v3389_v30 = vsel %vm3384_vm9, %v3380_v53, %v7587_v7  ;;  %vm12450_vm9 = vcmask 1041408  }
 0x14b   : > { %v7601_v39 = vpop.permute.xlu1 %7600 }
 0x14c   : > { %v7603_v15 = vunpack.i.h.bf16 %v7601_v39  ;;  %v7602_v50 = vunpack.i.l.bf16 %v7601_v39 }
 0x14e   : > { %v3400_v56 = vsel %vm3393_vm10, %v3391_v47, %v7602_v50  ;;  %v3401_v24 = vsel %vm3393_vm10, %v3392_v21, %v7603_v15 }
 0x159   : > { %v7596_v33 = vpop.permute.xlu0 %7595 }
 0x15a   : > { %v7598_v5 = vunpack.i.h.bf16 %v7596_v33  ;;  %v7597_v41 = vunpack.i.l.bf16 %v7596_v33 }
 0x15c   : > { %v3398_v6 = vsel %vm3393_vm10, %v3389_v30, %v7597_v41  ;;  %v3399_v31 = vsel %vm3393_vm10, %v3390_v54, %v7598_v5  ;;  %vm12796_vm10 = vcmask 1045509  }
 0x160   : > { %v7611_v17 = vpop.permute.xlu1 %7610 }
 0x161   : > { %v7613_v2 = vunpack.i.h.bf16 %v7611_v17  ;;  %v7612_v22 = vunpack.i.l.bf16 %v7611_v17 }
 0x163   : > { %v3409_v0 = vsel %vm3402_vm11, %v3400_v56, %v7612_v22  ;;  %v3410_v37 = vsel %vm3402_vm11, %v3401_v24, %v7613_v2 }
 0x169   : > { %v7606_v38 = vpop.permute.xlu0 %7605 }
 0x16a   : > { %v7608_v40 = vunpack.i.h.bf16 %v7606_v38  ;;  %v7607_v58 = vunpack.i.l.bf16 %v7606_v38 }
 0x16c   : > { %v7621_v42 = vpop.permute.xlu1 %7620  ;;  %v3407_v20 = vsel %vm3402_vm11, %v3398_v6, %v7607_v58  ;;  %v3408_v62 = vsel %vm3402_vm11, %v3399_v31, %v7608_v40  ;;  %v10390_v6 = vld [vmem:[%s12775_s30] ss:$0 sm:$0xff]  ;;  %s12453_s30 = smov 56   ;;  %vm12798_vm11 = vcmask 1046534  }
 0x16d   : > { %v7623_v60 = vunpack.i.h.bf16 %v7621_v42  ;;  %v7622_v4 = vunpack.i.l.bf16 %v7621_v42 }
 0x16f   : > { %v3418_v54 = vsel %vm3411_vm12, %v3409_v0, %v7622_v4  ;;  %v3419_v39 = vsel %vm3411_vm12, %v3410_v37, %v7623_v60 }
 0x173   : > { %v7616_v44 = vpop.permute.xlu0 %7615 }
 0x174   : > { %v7618_v12 = vunpack.i.h.bf16 %v7616_v44  ;;  %v7617_v32 = vunpack.i.l.bf16 %v7616_v44 }
 0x176   : > { %v3416_v33 = vsel %vm3411_vm12, %v3407_v20, %v7617_v32  ;;  %v3417_v17 = vsel %vm3411_vm12, %v3408_v62, %v7618_v12  ;;  %vm12801_vm12 = vcmask 1047559  }
 0x17e   : > { %v7631_v26 = vpop.permute.xlu1 %7630 }
 0x17f   : > { %v7633_v34 = vunpack.i.h.bf16 %v7631_v26  ;;  %v7632_v36 = vunpack.i.l.bf16 %v7631_v26 }
 0x180   : > { %v7626_v57 = vpop.permute.xlu0 %7625 }
 0x181   : > { %v7628_v18 = vunpack.i.h.bf16 %v7626_v57  ;;  %v7627_v49 = vunpack.i.l.bf16 %v7626_v57  ;;  %v3427_v5 = vsel %vm3420_vm13, %v3418_v54, %v7632_v36  ;;  %v3428_v41 = vsel %vm3420_vm13, %v3419_v39, %v7633_v34 }
 0x183   : > { %v3425_v19 = vsel %vm3420_vm13, %v3416_v33, %v7627_v49  ;;  %v3426_v7 = vsel %vm3420_vm13, %v3417_v17, %v7628_v18  ;;  %v12776_v17 = vld [vmem:[#allocation7_spill] sm:$0xff]  ;;  %vm12802_vm13 = vmmov %vm12796_vm10 }
 0x184   : > { %v7636_v45 = vpop.permute.xlu0 %7635 }
 0x185   : > { %v7638_v21 = vunpack.i.h.bf16 %v7636_v45  ;;  %v7637_v1 = vunpack.i.l.bf16 %v7636_v45 }
 0x186   : > { %v7641_v47 = vpop.permute.xlu1 %7640 }
 0x187   : > { %v7643_v38 = vunpack.i.h.bf16 %v7641_v47  ;;  %v7642_v42 = vunpack.i.l.bf16 %v7641_v47  ;;  %v3434_v26 = vsel %vm3429_vm14, %v3425_v19, %v7637_v1  ;;  %v3435_v57 = vsel %vm3429_vm14, %v3426_v7, %v7638_v21  ;;  %v12777_v7 = vld [vmem:[#allocation8_spill] sm:$0xff] }
 0x188   : > { %v7646_v44 = vpop.permute.xlu0 %7645 }
 0x189   : > { %v7648_v15 = vunpack.i.h.bf16 %v7646_v44  ;;  %v7647_v50 = vunpack.i.l.bf16 %v7646_v44  ;;  %v3436_v56 = vsel %vm3429_vm14, %v3427_v5, %v7642_v42  ;;  %v3437_v24 = vsel %vm3429_vm14, %v3428_v41, %v7643_v38  ;;  %vm12805_vm14 = vmmov %vm12798_vm11 }
 0x18a   : > { %v7651_v43 = vpop.permute.xlu1 %7650  ;;  %v4021_v38 = vrot.slane %v12776_v17, 1 }
 0x18b   : > { %v7653_v53 = vunpack.i.h.bf16 %v7651_v43  ;;  %v7652_v2 = vunpack.i.l.bf16 %v7651_v43  ;;  %v3443_v22 = vsel %vm3438_vm7, %v3434_v26, %v7647_v50  ;;  %v3444_v30 = vsel %vm3438_vm7, %v3435_v57, %v7648_v15 }
 0x18c   : > { %v3449_v40 = vpack.c.bf16 %v3444_v30, %v3443_v22  ;;  %v4022_v15 = vrot.slane %v12777_v7, 1 }
 0x18d   : > { %v3445_v58 = vsel %vm3438_vm7, %v3436_v56, %v7652_v2  ;;  %v3446_v60 = vsel %vm3438_vm7, %v3437_v24, %v7653_v53 }
 0x18e   : > { %v3450_v4 = vpack.c.bf16 %v3446_v60, %v3445_v58  ;;  %7364 = vmatprep.mubr.msk.bf16.mxu0 %vm3468_vm5, %v3449_v40 }
 0x190   : > { %7365 = vmatmul.mubr.msk.bf16.gmra.mrb[4].mxu0 %vm3468_vm5, %v3450_v4  ;;  %vm4020_vm5 = vcmask 1046528  }
 0x202   : > { %v7362_v31 = vpop.f32.mrb[0].mxu0 }
 0x203   : > { %v3531_v12 = vadd.f32 %v7362_v31, %v10390_v6  ;;  %v3522_v32 = vpop.f32.mrb[1].mxu0 }
 0x204   : > { %v3523_v45 = vadd.f32 %v10390_v6, %v3522_v32  ;;  %v7363_v0 = vpop.f32.mrb[2].mxu0 }
 0x205   : > { %v3555_v37 = vmul.f32 0.2, %v3531_v12  ;;  %v3534_v18 = vadd.f32 %v7363_v0, %v10390_v6  ;;  %v3525_v49 = vpop.f32.mrb[3].mxu0 }
 0x206   : > { %v3553_v34 = vmul.f32 0.2, %v3523_v45  ;;  %v3526_v36 = vadd.f32 %v10390_v6, %v3525_v49 }
 0x207   : > { %v3563_v47 = vmax.f32 %v3531_v12, %v3555_v37  ;;  %v3556_v21 = vmul.f32 0.2, %v3534_v18 }
 0x208   : > { %v3561_v1 = vmax.f32 %v3523_v45, %v3553_v34  ;;  %v3554_v20 = vmul.f32 0.2, %v3526_v36 }
 0x209   : > { %v3976_v62 = vrot.slane %v3563_v47, 7  ;;  %v3564_v54 = vmax.f32 %v3534_v18, %v3556_v21  ;;  %v10432_v47 = vsel %vm4020_vm5, %v4021_v38, %v4022_v15 }
 0x20a   : > { %v3974_v39 = vrot.slane %v3561_v1, 7  ;;  %v3562_v33 = vmax.f32 %v3526_v36, %v3554_v20  ;;  %v4045_v1 = vrot.slane %v12776_v17, 2 }
 0x20b   : > { %v10398_v42 = vsel %vm12470_vm0, 0.0, %v3976_v62  ;;  %v4000_v44 = vsel %vm12470_vm0, %v3976_v62, 0.0  ;;  %v3977_v19 = vrot.slane %v3564_v54, 7 }
 0x20c   : > { %v4031_v50 = vrot.slane %v4000_v44, 1  ;;  %v4055_v5 = vrot.slane %v4000_v44, 2  ;;  %v10403_v41 = vsel %vm12470_vm0, 0.0, %v3974_v39  ;;  %v3998_v26 = vsel %vm12470_vm0, %v3974_v39, 0.0 }
 0x20d   : > { %v4024_v57 = vrot.slane %v10403_v41, 1  ;;  %v4025_v43 = vrot.slane %v3998_v26, 1  ;;  %v4048_v53 = vrot.slane %v10403_v41, 2  ;;  %v4049_v2 = vrot.slane %v3998_v26, 2 }
 0x20e   : > { %v10409_v22 = vsel %vm12470_vm0, 0.0, %v3977_v19  ;;  %v4001_v30 = vsel %vm12470_vm0, %v3977_v19, 0.0  ;;  %v3975_v56 = vrot.slane %v3562_v33, 7  ;;  %v4030_v24 = vrot.slane %v10398_v42, 1 }
 0x20f   : > { %v4034_v40 = vrot.slane %v4001_v30, 1  ;;  %v4058_v58 = vrot.slane %v4001_v30, 2  ;;  %v7654_v60 = vpack.i.bf16 %v10409_v22, %v10398_v42  ;;  %v4033_v4 = vrot.slane %v10409_v22, 1 }
 0x210   : > { %v10417_v31 = vsel %vm12470_vm0, 0.0, %v3975_v56  ;;  %v3999_v12 = vsel %vm12470_vm0, %v3975_v56, 0.0  ;;  %v4032_v32 = vsel %vm4020_vm5, %v4030_v24, %v4031_v50  ;;  %v4054_v45 = vrot.slane %v10398_v42, 2 }
 0x211   : > { %v4028_v0 = vrot.slane %v3999_v12, 1  ;;  %v4052_v37 = vrot.slane %v3999_v12, 2  ;;  %7655 = vrot.lane.b32.xlu1 %v7654_v60, %s8011_s3  ;;  %v7659_v18 = vpack.i.bf16 %v10417_v31, %v10403_v41  ;;  %v10426_v49 = vsel %vm4020_vm5, %v4033_v4, %v4034_v40  ;;  %v12779_v40 = vld [vmem:[#allocation76_spill] sm:$0xff] }
 0x212   : > { %v7679_v34 = vpack.i.bf16 %v10426_v49, %v4032_v32  ;;  %v4057_v36 = vrot.slane %v10409_v22, 2  ;;  %v4027_v21 = vrot.slane %v10417_v31, 1  ;;  %v4051_v20 = vrot.slane %v10417_v31, 2  ;;  %v12780_v60 = vld [vmem:[#allocation80_spill] sm:$0xff] }
 0x213   : > { %7660 = vrot.lane.b32.xlu0 %v7659_v18, %s8011_s3  ;;  %v7664_v62 = vpack.i.bf16 %v10398_v42, %v10417_v31  ;;  %v4056_v54 = vsel %vm3482_vm6, %v4054_v45, %v4055_v5  ;;  %v4046_v33 = vrot.slane %v12777_v7, 2  ;;  %v4026_v38 = vsel %vm4020_vm5, %v4024_v57, %v4025_v43 }
 0x214   : > { %v10441_v39 = vsel %vm3482_vm6, %v4057_v36, %v4058_v58  ;;  %v4029_v44 = vsel %vm4020_vm5, %v4027_v21, %v4028_v0  ;;  %v10448_v19 = vsel %vm3482_vm6, %v4048_v53, %v4049_v2  ;;  %v10451_v15 = vsel %vm3482_vm6, %v4051_v20, %v4052_v37  ;;  %v697_v2 = vld [vmem:[%s12778_s25] sm:$0x3]  ;;  %v12782_v0 = vld [vmem:[#allocation77_spill] sm:$0xff] }
 0x215   : > { %7680 = vrot.lane.b32.xlu1 %v7679_v34, %s12484_s5  ;;  %v10453_v50 = vpack.i.bf16 %v4032_v32, %v4029_v44  ;;  %v10456_v5 = vpack.i.bf16 %v4056_v54, %v10451_v15  ;;  %v7699_v26 = vpack.i.bf16 %v4029_v44, %v4026_v38  ;;  %v7704_v7 = vpack.i.bf16 %v10451_v15, %v10448_v19  ;;  %v12781_v32 = vld [vmem:[#allocation84_spill] sm:$0xff]  ;;  %v12783_v37 = vld [vmem:[#allocation83_spill] sm:$0xff]  ;;  %v12784_v34 = vld [vmem:[#allocation81_spill] sm:$0xff] }
 0x216   : > { %v7684_v57 = vpack.i.bf16 %v10441_v39, %v4056_v54  ;;  %v7669_v43 = vpack.i.bf16 %v4026_v38, %v10432_v47  ;;  %v10465_v53 = vsel %vm3482_vm6, %v4045_v1, %v4046_v33  ;;  %v3896_v30 = vsel %vm12470_vm0, 4294967295, %v8012_v48  ;;  %v12785_v21 = vld [vmem:[#allocation82_spill] sm:$0xff]  ;;  %v12786_v20 = vld [vmem:[#allocation85_spill] sm:$0xff]  ;;  %v12787_v54 = vld [vmem:[#allocation88_spill] sm:$0xff] }
 0x217   : > { %7665 = vrot.lane.b32.xlu0 %v7664_v62, %s12454_s22  ;;  %v7674_v56 = vpack.i.bf16 %v10448_v19, %v10465_v53  ;;  %v3897_v24 = vsel %vm12450_vm9, %v3896_v30, 0  ;;  %v3569_v58 = vpack.c.bf16 %v12779_v40, %v12779_v40  ;;  %v3571_v4 = vpack.c.bf16 %v12780_v60, %v12780_v60  ;;  %v12788_v38 = vld [vmem:[#allocation87_spill] sm:$0xff]  ;;  %v12789_v19 = vld [vmem:[#allocation89_spill] sm:$0xff]  ;;  %v12794_v60 = vld [vmem:[#allocation90_spill] sm:$0xff] }
 0x218   : > { %v3899_v12 = vand.u32 %v3897_v24, %v697_v2  ;;  %v3572_v45 = vpack.c.bf16 %v12781_v32, %v12781_v32  ;;  %v3573_v48 = vpack.c.bf16 %v12782_v0, %v12782_v0  ;;  %v3574_v18 = vpack.c.bf16 %v12783_v37, %v12783_v37  ;;  %v12791_v2 = vld [vmem:[#allocation86_spill] sm:$0xff]  ;;  %v12793_v24 = vld [vmem:[#allocation91_spill] sm:$0xff] }
 0x219   : > { %7685 = vrot.lane.b32.xlu1 %v7684_v57, %s8015_s23  ;;  %v3570_v36 = vpack.c.bf16 %v12784_v34, %v12784_v34  ;;  %v3575_v1 = vpack.c.bf16 %v12785_v21, %v12785_v21  ;;  %v3577_v62 = vpack.c.bf16 %v12786_v20, %v12786_v20  ;;  %v3579_v33 = vpack.c.bf16 %v12787_v54, %v12787_v54  ;;  %v12790_v57 = vld [vmem:[#allocation92_spill] sm:$0xff]  ;;  %v12795_v34 = vld [vmem:[#allocation93_spill] sm:$0xff] }
 0x21a   : > { %7368 = vmatprep.subr.bf16.mxu1 %v3899_v12  ;;  %v3576_v44 = vpack.c.bf16 %v12788_v38, %v12788_v38  ;;  %v3578_v15 = vpack.c.bf16 %v12789_v19, %v12789_v19  ;;  %v3581_v30 = vpack.c.bf16 %v12791_v2, %v12791_v2  ;;  %v3582_v40 = vpack.c.bf16 %v12793_v24, %v12793_v24 }
 0x21b   : > { %7670 = vrot.lane.b32.xlu0 %v7669_v43, %s8016_s1  ;;  %v3580_v43 = vpack.c.bf16 %v12790_v57, %v12790_v57  ;;  %7369 = vmatpush3.bf16.msra.mxu1 %v3899_v12  ;;  %v3583_v32 = vpack.c.bf16 %v12794_v60, %v12794_v60  ;;  %v3703_v0 = vunpack.c.l.b16 %v3569_v58  ;;  %v3705_v37 = vunpack.c.l.b16 %v3571_v4 }
 0x21c   : > { %v3584_v21 = vpack.c.bf16 %v12795_v34, %v12795_v34  ;;  %v3706_v20 = vunpack.c.l.b16 %v3572_v45  ;;  %v3707_v54 = vunpack.c.l.b16 %v3573_v48  ;;  %v3708_v38 = vunpack.c.l.b16 %v3574_v18 }
 0x21d   : > { %7690 = vrot.lane.b32.xlu1 %v10453_v50, %s8016_s1  ;;  %v3704_v19 = vunpack.c.l.b16 %v3570_v36  ;;  %v3709_v12 = vunpack.c.l.b16 %v3575_v1  ;;  %v3711_v57 = vunpack.c.l.b16 %v3577_v62  ;;  %v3713_v2 = vunpack.c.l.b16 %v3579_v33 }
 0x21e   : > { %v3710_v24 = vunpack.c.l.b16 %v3576_v44  ;;  %v3712_v16 = vunpack.c.l.b16 %v3578_v15  ;;  %v3714_v13 = vunpack.c.l.b16 %v3580_v43  ;;  %v3715_v60 = vunpack.c.l.b16 %v3581_v30 }
 0x21f   : > { %7675 = vrot.lane.b32.xlu0 %v7674_v56, %s8017_s28  ;;  %v10508_v56 = vld [vmem:[%s12792_s4] sm:$0xff]   ;;  %v3716_v58 = vunpack.c.l.b16 %v3582_v40  ;;  %v3767_v4 = vrot.slane %v3703_v0, 1  ;;  %v3769_v9 = vrot.slane %v3705_v37, 7  ;;  %v3771_v8 = vrot.slane %v3706_v20, 6 }
 0x220   : > { %7378 = vmatprep.subr.bf16.mxu1 %v10508_v56  ;;  %v3717_v34 = vunpack.c.l.b16 %v3583_v32  ;;  %v3718_v45 = vunpack.c.l.b16 %v3584_v21  ;;  %v3773_v48 = vrot.slane %v3707_v54, 5  ;;  %v3775_v18 = vrot.slane %v3708_v38, 4  ;;  %v12797_v20 = vld [vmem:[#allocation11_spill] sm:$0xff] }
 0x221   : > { %7695 = vrot.lane.b32.xlu1 %v10456_v5, %s8017_s28  ;;  %v3781_v36 = vrot.slane %v3711_v57, 1  ;;  %v3783_v1 = vrot.slane %v3713_v2, 7  ;;  %v3785_v62 = vrot.slane %v3714_v13, 6  ;;  %v3777_v44 = vrot.slane %v3709_v12, 3  ;;  %v12799_v38 = vld [vmem:[#allocation15_spill] sm:$0xff]  ;;  %v12800_v12 = vld [vmem:[#allocation14_spill] sm:$0xff] }
 0x222   : > { %v3787_v15 = vrot.slane %v3715_v60, 5  ;;  %v3779_v30 = vrot.slane %v3710_v24, 2  ;;  %v3789_v32 = vrot.slane %v3716_v58, 4  ;;  %v3793_v21 = vrot.slane %v3718_v45, 2  ;;  %v12803_v24 = vld [vmem:[#allocation22_spill] sm:$0xff]  ;;  %v12804_v58 = vld [vmem:[#allocation12_spill] sm:$0xff] }
 0x223   : > { %7700 = vrot.lane.b32.xlu0 %v7699_v26, %s12484_s5  ;;  %v3768_v26 = vsel %vm1911_vm1, %v3704_v19, %v3767_v4  ;;  %v3782_v40 = vsel %vm1911_vm1, %v3712_v16, %v3781_v36  ;;  %v3586_v19 = vpack.c.bf16 %v12799_v38, %v12799_v38  ;;  %v3587_v57 = vpack.c.bf16 %v12800_v12, %v12800_v12  ;;  %v12806_v45 = vld [vmem:[#allocation18_spill] sm:$0xff]  ;;  %v12808_v36 = vld [vmem:[#allocation23_spill] sm:$0xff] }
 0x224   : > { %v3770_v33 = vsel %vm12480_vm2, %v3769_v9, %v3768_v26  ;;  %v3784_v37 = vsel %vm12480_vm2, %v3783_v1, %v3782_v40  ;;  %v3588_v60 = vpack.c.bf16 %v12803_v24, %v12803_v24  ;;  %v3589_v4 = vpack.c.bf16 %v12804_v58, %v12804_v58  ;;  %v12817_v12 = vld [vmem:[#allocation26_spill] sm:$0xff] }
 0x225   : > { %v3772_v43 = vsel %vm1915_vm3, %v3771_v8, %v3770_v33  ;;  %v3786_v9 = vsel %vm1915_vm3, %v3785_v62, %v3784_v37  ;;  %v3585_v8 = vpack.c.bf16 %v12797_v20, %v12797_v20  ;;  %v3592_v1 = vpack.c.bf16 %v12808_v36, %v12808_v36  ;;  %v12810_v33 = vld [vmem:[#allocation13_spill] sm:$0xff] }
 0x226   : > { %v3774_v0 = vsel %vm1917_vm4, %v3773_v48, %v3772_v43  ;;  %v3788_v54 = vsel %vm1917_vm4, %v3787_v15, %v3786_v9  ;;  %v3590_v48 = vpack.c.bf16 %v12806_v45, %v12806_v45  ;;  %v12811_v15 = vld [vmem:[#allocation19_spill] sm:$0xff]  ;;  %v12815_v9 = vld [vmem:[#allocation24_spill] sm:$0xff]  ;;  %v3722_v38 = vunpack.c.l.b16 %v3588_v60 }
 0x227   : > { %7705 = vrot.lane.b32.xlu0 %v7704_v7, %s8015_s23  ;;  %v3791_v7 = vrot.slane %v3717_v34, 3  ;;  %v3776_v13 = vsel %vm12796_vm10, %v3775_v18, %v3774_v0  ;;  %v3790_v2 = vsel %vm12802_vm13, %v3789_v32, %v3788_v54  ;;  %v12807_v18 = vld [vmem:[#allocation16_spill] sm:$0xff]  ;;  %vm12809_vm10 = vmmov %vm12801_vm12  ;;  %v3595_v43 = vpack.c.bf16 %v12811_v15, %v12811_v15 }
 0x228   : > { %v3778_v16 = vsel %vm12798_vm11, %v3777_v44, %v3776_v13  ;;  %v3591_v26 = vpack.c.bf16 %v12807_v18, %v12807_v18  ;;  %v3593_v44 = vpack.c.bf16 %v12810_v33, %v12810_v33  ;;  %v12813_v0 = vld [vmem:[#allocation20_spill] sm:$0xff]  ;;  %v3721_v54 = vunpack.c.l.b16 %v3587_v57  ;;  %vm12818_vm11 = vmmov %vm12802_vm13 }
 0x229   : > { %v3792_v34 = vsel %vm12805_vm14, %v3791_v7, %v3790_v2  ;;  %v3594_v37 = vpack.c.bf16 %v12813_v0, %v12813_v0  ;;  %v12814_v7 = vld [vmem:[#allocation17_spill] sm:$0xff]  ;;  %v3720_v2 = vunpack.c.l.b16 %v3586_v19  ;;  %v3723_v24 = vunpack.c.l.b16 %v3589_v4  ;;  %vm12820_vm13 = vmmov %vm12818_vm11 }
 0x22a   : > { %v3794_v62 = vsel %vm12809_vm10, %v3793_v21, %v3792_v34  ;;  %v3597_v13 = vpack.c.bf16 %v12814_v7, %v12814_v7  ;;  %v12816_v21 = vld [vmem:[#allocation21_spill] sm:$0xff]  ;;  %v3724_v58 = vunpack.c.l.b16 %v3590_v48  ;;  %v3725_v34 = vunpack.c.l.b16 %v3591_v26 }
 0x22b   : > { %7710 = vrot.lane.b32.xlu0 %v10453_v50, %s12453_s30  ;;  %v3780_v50 = vsel %vm12801_vm12, %v3779_v30, %v3778_v16  ;;  %v12812_v30 = vld [vmem:[#allocation25_spill] sm:$0xff]  ;;  %v3599_v20 = vpack.c.bf16 %v12816_v21, %v12816_v21  ;;  %v3719_v16 = vunpack.c.l.b16 %v3585_v8  ;;  %v3727_v45 = vunpack.c.l.b16 %v3593_v44  ;;  %vm12819_vm12 = vmmov %vm12805_vm14 }
 0x22c   : > { %v3596_v40 = vpack.c.bf16 %v12812_v30, %v12812_v30  ;;  %v3879_v32 = vpack.c.b16 %v3794_v62, %v3780_v50  ;;  %v3600_v50 = vpack.c.bf16 %v12817_v12, %v12817_v12  ;;  %v3729_v18 = vunpack.c.l.b16 %v3595_v43  ;;  %vm12821_vm14 = vmmov %vm12809_vm10 }
 0x22d   : > { %v3726_v62 = vunpack.c.l.b16 %v3592_v1  ;;  %v3728_v33 = vunpack.c.l.b16 %v3594_v37  ;;  %v3731_v15 = vunpack.c.l.b16 %v3597_v13  ;;  %v3733_v0 = vunpack.c.l.b16 %v3599_v20  ;;  %vm12822_vm10 = vmmov %vm12819_vm12 }
 0x22e   : > { %7370 = vmatprep.mubr.msk.bf16.mxu1 %vm3375_vm8, %v3879_v32  ;;  %v3730_v36 = vunpack.c.l.b16 %v3596_v40  ;;  %v3795_v8 = vrot.slane %v3719_v16, 1  ;;  %v3797_v57 = vrot.slane %v3721_v54, 7  ;;  %v3799_v60 = vrot.slane %v3722_v38, 6  ;;  %vm12823_vm9 = vmmov %vm12821_vm14 }
 0x22f   : > { %7715 = vrot.lane.b32.xlu0 %v10456_v5, %s12451_s24  ;;  %v3598_v5 = vpack.c.bf16 %v12815_v9, %v12815_v9  ;;  %v3734_v7 = vunpack.c.l.b16 %v3600_v50  ;;  %v3801_v32 = vrot.slane %v3723_v24, 5  ;;  %v3803_v9 = vrot.slane %v3724_v58, 4 }
 0x230   : > { %v3809_v21 = vrot.slane %v3727_v45, 1  ;;  %v3796_v19 = vsel %vm1911_vm1, %v3720_v2, %v3795_v8  ;;  %v3811_v4 = vrot.slane %v3729_v18, 7  ;;  %v3813_v48 = vrot.slane %v3730_v36, 6 }
 0x231   : > { %v3732_v30 = vunpack.c.l.b16 %v3598_v5  ;;  %v3815_v26 = vrot.slane %v3731_v15, 5  ;;  %v3798_v44 = vsel %vm12480_vm2, %v3797_v57, %v3796_v19  ;;  %v3805_v43 = vrot.slane %v3725_v34, 3 }
 0x232   : > { %v3810_v1 = vsel %vm1911_vm1, %v3728_v33, %v3809_v21  ;;  %v3800_v37 = vsel %vm1915_vm3, %v3799_v60, %v3798_v44  ;;  %v3807_v13 = vrot.slane %v3726_v62, 2  ;;  %v3819_v20 = vrot.slane %v3733_v0, 3 }
 0x233   : > { %v3817_v40 = vrot.slane %v3732_v30, 4  ;;  %v3812_v5 = vsel %vm12480_vm2, %v3811_v4, %v3810_v1  ;;  %v3802_v16 = vsel %vm1917_vm4, %v3801_v32, %v3800_v37  ;;  %v3821_v38 = vrot.slane %v3734_v7, 2 }
 0x234   : > { %v3814_v54 = vsel %vm1915_vm3, %v3813_v48, %v3812_v5  ;;  %v3804_v12 = vsel %vm12818_vm11, %v3803_v9, %v3802_v16  ;;  %v3601_v36 = vpack.c.bf16 %v9767_v55, %v9767_v55  ;;  %v3603_v62 = vpack.c.bf16 %v9774_v51, %v9774_v51 }
 0x235   : > { %v3816_v50 = vsel %vm1917_vm4, %v3815_v26, %v3814_v54  ;;  %v3806_v2 = vsel %vm12819_vm12, %v3805_v43, %v3804_v12  ;;  %v3602_v33 = vpack.c.bf16 %v9783_v61, %v9783_v61  ;;  %v3609_v15 = vpack.c.bf16 %v9797_v3, %v9797_v3 }
 0x236   : > { %v3818_v24 = vsel %vm12820_vm13, %v3817_v40, %v3816_v50  ;;  %v3808_v58 = vsel %vm12821_vm14, %v3807_v13, %v3806_v2  ;;  %v3611_v30 = vpack.c.bf16 %v9804_v52, %v9804_v52  ;;  %v3604_v8 = vpack.c.bf16 %v9790_v27, %v9790_v27  ;;  %vm12837_vm13 = vmmov %vm12823_vm9 }
 0x237   : > { %v3820_v34 = vsel %vm12822_vm10, %v3819_v20, %v3818_v24  ;;  %v3610_v55 = vpack.c.bf16 %v9812_v59, %v9812_v59  ;;  %v3612_v51 = vpack.c.bf16 %v9826_v46, %v9826_v46  ;;  %v3613_v3 = vpack.c.bf16 %v9807_v25, %v9807_v25 }
 0x238   : > { %v3822_v45 = vsel %vm12823_vm9, %v3821_v38, %v3820_v34  ;;  %v10609_v52 = vunpack.c.l.b16 %v3601_v36  ;;  %v10611_v60 = vunpack.c.l.b16 %v3603_v62  ;;  %v3607_v59 = vpack.c.bf16 %v9786_v14, %v9786_v14 }
 0x239   : > { %v3880_v18 = vpack.c.b16 %v3822_v45, %v3808_v58  ;;  %v3614_v46 = vpack.c.bf16 %v9833_v35, %v9833_v35  ;;  %v3608_v21 = vpack.c.bf16 %v9801_v11, %v9801_v11  ;;  %v10623_v19 = vunpack.c.l.b16 %v3602_v33  ;;  %v7924_v33 = vld [vmem:[%s12792_s4 + $0x18] sm:$0xff]  }
 0x23a   : > { %v3615_v14 = vpack.c.bf16 %v9829_v63, %v9829_v63  ;;  %v10631_v35 = vunpack.c.l.b16 %v3604_v8  ;;  %v3616_v43 = vpack.c.bf16 %v9857_v29, %v9857_v29  ;;  %v10639_v37 = vunpack.c.l.b16 %v3607_v59  ;;  %v7923_v63 = vld [vmem:[%s12792_s4 + $0x10] sm:$0xff]  }
 0x23b   : > { %7371 = vmatmul.mubr.msk.bf16.vlgmr.msra.gmra.mrb[0].mxu1 %vm3375_vm8, %v3880_v18  ;;  %v10644_v20 = vunpack.c.l.b16 %v3608_v21  ;;  %v10646_v16 = vunpack.c.l.b16 %v3609_v15  ;;  %v10648_v38 = vunpack.c.l.b16 %v3610_v55  ;;  %v10650_v12 = vunpack.c.l.b16 %v3611_v30 }
 0x23c   : > { %7379 = vmatpush3.bf16.msra.mxu1 %v10508_v56  ;;  %v3605_v56 = vpack.c.bf16 %v9777_v28, %v9777_v28  ;;  %v3606_v28 = vpack.c.bf16 %v9794_v23, %v9794_v23  ;;  %v7922_v23 = vld [vmem:[%s12792_s4 + $0x8] sm:$0xff]   ;;  %v10652_v50 = vunpack.c.l.b16 %v3612_v51  ;;  %v10655_v34 = vunpack.c.l.b16 %v3613_v3 }
 0x23d   : > { %7380 = vmatprep.subr.bf16.mxu1 %v7922_v23  ;;  %v10661_v36 = vunpack.c.l.b16 %v3614_v46  ;;  %v10663_v62 = vunpack.c.l.b16 %v3615_v14  ;;  %v3823_v8 = vrot.slane %v10609_v52, 1  ;;  %v3825_v14 = vrot.slane %v10611_v60, 7 }
 0x23e   : > { %v10635_v11 = vunpack.c.l.b16 %v3605_v56 }
 0x240   : > { %7381 = vmatpush3.bf16.msra.mxu1 %v7922_v23 }
 0x241   : > { %7382 = vmatprep.subr.bf16.mxu1 %v7923_v63 }
 0x244   : > { %7383 = vmatpush3.bf16.msra.mxu1 %v7923_v63 }
 0x245   : > { %7384 = vmatprep.subr.bf16.mxu1 %v7924_v33 }
 0x248   : > { %7385 = vmatpush3.bf16.msra.mxu1 %v7924_v33 }
 0x263   : > { %v7366_v0 = vpop.f32.mrb[4].mxu0 }
 0x264   : > { %v3547_v61 = vadd.f32 %v7366_v0, %v10390_v6  ;;  %v3538_v57 = vpop.f32.mrb[5].mxu0 }
 0x265   : > { %v3539_v27 = vadd.f32 %v10390_v6, %v3538_v57  ;;  %v7367_v7 = vpop.f32.mrb[6].mxu0 }
 0x266   : > { %v3559_v32 = vmul.f32 0.2, %v3547_v61  ;;  %v3550_v9 = vadd.f32 %v7367_v7, %v10390_v6  ;;  %v3541_v25 = vpop.f32.mrb[7].mxu0 }
 0x267   : > { %v3557_v4 = vmul.f32 0.2, %v3539_v27  ;;  %v3542_v48 = vadd.f32 %v10390_v6, %v3541_v25  ;;  %v10637_v6 = vunpack.c.l.b16 %v3606_v28 }
 0x268   : > { %v3567_v26 = vmax.f32 %v3547_v61, %v3559_v32  ;;  %v3560_v44 = vmul.f32 0.2, %v3550_v9 }
 0x269   : > { %v3565_v1 = vmax.f32 %v3539_v27, %v3557_v4  ;;  %v3558_v40 = vmul.f32 0.2, %v3542_v48 }
 0x26a   : > { %v3980_v13 = vrot.slane %v3567_v26, 7  ;;  %v3568_v5 = vmax.f32 %v3550_v9, %v3560_v44 }
 0x26b   : > { %v3978_v54 = vrot.slane %v3565_v1, 7  ;;  %v3566_v58 = vmax.f32 %v3542_v48, %v3558_v40 }
 0x26c   : > { %v4004_v2 = vsel %vm12470_vm0, %v3980_v13, 0.0  ;;  %v3981_v24 = vrot.slane %v3568_v5, 7  ;;  %v10669_v15 = vsel %vm12470_vm0, 0.0, %v3980_v13 }
 0x26d   : > { %v10658_v45 = vsel %vm12470_vm0, 0.0, %v3978_v54  ;;  %v4002_v18 = vsel %vm12470_vm0, %v3978_v54, 0.0  ;;  %v4043_v56 = vrot.slane %v4004_v2, 1  ;;  %v3979_v27 = vrot.slane %v3566_v58, 7 }
 0x26e   : > { %v3997_v30 = vsel %vm12470_vm0, 0.0, %v3981_v24  ;;  %v4005_v0 = vsel %vm12470_vm0, %v3981_v24, 0.0  ;;  %v4037_v55 = vrot.slane %v4002_v18, 1  ;;  %v7719_v7 = vpack.i.bf16 %v10658_v45, %v10409_v22 }
 0x26f   : > { %v4071_v51 = vrot.slane %v3997_v30, 1  ;;  %v4072_v61 = vrot.slane %v4005_v0, 1  ;;  %v4074_v57 = vrot.slane %v3997_v30, 2  ;;  %v4075_v3 = vrot.slane %v4005_v0, 2 }
 0x270   : > { %v4061_v28 = vrot.slane %v4002_v18, 2  ;;  %v4036_v59 = vrot.slane %v10658_v45, 1  ;;  %v4060_v46 = vrot.slane %v10658_v45, 2  ;;  %v4042_v32 = vrot.slane %v10669_v15, 1  ;;  %7720 = vrot.lane.b32.xlu1 %v7719_v7, %s12454_s22 }
 0x271   : > { %v4067_v52 = vrot.slane %v4004_v2, 2  ;;  %v10680_v9 = vsel %vm12470_vm0, 0.0, %v3979_v27  ;;  %v4003_v25 = vsel %vm12470_vm0, %v3979_v27, 0.0  ;;  %v4066_v21 = vrot.slane %v10669_v15, 2 }
 0x272   : > { %v4040_v4 = vrot.slane %v4003_v25, 1  ;;  %v7734_v48 = vpack.i.bf16 %v10680_v9, %v10658_v45  ;;  %v10688_v23 = vsel %vm4020_vm5, %v4071_v51, %v4072_v61  ;;  %v4064_v26 = vrot.slane %v4003_v25, 2 }
 0x273   : > { %v7724_v44 = vpack.i.bf16 %v3997_v30, %v10669_v15  ;;  %v4039_v1 = vrot.slane %v10680_v9, 1  ;;  %v10694_v40 = vsel %vm3482_vm6, %v4074_v57, %v4075_v3  ;;  %v7739_v63 = vpack.i.bf16 %v10669_v15, %v10680_v9 }
 0x274   : > { %7735 = vrot.lane.b32.xlu0 %v7734_v48, %s8011_s3  ;;  %v10700_v13 = vsel %vm4020_vm5, %v4036_v59, %v4037_v55  ;;  %v10703_v5 = vsel %vm3482_vm6, %v4060_v46, %v4061_v28  ;;  %v10706_v60 = vsel %vm4020_vm5, %v4042_v32, %v4043_v56  ;;  %v10713_v24 = vsel %vm3482_vm6, %v4066_v21, %v4067_v52  ;;  %v12826_v52 = vld [vmem:[#allocation40_spill] sm:$0xff]  ;;  %v12828_v48 = vld [vmem:[#allocation57_spill] sm:$0xff] }
 0x275   : > { %7725 = vrot.lane.b32.xlu1 %v7724_v44, %s8011_s3  ;;  %v7764_v54 = vpack.i.bf16 %v10688_v23, %v10706_v60  ;;  %v4041_v2 = vsel %vm4020_vm5, %v4039_v1, %v4040_v4  ;;  %v4063_v58 = vrot.slane %v10680_v9, 2  ;;  %v7769_v33 = vpack.i.bf16 %v10694_v40, %v10713_v24  ;;  %vm12827_vm5 = vmmov %vm12822_vm10  ;;  %v12831_v1 = vld [vmem:[#allocation39_spill] sm:$0xff] }
 0x276   : > { %v7789_v18 = vpack.i.bf16 %v4041_v2, %v10700_v13  ;;  %v10720_v0 = vpack.i.bf16 %v10706_v60, %v4041_v2  ;;  %v7729_v56 = vpack.i.bf16 %v12776_v17, %v3997_v30  ;;  %v3750_v51 = vunpack.c.l.b16 %v3616_v43  ;;  %vm12833_vm12 = vmmov %vm12827_vm5 }
 0x277   : > { %v10724_v55 = vsel %vm3482_vm6, %v4063_v58, %v4064_v26  ;;  %v3824_v61 = vsel %vm1911_vm1, %v10623_v19, %v3823_v8  ;;  %v7754_v29 = vpack.i.bf16 %v10703_v5, %v10441_v39  ;;  %v3827_v43 = vrot.slane %v10631_v35, 6  ;;  %v12824_v35 = vld [vmem:[#allocation71_spill] sm:$0xff]  ;;  %vm12825_vm6 = vmmov %vm12818_vm11 }
 0x278   : > { %7740 = vrot.lane.b32.xlu0 %v7739_v63, %s12454_s22  ;;  %v7794_v57 = vpack.i.bf16 %v10724_v55, %v10703_v5  ;;  %v10736_v3 = vpack.i.bf16 %v10713_v24, %v10724_v55  ;;  %v3826_v30 = vsel %vm12480_vm2, %v3825_v14, %v3824_v61  ;;  %v3829_v19 = vrot.slane %v10635_v11, 5  ;;  %v12829_v14 = vld [vmem:[#allocation41_spill] sm:$0xff]  ;;  %vm12830_vm11 = vmmov %vm12825_vm6  ;;  %v12835_v61 = vld [vmem:[#allocation34_spill] sm:$0xff] }
 0x279   : > { %7730 = vrot.lane.b32.xlu1 %v7729_v56, %s12454_s22  ;;  %v3831_v8 = vrot.slane %v10637_v6, 4  ;;  %v3833_v27 = vrot.slane %v10639_v37, 3  ;;  %v3837_v7 = vrot.slane %v10646_v16, 1  ;;  %v3839_v28 = vrot.slane %v10650_v12, 7  ;;  %v12834_v56 = vld [vmem:[#allocation94_spill] sm:$0xff]  ;;  %vm12845_vm14 = vmmov %vm12825_vm6  ;;  %s12969_s22 = smov 64  }
 0x27a   : > { %v3841_v59 = vrot.slane %v10652_v50, 6  ;;  %v7744_v46 = vpack.i.bf16 %v10700_v13, %v10426_v49  ;;  %v3828_v32 = vsel %vm1915_vm3, %v3827_v43, %v3826_v30  ;;  %v3843_v39 = vrot.slane %v10655_v34, 5  ;;  %v12832_v13 = vld [vmem:[#allocation33_spill] sm:$0xff]  ;;  %vm12846_vm10 = vmmov %vm12827_vm5 }
 0x27b   : > { %v3617_v11 = vpack.c.bf16 %v12824_v35, %v12824_v35  ;;  %v3830_v6 = vsel %vm1917_vm4, %v3829_v19, %v3828_v32  ;;  %v3835_v37 = vrot.slane %v10644_v20, 2  ;;  %v3838_v16 = vsel %vm1911_vm1, %v10648_v38, %v3837_v7  ;;  %v12839_v7 = vld [vmem:[#allocation72_spill] sm:$0xff] }
 0x27c   : > { %7755 = vrot.lane.b32.xlu0 %v7754_v29, %s12451_s24  ;;  %v3845_v12 = vrot.slane %v10661_v36, 4  ;;  %v3832_v49 = vsel %vm12825_vm6, %v3831_v8, %v3830_v6  ;;  %v3840_v50 = vsel %vm12480_vm2, %v3839_v28, %v3838_v16  ;;  %v3847_v34 = vrot.slane %v10663_v62, 3  ;;  %v12838_v8 = vld [vmem:[#allocation59_spill] sm:$0xff] }
 0x27d   : > { %7745 = vrot.lane.b32.xlu1 %v7744_v46, %s12453_s30  ;;  %v3625_v25 = vpack.c.bf16 %v12826_v52, %v12826_v52  ;;  %v3834_v21 = vsel %vm12827_vm5, %v3833_v27, %v3832_v49  ;;  %v3842_v20 = vsel %vm1915_vm3, %v3841_v59, %v3840_v50  ;;  %v3849_v4 = vrot.slane %v3750_v51, 2  ;;  %v12840_v59 = vld [vmem:[#allocation70_spill] sm:$0xff]  ;;  %v12843_v50 = vld [vmem:[#allocation73_spill] sm:$0xff]  ;;  %vm12847_vm5 = vmmov %vm12823_vm9 }
 0x27e   : > { %v3844_v38 = vsel %vm1917_vm4, %v3843_v39, %v3842_v20  ;;  %v3619_v36 = vpack.c.bf16 %v12828_v48, %v12828_v48  ;;  %v3620_v26 = vpack.c.bf16 %v12829_v14, %v12829_v14  ;;  %v3836_v62 = vsel %vm12823_vm9, %v3835_v37, %v3834_v21  ;;  %v12841_v37 = vld [vmem:[#allocation68_spill] sm:$0xff]  ;;  %vm12848_vm9 = vmmov %vm12846_vm10 }
 0x27f   : > { %v3846_v44 = vsel %vm12830_vm11, %v3845_v12, %v3844_v38  ;;  %v3618_v63 = vpack.c.bf16 %v12831_v1, %v12831_v1  ;;  %v3621_v2 = vpack.c.bf16 %v12832_v13, %v12832_v13  ;;  %v3622_v51 = vpack.c.bf16 %v12834_v56, %v12834_v56  ;;  %v12842_v12 = vld [vmem:[#allocation74_spill] sm:$0xff] }
 0x280   : > { %7760 = vrot.lane.b32.xlu0 %v7754_v29, %s8017_s28  ;;  %v3848_v58 = vsel %vm12833_vm12, %v3847_v34, %v3846_v44  ;;  %v3623_v30 = vpack.c.bf16 %v12835_v61, %v12835_v61  ;;  %v12836_v29 = vld [vmem:[#allocation69_spill] sm:$0xff]  ;;  %v3627_v27 = vpack.c.bf16 %v12838_v8, %v12838_v8  ;;  %v3628_v28 = vpack.c.bf16 %v12839_v7, %v12839_v7  ;;  %vm12849_vm12 = vmmov %vm12847_vm5 }
 0x281   : > { %7750 = vrot.lane.b32.xlu1 %v7744_v46, %s8016_s1  ;;  %v3626_v43 = vpack.c.bf16 %v12836_v29, %v12836_v29  ;;  %v3850_v19 = vsel %vm12837_vm13, %v3849_v4, %v3848_v58  ;;  %v3629_v46 = vpack.c.bf16 %v12840_v59, %v12840_v59  ;;  %v3751_v39 = vunpack.c.l.b16 %v3617_v11  ;;  %v12844_v11 = vld [vmem:[#allocation103_spill] sm:$0xff] }
 0x282   : > { %v3881_v32 = vpack.c.b16 %v3850_v19, %v3836_v62  ;;  %v3753_v35 = vunpack.c.l.b16 %v3619_v36  ;;  %v3754_v6 = vunpack.c.l.b16 %v3620_v26  ;;  %v3624_v16 = vpack.c.bf16 %v12841_v37, %v12841_v37 }
 0x283   : > { %v3630_v49 = vpack.c.bf16 %v12842_v12, %v12842_v12  ;;  %v3631_v34 = vpack.c.bf16 %v12843_v50, %v12843_v50  ;;  %v3755_v52 = vunpack.c.l.b16 %v3621_v2  ;;  %v3752_v21 = vunpack.c.l.b16 %v3618_v63 }
 0x284   : > { %7790 = vrot.lane.b32.xlu0 %v7789_v18, %s12484_s5  ;;  %7374 = vmatprep.mubr.msk.bf16.mxu1 %vm3375_vm8, %v3881_v32  ;;  %v3632_v18 = vpack.c.bf16 %v12844_v11, %v12844_v11  ;;  %v3756_v20 = vunpack.c.l.b16 %v3622_v51  ;;  %v3759_v4 = vunpack.c.l.b16 %v3625_v25  ;;  %v3757_v38 = vunpack.c.l.b16 %v3623_v30 }
 0x285   : > { %7765 = vrot.lane.b32.xlu1 %v7764_v54, %s12484_s5  ;;  %v3760_v48 = vunpack.c.l.b16 %v3626_v43  ;;  %v3761_v36 = vunpack.c.l.b16 %v3627_v27  ;;  %v3762_v14 = vunpack.c.l.b16 %v3628_v28  ;;  %v10810_v26 = vpop.permute.xlu0 %7660  ;;  %v3763_v62 = vunpack.c.l.b16 %v3629_v46  ;;  %v7925_v46 = vld [vmem:[%s12792_s4 + $0x20] ss:$0 sps:$4 sm:$0xff]  }
 0x286   : > { %v3851_v44 = vrot.slane %v3751_v39, 1  ;;  %v3853_v1 = vrot.slane %v3753_v35, 7  ;;  %v3855_v13 = vrot.slane %v3754_v6, 6  ;;  %v3758_v60 = vunpack.c.l.b16 %v3624_v16 }
 0x287   : > { %v3764_v54 = vunpack.c.l.b16 %v3630_v49  ;;  %v3857_v63 = vrot.slane %v3755_v52, 5  ;;  %v3765_v25 = vunpack.c.l.b16 %v3631_v34  ;;  %v3859_v58 = vrot.slane %v3756_v20, 4 }
 0x288   : > { %7795 = vrot.lane.b32.xlu0 %v7794_v57, %s8015_s23  ;;  %v3852_v2 = vsel %vm1911_vm1, %v3752_v21, %v3851_v44  ;;  %v3865_v56 = vrot.slane %v3759_v4, 1  ;;  %v3766_v51 = vunpack.c.l.b16 %v3632_v18  ;;  %v3861_v30 = vrot.slane %v3757_v38, 3 }
 0x289   : > { %7770 = vrot.lane.b32.xlu1 %v7769_v33, %s8015_s23  ;;  %v3854_v61 = vsel %vm12480_vm2, %v3853_v1, %v3852_v2  ;;  %v3867_v29 = vrot.slane %v3761_v36, 7  ;;  %v10822_v5 = vpop.permute.xlu0 %7665  ;;  %v3869_v43 = vrot.slane %v3762_v14, 6  ;;  %v3871_v19 = vrot.slane %v3763_v62, 5 }
 0x28a   : > { %v3856_v55 = vsel %vm1915_vm3, %v3855_v13, %v3854_v61  ;;  %v3866_v57 = vsel %vm1911_vm1, %v3760_v48, %v3865_v56  ;;  %v3863_v33 = vrot.slane %v3758_v60, 2  ;;  %v3873_v28 = vrot.slane %v3764_v54, 4 }
 0x28b   : > { %v3858_v24 = vsel %vm1917_vm4, %v3857_v63, %v3856_v55  ;;  %v3868_v8 = vsel %vm12480_vm2, %v3867_v29, %v3866_v57  ;;  %v3875_v59 = vrot.slane %v3765_v25, 3  ;;  %v3877_v37 = vrot.slane %v3766_v51, 2 }
 0x28c   : > { %7800 = vrot.lane.b32.xlu0 %v10720_v0, %s12453_s30  ;;  %v3860_v27 = vsel %vm12845_vm14, %v3859_v58, %v3858_v24  ;;  %v3870_v7 = vsel %vm1915_vm3, %v3869_v43, %v3868_v8  ;;  %vm4390_vm11 = vcmask 1043456   ;;  %v7784_v50 = vpack.i.bf16 %v10432_v47, %v10688_v23 }
 0x28d   : > { %7775 = vrot.lane.b32.xlu1 %v10720_v0, %s8016_s1  ;;  %v3862_v32 = vsel %vm12846_vm10, %v3861_v30, %v3860_v27  ;;  %v3872_v39 = vsel %vm1917_vm4, %v3871_v19, %v3870_v7  ;;  %v7671_v35 = vpop.permute.xlu0 %7670  ;;  %7462 = vmatprep.subr.msk.bf16.mxu1 %vm4390_vm11, %v7925_v46  ;;  %v4392_v49 = vsel %vm4390_vm11, %v7925_v46, 0  ;;  %v7809_v11 = vpack.i.bf16 %v10465_v53, %v10694_v40 }
 0x28e   : > { %v3874_v6 = vsel %vm12825_vm6, %v3873_v28, %v3872_v39  ;;  %v3864_v0 = vsel %vm12847_vm5, %v3863_v33, %v3862_v32  ;;  %7387 = vmatpush3.bf16.msra.mxu1 %v4392_v49  ;;  %v7672_v18 = vunpack.i.l.bf16 %v7671_v35  ;;  %vm4269_vm13 = vcmask 64512  }
 0x28f   : > { %v3876_v16 = vsel %vm12848_vm9, %v3875_v59, %v3874_v6  ;;  %vm4278_vm14 = vcmask 130048   ;;  %vm4295_vm10 = vcmask 261120   ;;  %v7663_v14 = vunpack.i.h.bf16 %v10810_v26 }
 0x290   : > { %7805 = vrot.lane.b32.xlu0 %v10736_v3, %s12451_s24  ;;  %v3878_v12 = vsel %vm12849_vm12, %v3877_v37, %v3876_v16  ;;  %v4270_v23 = vsel %vm4269_vm13, %v12776_v17, %v7672_v18  ;;  %v7662_v62 = vunpack.i.l.bf16 %v10810_v26  ;;  %vm12479_vm6 = vcmask 392192  }
 0x291   : > { %7780 = vrot.lane.b32.xlu1 %v10736_v3, %s8017_s28  ;;  %v7676_v34 = vpop.permute.xlu0 %7675  ;;  %v3882_v52 = vpack.c.b16 %v3878_v12, %v3864_v0  ;;  %v7673_v3 = vunpack.i.h.bf16 %v7671_v35  ;;  %v7668_v26 = vunpack.i.h.bf16 %v10822_v5  ;;  %v7667_v51 = vunpack.i.l.bf16 %v10822_v5  ;;  %v7656_v5 = vpop.permute.xlu1 %7655 }
 0x292   : > { %v7678_v20 = vunpack.i.h.bf16 %v7676_v34  ;;  %v7677_v4 = vunpack.i.l.bf16 %v7676_v34  ;;  %vm12478_vm5 = vcmask 457728   ;;  %vm12471_vm9 = vcmask 523264  }
 0x293   : > { %7375 = vmatmul.mubr.msk.bf16.gmra.mrb[4].mxu1 %vm3375_vm8, %v3882_v52  ;;  %v4271_v47 = vsel %vm4269_vm13, %v10403_v41, %v7673_v3  ;;  %vm4304_vm8 = vcmask 326656   ;;  %vm12468_vm12 = vcmask 588800   ;;  %v7658_v34 = vunpack.i.h.bf16 %v7656_v5 }
 0x294   : > { %v4279_v48 = vsel %vm4278_vm14, %v4270_v23, %v7677_v4  ;;  %v4280_v53 = vsel %vm4278_vm14, %v4271_v47, %v7678_v20  ;;  %v7657_v52 = vunpack.i.l.bf16 %v7656_v5 }
 0x295   : > { %7785 = vrot.lane.b32.xlu1 %v7784_v50, %s12453_s30  ;;  %v7701_v21 = vpop.permute.xlu0 %7700  ;;  %v4287_v13 = vsel %vm3438_vm7, %v4279_v48, %v7662_v62  ;;  %v4288_v41 = vsel %vm3438_vm7, %v4280_v53, %v7663_v14  ;;  %v7681_v27 = vpop.permute.xlu1 %7680  ;;  %s12481_s30 = smov 112  }
 0x296   : > { %v7703_v40 = vunpack.i.h.bf16 %v7701_v21  ;;  %v7702_v36 = vunpack.i.l.bf16 %v7701_v21  ;;  %v7683_v21 = vunpack.i.h.bf16 %v7681_v27 }
 0x298   : > { %v4296_v54 = vsel %vm4295_vm10, %v4287_v13, %v7702_v36  ;;  %v4297_v63 = vsel %vm4295_vm10, %v4288_v41, %v7703_v40 }
 0x299   : > { %7810 = vrot.lane.b32.xlu1 %v7809_v11, %s12451_s24  ;;  %v7706_v38 = vpop.permute.xlu0 %7705  ;;  %v7686_v7 = vpop.permute.xlu1 %7685  ;;  %s12850_s24 = sld [smem:[#allocation118_spill]] }
 0x29a   : > { %v7708_v44 = vunpack.i.h.bf16 %v7706_v38  ;;  %v7707_v1 = vunpack.i.l.bf16 %v7706_v38  ;;  %v7688_v38 = vunpack.i.h.bf16 %v7686_v7  ;;  %v7687_v48 = vunpack.i.l.bf16 %v7686_v7 }
 0x29c   : > { %v4305_v25 = vsel %vm4304_vm8, %v4296_v54, %v7707_v1  ;;  %v4306_v2 = vsel %vm4304_vm8, %v4297_v63, %v7708_v44 }
 0x29d   : > { %v7711_v60 = vpop.permute.xlu0 %7710  ;;  %v4314_v30 = vsel %vm12479_vm6, %v4305_v25, %v7667_v51  ;;  %v4315_v29 = vsel %vm12479_vm6, %v4306_v2, %v7668_v26  ;;  %v7691_v28 = vpop.permute.xlu1 %7690 }
 0x29e   : > { %v7713_v58 = vunpack.i.h.bf16 %v7711_v60  ;;  %v7712_v56 = vunpack.i.l.bf16 %v7711_v60  ;;  %v7693_v46 = vunpack.i.h.bf16 %v7691_v28  ;;  %v7692_v32 = vunpack.i.l.bf16 %v7691_v28 }
 0x2a0   : > { %v4323_v43 = vsel %vm12478_vm5, %v4314_v30, %v7712_v56  ;;  %v4324_v19 = vsel %vm12478_vm5, %v4315_v29, %v7713_v58  ;;  %v4273_v37 = vsel %vm4269_vm13, %v10398_v42, %v7693_v46  ;;  %v4272_v0 = vsel %vm4269_vm13, %v10417_v31, %v7692_v32 }
 0x2a1   : > { %v7716_v61 = vpop.permute.xlu0 %7715  ;;  %v7696_v59 = vpop.permute.xlu1 %7695  ;;  %v7682_v42 = vunpack.i.l.bf16 %v7681_v27 }
 0x2a2   : > { %v7718_v55 = vunpack.i.h.bf16 %v7716_v61  ;;  %v7717_v57 = vunpack.i.l.bf16 %v7716_v61  ;;  %v7698_v39 = vunpack.i.h.bf16 %v7696_v59  ;;  %v7697_v35 = vunpack.i.l.bf16 %v7696_v59 }
 0x2a4   : > { %v4332_v24 = vsel %vm12471_vm9, %v4323_v43, %v7717_v57  ;;  %v4333_v33 = vsel %vm12471_vm9, %v4324_v19, %v7718_v55  ;;  %v4281_v12 = vsel %vm4278_vm14, %v4272_v0, %v7697_v35  ;;  %v4282_v49 = vsel %vm4278_vm14, %v4273_v37, %v7698_v39 }
 0x2a5   : > { %v4340_v8 = vpack.c.bf16 %v4333_v33, %v4332_v24  ;;  %v4289_v11 = vsel %vm3438_vm7, %v4281_v12, %v7657_v52  ;;  %v4290_v3 = vsel %vm3438_vm7, %v4282_v49, %v7658_v34 }
 0x2a6   : > { %v4298_v47 = vsel %vm4295_vm10, %v4289_v11, %v7682_v42  ;;  %v4299_v23 = vsel %vm4295_vm10, %v4290_v3, %v7683_v21 }
 0x2a7   : > { %7388 = vmatprep.mubr.msk.bf16.mxu1 %vm12468_vm12, %v4340_v8  ;;  %v4307_v62 = vsel %vm4304_vm8, %v4298_v47, %v7687_v48  ;;  %v4308_v44 = vsel %vm4304_vm8, %v4299_v23, %v7688_v38 }
 0x2e2   : > { %v7721_v6 = vpop.permute.xlu1 %7720 }
 0x2e3   : > { %v7723_v31 = vunpack.i.h.bf16 %v7721_v6  ;;  %v7722_v4 = vunpack.i.l.bf16 %v7721_v6 }
 0x2e5   : > { %v4316_v41 = vsel %vm12479_vm6, %v4307_v62, %v7722_v4  ;;  %v4317_v60 = vsel %vm12479_vm6, %v4308_v44, %v7723_v31 }
 0x2e6   : > { %v7736_v16 = vpop.permute.xlu0 %7735 }
 0x2e7   : > { %v10885_v50 = vpop.permute.xlu1 %7725  ;;  %v7738_v28 = vunpack.i.h.bf16 %v7736_v16  ;;  %v7737_v59 = vunpack.i.l.bf16 %v7736_v16 }
 0x2e8   : > { %v7728_v21 = vunpack.i.h.bf16 %v10885_v50  ;;  %v7727_v42 = vunpack.i.l.bf16 %v10885_v50 }
 0x2ea   : > { %v10889_v18 = vpop.permute.xlu0 %7740 }
 0x2eb   : > { %v10891_v20 = vpop.permute.xlu1 %7730  ;;  %v7743_v16 = vunpack.i.h.bf16 %v10889_v18  ;;  %v7742_v52 = vunpack.i.l.bf16 %v10889_v18 }
 0x2ee   : > { %v7756_v53 = vpop.permute.xlu0 %7755 }
 0x2ef   : > { %v7746_v40 = vpop.permute.xlu1 %7745  ;;  %v7758_v36 = vunpack.i.h.bf16 %v7756_v53  ;;  %v7757_v14 = vunpack.i.l.bf16 %v7756_v53 }
 0x2f0   : > { %v7748_v1 = vunpack.i.h.bf16 %v7746_v40  ;;  %v7747_v13 = vunpack.i.l.bf16 %v7746_v40 }
 0x2f2   : > { %v4325_v54 = vsel %vm12478_vm5, %v4316_v41, %v7747_v13  ;;  %v4326_v63 = vsel %vm12478_vm5, %v4317_v60, %v7748_v1  ;;  %v7761_v25 = vpop.permute.xlu0 %7760 }
 0x2f3   : > { %v4335_v2 = vsel %vm12471_vm9, %v4326_v63, %v7758_v36  ;;  %v4334_v58 = vsel %vm12471_vm9, %v4325_v54, %v7757_v14  ;;  %v7751_v56 = vpop.permute.xlu1 %7750  ;;  %v7763_v29 = vunpack.i.h.bf16 %v7761_v25  ;;  %v7762_v55 = vunpack.i.l.bf16 %v7761_v25 }
 0x2f4   : > { %v4341_v26 = vpack.c.bf16 %v4335_v2, %v4334_v58  ;;  %v7753_v51 = vunpack.i.h.bf16 %v7751_v56  ;;  %v7752_v61 = vunpack.i.l.bf16 %v7751_v56  ;;  %v7733_v56 = vunpack.i.h.bf16 %v10891_v20 }
 0x2f6   : > { %7389 = vmatmul.mubr.msk.bf16.vlgmr.msra.gmra.mrb[0].mxu1 %vm12468_vm12, %v4341_v26  ;;  %v7791_v30 = vpop.permute.xlu0 %7790  ;;  %v4275_v43 = vsel %vm4269_vm13, %v10658_v45, %v7753_v51  ;;  %v4274_v19 = vsel %vm4269_vm13, %v10409_v22, %v7752_v61 }
 0x2f7   : > { %v7766_v57 = vpop.permute.xlu1 %7765  ;;  %v4284_v33 = vsel %vm4278_vm14, %v4275_v43, %v7763_v29  ;;  %v4283_v8 = vsel %vm4278_vm14, %v4274_v19, %v7762_v55  ;;  %v7793_v5 = vunpack.i.h.bf16 %v7791_v30  ;;  %v7792_v27 = vunpack.i.l.bf16 %v7791_v30 }
 0x2f8   : > { %v4291_v39 = vsel %vm3438_vm7, %v4283_v8, %v7737_v59  ;;  %v4292_v35 = vsel %vm3438_vm7, %v4284_v33, %v7738_v28  ;;  %v7768_v31 = vunpack.i.h.bf16 %v7766_v57  ;;  %v7767_v13 = vunpack.i.l.bf16 %v7766_v57  ;;  %v7926_v28 = vld [vmem:[%s12248_s7] sm:$0xff]  }
 0x2f9   : > { %v4300_v6 = vsel %vm4295_vm10, %v4291_v39, %v7792_v27  ;;  %v4301_v22 = vsel %vm4295_vm10, %v4292_v35, %v7793_v5  ;;  %7397 = vmatpush3.bf16.msra.mxu0 %v7926_v28  ;;  %v7162_v59 = vld [vmem:[%s12850_s24] ss:$0 sm:$0xff] }
 0x2fa   : > { %v7796_v24 = vpop.permute.xlu0 %7795  ;;  %7398 = vmatprep.subr.bf16.mxu0 %v12773_v10 }
 0x2fb   : > { %v7771_v7 = vpop.permute.xlu1 %7770  ;;  %v7798_v46 = vunpack.i.h.bf16 %v7796_v24  ;;  %v7797_v32 = vunpack.i.l.bf16 %v7796_v24 }
 0x2fc   : > { %v7773_v63 = vunpack.i.h.bf16 %v7771_v7  ;;  %v7772_v25 = vunpack.i.l.bf16 %v7771_v7 }
 0x2fd   : > { %v4309_v0 = vsel %vm4304_vm8, %v4300_v6, %v7797_v32  ;;  %v4310_v12 = vsel %vm4304_vm8, %v4301_v22, %v7798_v46  ;;  %v7167_v46 = vld [vmem:[%s12247_s6] ss:$0 sm:$0xff] }
 0x2fe   : > { %v7801_v45 = vpop.permute.xlu0 %7800  ;;  %v4318_v47 = vsel %vm12479_vm6, %v4309_v0, %v7742_v52  ;;  %v4319_v23 = vsel %vm12479_vm6, %v4310_v12, %v7743_v16  ;;  %v10958_v32 = vadd.f32 %v7167_v46, %v7162_v59 }
 0x2ff   : > { %v7776_v37 = vpop.permute.xlu1 %7775  ;;  %v7803_v49 = vunpack.i.h.bf16 %v7801_v45  ;;  %v7802_v34 = vunpack.i.l.bf16 %v7801_v45 }
 0x300   : > { %v7778_v11 = vunpack.i.h.bf16 %v7776_v37  ;;  %v7777_v3 = vunpack.i.l.bf16 %v7776_v37 }
 0x301   : > { %v4327_v40 = vsel %vm12478_vm5, %v4318_v47, %v7802_v34  ;;  %v4328_v36 = vsel %vm12478_vm5, %v4319_v23, %v7803_v49 }
 0x302   : > { %v7806_v4 = vpop.permute.xlu0 %7805  ;;  %v4277_v62 = vsel %vm4269_vm13, %v10669_v15, %v7778_v11  ;;  %v4276_v50 = vsel %vm4269_vm13, %v10680_v9, %v7777_v3  ;;  %v7732_v9 = vunpack.i.l.bf16 %v10891_v20 }
 0x303   : > { %v7781_v38 = vpop.permute.xlu1 %7780  ;;  %v7808_v48 = vunpack.i.h.bf16 %v7806_v4  ;;  %v7807_v53 = vunpack.i.l.bf16 %v7806_v4 }
 0x304   : > { %v7783_v18 = vunpack.i.h.bf16 %v7781_v38  ;;  %v7782_v14 = vunpack.i.l.bf16 %v7781_v38 }
 0x305   : > { %v4336_v44 = vsel %vm12471_vm9, %v4327_v40, %v7807_v53  ;;  %v4337_v1 = vsel %vm12471_vm9, %v4328_v36, %v7808_v48  ;;  %v12851_v53 = vld [vmem:[#allocation100_spill] sm:$0xff]  ;;  %v12852_v40 = vld [vmem:[#allocation99_spill] sm:$0xff] }
 0x306   : > { %v4285_v41 = vsel %vm4278_vm14, %v4276_v50, %v7782_v14  ;;  %v4286_v60 = vsel %vm4278_vm14, %v4277_v62, %v7783_v18  ;;  %v4342_v54 = vpack.c.bf16 %v4337_v1, %v4336_v44  ;;  %v10966_v36 = vsel %vm1915_vm3, %v12852_v40, %v12851_v53  ;;  %v12853_v62 = vld [vmem:[#allocation3_spill] sm:$0xff] }
 0x307   : > { %v4293_v2 = vsel %vm3438_vm7, %v4285_v41, %v7727_v42  ;;  %v4294_v58 = vsel %vm3438_vm7, %v4286_v60, %v7728_v21  ;;  %v7786_v15 = vpop.permute.xlu1 %7785 }
 0x308   : > { %v4302_v26 = vsel %vm4295_vm10, %v4293_v2, %v7767_v13  ;;  %v4303_v51 = vsel %vm4295_vm10, %v4294_v58, %v7768_v31  ;;  %7392 = vmatprep.mubr.msk.bf16.mxu1 %vm12468_vm12, %v4342_v54  ;;  %v7788_v61 = vunpack.i.h.bf16 %v7786_v15  ;;  %v7787_v30 = vunpack.i.l.bf16 %v7786_v15 }
 0x309   : > { %v4311_v29 = vsel %vm4304_vm8, %v4302_v26, %v7772_v25  ;;  %v4312_v55 = vsel %vm4304_vm8, %v4303_v51, %v7773_v63  ;;  %v12854_v26 = vld [vmem:[#allocation4_spill] sm:$0xff] }
 0x30a   : > { %v4320_v57 = vsel %vm12479_vm6, %v4311_v29, %v7732_v9  ;;  %v4321_v43 = vsel %vm12479_vm6, %v4312_v55, %v7733_v56  ;;  %v12855_v55 = vld [vmem:[#allocation6_spill] sm:$0xff] }
 0x30b   : > { %v7811_v19 = vpop.permute.xlu1 %7810  ;;  %v4329_v20 = vsel %vm12478_vm5, %v4320_v57, %v7787_v30  ;;  %v4330_v8 = vsel %vm12478_vm5, %v4321_v43, %v7788_v61 }
 0x30c   : > { %v7813_v24 = vunpack.i.h.bf16 %v7811_v19  ;;  %v7812_v33 = vunpack.i.l.bf16 %v7811_v19 }
 0x30e   : > { %v4338_v5 = vsel %vm12471_vm9, %v4329_v20, %v7812_v33  ;;  %v4339_v27 = vsel %vm12471_vm9, %v4330_v8, %v7813_v24 }
 0x30f   : > { %v4343_v7 = vpack.c.bf16 %v4339_v27, %v4338_v5 }
 0x311   : > { %7393 = vmatmul.mubr.msk.bf16.gmra.mrb[4].mxu1 %vm12468_vm12, %v4343_v7  ;;  %vm12881_vm12 = vcmask 1047559  }
 0x3c9   : > { %v7390_v39 = vpop.f32.mrb[0].mxu1 }
 0x3ca   : > { %v7438_v35 = vadd.f32 %v7390_v39, %v7162_v59  ;;  %v4428_v45 = vpop.f32.mrb[1].mxu1 }
 0x3cb   : > { %v7440_v6 = vadd.f32 %v7162_v59, %v4428_v45  ;;  %v7391_v22 = vpop.f32.mrb[2].mxu1 }
 0x3cc   : > { %v7439_v37 = vadd.f32 %v7438_v35, %v7167_v46  ;;  %v7443_v0 = vadd.f32 %v10958_v32, %v7391_v22  ;;  %v4431_v12 = vpop.f32.mrb[3].mxu1 }
 0x3cd   : > { %v7441_v49 = vadd.f32 %v7440_v6, %v7167_v46  ;;  %v7445_v34 = vadd.f32 %v10958_v32, %v4431_v12 }
 0x3ce   : > { %v4469_v16 = vmul.f32 0.2, %v7439_v37  ;;  %v4470_v52 = vmul.f32 0.2, %v7443_v0 }
 0x3cf   : > { %v4467_v11 = vmul.f32 0.2, %v7441_v49  ;;  %v4468_v3 = vmul.f32 0.2, %v7445_v34 }
 0x3d0   : > { %v4477_v21 = vmax.f32 %v7439_v37, %v4469_v16  ;;  %v4478_v42 = vmax.f32 %v7443_v0, %v4470_v52 }
 0x3d1   : > { %v4475_v31 = vmax.f32 %v7441_v49, %v4467_v11  ;;  %v4476_v23 = vmax.f32 %v7445_v34, %v4468_v3 }
 0x3d2   : > { %v4524_v4 = vrot.slane %v4477_v21, 7  ;;  %v4525_v47 = vrot.slane %v4478_v42, 7 }
 0x3d3   : > { %v4522_v38 = vrot.slane %v4475_v31, 7  ;;  %v4523_v60 = vrot.slane %v4476_v23, 7 }
 0x3d4   : > { %v4540_v48 = vsel %vm12470_vm0, 0.0, %v4524_v4  ;;  %v10969_v18 = vsel %vm12470_vm0, %v4524_v4, 0.0  ;;  %v4541_v41 = vsel %vm12470_vm0, 0.0, %v4525_v47  ;;  %v4549_v2 = vsel %vm12470_vm0, %v4525_v47, 0.0 }
 0x3d5   : > { %v4690_v14 = vcombine.high %v4540_v48, %v4540_v48  ;;  %v10972_v50 = vrot.slane %v4540_v48, %v12853_v62  ;;  %v4538_v44 = vsel %vm12470_vm0, 0.0, %v4522_v38  ;;  %v4546_v25 = vsel %vm12470_vm0, %v4522_v38, 0.0 }
 0x3d6   : > { %v4666_v1 = vcombine.high %v4538_v44, %v4538_v44  ;;  %v10976_v13 = vrot.slane %v4538_v44, %v12853_v62  ;;  %v4586_v29 = vcombine.high %v4541_v41, %v4541_v41  ;;  %v4689_v19 = vrot.slane %v4546_v25, %v12853_v62 }
 0x3d7   : > { %v10980_v54 = vrot.slane %v4690_v14, %v12853_v62  ;;  %v10984_v63 = vcombine.high %v10972_v50, %v10972_v50  ;;  %v5368_v15 = vpack.c.bf16 %v10972_v50, %v10972_v50  ;;  %v4593_v37 = vrot.slane %v4541_v41, %v12853_v62  ;;  %v12869_v14 = vld [vmem:[#allocation75_spill] sm:$0xff] }
 0x3d8   : > { %v10993_v56 = vrot.slane %v4666_v1, %v12853_v62  ;;  %v10997_v9 = vcombine.high %v10976_v13, %v10976_v13  ;;  %v5364_v28 = vpack.c.bf16 %v10976_v13, %v10976_v13  ;;  %v4600_v0 = vrot.slane %v4586_v29, %v12853_v62 }
 0x3d9   : > { %v5369_v61 = vpack.c.bf16 %v10984_v63, %v10984_v63  ;;  %v5370_v30 = vpack.c.bf16 %v10980_v54, %v10980_v54  ;;  %v11014_v33 = vunpack.c.l.b16 %v5368_v15  ;;  %v11046_v49 = vrot.slane %v4689_v19, %v12854_v26 }
 0x3da   : > { %v11009_v43 = vcombine.high %v10993_v56, %v10993_v56  ;;  %v11018_v20 = vrot.slane %v10997_v9, %v12854_v26  ;;  %v11022_v8 = vrot.slane %v10993_v56, %v12854_v26  ;;  %v5365_v59 = vpack.c.bf16 %v10997_v9, %v10997_v9 }
 0x3db   : > { %12856 = vst [vmem:[#allocation107_spill] sm:$0xff] %v11014_v33  ;;  %v11026_v27 = vunpack.c.l.b16 %v5369_v61  ;;  %v11028_v7 = vunpack.c.l.b16 %v5370_v30  ;;  %v5366_v35 = vpack.c.bf16 %v10993_v56, %v10993_v56  ;;  %v5402_v6 = vunpack.c.l.b16 %v5364_v28 }
 0x3dc   : > { %v5367_v45 = vpack.c.bf16 %v11009_v43, %v11009_v43  ;;  %v5403_v22 = vunpack.c.l.b16 %v5365_v59  ;;  %v4601_v3 = vcombine.high %v4593_v37, %v4593_v37  ;;  %v4602_v21 = vcombine.high %v4600_v0, %v4600_v0 }
 0x3dd   : > { %12857 = vst [vmem:[#allocation101_spill] sm:$0xff] %v11026_v27  ;;  %12858 = vst [vmem:[#allocation108_spill] sm:$0xff] %v11028_v7  ;;  %v5404_v34 = vunpack.c.l.b16 %v5366_v35  ;;  %v5418_v11 = vrot.slane %v5402_v6, 1  ;;  %v4609_v31 = vrot.slane %v4549_v2, %v12853_v62  ;;  %v11053_v4 = vrot.slane %v4600_v0, %v12854_v26 }
 0x3de   : > { %v11048_v16 = vunpack.c.l.b16 %v5367_v45  ;;  %v4539_v47 = vsel %vm12470_vm0, 0.0, %v4523_v60  ;;  %v11058_v38 = vrot.slane %v4593_v37, %v12854_v26  ;;  %v11061_v48 = vrot.slane %v4601_v3, %v12854_v26 }
 0x3df   : > { %v5420_v42 = vrot.slane %v5404_v34, 7  ;;  %12860 = vst [vmem:[#allocation110_spill] sm:$0xff] %v11053_v4  ;;  %v5419_v23 = vsel %vm1911_vm1, %v5403_v22, %v5418_v11  ;;  %v11064_v53 = vrot.slane %v4602_v21, %v12854_v26  ;;  %v11071_v44 = vrot.slane %v4593_v37, %v12855_v55 }
 0x3e0   : > { %12859 = vst [vmem:[#allocation102_spill] sm:$0xff] %v11048_v16  ;;  %v11074_v1 = vrot.slane %v4601_v3, %v12855_v55  ;;  %v4830_v41 = vsel %vm1911_vm1, %v11061_v48, %v11058_v38  ;;  %v11080_v25 = vrot.slane %v4600_v0, %v12855_v55  ;;  %v4921_v2 = vsel %vm1911_vm1, %v11053_v4, %v11061_v48 }
 0x3e1   : > { %12861 = vst [vmem:[#allocation106_spill] sm:$0xff] %v11064_v53  ;;  %v11067_v40 = vsel %vm12480_vm2, %v5420_v42, %v5419_v23  ;;  %12863 = vst [vmem:[#allocation111_spill] sm:$0xff] %v11071_v44  ;;  %v4547_v15 = vsel %vm12470_vm0, %v4523_v60, 0.0  ;;  %v4831_v30 = vsel %vm12480_vm2, %v11053_v4, %v4830_v41  ;;  %v11089_v29 = vrot.slane %v4602_v21, %v12855_v55 }
 0x3e2   : > { %12862 = vst [vmem:[#allocation104_spill] sm:$0xff] %v11067_v40  ;;  %12864 = vst [vmem:[#allocation109_spill] sm:$0xff] %v11074_v1  ;;  %v4562_v19 = vcombine.high %v4539_v47, %v4539_v47  ;;  %v4569_v28 = vrot.slane %v4539_v47, %v12853_v62  ;;  %v11093_v35 = vrot.slane %v4609_v31, %v12854_v26 }
 0x3e3   : > { %12865 = vst [vmem:[#allocation105_spill] sm:$0xff] %v11080_v25  ;;  %12866 = vst [vmem:[#allocation112_spill] sm:$0xff] %v11089_v29  ;;  %v4922_v45 = vsel %vm12480_vm2, %v11064_v53, %v4921_v2  ;;  %v11102_v37 = vsel %vm1911_vm1, %v11074_v1, %v11071_v44  ;;  %v4585_v11 = vrot.slane %v4547_v15, %v12853_v62 }
 0x3e4   : > { %v7394_v61 = vpop.f32.mrb[4].mxu1  ;;  %12867 = vst [vmem:[#allocation45_spill] sm:$0xff] %v11093_v35  ;;  %v4576_v0 = vrot.slane %v4562_v19, %v12853_v62  ;;  %v4577_v34 = vcombine.high %v4569_v28, %v4569_v28  ;;  %v4781_v21 = vrot.slane %v4569_v28, %v12854_v26  ;;  %v11110_v23 = vsel %vm1915_vm3, %v11093_v35, %v4922_v45 }
 0x3e5   : > { %v4444_v59 = vpop.f32.mrb[5].mxu1  ;;  %v7447_v6 = vadd.f32 %v10958_v32, %v7394_v61  ;;  %v4842_v2 = vrot.slane %v4569_v28, %v12855_v55  ;;  %v11126_v45 = vrot.slane %v4585_v11, %v12854_v26  ;;  %v11130_v12 = vsel %vm1915_vm3, %v11064_v53, %v4831_v30 }
 0x3e6   : > { %v7449_v60 = vadd.f32 %v10958_v32, %v4444_v59  ;;  %v7395_v22 = vpop.f32.mrb[6].mxu1  ;;  %v11113_v41 = vrot.slane %v4577_v34, %v12854_v26  ;;  %v11117_v61 = vrot.slane %v4577_v34, %v12855_v55  ;;  %v4578_v28 = vcombine.high %v4576_v0, %v4576_v0 }
 0x3e7   : > { %v4447_v3 = vpop.f32.mrb[7].mxu1  ;;  %v4473_v42 = vmul.f32 0.2, %v7447_v6  ;;  %v7451_v47 = vadd.f32 %v10958_v32, %v7395_v22  ;;  %v11123_v22 = vrot.slane %v4576_v0, %v12854_v26  ;;  %12868 = vst [vmem:[#allocation43_spill] sm:$0xff] %v11126_v45  ;;  %v11134_v34 = vsel %vm1917_vm4, %v4781_v21, %v12869_v14 }
 0x3e8   : > { %v4471_v31 = vmul.f32 0.2, %v7449_v60  ;;  %v11120_v52 = vadd.f32 %v10958_v32, %v4447_v3  ;;  %12870 = vst [vmem:[#allocation113_spill] sm:$0xff] %v11134_v34  ;;  %v11142_v3 = vsel %vm1911_vm1, %v11117_v61, %v4842_v2  ;;  %v11146_v30 = vrot.slane %v4578_v28, %v12854_v26 }
 0x3e9   : > { %v4481_v15 = vmax.f32 %v7447_v6, %v4473_v42  ;;  %v4474_v59 = vmul.f32 0.2, %v7451_v47  ;;  %v11138_v6 = vsel %vm1911_vm1, %v11113_v41, %v4781_v21  ;;  %12871 = vst [vmem:[#allocation62_spill] sm:$0xff] %v11142_v3  ;;  %v11163_v46 = vrot.slane %v4578_v28, %v12855_v55 }
 0x3ea   : > { %v4479_v19 = vmax.f32 %v7449_v60, %v4471_v31  ;;  %v4472_v42 = vmul.f32 0.2, %v11120_v52 }
 0x3eb   : > { %v4528_v32 = vrot.slane %v4481_v15, 7  ;;  %v4482_v11 = vmax.f32 %v7451_v47, %v4474_v59  ;;  %v11156_v47 = vrot.slane %v4576_v0, %v12855_v55 }
 0x3ec   : > { %v4526_v60 = vrot.slane %v4479_v19, 7 }
 0x3ed   : > { %v4544_v31 = vsel %vm12470_vm0, 0.0, %v4528_v32  ;;  %v4552_v14 = vsel %vm12470_vm0, %v4528_v32, 0.0  ;;  %v12872_v32 = vld [vmem:[#allocation56_spill] sm:$0xff]  ;;  %v4529_v51 = vrot.slane %v4482_v11, 7 }
 0x3ee   : > { %v4542_v57 = vsel %vm12470_vm0, 0.0, %v4526_v60  ;;  %v4550_v21 = vsel %vm12470_vm0, %v4526_v60, 0.0  ;;  %v4738_v15 = vcombine.high %v4544_v31, %v4544_v31  ;;  %v11153_v19 = vrot.slane %v4544_v31, %v12853_v62 }
 0x3ef   : > { %v4714_v58 = vcombine.high %v4542_v57, %v4542_v57  ;;  %v4761_v59 = vrot.slane %v4552_v14, %v12853_v62  ;;  %v11160_v39 = vrot.slane %v4542_v57, %v12853_v62  ;;  %v4887_v5 = vsel %vm1917_vm4, %v4842_v2, %v12872_v32 }
 0x3f0   : > { %v11168_v60 = vrot.slane %v4738_v15, %v12853_v62  ;;  %v11172_v31 = vcombine.high %v11153_v19, %v11153_v19  ;;  %v4737_v0 = vrot.slane %v4550_v21, %v12853_v62  ;;  %v5376_v57 = vpack.c.bf16 %v11153_v19, %v11153_v19 }
 0x3f1   : > { %v11178_v14 = vrot.slane %v4714_v58, %v12853_v62  ;;  %v11182_v28 = vcombine.high %v11160_v39, %v11160_v39  ;;  %v4480_v2 = vmax.f32 %v11120_v52, %v4472_v42  ;;  %v11194_v58 = vrot.slane %v4761_v59, %v12854_v26 }
 0x3f2   : > { %v5377_v11 = vpack.c.bf16 %v11172_v31, %v11172_v31  ;;  %v5378_v21 = vpack.c.bf16 %v11168_v60, %v11168_v60  ;;  %v11208_v32 = vunpack.c.l.b16 %v5376_v57  ;;  %v5113_v59 = vrot.slane %v4737_v0, %v12854_v26 }
 0x3f3   : > { %v11198_v24 = vcombine.high %v11178_v14, %v11178_v14  ;;  %v11202_v52 = vrot.slane %v11182_v28, %v12854_v26  ;;  %v11206_v42 = vrot.slane %v11178_v14, %v12854_v26  ;;  %v5373_v17 = vpack.c.bf16 %v11182_v28, %v11182_v28 }
 0x3f4   : > { %12873 = vst [vmem:[#allocation9_spill] sm:$0xff] %v11208_v32  ;;  %v11210_v15 = vunpack.c.l.b16 %v5377_v11  ;;  %v11216_v27 = vunpack.c.l.b16 %v5378_v21  ;;  %v5372_v21 = vpack.c.bf16 %v11160_v39, %v11160_v39  ;;  %v5374_v16 = vpack.c.bf16 %v11178_v14, %v11178_v14 }
 0x3f5   : > { %v11220_v33 = vrot.slane %v11198_v24, %v12854_v26  ;;  %v5125_v57 = vsel %vm1911_vm1, %v11206_v42, %v11202_v52  ;;  %v4545_v40 = vsel %vm12470_vm0, 0.0, %v4529_v51  ;;  %v5411_v32 = vunpack.c.l.b16 %v5373_v17 }
 0x3f6   : > { %12874 = vst [vmem:[#allocation63_spill] sm:$0xff] %v11210_v15  ;;  %12875 = vst [vmem:[#allocation64_spill] sm:$0xff] %v11216_v27  ;;  %v5375_v15 = vpack.c.bf16 %v11198_v24, %v11198_v24  ;;  %v5410_v0 = vunpack.c.l.b16 %v5372_v21  ;;  %v4553_v7 = vsel %vm12470_vm0, %v4529_v51, 0.0  ;;  %v5412_v35 = vunpack.c.l.b16 %v5374_v16 }
 0x3f7   : > { %v5126_v27 = vsel %vm12480_vm2, %v11220_v33, %v5125_v57  ;;  %v4634_v1 = vcombine.high %v4545_v40, %v4545_v40  ;;  %v11248_v57 = vrot.slane %v4545_v40, %v12853_v62  ;;  %v4657_v53 = vrot.slane %v4553_v7, %v12853_v62 }
 0x3f8   : > { %v11242_v11 = vsel %vm1915_vm3, %v5113_v59, %v5126_v27  ;;  %v11245_v34 = vunpack.c.l.b16 %v5375_v15  ;;  %v5432_v44 = vrot.slane %v5410_v0, 1  ;;  %v4527_v4 = vrot.slane %v4480_v2, 7 }
 0x3f9   : > { %v4888_v3 = vsel %vm12877_vm15, %v11117_v61, %v4887_v5  ;;  %v5434_v27 = vrot.slane %v5412_v35, 7  ;;  %v11255_v17 = vrot.slane %v4634_v1, %v12853_v62  ;;  %v11259_v51 = vcombine.high %v11248_v57, %v11248_v57 }
 0x3fa   : > { %12876 = vst [vmem:[#allocation27_spill] sm:$0xff] %v11245_v34  ;;  %v5433_v16 = vsel %vm1911_vm1, %v5411_v32, %v5432_v44  ;;  %v11267_v5 = vrot.slane %v4657_v53, %v12854_v26  ;;  %v4543_v44 = vsel %vm12470_vm0, 0.0, %v4527_v4  ;;  %v4551_v2 = vsel %vm12470_vm0, %v4527_v4, 0.0 }
 0x3fb   : > { %v11270_v35 = vsel %vm12480_vm2, %v5434_v27, %v5433_v16  ;;  %v11274_v1 = vrot.slane %v11259_v51, %v12854_v26  ;;  %v4610_v15 = vcombine.high %v4543_v44, %v4543_v44  ;;  %v4617_v32 = vrot.slane %v4543_v44, %v12853_v62 }
 0x3fc   : > { %12878 = vst [vmem:[#allocation28_spill] sm:$0xff] %v11267_v5  ;;  %12879 = vst [vmem:[#allocation46_spill] sm:$0xff] %v11270_v35  ;;  %vm12880_vm15 = vcmask 1046534   ;;  %v4633_v21 = vrot.slane %v4551_v2, %v12853_v62  ;;  %v4892_v27 = vsel %vm12480_vm2, %v11080_v25, %v11102_v37  ;;  %v4917_v16 = vsel %vm1917_vm4, %v11113_v41, %v10966_v36  ;;  %v7927_v2 = vld [vmem:[%s12248_s7 + $0x8] sm:$0xff]  }
 0x3fd   : > { %v4889_v53 = vsel %vm12880_vm15, %v11156_v47, %v4888_v3  ;;  %v4624_v4 = vrot.slane %v4610_v15, %v12853_v62  ;;  %v4625_v59 = vcombine.high %v4617_v32, %v4617_v32  ;;  %v4813_v44 = vrot.slane %v4617_v32, %v12854_v26  ;;  %7399 = vmatpush3.bf16.msra.mxu0 %v7927_v2  ;;  %vm12887_vm9 = vmmov %vm12880_vm15 }
 0x3fe   : > { %v4890_v0 = vsel %vm12881_vm12, %v11163_v46, %v4889_v53  ;;  %v4874_v3 = vrot.slane %v4617_v32, %v12855_v55  ;;  %v11299_v53 = vrot.slane %v4633_v21, %v12854_v26  ;;  %v4893_v37 = vsel %vm1915_vm3, %v11089_v29, %v4892_v27  ;;  %7400 = vmatprep.subr.bf16.mxu0 %v12773_v10 }
 0x3ff   : > { %vm12883_vm12 = vcmask 1045509   ;;  %v11307_v15 = vcombine.high %v10980_v54, %v10980_v54  ;;  %v11310_v61 = vrot.slane %v4625_v59, %v12854_v26  ;;  %v11313_v32 = vrot.slane %v4624_v4, %v12854_v26 }
 0x400   : > { %12882 = vst [vmem:[#allocation36_spill] sm:$0xff] %v11299_v53  ;;  %v4918_v36 = vsel %vm12883_vm12, %v11123_v22, %v4917_v16  ;;  %v11317_v21 = vsel %vm1917_vm4, %v4813_v44, %v11130_v12  ;;  %v4878_v7 = vrot.slane %v4625_v59, %v12855_v55  ;;  %v4626_v27 = vcombine.high %v4624_v4, %v4624_v4 }
 0x401   : > { %12884 = vst [vmem:[#allocation35_spill] sm:$0xff] %v11310_v61  ;;  %12885 = vst [vmem:[#allocation65_spill] sm:$0xff] %v11317_v21  ;;  %v11321_v16 = vrot.slane %v4624_v4, %v12855_v55  ;;  %v4894_v40 = vsel %vm1917_vm4, %v4874_v3, %v4893_v37  ;;  %v4919_v34 = vsel %vm12880_vm15, %v11146_v30, %v4918_v36  ;;  %vm12886_vm0 = vcmask 1047559  }
 0x402   : > { %v11329_v35 = vsel %vm1911_vm1, %v11310_v61, %v4813_v44  ;;  %v11332_v12 = vsel %vm1911_vm1, %v4878_v7, %v4874_v3  ;;  %v4895_v59 = vsel %vm12883_vm12, %v4878_v7, %v4894_v40  ;;  %v4920_v4 = vsel %vm12886_vm0, %v11126_v45, %v4919_v34  ;;  %vm12888_vm15 = vmmov %vm12883_vm12 }
 0x403   : > { %v11338_v2 = vrot.slane %v4626_v27, %v12855_v55  ;;  %v4896_v37 = vsel %vm12887_vm9, %v11321_v16, %v4895_v59  ;;  %v11343_v36 = vrot.slane %v4626_v27, %v12854_v26  ;;  %v4924_v44 = vsel %vm1917_vm4, %v11310_v61, %v11110_v23  ;;  %vm12889_vm12 = vmmov %vm12886_vm0 }
 0x404   : > { %v4925_v3 = vsel %vm12888_vm15, %v11313_v32, %v4924_v44  ;;  %v11352_v40 = vcombine.high %v11168_v60, %v11168_v60  ;;  %v4949_v34 = vrot.slane %v11009_v43, %v12854_v26  ;;  %v11358_v7 = vrot.slane %v10984_v63, %v12854_v26 }
 0x405   : > { %v4897_v27 = vsel %vm12886_vm0, %v11338_v2, %v4896_v37  ;;  %v4926_v23 = vsel %vm12887_vm9, %v11343_v36, %v4925_v3  ;;  %v11366_v59 = vrot.slane %v10980_v54, %v12854_v26  ;;  %v11370_v44 = vrot.slane %v11307_v15, %v12854_v26  ;;  %vm12894_vm0 = vmmov %vm12888_vm15 }
 0x406   : > { %v7814_v5 = vpack.i.bf16 %v4897_v27, %v4890_v0  ;;  %v4927_v21 = vsel %vm12889_vm12, %v11299_v53, %v4926_v23  ;;  %v4989_v45 = vrot.slane %v11172_v31, %v12854_v26  ;;  %v4993_v37 = vrot.slane %v11168_v60, %v12854_v26  ;;  %vm12895_vm12 = vmmov %vm12887_vm9 }
 0x407   : > { %v7819_v29 = vpack.i.bf16 %v4927_v21, %v4920_v4  ;;  %v4997_v3 = vrot.slane %v11352_v40, %v12854_v26  ;;  %v12890_v61 = vrot.slane %v10976_v13, %v12854_v26  ;;  %v12891_v0 = vrot.slane %v11160_v39, %v12854_v26 }
 0x408   : > { %7815 = vrot.lane.b32.xlu0 %v7814_v5, %s8016_s1  ;;  %v5033_v23 = vrot.slane %v11009_v43, %v12855_v55  ;;  %v5045_v5 = vrot.slane %v10980_v54, %v12855_v55  ;;  %v7928_v54 = vld [vmem:[%s12248_s7 + $0x10] sm:$0xff]  }
 0x409   : > { %v4998_v25 = vsel %vm1911_vm1, %v11018_v20, %v12890_v61  ;;  %v5005_v27 = vsel %vm1911_vm1, %v11202_v52, %v12891_v0  ;;  %v5041_v61 = vrot.slane %v10984_v63, %v12855_v55  ;;  %7820 = vrot.lane.b32.xlu1 %v7819_v29, %s8017_s28  ;;  %v12893_v63 = vrot.slane %v11153_v19, %v12854_v26 }
 0x40a   : > { %v4999_v21 = vsel %vm12480_vm2, %v11022_v8, %v4998_v25  ;;  %v5006_v4 = vsel %vm12480_vm2, %v11206_v42, %v5005_v27  ;;  %v5049_v25 = vrot.slane %v11307_v15, %v12855_v55  ;;  %v12892_v42 = vrot.slane %v10972_v50, %v12854_v26  ;;  %7401 = vmatpush3.bf16.msra.mxu0 %v7928_v54 }
 0x40b   : > { %v5000_v53 = vsel %vm1915_vm3, %v4949_v34, %v4999_v21  ;;  %v5007_v52 = vsel %vm1915_vm3, %v11220_v33, %v5006_v4  ;;  %v5065_v0 = vrot.slane %v11198_v24, %v12855_v55  ;;  %v5073_v33 = vrot.slane %v11172_v31, %v12855_v55  ;;  %7402 = vmatprep.subr.bf16.mxu0 %v12773_v10 }
 0x40c   : > { %v5001_v43 = vsel %vm1917_vm4, %v12892_v42, %v5000_v53  ;;  %v5008_v29 = vsel %vm1917_vm4, %v12893_v63, %v5007_v52  ;;  %v5077_v21 = vrot.slane %v11168_v60, %v12855_v55  ;;  %v5081_v4 = vrot.slane %v11352_v40, %v12855_v55 }
 0x40d   : > { %v5002_v27 = vsel %vm12888_vm15, %v11358_v7, %v5001_v43  ;;  %v5009_v53 = vsel %vm12894_vm0, %v4989_v45, %v5008_v29  ;;  %v12896_v52 = vrot.slane %v10976_v13, %v12855_v55  ;;  %v12897_v42 = vrot.slane %v10997_v9, %v12855_v55 }
 0x40e   : > { %v5003_v24 = vsel %vm12887_vm9, %v11366_v59, %v5002_v27  ;;  %v5010_v31 = vsel %vm12895_vm12, %v4993_v37, %v5009_v53  ;;  %v12898_v63 = vrot.slane %v11160_v39, %v12855_v55  ;;  %v12899_v60 = vrot.slane %v11182_v28, %v12855_v55 }
 0x40f   : > { %v5082_v43 = vsel %vm1911_vm1, %v12897_v42, %v12896_v52  ;;  %vm12900_vm15 = vcmask 1047559   ;;  %v12902_v13 = vrot.slane %v10993_v56, %v12855_v55  ;;  %v12903_v52 = vrot.slane %v11178_v14, %v12855_v55 }
 0x410   : > { %v5089_v29 = vsel %vm1911_vm1, %v12899_v60, %v12898_v63  ;;  %v5004_v27 = vsel %vm12900_vm15, %v11370_v44, %v5003_v24  ;;  %vm12901_vm0 = vmmov %vm12900_vm15  ;;  %v12904_v24 = vrot.slane %v10969_v18, %v12853_v62  ;;  %v12905_v56 = vrot.slane %v10972_v50, %v12855_v55 }
 0x411   : > { %v5011_v53 = vsel %vm12901_vm0, %v4997_v3, %v5010_v31  ;;  %v5083_v9 = vsel %vm12480_vm2, %v12902_v13, %v5082_v43  ;;  %v5090_v39 = vsel %vm12480_vm2, %v12903_v52, %v5089_v29  ;;  %v12906_v14 = vrot.slane %v11153_v19, %v12855_v55 }
 0x412   : > { %v7824_v28 = vpack.i.bf16 %v5011_v53, %v5004_v27  ;;  %v5084_v54 = vsel %vm1915_vm3, %v5033_v23, %v5083_v9  ;;  %v5091_v42 = vsel %vm1915_vm3, %v5065_v0, %v5090_v39  ;;  %v5109_v31 = vrot.slane %v12904_v24, %v12854_v26 }
 0x413   : > { %v5085_v43 = vsel %vm1917_vm4, %v12905_v56, %v5084_v54  ;;  %v5092_v63 = vsel %vm1917_vm4, %v12906_v14, %v5091_v42  ;;  %v5118_v23 = vsel %vm1911_vm1, %v11022_v8, %v11018_v20  ;;  %v5128_v0 = vsel %vm1917_vm4, %v4989_v45, %v11242_v11  ;;  %v7929_v45 = vld [vmem:[%s12248_s7 + $0x18] sm:$0xff]  }
 0x414   : > { %7825 = vrot.lane.b32.xlu0 %v7824_v28, %s8011_s3  ;;  %vm12907_vm9 = vcmask 1045509   ;;  %v5119_v60 = vsel %vm12480_vm2, %v4949_v34, %v5118_v23  ;;  %vm12910_vm0 = vcmask 1046534   ;;  %7403 = vmatpush3.bf16.msra.mxu0 %v7929_v45  ;;  %v12922_v28 = vld [vmem:[#allocation62_spill] sm:$0xff]  ;;  %v12928_v23 = vld [vmem:[#allocation111_spill] sm:$0xff]  ;;  %s12936_s3 = smov 48  }
 0x415   : > { %v5086_v18 = vsel %vm12907_vm9, %v5041_v61, %v5085_v43  ;;  %vm12908_vm12 = vmmov %vm12907_vm9  ;;  %v5120_v20 = vsel %vm1915_vm3, %v11046_v49, %v5119_v60  ;;  %7404 = vmatprep.subr.bf16.mxu0 %v12773_v10  ;;  %v5191_v54 = vsel %vm12480_vm2, %v11156_v47, %v12922_v28  ;;  %v12923_v42 = vld [vmem:[#allocation110_spill] sm:$0xff] }
 0x416   : > { %v5093_v50 = vsel %vm12908_vm12, %v5073_v33, %v5092_v63  ;;  %vm12909_vm15 = vmmov %vm12907_vm9  ;;  %v5087_v19 = vsel %vm12910_vm0, %v5045_v5, %v5086_v18  ;;  %vm12913_vm9 = vcmask 1047559   ;;  %v5121_v34 = vsel %vm1917_vm4, %v11358_v7, %v5120_v20  ;;  %v12926_v14 = vld [vmem:[#allocation106_spill] sm:$0xff] }
 0x417   : > { %v5129_v29 = vsel %vm12909_vm15, %v4993_v37, %v5128_v0  ;;  %vm12911_vm5 = vmmov %vm12910_vm0  ;;  %v5088_v11 = vsel %vm12913_vm9, %v5049_v25, %v5087_v19  ;;  %v5149_v33 = vrot.slane %v11255_v17, %v12854_v26  ;;  %v5155_v7 = vsel %vm12480_vm2, %v11123_v22, %v11138_v6  ;;  %v12933_v19 = vld [vmem:[#allocation105_spill] sm:$0xff] }
 0x418   : > { %v5094_v27 = vsel %vm12911_vm5, %v5077_v21, %v5093_v50  ;;  %vm12912_vm6 = vmmov %vm12910_vm0  ;;  %vm12916_vm5 = vcmask 1045509   ;;  %v5192_v56 = vsel %vm1915_vm3, %v11163_v46, %v5191_v54  ;;  %v12930_v50 = vld [vmem:[#allocation109_spill] sm:$0xff]  ;;  %v12955_v54 = vld [vmem:[#allocation108_spill] sm:$0xff] }
 0x419   : > { %v5130_v8 = vsel %vm12912_vm6, %v4997_v3, %v5129_v29  ;;  %vm12914_vm12 = vmmov %vm12913_vm9  ;;  %v5122_v49 = vsel %vm12916_vm5, %v11366_v59, %v5121_v34  ;;  %v4650_v3 = vcombine.high %v11255_v17, %v11255_v17  ;;  %v5185_v59 = vrot.slane %v11255_v17, %v12855_v55  ;;  %v12939_v34 = vld [vmem:[#allocation43_spill] sm:$0xff] }
 0x41a   : > { %v5095_v61 = vsel %vm12914_vm12, %v5081_v4, %v5094_v27  ;;  %vm12915_vm15 = vmmov %vm12913_vm9  ;;  %v12919_v17 = vrot.slane %v11248_v57, %v12854_v26  ;;  %v5214_v29 = vsel %vm1911_vm1, %v11123_v22, %v11113_v41 }
 0x41b   : > { %v5131_v37 = vsel %vm12915_vm15, %v11194_v58, %v5130_v8  ;;  %v7829_v5 = vpack.i.bf16 %v5095_v61, %v5088_v11  ;;  %vm12917_vm6 = vmmov %vm12910_vm0  ;;  %v5162_v58 = vsel %vm12480_vm2, %v11313_v32, %v11329_v35  ;;  %v5153_v4 = vrot.slane %v4650_v3, %v12854_v26  ;;  %v12935_v8 = vld [vmem:[#allocation35_spill] sm:$0xff] }
 0x41c   : > { %v5123_v25 = vsel %vm12917_vm6, %v11370_v44, %v5122_v49  ;;  %vm12918_vm0 = vmmov %vm12913_vm9  ;;  %v5156_v44 = vsel %vm1915_vm3, %v11146_v30, %v5155_v7  ;;  %v5163_v6 = vsel %vm1915_vm3, %v11343_v36, %v5162_v58  ;;  %v5189_v9 = vrot.slane %v4650_v3, %v12855_v55  ;;  %v7930_v49 = vld [vmem:[%s12248_s7 + $0x20] ss:$0 sps:$4 sm:$0xff]   ;;  %v12940_v7 = vld [vmem:[#allocation36_spill] sm:$0xff] }
 0x41d   : > { %7830 = vrot.lane.b32.xlu1 %v7829_v5, %s12484_s5  ;;  %v5124_v21 = vsel %vm12918_vm0, %v5109_v31, %v5123_v25  ;;  %v5157_v35 = vsel %vm1917_vm4, %v11058_v38, %v5156_v44  ;;  %v5164_v13 = vsel %vm1917_vm4, %v12919_v17, %v5163_v6  ;;  %vm12920_vm9 = vmmov %vm12916_vm5  ;;  %v5198_v38 = vsel %vm12480_vm2, %v11321_v16, %v11332_v12 }
 0x41e   : > { %v7834_v53 = vpack.i.bf16 %v5131_v37, %v5124_v21  ;;  %v5158_v52 = vsel %vm12920_vm9, %v11061_v48, %v5157_v35  ;;  %vm12921_vm12 = vmmov %vm12916_vm5  ;;  %v5199_v43 = vsel %vm1915_vm3, %v11338_v2, %v5198_v38  ;;  %v5193_v16 = vsel %vm1917_vm4, %v12928_v23, %v5192_v56  ;;  %v12944_v35 = vld [vmem:[#allocation65_spill] sm:$0xff]  ;;  %v12960_v56 = vld [vmem:[#allocation102_spill] sm:$0xff] }
 0x41f   : > { %v5165_v39 = vsel %vm12921_vm12, %v11274_v1, %v5164_v13  ;;  %vm12924_vm15 = vmmov %vm12917_vm6  ;;  %v12929_v12 = vrot.slane %v11248_v57, %v12855_v55  ;;  %v5194_v46 = vsel %vm12920_vm9, %v12930_v50, %v5193_v16  ;;  %v12931_v2 = vrot.slane %v11259_v51, %v12855_v55  ;;  %v12937_v51 = vld [vmem:[#allocation112_spill] sm:$0xff]  ;;  %v12963_v23 = vld [vmem:[#allocation107_spill] sm:$0xff] }
 0x420   : > { %7835 = vrot.lane.b32.xlu0 %v7834_v53, %s8015_s23  ;;  %v5159_v24 = vsel %vm12924_vm15, %v12923_v42, %v5158_v52  ;;  %vm12925_vm5 = vmmov %vm12917_vm6  ;;  %v5215_v20 = vsel %vm12480_vm2, %v11146_v30, %v5214_v29  ;;  %v5221_v45 = vsel %vm1911_vm1, %v11313_v32, %v12935_v8  ;;  %v5288_v28 = vsel %vm4390_vm11, %v7930_v49, 0  ;;  %v12970_v29 = vld [vmem:[#allocation101_spill] sm:$0xff]  ;;  %s13029_s23 = smov 96  }
 0x421   : > { %v5166_v31 = vsel %vm12925_vm5, %v5149_v33, %v5165_v39  ;;  %vm12927_vm6 = vmmov %vm12918_vm0  ;;  %v5200_v0 = vsel %vm1917_vm4, %v12929_v12, %v5199_v43  ;;  %v5216_v37 = vsel %vm1915_vm3, %v12939_v34, %v5215_v20  ;;  %v5222_v5 = vsel %vm12480_vm2, %v11343_v36, %v5221_v45  ;;  %7405 = vmatpush3.bf16.msra.mxu0 %v5288_v28 }
 0x422   : > { %v5160_v47 = vsel %vm12927_vm6, %v12926_v14, %v5159_v24  ;;  %v5167_v63 = vsel %vm12918_vm0, %v5153_v4, %v5166_v31  ;;  %vm12932_vm12 = vmmov %vm12920_vm9  ;;  %v5217_v25 = vsel %vm1917_vm4, %v11061_v48, %v5216_v37  ;;  %v5223_v58 = vsel %vm1915_vm3, %v12940_v7, %v5222_v5  ;;  %7410 = vmatprep.subr.bf16.mxu0 %v12773_v10 }
 0x423   : > { %v7839_v18 = vpack.i.bf16 %v5167_v63, %v5160_v47  ;;  %v5201_v60 = vsel %vm12932_vm12, %v12931_v2, %v5200_v0  ;;  %vm12934_vm15 = vmmov %vm12925_vm5  ;;  %v5224_v6 = vsel %vm1917_vm4, %v11274_v1, %v5223_v58  ;;  %v5428_v38 = vrot.slane %v12955_v54, 3  ;;  %v12962_v47 = vld [vmem:[#allocation63_spill] sm:$0xff]  ;;  %v12965_v0 = vld [vmem:[#allocation46_spill] sm:$0xff] }
 0x424   : > { %v5195_v27 = vsel %vm12934_vm15, %v12933_v19, %v5194_v46  ;;  %v5202_v57 = vsel %vm12925_vm5, %v5185_v59, %v5201_v60  ;;  %vm12938_vm6 = vmmov %vm12918_vm0  ;;  %v12941_v59 = vld [vmem:[#allocation113_spill] sm:$0xff]  ;;  %v12961_v43 = vrot.slane %v12960_v56, 6  ;;  %v5440_v63 = vrot.slane %v12962_v47, 4  ;;  %v12968_v2 = vld [vmem:[#allocation64_spill] sm:$0xff] }
 0x425   : > { %7840 = vrot.lane.b32.xlu1 %v7839_v18, %s12936_s3  ;;  %v5196_v11 = vsel %vm12938_vm6, %v12937_v51, %v5195_v27  ;;  %v5203_v61 = vsel %vm12918_vm0, %v5189_v9, %v5202_v57  ;;  %v4827_v21 = vsel %vm12920_vm9, %v11113_v41, %v12941_v59  ;;  %vm12942_vm12 = vmmov %vm12920_vm9  ;;  %v12951_v9 = vld [vmem:[#allocation45_spill] sm:$0xff]  ;;  %v12964_v16 = vrot.slane %v12963_v23, 5  ;;  %v12966_v18 = vld [vmem:[#allocation27_spill] sm:$0xff] }
 0x426   : > { %v7844_v3 = vpack.i.bf16 %v5203_v61, %v5196_v11  ;;  %v5218_v44 = vsel %vm12942_vm12, %v12923_v42, %v5217_v25  ;;  %vm12943_vm15 = vmmov %vm12925_vm5  ;;  %v12956_v42 = vld [vmem:[#allocation28_spill] sm:$0xff]  ;;  %v12967_v50 = vrot.slane %v12966_v18, 6  ;;  %v5442_v60 = vrot.slane %v12968_v2, 3  ;;  %v4493_v23 = vld [vmem:[%s12250_s9] sm:$0xf] }
 0x427   : > { %v4828_v53 = vsel %vm12943_vm15, %v11123_v22, %v4827_v21  ;;  %vm12945_vm5 = vmmov %vm12920_vm9  ;;  %vm12949_vm9 = vcmask 1047559   ;;  %v12971_v19 = vrot.slane %v12970_v29, 4  ;;  %v5451_v18 = vsel %vm4390_vm11, %v4493_v23, 0  ;;  %v7932_v2 = vld [vmem:[%s12252_s11 + $0x8] sm:$0xff]   ;;  %v7177_v29 = vld [vmem:[%s12249_s8] ss:$0 sm:$0xff] }
 0x428   : > { %v4834_v48 = vsel %vm12945_vm5, %v12935_v8, %v12944_v35  ;;  %7845 = vrot.lane.b32.xlu0 %v7844_v3, %s12946_s0  ;;  %vm12947_vm6 = vmmov %vm12943_vm15  ;;  %v4829_v13 = vsel %vm12949_vm9, %v11146_v30, %v4828_v53  ;;  %v5371_v30 = vpack.c.bf16 %v11307_v15, %v11307_v15  ;;  %v5437_v46 = vsel %vm1915_vm3, %v12967_v50, %v12965_v0  ;;  %v7931_v50 = vld [vmem:[%s12252_s11] sm:$0xff]   ;;  %s12482_s0 = smov 96  }
 0x429   : > { %v5219_v17 = vsel %vm12947_vm6, %v12926_v14, %v5218_v44  ;;  %vm12948_vm0 = vmmov %vm12945_vm5  ;;  %vm12984_vm11 = vcmask 1044480  }
 0x42a   : > { %v5225_v41 = vsel %vm12948_vm0, %v5149_v33, %v5224_v6  ;;  %vm12950_vm12 = vmmov %vm12947_vm6  ;;  %v5409_v15 = vunpack.c.l.b16 %v5371_v30 }
 0x42b   : > { %v4835_v1 = vsel %vm12950_vm12, %v11313_v32, %v4834_v48  ;;  %vm12952_vm2 = vmmov %vm12949_vm9  ;;  %v12958_v32 = vld [vmem:[#allocation9_spill] sm:$0xff] }
 0x42c   : > { %v5220_v22 = vsel %vm12952_vm2, %v12951_v9, %v5219_v17  ;;  %vm12953_vm15 = vmmov %vm12947_vm6  ;;  %v5438_v24 = vrot.slane %v12958_v32, 5  ;;  %v5430_v8 = vrot.slane %v5409_v15, 2 }
 0x42d   : > { %v5226_v52 = vsel %vm12953_vm15, %v5153_v4, %v5225_v41  ;;  %vm12954_vm5 = vmmov %vm12952_vm2  ;;  %v12959_v4 = vld [vmem:[#allocation104_spill] sm:$0xff] }
 0x42e   : > { %v4836_v39 = vsel %vm12954_vm5, %v11343_v36, %v4835_v1  ;;  %vm12957_vm6 = vmmov %vm12952_vm2  ;;  %vm8020_vm2 = vmmov 0   ;;  %v5379_v36 = vpack.c.bf16 %v11352_v40, %v11352_v40  ;;  %v5423_v14 = vsel %vm1915_vm3, %v12961_v43, %v12959_v4 }
 0x42f   : > { %v5227_v33 = vsel %vm12957_vm6, %v12956_v42, %v5226_v52  ;;  %7406 = vmatprep.mubr.msk.bf16.mxu0 %vm8020_vm2, %v12773_v10  ;;  %v5425_v12 = vsel %vm1917_vm4, %v12964_v16, %v5423_v14  ;;  %v5439_v57 = vsel %vm1917_vm4, %v5438_v24, %v5437_v46  ;;  %vm12972_vm9 = vmmov %vm12950_vm12  ;;  %v8021_v46 = vmov 0  }
 0x430   : > { %v7849_v31 = vpack.i.bf16 %v5227_v33, %v5220_v22  ;;  %v5417_v40 = vunpack.c.l.b16 %v5379_v36  ;;  %v5427_v27 = vsel %vm12948_vm0, %v12971_v19, %v5425_v12  ;;  %vm12973_vm12 = vmmov %vm12948_vm0  ;;  %vm12976_vm0 = vcmask 392192   ;;  %5713 = vmatprep.subr.bf16.mxu1 %v8021_v46 }
 0x431   : > { %v5429_v20 = vsel %vm12972_vm9, %v5428_v38, %v5427_v27  ;;  %v5441_v45 = vsel %vm12973_vm12, %v5440_v63, %v5439_v57  ;;  %vm12974_vm15 = vmmov %vm12972_vm9  ;;  %5714 = vmatpush1.bf16.msra.mxu1 %v7931_v50 }
 0x432   : > { %7850 = vrot.lane.b32.xlu1 %v7849_v31, %s12969_s22  ;;  %v5443_v51 = vsel %vm12974_vm15, %v5442_v60, %v5441_v45  ;;  %v5444_v11 = vrot.slane %v5417_v40, 2  ;;  %v5431_v61 = vsel %vm12954_vm5, %v5430_v8, %v5429_v20  ;;  %vm12975_vm6 = vmmov %vm12954_vm5  ;;  %vm12980_vm15 = vcmask 523264   ;;  %5715 = vmatprep.subr.bf16.mxu1 %v8021_v46  ;;  %v7933_v60 = vld [vmem:[%s12252_s11 + $0x10] sm:$0xff]   ;;  %v7934_v40 = vld [vmem:[%s12252_s11 + $0x18] sm:$0xff]  }
 0x433   : > { %vm12977_vm9 = vmmov %vm12976_vm0  ;;  %vm12982_vm5 = vcmask 588800  }
 0x434   : > { %v5445_v34 = vsel %vm12975_vm6, %v5444_v11, %v5443_v51  ;;  %vm5523_vm6 = vcmask 1042432  }
 0x435   : > { %v5446_v37 = vpack.c.b16 %v5445_v34, %v5431_v61  ;;  %5716 = vmatpush1.bf16.msra.mxu1 %v7932_v2 }
 0x436   : > { %5717 = vmatprep.subr.bf16.mxu1 %v8021_v46 }
 0x439   : > { %5718 = vmatpush1.bf16.msra.mxu1 %v7933_v60 }
 0x43a   : > { %5719 = vmatprep.subr.bf16.mxu1 %v8021_v46 }
 0x43d   : > { %5720 = vmatpush1.bf16.msra.mxu1 %v7934_v40 }
 0x43e   : > { %5721 = vmatprep.subr.bf16.mxu1 %v8021_v46 }
 0x47a   : > { %v7816_v5 = vpop.permute.xlu0 %7815 }
 0x47b   : > { %v7821_v49 = vpop.permute.xlu1 %7820  ;;  %v7818_v25 = vunpack.i.h.bf16 %v7816_v5  ;;  %v7817_v7 = vunpack.i.l.bf16 %v7816_v5 }
 0x47c   : > { %v7823_v59 = vunpack.i.h.bf16 %v7821_v49  ;;  %v7822_v21 = vunpack.i.l.bf16 %v7821_v49 }
 0x47d   : > { %v5234_v44 = vsel %vm4269_vm13, %v4829_v13, %v7817_v7  ;;  %v5235_v6 = vsel %vm4269_vm13, %v4836_v39, %v7818_v25 }
 0x47e   : > { %v5236_v17 = vsel %vm4278_vm14, %v5234_v44, %v7822_v21  ;;  %v5237_v41 = vsel %vm4278_vm14, %v5235_v6, %v7823_v59 }
 0x486   : > { %v7826_v3 = vpop.permute.xlu0 %7825 }
 0x487   : > { %v7828_v53 = vunpack.i.h.bf16 %v7826_v3  ;;  %v7827_v35 = vunpack.i.l.bf16 %v7826_v3 }
 0x489   : > { %v5238_v22 = vsel %vm3438_vm7, %v5236_v17, %v7827_v35  ;;  %v5239_v52 = vsel %vm3438_vm7, %v5237_v41, %v7828_v53  ;;  %vm12978_vm7 = vcmask 457728  }
 0x48a   : > { %vm12979_vm12 = vmmov %vm12978_vm7 }
 0x48f   : > { %v7831_v58 = vpop.permute.xlu1 %7830 }
 0x490   : > { %v7833_v1 = vunpack.i.h.bf16 %v7831_v58  ;;  %v7832_v9 = vunpack.i.l.bf16 %v7831_v58 }
 0x492   : > { %v7836_v48 = vpop.permute.xlu0 %7835  ;;  %v5240_v13 = vsel %vm4295_vm10, %v5238_v22, %v7832_v9  ;;  %v5241_v39 = vsel %vm4295_vm10, %v5239_v52, %v7833_v1 }
 0x493   : > { %v7838_v28 = vunpack.i.h.bf16 %v7836_v48  ;;  %v7837_v54 = vunpack.i.l.bf16 %v7836_v48 }
 0x495   : > { %v5242_v32 = vsel %vm4304_vm8, %v5240_v13, %v7837_v54  ;;  %v5243_v24 = vsel %vm4304_vm8, %v5241_v39, %v7838_v28  ;;  %vm12981_vm8 = vmmov %vm12980_vm15 }
 0x497   : > { %v7841_v38 = vpop.permute.xlu1 %7840 }
 0x498   : > { %v7843_v42 = vunpack.i.h.bf16 %v7841_v38  ;;  %v7842_v33 = vunpack.i.l.bf16 %v7841_v38 }
 0x49a   : > { %v7846_v30 = vpop.permute.xlu0 %7845  ;;  %v5244_v4 = vsel %vm12976_vm0, %v5242_v32, %v7842_v33  ;;  %v5245_v56 = vsel %vm12977_vm9, %v5243_v24, %v7843_v42  ;;  %v12983_v42 = vld [vmem:[#allocation7_spill] sm:$0xff]  ;;  %vm5524_vm0 = vcmask 1046532   ;;  %vm12985_vm9 = vcmask 1041408  }
 0x49b   : > { %v7848_v31 = vunpack.i.h.bf16 %v7846_v30  ;;  %v7847_v36 = vunpack.i.l.bf16 %v7846_v30  ;;  %v11701_v33 = vsel %vm12984_vm11, %v12983_v42, 0.0 }
 0x49c   : > { %v7186_v23 = vrot.slane %v11701_v33, 9 }
 0x49d   : > { %v5246_v43 = vsel %vm12978_vm7, %v5244_v4, %v7847_v36  ;;  %v5247_v14 = vsel %vm12979_vm12, %v5245_v56, %v7848_v31  ;;  %v11705_v31 = vcombine.high %v11701_v33, %v11701_v33  ;;  %v7935_v56 = vld [vmem:[%s12252_s11 + $0x20] sm:$0xff]   ;;  %vm11724_vm12 = vmor %vm5523_vm6, %vm5524_vm0 }
 0x49e   : > { %5722 = vmatpush1.bf16.msra.mxu1 %v7935_v56 }
 0x49f   : > { %5723 = vmatprep.subr.bf16.mxu1 %v8021_v46 }
 0x4a4   : > { %v7851_v47 = vpop.permute.xlu1 %7850 }
 0x4a5   : > { %v7853_v63 = vunpack.i.h.bf16 %v7851_v47  ;;  %v7852_v15 = vunpack.i.l.bf16 %v7851_v47 }
 0x4a7   : > { %v5248_v16 = vsel %vm12980_vm15, %v5246_v43, %v7852_v15  ;;  %v5249_v12 = vsel %vm12981_vm8, %v5247_v14, %v7853_v63  ;;  %v7190_v63 = vrot.slane %v11701_v33, 10  ;;  %v5546_v15 = vrot.slane %v11705_v31, 6 }
 0x4a8   : > { %v5250_v0 = vpack.c.bf16 %v5249_v12, %v5248_v16  ;;  %v5528_v16 = vrot.slane %v11705_v31, 5  ;;  %v7936_v12 = vld [vmem:[%s12252_s11 + $0x28] sm:$0xff]   ;;  %vm12990_vm15 = vcmask 1040384  }
 0x4a9   : > { %vm12991_vm8 = vmmov %vm12990_vm15  ;;  %5724 = vmatpush1.bf16.msra.mxu1 %v7936_v12 }
 0x4aa   : > { %7407 = vmatmul.mubr.msk.bf16.vlgmr.msra.gmra.mrb[8].mxu0 %vm12982_vm5, %v5250_v0  ;;  %vm12992_vm5 = vmmov %vm12984_vm11  ;;  %5725 = vmatprep.subr.bf16.mxu1 %v8021_v46 }
 0x4ab   : > { %7411 = vmatpush3.bf16.msra.mxu0 %v5451_v18  ;;  %7412 = vmatprep.mubr.msk.bf16.mxu0 %vm8020_vm2, %v12773_v10  ;;  %vm12993_vm11 = vmmov %vm12992_vm5 }
 0x4ac   : > { %6176 = vmatprep.subr.bf16.mxu0 %v8021_v46  ;;  %vm12995_vm0 = vmmov %vm12991_vm8 }
 0x4b2   : > { %7413 = vmatmul.mubr.msk.bf16.vlgmr.msra.gmra.mrb[12].mxu0 %vm4269_vm13, %v5446_v37  ;;  %vm5542_vm13 = vcmask 1045508  }
 0x4b3   : > { %vm11711_vm7 = vmor %vm12985_vm9, %vm5542_vm13 }
 0x4b4   : > { %vm12994_vm13 = vmmov %vm12991_vm8 }
 0x4b5   : > { %vm12996_vm9 = vmmov %vm12992_vm5 }
 0x57d   : > { %v5324_v19 = vpop.f32.mrb[8].mxu0 }
 0x57e   : > { %v5325_v27 = vadd.f32 %v7177_v29, %v5324_v19  ;;  %v7408_v57 = vpop.f32.mrb[9].mxu0 }
 0x57f   : > { %v5327_v20 = vpop.f32.mrb[10].mxu0 }
 0x580   : > { %v5328_v8 = vadd.f32 %v7177_v29, %v5327_v20  ;;  %v7409_v45 = vpop.f32.mrb[11].mxu0  ;;  %v5331_v51 = vsel %vm4278_vm14, %v5325_v27, 0.0 }
 0x581   : > { %v11739_v45 = vsel %vm11724_vm12, %v7186_v23, %v5528_v16 }
 0x582   : > { %v5332_v11 = vsel %vm4278_vm14, %v5328_v8, 0.0 }
 0x583   : > { %v5333_v61 = vadd.f32 %v5332_v11, %v5331_v51 }
 0x585   : > { %v5334_v34 = vrot.slane %v5333_v61, 4  ;;  %v11693_v37 = vpop.f32.mrb[12].mxu0 }
 0x586   : > { %v7414_v5 = vpop.f32.mrb[13].mxu0 }
 0x587   : > { %v5335_v49 = vadd.f32 %v5334_v34, %v5333_v61  ;;  %v11695_v3 = vpop.f32.mrb[14].mxu0 }
 0x588   : > { %v7415_v25 = vpop.f32.mrb[15].mxu0 }
 0x589   : > { %v5336_v7 = vrot.slane %v5335_v49, 2 }
 0x58b   : > { %v5337_v58 = vadd.f32 %v5336_v7, %v5335_v49 }
 0x58d   : > { %v5338_v59 = vrot.slane %v5337_v58, 1 }
 0x58f   : > { %v5339_v21 = vadd.f32 %v5338_v59, %v5337_v58 }
 0x591   : > { %v5341_v44 = vmul.f32 0.0625, %v5339_v21 }
 0x593   : > { %v5342_v6 = vsub.f32 %v5325_v27, %v5341_v44  ;;  %v5343_v53 = vsub.f32 %v5328_v8, %v5341_v44  ;;  %v5547_v8 = vsel %vm11711_vm7, %v7190_v63, %v5546_v15 }
 0x595   : > { %v5344_v35 = vmul.f32 %v5342_v6, %v5342_v6  ;;  %v5345_v48 = vmul.f32 %v5343_v53, %v5343_v53 }
 0x597   : > { %v5346_v17 = vsel %vm4278_vm14, %v5344_v35, 0.0  ;;  %v5347_v41 = vsel %vm4278_vm14, %v5345_v48, 0.0 }
 0x598   : > { %v5348_v1 = vadd.f32 %v5347_v41, %v5346_v17 }
 0x59a   : > { %v5349_v9 = vrot.slane %v5348_v1, 4 }
 0x59c   : > { %v5350_v22 = vadd.f32 %v5349_v9, %v5348_v1 }
 0x59e   : > { %v5351_v52 = vrot.slane %v5350_v22, 2 }
 0x5a0   : > { %v5352_v28 = vadd.f32 %v5351_v52, %v5350_v22  ;;  %v7937_v22 = vld [vmem:[%s12252_s11 + $0x30] sm:$0xff]  }
 0x5a1   : > { %5726 = vmatpush1.bf16.msra.mxu1 %v7937_v22 }
 0x5a2   : > { %v5353_v54 = vrot.slane %v5352_v28, 1  ;;  %5727 = vmatprep.subr.bf16.mxu1 %v8021_v46 }
 0x5a4   : > { %v5354_v38 = vadd.f32 %v5353_v54, %v5352_v28 }
 0x5a6   : > { %v5355_v13 = vmul.f32 0.0625, %v5354_v38 }
 0x5a8   : > { %v5356_v39 = vadd.f32 1e-05, %v5355_v13 }
 0x5aa   : > { %7986 = vrsqrt.f32 %v5356_v39 }
 0x5b4   : > { %v7987_v30 = vpop.eup %7986 }
 0x5b5   : > { %v5358_v32 = vmul.f32 %v7987_v30, %v5342_v6  ;;  %v5359_v24 = vmul.f32 %v7987_v30, %v5343_v53 }
 0x5b7   : > { %v5360_v36 = vmul.f32 0.2, %v5358_v32  ;;  %v5361_v4 = vmul.f32 0.2, %v5359_v24 }
 0x5b9   : > { %v5362_v43 = vmax.f32 %v5358_v32, %v5360_v36  ;;  %v5363_v14 = vmax.f32 %v5359_v24, %v5361_v4 }
 0x5bb   : > { %v5496_v0 = vcombine.high %v5362_v43, %v5362_v43  ;;  %v5497_v18 = vcombine.high %v5363_v14, %v5363_v14  ;;  %v5498_v50 = vrot.slane %v5362_v43, 7  ;;  %v5500_v2 = vrot.slane %v5363_v14, 7  ;;  %v7938_v43 = vld [vmem:[%s12252_s11 + $0x38] sm:$0xff]  }
 0x5bc   : > { %5728 = vmatpush1.bf16.msra.mxu1 %v7938_v43 }
 0x5bd   : > { %v5499_v40 = vrot.slane %v5496_v0, 7  ;;  %v5501_v29 = vrot.slane %v5497_v18, 7  ;;  %v5508_v19 = vsel %vm12990_vm15, 0.0, %v5500_v2  ;;  %v5506_v27 = vsel %vm12991_vm8, 0.0, %v5498_v50  ;;  %vm12997_vm15 = vmmov %vm12992_vm5  ;;  %5729 = vmatprep.subr.bf16.mxu1 %v8021_v46 }
 0x5be   : > { %v5513_v57 = vsel %vm12992_vm5, %v5508_v19, 0.0  ;;  %v11733_v20 = vsel %vm12993_vm11, %v5506_v27, 0.0  ;;  %vm13000_vm5 = vcmask 523264  }
 0x5bf   : > { %v5509_v51 = vsel %vm12994_vm13, 0.0, %v5501_v29  ;;  %v5507_v11 = vsel %vm12995_vm0, 0.0, %v5499_v40  ;;  %v5520_v61 = vcombine.high %v11733_v20, %v11733_v20  ;;  %v5522_v34 = vcombine.high %v5513_v57, %v5513_v57  ;;  %vm13001_vm11 = vmmov %vm13000_vm5 }
 0x5c0   : > { %v11747_v5 = vsel %vm12996_vm9, %v5509_v51, 0.0  ;;  %v5512_v49 = vsel %vm12997_vm15, %v5507_v11, 0.0  ;;  %v7191_v25 = vrot.slane %v11733_v20, 10  ;;  %v7193_v7 = vrot.slane %v5513_v57, 10 }
 0x5c1   : > { %v5590_v58 = vcombine.low %v11733_v20, %v5512_v49  ;;  %v5591_v59 = vcombine.low %v5513_v57, %v11747_v5  ;;  %v5521_v21 = vcombine.high %v5512_v49, %v5512_v49  ;;  %v5550_v44 = vrot.slane %v5520_v61, 6 }
 0x5c2   : > { %v7192_v6 = vrot.slane %v5512_v49, 10  ;;  %v5558_v53 = vrot.slane %v5522_v34, 6  ;;  %v5561_v35 = vcombine.high %v11747_v5, %v11747_v5  ;;  %v7195_v48 = vrot.slane %v11747_v5, 10 }
 0x5c3   : > { %v7854_v17 = vpack.i.bf16 %v5591_v59, %v5590_v58  ;;  %v5551_v41 = vsel %vm11711_vm7, %v7191_v25, %v5550_v44  ;;  %v5554_v1 = vrot.slane %v5521_v21, 6  ;;  %v7187_v9 = vrot.slane %v11733_v20, 9 }
 0x5c4   : > { %v5559_v52 = vsel %vm11711_vm7, %v7193_v7, %v5558_v53  ;;  %v5568_v28 = vrot.slane %v5561_v35, 6  ;;  %v5582_v54 = vcombine.low %v5547_v8, %v5551_v41  ;;  %v5532_v38 = vrot.slane %v5520_v61, 5  ;;  %v7939_v61 = vld [vmem:[%s12252_s11 + $0x40] sm:$0xff]  }
 0x5c5   : > { %7855 = vrot.lane.b32.xlu0 %v7854_v17, %s12936_s3  ;;  %v5555_v13 = vsel %vm11711_vm7, %v7192_v6, %v5554_v1  ;;  %v7188_v39 = vrot.slane %v5512_v49, 9  ;;  %v5536_v30 = vrot.slane %v5521_v21, 5  ;;  %v7189_v32 = vrot.slane %v5513_v57, 9  ;;  %5730 = vmatpush1.bf16.msra.mxu1 %v7939_v61 }
 0x5c6   : > { %v5569_v24 = vsel %vm11711_vm7, %v7195_v48, %v5568_v28  ;;  %v5583_v36 = vcombine.low %v5555_v13, %v5559_v52  ;;  %v5533_v4 = vsel %vm11724_vm12, %v7187_v9, %v5532_v38  ;;  %v5540_v56 = vrot.slane %v5522_v34, 5  ;;  %7416 = vmatprep.subr.bf16.mxu1 %v12773_v10 }
 0x5c7   : > { %v5628_v14 = vcombine.low %v5569_v24, %v5547_v8  ;;  %v5537_v63 = vsel %vm11724_vm12, %v7188_v39, %v5536_v30  ;;  %v5574_v15 = vcombine.low %v11739_v45, %v5533_v4  ;;  %v7194_v47 = vrot.slane %v11747_v5, 9 }
 0x5c8   : > { %v7864_v23 = vpack.i.bf16 %v5583_v36, %v5582_v54  ;;  %v5541_v16 = vsel %vm11724_vm12, %v7189_v32, %v5540_v56  ;;  %v5564_v12 = vrot.slane %v5561_v35, 5  ;;  %v5598_v0 = vcombine.low %v5533_v4, %v5537_v63 }
 0x5c9   : > { %v5649_v18 = vpack.c.bf16 %v5628_v14, %v5583_v36  ;;  %v5575_v50 = vcombine.low %v5537_v63, %v5541_v16  ;;  %v5606_v2 = vcombine.low %v5551_v41, %v5555_v13  ;;  %v5607_v40 = vcombine.low %v5559_v52, %v5569_v24 }
 0x5ca   : > { %7865 = vrot.lane.b32.xlu1 %v7864_v23, %s12484_s5  ;;  %v5565_v29 = vsel %vm11724_vm12, %v7194_v47, %v5564_v12  ;;  %v5571_v19 = vcombine.low %v5512_v49, %v5513_v57  ;;  %v5614_v60 = vcombine.low %v11747_v5, %v11701_v33  ;;  %v5570_v59 = vcombine.low %v11701_v33, %v11733_v20  ;;  %v7940_v12 = vld [vmem:[%s12256_s15] sm:$0xff]  }
 0x5cb   : > { %7206 = vmatprep.mubr.msk.bf16.mxu1 %vm4278_vm14, %v5649_v18  ;;  %v7859_v27 = vpack.i.bf16 %v5575_v50, %v5574_v15  ;;  %v5599_v8 = vcombine.low %v5541_v16, %v5565_v29  ;;  %v7879_v51 = vpack.i.bf16 %v5607_v40, %v5606_v2  ;;  %v5621_v11 = vcombine.low %v5565_v29, %v11739_v45  ;;  %v7941_v2 = vld [vmem:[%s12254_s13] sm:$0xff]  }
 0x5cc   : > { %v7874_v45 = vpack.i.bf16 %v5614_v60, %v5571_v19  ;;  %vm5639_vm7 = vcmask 654336   ;;  %vm12998_vm12 = vcmask 392192   ;;  %vm5642_vm13 = vcmask 785408   ;;  %6177 = vmatpush1.bf16.msra.mxu0 %v7941_v2 }
 0x5cd   : > { %7860 = vrot.lane.b32.xlu0 %v7859_v27, %s8017_s28  ;;  %v7869_v34 = vpack.i.bf16 %v5599_v8, %v5598_v0  ;;  %v7884_v57 = vpack.i.bf16 %v5621_v11, %v5575_v50  ;;  %vm12999_vm8 = vmmov %vm12998_vm12  ;;  %vm5645_vm0 = vcmask 916480   ;;  %v11821_v0 = vrot.slane %v11701_v33, %v12853_v62  ;;  %v7942_v33 = vld [vmem:[%s12254_s13 + $0x8] sm:$0xff]   ;;  %6178 = vmatprep.subr.bf16.mxu0 %v8021_v46  ;;  %v7944_v27 = vld [vmem:[%s12254_s13 + $0x18] sm:$0xff]  }
 0x5ce   : > { %v7945_v8 = vld [vmem:[%s12254_s13 + $0x20] sm:$0xff]   ;;  %vm13002_vm9 = vcmask 1040384  }
 0x5cf   : > { %7870 = vrot.lane.b32.xlu1 %v7869_v34, %s12969_s22  ;;  %v11825_v18 = vcombine.high %v11821_v0, %v11821_v0  ;;  %v5957_v40 = vrot.slane %v11821_v0, %v12854_v26  ;;  %v5977_v2 = vrot.slane %v11821_v0, %v12855_v55  ;;  %vm13003_vm15 = vmmov %vm13002_vm9 }
 0x5d0   : > { %6179 = vmatpush1.bf16.msra.mxu0 %v7942_v33 }
 0x5d1   : > { %7880 = vrot.lane.b32.xlu0 %v7879_v51, %s8022_s29  ;;  %v11829_v50 = vrot.slane %v11825_v18, %v12854_v26  ;;  %6180 = vmatprep.subr.bf16.mxu0 %v8021_v46  ;;  %v7196_v51 = vld [vmem:[%s12253_s12] ss:$0 sm:$0xff] }
 0x5d3   : > { %7875 = vrot.lane.b32.xlu1 %v7874_v45, %s12482_s0  ;;  %v11841_v29 = vsel %vm1911_vm1, %v11829_v50, %v5957_v40  ;;  %v5981_v40 = vrot.slane %v11825_v18, %v12855_v55 }
 0x5d5   : > { %7885 = vrot.lane.b32.xlu0 %v7884_v57, %s12481_s30 }
 0x637   : > { %v7856_v49 = vpop.permute.xlu0 %7855 }
 0x638   : > { %v7858_v6 = vunpack.i.h.bf16 %v7856_v49  ;;  %v7857_v53 = vunpack.i.l.bf16 %v7856_v49 }
 0x63c   : > { %v7866_v25 = vpop.permute.xlu1 %7865 }
 0x63d   : > { %v7868_v7 = vunpack.i.h.bf16 %v7866_v25  ;;  %v7867_v5 = vunpack.i.l.bf16 %v7866_v25 }
 0x63f   : > { %v7861_v58 = vpop.permute.xlu0 %7860 }
 0x640   : > { %v7863_v21 = vunpack.i.h.bf16 %v7861_v58  ;;  %v7862_v44 = vunpack.i.l.bf16 %v7861_v58 }
 0x641   : > { %v7871_v35 = vpop.permute.xlu1 %7870 }
 0x642   : > { %v5632_v48 = vsel %vm4278_vm14, %v5571_v19, %v7863_v21  ;;  %v5631_v17 = vsel %vm4278_vm14, %v5570_v59, %v7862_v44  ;;  %v7873_v41 = vunpack.i.h.bf16 %v7871_v35  ;;  %v7872_v1 = vunpack.i.l.bf16 %v7871_v35  ;;  %v7943_v19 = vld [vmem:[%s12254_s13 + $0x10] sm:$0xff]  }
 0x643   : > { %v5634_v9 = vsel %vm4295_vm10, %v5632_v48, %v7868_v7  ;;  %v5633_v22 = vsel %vm4295_vm10, %v5631_v17, %v7867_v5  ;;  %v7881_v52 = vpop.permute.xlu0 %7880  ;;  %6181 = vmatpush1.bf16.msra.mxu0 %v7943_v19 }
 0x644   : > { %v5635_v28 = vsel %vm12998_vm12, %v5633_v22, %v7857_v53  ;;  %v5636_v20 = vsel %vm12999_vm8, %v5634_v9, %v7858_v6  ;;  %v7883_v54 = vunpack.i.h.bf16 %v7881_v52  ;;  %v7882_v38 = vunpack.i.l.bf16 %v7881_v52  ;;  %6182 = vmatprep.subr.bf16.mxu0 %v8021_v46 }
 0x645   : > { %v5637_v13 = vsel %vm13000_vm5, %v5635_v28, %v7872_v1  ;;  %v5638_v39 = vsel %vm13001_vm11, %v5636_v20, %v7873_v41  ;;  %v7876_v30 = vpop.permute.xlu1 %7875  ;;  %vm13004_vm12 = vcmask 1044480   ;;  %vm13006_vm5 = vmmov %vm13002_vm9 }
 0x646   : > { %v7878_v32 = vunpack.i.h.bf16 %v7876_v30  ;;  %v7877_v24 = vunpack.i.l.bf16 %v7876_v30  ;;  %v5640_v36 = vsel %vm5639_vm7, %v5637_v13, %v7882_v38  ;;  %v5641_v4 = vsel %vm5639_vm7, %v5638_v39, %v7883_v54  ;;  %vm13005_vm8 = vmmov %vm13004_vm12 }
 0x647   : > { %v7886_v56 = vpop.permute.xlu0 %7885  ;;  %6183 = vmatpush1.bf16.msra.mxu0 %v7944_v27  ;;  %vm13007_vm11 = vmmov %vm13006_vm5 }
 0x648   : > { %v5643_v43 = vsel %vm5642_vm13, %v5640_v36, %v7877_v24  ;;  %v5644_v14 = vsel %vm5642_vm13, %v5641_v4, %v7878_v32  ;;  %v7888_v63 = vunpack.i.h.bf16 %v7886_v56  ;;  %v7887_v15 = vunpack.i.l.bf16 %v7886_v56  ;;  %6184 = vmatprep.subr.bf16.mxu0 %v8021_v46  ;;  %v7184_v32 = vld [vmem:[%s12251_s10] ss:$0 sm:$0xff] }
 0x649   : > { %v5488_v36 = vadd.f32 %v7184_v32, %v11693_v37  ;;  %v5491_v4 = vadd.f32 %v7184_v32, %v11695_v3 }
 0x64a   : > { %v5646_v47 = vsel %vm5645_vm0, %v5643_v43, %v7887_v15  ;;  %v5647_v23 = vsel %vm5645_vm0, %v5644_v14, %v7888_v63  ;;  %v5882_v15 = vrot.slane %v11705_v31, %v12853_v62  ;;  %v7946_v31 = vld [vmem:[%s12254_s13 + $0x28] sm:$0xff]  }
 0x64b   : > { %v5648_v16 = vpack.c.bf16 %v5647_v23, %v5646_v47  ;;  %6185 = vmatpush1.bf16.msra.mxu0 %v7945_v8 }
 0x64c   : > { %6186 = vmatprep.subr.bf16.mxu0 %v8021_v46  ;;  %v5999_v37 = vrot.slane %v5882_v15, %v12854_v26 }
 0x64d   : > { %5746 = vmatmul.mubr.bf16.vlgmr.msra.gmra.mrb[8].mxu1 %v5648_v16 }
 0x64e   : > { %7418 = vmatprep.mubr.msk.bf16.mxu1 %vm8020_vm2, %v12773_v10  ;;  %7417 = vmatpush3.bf16.msra.mxu1 %v7940_v12 }
 0x64f   : > { %6187 = vmatpush1.bf16.msra.mxu0 %v7946_v31 }
 0x650   : > { %6188 = vmatprep.subr.bf16.mxu0 %v8021_v46 }
 0x720   : > { %v5747_v11 = vpop.f32.mrb[8].mxu1 }
 0x721   : > { %v5748_v61 = vadd.f32 %v7196_v51, %v5747_v11  ;;  %v5749_v34 = vpop.f32.mrb[9].mxu1 }
 0x722   : > { %v5750_v60 = vpop.f32.mrb[10].mxu1  ;;  %v5990_v34 = vsel %vm1911_vm1, %v5981_v40, %v5977_v2 }
 0x723   : > { %v5751_v57 = vadd.f32 %v7196_v51, %v5750_v60  ;;  %v5752_v45 = vpop.f32.mrb[11].mxu1  ;;  %v5754_v49 = vsel %vm4278_vm14, %v5748_v61, 0.0  ;;  %v6004_v60 = vsel %vm1911_vm1, %v5999_v37, %v11829_v50 }
 0x725   : > { %v5755_v25 = vsel %vm4278_vm14, %v5751_v57, 0.0 }
 0x726   : > { %v5756_v7 = vadd.f32 %v5755_v25, %v5754_v49 }
 0x728   : > { %v5757_v5 = vrot.slane %v5756_v7, 4 }
 0x72a   : > { %v5758_v58 = vadd.f32 %v5757_v5, %v5756_v7 }
 0x72c   : > { %v5759_v59 = vrot.slane %v5758_v58, 2 }
 0x72e   : > { %v5760_v21 = vadd.f32 %v5759_v59, %v5758_v58 }
 0x730   : > { %v5761_v44 = vrot.slane %v5760_v21, 1 }
 0x732   : > { %v5762_v6 = vadd.f32 %v5761_v44, %v5760_v21 }
 0x734   : > { %v5763_v53 = vmul.f32 0.0625, %v5762_v6 }
 0x736   : > { %v5764_v35 = vsub.f32 %v5748_v61, %v5763_v53  ;;  %v5765_v48 = vsub.f32 %v5751_v57, %v5763_v53 }
 0x738   : > { %v5766_v17 = vmul.f32 %v5764_v35, %v5764_v35  ;;  %v5767_v41 = vmul.f32 %v5765_v48, %v5765_v48 }
 0x73a   : > { %v5768_v1 = vsel %vm4278_vm14, %v5766_v17, 0.0  ;;  %v5769_v9 = vsel %vm4278_vm14, %v5767_v41, 0.0  ;;  %v7947_v41 = vld [vmem:[%s12254_s13 + $0x30] sm:$0xff]  }
 0x73b   : > { %v5770_v22 = vadd.f32 %v5769_v9, %v5768_v1  ;;  %6189 = vmatpush1.bf16.msra.mxu0 %v7947_v41 }
 0x73c   : > { %6190 = vmatprep.subr.bf16.mxu0 %v8021_v46 }
 0x73d   : > { %v5771_v52 = vrot.slane %v5770_v22, 4 }
 0x73f   : > { %v5772_v28 = vadd.f32 %v5771_v52, %v5770_v22 }
 0x741   : > { %v5773_v20 = vrot.slane %v5772_v28, 2 }
 0x743   : > { %v5774_v54 = vadd.f32 %v5773_v20, %v5772_v28 }
 0x745   : > { %v5775_v38 = vrot.slane %v5774_v54, 1 }
 0x747   : > { %v5776_v13 = vadd.f32 %v5775_v38, %v5774_v54 }
 0x749   : > { %v5777_v39 = vmul.f32 0.0625, %v5776_v13 }
 0x74b   : > { %v5778_v30 = vadd.f32 1e-05, %v5777_v39 }
 0x74d   : > { %7988 = vrsqrt.f32 %v5778_v30 }
 0x757   : > { %v7989_v24 = vpop.eup %7988 }
 0x758   : > { %v5780_v56 = vmul.f32 %v7989_v24, %v5764_v35  ;;  %v5781_v43 = vmul.f32 %v7989_v24, %v5765_v48 }
 0x75a   : > { %v5782_v14 = vadd.f32 %v5780_v56, %v5488_v36  ;;  %v5783_v63 = vadd.f32 %v5781_v43, %v5491_v4 }
 0x75c   : > { %v5784_v47 = vmul.f32 0.2, %v5782_v14  ;;  %v5785_v23 = vmul.f32 0.2, %v5783_v63 }
 0x75e   : > { %v5786_v16 = vmax.f32 %v5782_v14, %v5784_v47  ;;  %v5787_v12 = vmax.f32 %v5783_v63, %v5785_v23  ;;  %v7948_v47 = vld [vmem:[%s12254_s13 + $0x38] sm:$0xff]  }
 0x75f   : > { %6191 = vmatpush1.bf16.msra.mxu0 %v7948_v47 }
 0x760   : > { %v5790_v3 = vcombine.high %v5786_v16, %v5786_v16  ;;  %v5791_v33 = vcombine.high %v5787_v12, %v5787_v12  ;;  %v5851_v19 = vrot.slane %v5786_v16, 7  ;;  %v5853_v27 = vrot.slane %v5787_v12, 7  ;;  %6192 = vmatprep.subr.bf16.mxu0 %v8021_v46 }
 0x762   : > { %v5852_v8 = vrot.slane %v5790_v3, 7  ;;  %v5854_v51 = vrot.slane %v5791_v33, 7  ;;  %v5859_v11 = vsel %vm13002_vm9, 0.0, %v5851_v19  ;;  %v5861_v61 = vsel %vm13003_vm15, 0.0, %v5853_v27  ;;  %vm13008_vm9 = vmmov %vm13005_vm8 }
 0x763   : > { %v11882_v0 = vsel %vm13004_vm12, %v5859_v11, 0.0  ;;  %v11885_v18 = vsel %vm13005_vm8, %v5861_v61, 0.0  ;;  %vm13009_vm15 = vmmov %vm13005_vm8  ;;  %vm13010_vm12 = vcmask 1042434  }
 0x764   : > { %v5862_v57 = vsel %vm13006_vm5, 0.0, %v5854_v51  ;;  %v5925_v45 = vrot.slane %v11882_v0, %v12853_v62  ;;  %v5941_v49 = vrot.slane %v11885_v18, %v12853_v62  ;;  %v5860_v25 = vsel %vm13007_vm11, 0.0, %v5852_v8  ;;  %vm13011_vm8 = vmmov %vm13010_vm12 }
 0x765   : > { %v5866_v7 = vsel %vm13008_vm9, %v5862_v57, 0.0  ;;  %v5864_v5 = vsel %vm13009_vm15, %v5860_v25, 0.0  ;;  %v5918_v58 = vcombine.high %v11882_v0, %v11882_v0  ;;  %v5934_v50 = vcombine.high %v11885_v18, %v11885_v18  ;;  %vm13012_vm5 = vmmov %vm13011_vm8  ;;  %v7949_v18 = vld [vmem:[%s12254_s13 + $0x40] sm:$0xff]  }
 0x766   : > { %v5900_v59 = vcombine.high %v5866_v7, %v5866_v7  ;;  %v11904_v21 = vrot.slane %v5866_v7, %v12853_v62  ;;  %v11907_v44 = vrot.slane %v5864_v5, %v12853_v62  ;;  %v5933_v6 = vcombine.high %v5925_v45, %v5925_v45  ;;  %vm13013_vm11 = vmmov %vm13012_vm5  ;;  %6193 = vmatpush1.bf16.msra.mxu0 %v7949_v18 }
 0x767   : > { %v5949_v53 = vcombine.high %v5941_v49, %v5941_v49  ;;  %v6035_v35 = vrot.slane %v5925_v45, %v12855_v55  ;;  %v6043_v48 = vrot.slane %v5941_v49, %v12855_v55  ;;  %v6241_v17 = vpack.c.bf16 %v5925_v45, %v5925_v45  ;;  %vm13014_vm9 = vmmov %vm13012_vm5  ;;  %7422 = vmatprep.subr.bf16.mxu0 %v12773_v10 }
 0x768   : > { %v5899_v1 = vcombine.high %v11907_v44, %v11907_v44  ;;  %v11918_v9 = vrot.slane %v11907_v44, %v12855_v55  ;;  %v6039_v22 = vrot.slane %v5933_v6, %v12855_v55  ;;  %v6242_v52 = vpack.c.bf16 %v5933_v6, %v5933_v6  ;;  %vm13015_vm15 = vmmov %vm13012_vm5 }
 0x769   : > { %v6047_v28 = vrot.slane %v5949_v53, %v12855_v55  ;;  %v6244_v20 = vpack.c.bf16 %v5949_v53, %v5949_v53  ;;  %v6243_v54 = vpack.c.bf16 %v5941_v49, %v5941_v49  ;;  %v6255_v38 = vunpack.c.l.b16 %v6241_v17 }
 0x76a   : > { %v5989_v13 = vrot.slane %v5899_v1, %v12855_v55  ;;  %v5991_v39 = vsel %vm13010_vm12, %v11918_v9, %v5990_v34  ;;  %v11926_v30 = vrot.slane %v5899_v1, %v12854_v26  ;;  %v6048_v32 = vsel %vm1911_vm1, %v6039_v22, %v6035_v35  ;;  %vm13016_vm12 = vmmov %vm13012_vm5 }
 0x76b   : > { %v6049_v24 = vsel %vm13011_vm8, %v6043_v48, %v6048_v32  ;;  %v6256_v36 = vunpack.c.l.b16 %v6242_v52  ;;  %v6258_v4 = vunpack.c.l.b16 %v6244_v20  ;;  %v6257_v56 = vunpack.c.l.b16 %v6243_v54  ;;  %vm13017_vm8 = vmmov %vm13012_vm5 }
 0x76c   : > { %v5992_v43 = vsel %vm1915_vm3, %v5989_v13, %v5991_v39  ;;  %v6050_v14 = vsel %vm1915_vm3, %v6047_v28, %v6049_v24  ;;  %v6259_v63 = vrot.slane %v6255_v38, 1  ;;  %v5884_v15 = vcombine.high %v5864_v5, %v5864_v5 }
 0x76d   : > { %5993 = vrot.lane.b32.xlu1 %v5992_v43, %s8017_s28  ;;  %v6263_v23 = vrot.slane %v6258_v4, 6  ;;  %6051 = vrot.lane.b32.xlu0 %v6050_v14, %s12969_s22  ;;  %v6261_v16 = vrot.slane %v6257_v56, 7  ;;  %v6005_v12 = vsel %vm13012_vm5, %v11926_v30, %v6004_v60  ;;  %v6013_v2 = vrot.slane %v5925_v45, %v12854_v26 }
 0x76e   : > { %v6260_v40 = vsel %vm1911_vm1, %v6256_v36, %v6259_v63  ;;  %v5898_v37 = vrot.slane %v5884_v15, %v12853_v62  ;;  %v6017_v3 = vrot.slane %v5933_v6, %v12854_v26  ;;  %v6021_v33 = vrot.slane %v5941_v49, %v12854_v26 }
 0x76f   : > { %v6262_v19 = vsel %vm13013_vm11, %v6261_v16, %v6260_v40  ;;  %v6025_v27 = vrot.slane %v5949_v53, %v12854_v26  ;;  %v5914_v31 = vrot.slane %v5900_v59, %v12853_v62  ;;  %v5915_v8 = vcombine.high %v11904_v21, %v11904_v21  ;;  %vm13018_vm11 = vmmov %vm13012_vm5  ;;  %v7951_v40 = vld [vmem:[%s12258_s17 + $0x88] sm:$0xff]  }
 0x770   : > { %v6264_v51 = vsel %vm1915_vm3, %v6263_v23, %v6262_v19  ;;  %v6003_v11 = vrot.slane %v5898_v37, %v12854_v26  ;;  %v6026_v61 = vsel %vm1911_vm1, %v6017_v3, %v6013_v2  ;;  %v5932_v0 = vrot.slane %v5918_v58, %v12853_v62  ;;  %v7950_v2 = vld [vmem:[%s12258_s17 + $0x80] sm:$0xff]   ;;  %v7955_v19 = vld [vmem:[%s12258_s17 + $0x8] sm:$0xff]  }
 0x771   : > { %v6265_v34 = vpack.c.b16 %v6264_v51, %v6264_v51  ;;  %v6027_v60 = vsel %vm13014_vm9, %v6021_v33, %v6026_v61  ;;  %v6075_v57 = vrot.slane %v5915_v8, %v12854_v26  ;;  %v6099_v45 = vrot.slane %v5914_v31, %v12854_v26  ;;  %v7952_v37 = vld [vmem:[%s12258_s17 + $0x40] sm:$0xff]   ;;  %v7954_v33 = vld [vmem:[%s12258_s17 + $0x48] sm:$0xff]   ;;  %v7957_v31 = vld [vmem:[%s12258_s17 + $0x10] sm:$0xff]  }
 0x772   : > { %v6006_v46 = vsel %vm1915_vm3, %v6003_v11, %v6005_v12  ;;  %v6100_v49 = vsel %vm1911_vm1, %v6003_v11, %v11926_v30  ;;  %v6028_v25 = vsel %vm1915_vm3, %v6025_v27, %v6027_v60  ;;  %v5948_v7 = vrot.slane %v5934_v50, %v12853_v62  ;;  %7306 = vmatprep.subr.bf16.mxu1 %v7952_v37  ;;  %v7959_v51 = vld [vmem:[%s12258_s17 + $0x18] sm:$0xff]   ;;  %v7960_v11 = vld [vmem:[%s12258_s17 + $0x60] sm:$0xff]   ;;  %v7965_v37 = vld [vmem:[%s12258_s17 + $0x30] sm:$0xff]  }
 0x773   : > { %7419 = vmatmul.mubr.msk.bf16.vlgmr.msra.gmra.mrb[12].mxu1 %vm4278_vm14, %v6265_v34  ;;  %6007 = vrot.lane.b32.xlu0 %v6006_v46, %s12484_s5  ;;  %v6101_v5 = vsel %vm13015_vm15, %v6075_v57, %v6100_v49  ;;  %v6057_v58 = vrot.slane %v5932_v0, %v12854_v26  ;;  %v5965_v59 = vrot.slane %v11907_v44, %v12854_v26  ;;  %vm13021_vm9 = vcmask 523264   ;;  %v7207_v61 = vld [vmem:[%s12255_s14] ss:$0 sm:$0xff] }
 0x774   : > { %6029 = vrot.lane.b32.xlu1 %v6028_v25, %s12936_s3  ;;  %v6102_v6 = vsel %vm1915_vm3, %v6099_v45, %v6101_v5  ;;  %v6061_v53 = vrot.slane %v5948_v7, %v12854_v26  ;;  %v6071_v50 = vrot.slane %v11904_v21, %v12854_v26  ;;  %v6085_v35 = vrot.slane %v11904_v21, %v12855_v55  ;;  %s13019_s3 = smov 112  }
 0x775   : > { %v6112_v48 = vpack.c.bf16 %v6102_v6, %v6102_v6  ;;  %v6062_v17 = vsel %vm1911_vm1, %v6057_v58, %v6017_v3  ;;  %v6076_v41 = vsel %vm1911_vm1, %v11926_v30, %v5965_v59  ;;  %v6089_v44 = vrot.slane %v5915_v8, %v12855_v55  ;;  %v7953_v3 = vld [vmem:[%s12258_s17] sm:$0xff]   ;;  %v7958_v8 = vld [vmem:[%s12258_s17 + $0x58] sm:$0xff]  }
 0x776   : > { %v6063_v1 = vsel %vm13016_vm12, %v6025_v27, %v6062_v17  ;;  %v6077_v22 = vsel %vm13017_vm8, %v6071_v50, %v6076_v41  ;;  %v6090_v26 = vsel %vm1911_vm1, %v5989_v13, %v11918_v9  ;;  %v5971_v21 = vsel %vm13012_vm5, %v5965_v59, %v11841_v29  ;;  %7307 = vmatpush3.bf16.msra.mxu1 %v7953_v3  ;;  %v7956_v27 = vld [vmem:[%s12258_s17 + $0x50] sm:$0xff]  }
 0x777   : > { %7217 = vmatprep.mubr.msk.bf16.mxu0 %vm4278_vm14, %v6112_v48  ;;  %v6064_v52 = vsel %vm1915_vm3, %v6061_v53, %v6063_v1  ;;  %v6078_v28 = vsel %vm1915_vm3, %v6075_v57, %v6077_v22  ;;  %v6091_v55 = vsel %vm13018_vm11, %v6085_v35, %v6090_v26  ;;  %v5972_v20 = vsel %vm1915_vm3, %v11926_v30, %v5971_v21  ;;  %vm13030_vm11 = vmmov %vm13021_vm9 }
 0x778   : > { %6065 = vrot.lane.b32.xlu1 %v6064_v52, %s8022_s29  ;;  %6079 = vrot.lane.b32.xlu0 %v6078_v28, %s12482_s0  ;;  %v6092_v9 = vsel %vm1915_vm3, %v6089_v44, %v6091_v55  ;;  %vm13020_vm1 = vcmask 392192   ;;  %vm6216_vm3 = vcmask 257024   ;;  %v12052_v28 = vsel %vm5523_vm6, %v12983_v42, 0.0  ;;  %v7962_v42 = vld [vmem:[%s12258_s17 + $0x68] sm:$0xff]  }
 0x779   : > { %7308 = vmatprep.subr.bf16.mxu1 %v7954_v33 }
 0x77a   : > { %7309 = vmatpush3.bf16.msra.mxu1 %v7955_v19 }
 0x77b   : > { %7310 = vmatprep.subr.bf16.mxu1 %v7956_v27 }
 0x77c   : > { %6093 = vrot.lane.b32.xlu1 %v6092_v9, %s13019_s3 }
 0x77e   : > { %7311 = vmatpush3.bf16.msra.mxu1 %v7957_v31 }
 0x77f   : > { %7312 = vmatprep.subr.bf16.mxu1 %v7958_v8 }
 0x782   : > { %7313 = vmatpush3.bf16.msra.mxu1 %v7959_v51 }
 0x783   : > { %7314 = vmatprep.subr.bf16.mxu1 %v7960_v11 }
 0x7df   : > { %v6052_v29 = vpop.permute.xlu0 %6051  ;;  %v5994_v54 = vpop.permute.xlu1 %5993 }
 0x7e0   : > { %v6104_v38 = vsel %vm4278_vm14, %v5972_v20, %v5994_v54  ;;  %v12056_v20 = vrot.slane %v12052_v28, %v12853_v62  ;;  %vm13022_vm14 = vmmov %vm13012_vm5  ;;  %vm13026_vm5 = vcmask 1046534  }
 0x7e2   : > { %v6342_v54 = vcombine.high %v12056_v20, %v12056_v20 }
 0x7e5   : > { %v6008_v13 = vpop.permute.xlu0 %6007 }
 0x7e6   : > { %v6105_v39 = vsel %vm4295_vm10, %v6104_v38, %v6008_v13  ;;  %v6030_v32 = vpop.permute.xlu1 %6029  ;;  %v7961_v38 = vld [vmem:[%s12258_s17 + $0x20] sm:$0xff]  }
 0x7e7   : > { %v6106_v24 = vsel %vm13020_vm1, %v6105_v39, %v6030_v32  ;;  %7315 = vmatpush3.bf16.msra.mxu1 %v7961_v38  ;;  %v7963_v32 = vld [vmem:[%s12258_s17 + $0x28] sm:$0xff]   ;;  %vm13031_vm1 = vmmov %vm13021_vm9 }
 0x7e8   : > { %v6107_v30 = vsel %vm13021_vm9, %v6106_v24, %v6052_v29  ;;  %7316 = vmatprep.subr.bf16.mxu1 %v7962_v42 }
 0x7ea   : > { %v6066_v36 = vpop.permute.xlu1 %6065  ;;  %v6080_v56 = vpop.permute.xlu0 %6079 }
 0x7eb   : > { %v6108_v4 = vsel %vm5639_vm7, %v6107_v30, %v6066_v36  ;;  %vm13023_vm7 = vcmask 1040384   ;;  %7317 = vmatpush3.bf16.msra.mxu1 %v7963_v32 }
 0x7ec   : > { %v6109_v43 = vsel %vm5642_vm13, %v6108_v4, %v6080_v56  ;;  %vm13024_vm12 = vmmov %vm13023_vm7  ;;  %v7221_v4 = vrot.slane %v12056_v20, 9  ;;  %v6356_v56 = vrot.slane %v6342_v54, 7 }
 0x7ed   : > { %vm13025_vm8 = vmmov %vm13023_vm7 }
 0x7ee   : > { %v6094_v14 = vpop.permute.xlu1 %6093 }
 0x7ef   : > { %v6110_v63 = vsel %vm5645_vm0, %v6109_v43, %v6094_v14  ;;  %vm6351_vm0 = vmor %vm13023_vm7, %vm13022_vm14 }
 0x7f0   : > { %v6111_v15 = vpack.c.bf16 %v6110_v63, %v6110_v63  ;;  %vm6352_vm15 = vmor %vm6351_vm0, %vm1917_vm4 }
 0x7f1   : > { %vm12079_vm4 = vmor %vm6352_vm15, %vm13026_vm5 }
 0x7f2   : > { %6209 = vmatmul.mubr.bf16.vlgmr.msra.gmra.mrb[16].mxu0 %v6111_v15  ;;  %v12095_v3 = vsel %vm12079_vm4, %v7221_v4, %v6356_v56 }
 0x7f3   : > { %7426 = vmatprep.mubr.msk.bf16.mxu0 %vm8020_vm2, %v12773_v10  ;;  %7423 = vmatpush3.bf16.msra.mxu0 %v7950_v2 }
 0x7f4   : > { %7424 = vmatprep.subr.bf16.mxu0 %v12773_v10 }
 0x7f7   : > { %7425 = vmatpush3.bf16.msra.mxu0 %v7951_v40  ;;  %v7964_v40 = vld [vmem:[%s12258_s17 + $0x70] sm:$0xff]  }
 0x7f8   : > { %7318 = vmatprep.subr.bf16.mxu1 %v7964_v40  ;;  %v7973_v40 = vld [vmem:[%s12260_s19 + $0x8] sm:$0xff]  }
 0x7f9   : > { %7319 = vmatpush3.bf16.msra.mxu1 %v7965_v37  ;;  %v7975_v37 = vld [vmem:[%s12260_s19 + $0x10] sm:$0xff]  }
 0x846   : > { %v12009_v47 = vpop.f32.mrb[12].mxu1 }
 0x847   : > { %v7420_v23 = vpop.f32.mrb[13].mxu1 }
 0x848   : > { %v6312_v16 = vpop.f32.mrb[14].mxu1 }
 0x849   : > { %v7421_v12 = vpop.f32.mrb[15].mxu1 }
 0x8c5   : > { %v6210_v0 = vpop.f32.mrb[16].mxu0 }
 0x8c6   : > { %v6211_v18 = vadd.f32 %v7207_v61, %v6210_v0  ;;  %v6212_v34 = vpop.f32.mrb[17].mxu0 }
 0x8c7   : > { %v6213_v60 = vpop.f32.mrb[18].mxu0 }
 0x8c8   : > { %v6217_v57 = vsel %vm6216_vm3, %v6211_v18, 0.0  ;;  %v6214_v45 = vpop.f32.mrb[19].mxu0 }
 0x8c9   : > { %v6218_v46 = vrot.slane %v6217_v57, 4  ;;  %v7966_v45 = vld [vmem:[%s12258_s17 + $0x78] sm:$0xff]  }
 0x8ca   : > { %7320 = vmatprep.subr.bf16.mxu1 %v7966_v45 }
 0x8cb   : > { %v6219_v49 = vadd.f32 %v6218_v46, %v6217_v57  ;;  %v7967_v46 = vld [vmem:[%s12258_s17 + $0x38] sm:$0xff]  }
 0x8cc   : > { %7321 = vmatpush3.bf16.msra.mxu1 %v7967_v46 }
 0x8cd   : > { %v6220_v25 = vrot.slane %v6219_v49, 2  ;;  %7430 = vmatprep.subr.bf16.mxu1 %v12773_v10 }
 0x8cf   : > { %v6221_v7 = vadd.f32 %v6220_v25, %v6219_v49 }
 0x8d1   : > { %v6222_v5 = vrot.slane %v6221_v7, 1 }
 0x8d3   : > { %v6223_v58 = vadd.f32 %v6222_v5, %v6221_v7 }
 0x8d5   : > { %v6225_v59 = vmul.f32 0.25, %v6223_v58 }
 0x8d7   : > { %v6226_v6 = vsub.f32 %v6211_v18, %v6225_v59 }
 0x8d9   : > { %v6227_v53 = vmul.f32 %v6226_v6, %v6226_v6 }
 0x8db   : > { %v6228_v50 = vsel %vm6216_vm3, %v6227_v53, 0.0 }
 0x8dc   : > { %v6229_v35 = vrot.slane %v6228_v50, 4 }
 0x8de   : > { %v6230_v48 = vadd.f32 %v6229_v35, %v6228_v50 }
 0x8e0   : > { %v6231_v17 = vrot.slane %v6230_v48, 2 }
 0x8e2   : > { %v6232_v41 = vadd.f32 %v6231_v17, %v6230_v48 }
 0x8e4   : > { %v6233_v44 = vrot.slane %v6232_v41, 1 }
 0x8e6   : > { %v6234_v1 = vadd.f32 %v6233_v44, %v6232_v41 }
 0x8e8   : > { %v6235_v22 = vmul.f32 0.25, %v6234_v1 }
 0x8ea   : > { %v6236_v26 = vadd.f32 1e-05, %v6235_v22 }
 0x8ec   : > { %7990 = vrsqrt.f32 %v6236_v26 }
 0x8f6   : > { %v7991_v21 = vpop.eup %7990 }
 0x8f7   : > { %v6238_v52 = vmul.f32 %v7991_v21, %v6226_v6 }
 0x8f9   : > { %v6239_v55 = vmul.f32 0.2, %v6238_v52 }
 0x8fb   : > { %v6240_v9 = vmax.f32 %v6238_v52, %v6239_v55 }
 0x8fd   : > { %v6322_v29 = vrot.slane %v6240_v9, %v12853_v62 }
 0x8ff   : > { %v6323_v13 = vcombine.high %v6322_v29, %v6322_v29  ;;  %v6324_v39 = vrot.slane %v6322_v29, 7 }
 0x901   : > { %v6325_v24 = vrot.slane %v6323_v13, 7  ;;  %v6328_v30 = vsel %vm13024_vm12, 0.0, %v6324_v39 }
 0x902   : > { %v6331_v36 = vsel %vm5523_vm6, %v6328_v30, 0.0 }
 0x903   : > { %v6349_v43 = vrot.slane %v6331_v36, %v12853_v62  ;;  %v6329_v14 = vsel %vm13025_vm8, 0.0, %v6325_v24  ;;  %v6375_v17 = vcombine.low %v12052_v28, %v6331_v36 }
 0x904   : > { %v6332_v15 = vsel %vm5523_vm6, %v6329_v14, 0.0 }
 0x905   : > { %v7224_v23 = vcombine.high %v12056_v20, %v6349_v43  ;;  %v6437_v16 = vcombine.low %v6332_v15, %v12052_v28  ;;  %v6369_v12 = vrot.slane %v6332_v15, %v12853_v62  ;;  %v6350_v2 = vcombine.high %v6349_v43, %v6349_v43 }
 0x906   : > { %v7222_v33 = vrot.slane %v6349_v43, 9  ;;  %v6406_v58 = vcombine.low %v6331_v36, %v6332_v15  ;;  %v6382_v1 = vrot.slane %v6375_v17, %v12853_v62  ;;  %v7968_v15 = vld [vmem:[%s12260_s19 + $0x80] sm:$0xff]  }
 0x907   : > { %v6402_v19 = vrot.slane %v7224_v23, %v12853_v62  ;;  %v6444_v27 = vrot.slane %v6437_v16, %v12853_v62  ;;  %v7226_v31 = vcombine.high %v6369_v12, %v12056_v20  ;;  %v6360_v8 = vrot.slane %v6350_v2, 7  ;;  %v7969_v23 = vld [vmem:[%s12260_s19 + $0x88] sm:$0xff]   ;;  %v7970_v16 = vld [vmem:[%s12260_s19 + $0x40] sm:$0xff]  }
 0x908   : > { %v7225_v51 = vcombine.high %v6349_v43, %v6369_v12  ;;  %v6370_v11 = vcombine.high %v6369_v12, %v6369_v12  ;;  %v7223_v60 = vrot.slane %v6369_v12, 9  ;;  %v6413_v35 = vrot.slane %v6406_v58, %v12853_v62  ;;  %v7971_v12 = vld [vmem:[%s12260_s19] sm:$0xff]   ;;  %v7972_v2 = vld [vmem:[%s12260_s19 + $0x48] sm:$0xff]   ;;  %7331 = vmatprep.subr.bf16.mxu0 %v7970_v16  ;;  %v7982_v16 = vld [vmem:[%s12260_s19 + $0x70] sm:$0xff]  }
 0x909   : > { %v7889_v61 = vpack.i.bf16 %v6402_v19, %v6444_v27  ;;  %v6466_v0 = vrot.slane %v7226_v31, %v12853_v62  ;;  %v6361_v18 = vsel %vm12079_vm4, %v7222_v33, %v6360_v8  ;;  %v7976_v33 = vld [vmem:[%s12260_s19 + $0x58] sm:$0xff]   ;;  %v7978_v27 = vld [vmem:[%s12260_s19 + $0x60] sm:$0xff]  }
 0x90a   : > { %v6384_v34 = vcombine.low %v12095_v3, %v6361_v18  ;;  %v6373_v57 = vrot.slane %v6370_v11, 7  ;;  %v6433_v7 = vrot.slane %v7225_v51, %v12853_v62  ;;  %v7977_v19 = vld [vmem:[%s12260_s19 + $0x18] sm:$0xff]   ;;  %v7227_v8 = vld [vmem:[%s12259_s18] ss:$0 sm:$0xff] }
 0x90b   : > { %7890 = vrot.lane.b32.xlu1 %v7889_v61, %s12969_s22  ;;  %v6476_v49 = vpack.c.bf16 %v6466_v0, %v6466_v0 }
 0x90c   : > { %v6391_v25 = vrot.slane %v6384_v34, %v12853_v62  ;;  %v6374_v5 = vsel %vm12079_vm4, %v7223_v60, %v6373_v57 }
 0x90d   : > { %7427 = vmatmul.mubr.msk.bf16.vlgmr.msra.gmra.mrb[20].mxu0 %vm4295_vm10, %v6476_v49  ;;  %v6448_v59 = vcombine.low %v6374_v5, %v12095_v3  ;;  %v6417_v6 = vcombine.low %v6361_v18, %v6374_v5 }
 0x90e   : > { %v7894_v53 = vpack.i.bf16 %v6391_v25, %v6433_v7  ;;  %7332 = vmatpush3.bf16.msra.mxu0 %v7971_v12  ;;  %v7983_v12 = vld [vmem:[%s12260_s19 + $0x30] sm:$0xff]  }
 0x90f   : > { %v6455_v50 = vrot.slane %v6448_v59, %v12853_v62  ;;  %v6424_v21 = vrot.slane %v6417_v6, %v12853_v62  ;;  %7333 = vmatprep.subr.bf16.mxu0 %v7972_v2 }
 0x910   : > { %7895 = vrot.lane.b32.xlu0 %v7894_v53, %s12484_s5 }
 0x911   : > { %v7899_v48 = vpack.i.bf16 %v6413_v35, %v6455_v50 }
 0x912   : > { %7334 = vmatpush3.bf16.msra.mxu0 %v7973_v40 }
 0x914   : > { %7900 = vrot.lane.b32.xlu0 %v7899_v48, %s13029_s23 }
 0x97d   : > { %v7891_v44 = vpop.permute.xlu1 %7890 }
 0x97e   : > { %v7893_v9 = vunpack.i.h.bf16 %v7891_v44  ;;  %v7892_v29 = vunpack.i.l.bf16 %v7891_v44 }
 0x982   : > { %v7896_v41 = vpop.permute.xlu0 %7895 }
 0x983   : > { %v7898_v22 = vunpack.i.h.bf16 %v7896_v41  ;;  %v7897_v26 = vunpack.i.l.bf16 %v7896_v41 }
 0x985   : > { %v6468_v52 = vsel %vm4295_vm10, %v6382_v1, %v7898_v22  ;;  %v6471_v55 = vsel %vm4295_vm10, %v6424_v21, %v7897_v26  ;;  %v7218_v22 = vld [vmem:[%s12257_s16] ss:$0 sm:$0xff] }
 0x986   : > { %v7901_v54 = vpop.permute.xlu0 %7900  ;;  %v6469_v13 = vsel %vm13030_vm11, %v6468_v52, %v7893_v9  ;;  %v6472_v39 = vsel %vm13031_vm1, %v6471_v55, %v7892_v29  ;;  %v6310_v21 = vadd.f32 %v7218_v22, %v12009_v47  ;;  %v7981_v47 = vld [vmem:[%s12260_s19 + $0x28] sm:$0xff]  }
 0x987   : > { %v7903_v38 = vunpack.i.h.bf16 %v7901_v54  ;;  %v7902_v42 = vunpack.i.l.bf16 %v7901_v54 }
 0x989   : > { %v6470_v32 = vsel %vm5642_vm13, %v6469_v13, %v7903_v38  ;;  %v6473_v24 = vsel %vm5642_vm13, %v6472_v39, %v7902_v42  ;;  %v7979_v38 = vld [vmem:[%s12260_s19 + $0x20] sm:$0xff]   ;;  %v7980_v42 = vld [vmem:[%s12260_s19 + $0x68] sm:$0xff]  }
 0x98a   : > { %v6474_v30 = vpack.c.bf16 %v6470_v32, %v6470_v32  ;;  %v6475_v36 = vpack.c.bf16 %v6473_v24, %v6473_v24 }
 0x98c   : > { %6626 = vmatprep.mubr.bf16.mxu1 %v6475_v36 }
 0x98d   : > { %6627 = vmatmul.mubr.bf16.vlgmr.msra.gmra.mrb[16].mxu1 %v6474_v30 }
 0x98e   : > { %7434 = vmatprep.mubr.msk.bf16.mxu1 %vm8020_vm2, %v12773_v10  ;;  %7431 = vmatpush3.bf16.msra.mxu1 %v7968_v15  ;;  %vm13032_vm2 = vmmov %vm13023_vm7 }
 0x98f   : > { %7432 = vmatprep.subr.bf16.mxu1 %v12773_v10  ;;  %v7974_v10 = vld [vmem:[%s12260_s19 + $0x50] sm:$0xff]   ;;  %vm13033_vm9 = vmmov %vm13032_vm2 }
 0x990   : > { %7335 = vmatprep.subr.bf16.mxu0 %v7974_v10 }
 0x991   : > { %7336 = vmatpush3.bf16.msra.mxu0 %v7975_v37 }
 0x992   : > { %7433 = vmatpush3.bf16.msra.mxu1 %v7969_v23  ;;  %7337 = vmatprep.subr.bf16.mxu0 %v7976_v33 }
 0x995   : > { %7338 = vmatpush3.bf16.msra.mxu0 %v7977_v19 }
 0x996   : > { %7339 = vmatprep.subr.bf16.mxu0 %v7978_v27 }
 0x999   : > { %7340 = vmatpush3.bf16.msra.mxu0 %v7979_v38 }
 0x99a   : > { %7341 = vmatprep.subr.bf16.mxu0 %v7980_v42 }
 0x99d   : > { %7342 = vmatpush3.bf16.msra.mxu0 %v7981_v47 }
 0x99e   : > { %7343 = vmatprep.subr.bf16.mxu0 %v7982_v16 }
 0x9a1   : > { %7344 = vmatpush3.bf16.msra.mxu0 %v7983_v12 }
 0x9e0   : > { %v6668_v4 = vpop.f32.mrb[20].mxu0 }
 0x9e1   : > { %v7428_v56 = vpop.f32.mrb[21].mxu0 }
 0x9e2   : > { %v6671_v43 = vpop.f32.mrb[22].mxu0 }
 0x9e3   : > { %v7429_v14 = vpop.f32.mrb[23].mxu0 }
 0xa60   : > { %v7322_v31 = vpop.f32.mrb[16].mxu1 }
 0xa61   : > { %v7323_v51 = vpop.f32.mrb[17].mxu1 }
 0xa62   : > { %v7324_v11 = vadd.f32 %v7323_v51, %v7322_v31  ;;  %v7325_v61 = vpop.f32.mrb[18].mxu1 }
 0xa63   : > { %v7326_v0 = vpop.f32.mrb[19].mxu1 }
 0xa64   : > { %v6629_v18 = vadd.f32 %v7324_v11, %v7227_v8 }
 0xa66   : > { %v6669_v34 = vadd.f32 %v6668_v4, %v6629_v18  ;;  %v7984_v18 = vld [vmem:[%s12260_s19 + $0x78] sm:$0xff]  }
 0xa67   : > { %7345 = vmatprep.subr.bf16.mxu0 %v7984_v18 }
 0xa68   : > { %v6674_v60 = vsel %vm6216_vm3, %v6669_v34, 0.0 }
 0xa69   : > { %v6675_v57 = vrot.slane %v6674_v60, 4 }
 0xa6b   : > { %v6676_v45 = vadd.f32 %v6675_v57, %v6674_v60 }
 0xa6d   : > { %v6677_v46 = vrot.slane %v6676_v45, 2 }
 0xa6f   : > { %v6678_v49 = vadd.f32 %v6677_v46, %v6676_v45 }
 0xa71   : > { %v6679_v25 = vrot.slane %v6678_v49, 1 }
 0xa73   : > { %v6680_v7 = vadd.f32 %v6679_v25, %v6678_v49 }
 0xa75   : > { %v6681_v5 = vmul.f32 0.25, %v6680_v7 }
 0xa77   : > { %v6682_v58 = vsub.f32 %v6669_v34, %v6681_v5 }
 0xa79   : > { %v6683_v59 = vmul.f32 %v6682_v58, %v6682_v58 }
 0xa7b   : > { %v6684_v6 = vsel %vm6216_vm3, %v6683_v59, 0.0  ;;  %vm13036_vm3 = vmmov %vm13031_vm1 }
 0xa7c   : > { %v6685_v53 = vrot.slane %v6684_v6, 4 }
 0xa7e   : > { %v6686_v50 = vadd.f32 %v6685_v53, %v6684_v6 }
 0xa80   : > { %v6687_v35 = vrot.slane %v6686_v50, 2 }
 0xa82   : > { %v6688_v48 = vadd.f32 %v6687_v35, %v6686_v50 }
 0xa84   : > { %v6689_v17 = vrot.slane %v6688_v48, 1 }
 0xa86   : > { %v6690_v41 = vadd.f32 %v6689_v17, %v6688_v48 }
 0xa88   : > { %v6691_v44 = vmul.f32 0.25, %v6690_v41 }
 0xa8a   : > { %v6692_v1 = vadd.f32 1e-05, %v6691_v44 }
 0xa8c   : > { %7992 = vrsqrt.f32 %v6692_v1 }
 0xa96   : > { %v7993_v26 = vpop.eup %7992 }
 0xa97   : > { %v6694_v52 = vmul.f32 %v7993_v26, %v6682_v58 }
 0xa99   : > { %v6695_v55 = vadd.f32 %v6694_v52, %v6310_v21 }
 0xa9b   : > { %v6696_v9 = vmul.f32 0.2, %v6695_v55 }
 0xa9d   : > { %v6697_v29 = vmax.f32 %v6695_v55, %v6696_v9 }
 0xa9f   : > { %v6705_v54 = vrot.slane %v6697_v29, %v12853_v62 }
 0xaa1   : > { %v6744_v13 = vrot.slane %v6705_v54, 7  ;;  %v6706_v39 = vcombine.high %v6705_v54, %v6705_v54 }
 0xaa3   : > { %v6748_v32 = vsel %vm13032_vm2, 0.0, %v6744_v13  ;;  %v6745_v24 = vrot.slane %v6706_v39, 7 }
 0xaa4   : > { %v6750_v30 = vsel %vm5523_vm6, %v6748_v32, 0.0  ;;  %v7252_v32 = vld [vmem:[#allocation2] ss:$0 sm:$0xff] }
 0xaa5   : > { %v6749_v36 = vsel %vm13033_vm9, 0.0, %v6745_v24  ;;  %v6759_v4 = vrot.slane %v6750_v30, %v12853_v62  ;;  %v6778_v63 = vcombine.low %v12052_v28, %v6750_v30 }
 0xaa6   : > { %v6751_v56 = vsel %vm5523_vm6, %v6749_v36, 0.0  ;;  %vm13035_vm6 = vmmov %vm13031_vm1 }
 0xaa7   : > { %v7249_v43 = vcombine.high %v12056_v20, %v6759_v4  ;;  %v6840_v14 = vcombine.low %v6751_v56, %v12052_v28  ;;  %v6772_v15 = vrot.slane %v6751_v56, %v12853_v62  ;;  %v6760_v23 = vcombine.high %v6759_v4, %v6759_v4 }
 0xaa8   : > { %v7247_v2 = vrot.slane %v6759_v4, 9  ;;  %v6809_v46 = vcombine.low %v6750_v30, %v6751_v56  ;;  %v6785_v50 = vrot.slane %v6778_v63, %v12853_v62 }
 0xaa9   : > { %v6805_v40 = vrot.slane %v7249_v43, %v12853_v62  ;;  %v6847_v10 = vrot.slane %v6840_v14, %v12853_v62  ;;  %v7251_v37 = vcombine.high %v6772_v15, %v12056_v20  ;;  %v6763_v33 = vrot.slane %v6760_v23, 7  ;;  %v7985_v20 = vld [vmem:[%s12260_s19 + $0x38] sm:$0xff]  }
 0xaaa   : > { %v7250_v19 = vcombine.high %v6759_v4, %v6772_v15  ;;  %v6773_v27 = vcombine.high %v6772_v15, %v6772_v15  ;;  %v7248_v61 = vrot.slane %v6772_v15, 9  ;;  %7346 = vmatpush3.bf16.msra.mxu0 %v7985_v20  ;;  %v6816_v58 = vrot.slane %v6809_v46, %v12853_v62 }
 0xaab   : > { %v7909_v31 = vpack.i.bf16 %v6805_v40, %v6847_v10  ;;  %v6869_v8 = vrot.slane %v7251_v37, %v12853_v62  ;;  %v6764_v51 = vsel %vm12079_vm4, %v7247_v2, %v6763_v33 }
 0xaac   : > { %v6787_v11 = vcombine.low %v12095_v3, %v6764_v51  ;;  %v6776_v0 = vrot.slane %v6773_v27, 7  ;;  %v6836_v57 = vrot.slane %v7250_v19, %v12853_v62 }
 0xaad   : > { %7910 = vrot.lane.b32.xlu0 %v7909_v31, %s12969_s22  ;;  %v6879_v34 = vpack.c.bf16 %v6869_v8, %v6869_v8  ;;  %s13034_s22 = smov 32  }
 0xaae   : > { %v6794_v60 = vrot.slane %v6787_v11, %v12853_v62  ;;  %v6777_v45 = vsel %vm12079_vm4, %v7248_v61, %v6776_v0 }
 0xaaf   : > { %7435 = vmatmul.mubr.msk.bf16.vlgmr.msra.gmra.mrb[20].mxu1 %vm4295_vm10, %v6879_v34  ;;  %v6851_v49 = vcombine.low %v6777_v45, %v12095_v3  ;;  %v6820_v25 = vcombine.low %v6764_v51, %v6777_v45 }
 0xab0   : > { %v7904_v7 = vpack.i.bf16 %v6794_v60, %v6836_v57 }
 0xab1   : > { %v6858_v5 = vrot.slane %v6851_v49, %v12853_v62  ;;  %v6827_v48 = vrot.slane %v6820_v25, %v12853_v62 }
 0xab2   : > { %7905 = vrot.lane.b32.xlu1 %v7904_v7, %s13034_s22 }
 0xab3   : > { %v7914_v59 = vpack.i.bf16 %v6816_v58, %v6858_v5 }
 0xab6   : > { %7915 = vrot.lane.b32.xlu1 %v7914_v59, %s13029_s23  ;;  %s7275_s23 = sshll.u32 %s13038_s27, 2 }
 0xab7   : > { %s658_s1 = scalar_lea.vmem %s12262_s21, %s7275_s23 }
 0xb1f   : > { %v7911_v53 = vpop.permute.xlu0 %7910 }
 0xb20   : > { %v7913_v44 = vunpack.i.h.bf16 %v7911_v53  ;;  %v7912_v1 = vunpack.i.l.bf16 %v7911_v53 }
 0xb24   : > { %v7906_v6 = vpop.permute.xlu1 %7905 }
 0xb25   : > { %v7908_v35 = vunpack.i.h.bf16 %v7906_v6  ;;  %v7907_v3 = vunpack.i.l.bf16 %v7906_v6 }
 0xb27   : > { %v6871_v17 = vsel %vm4295_vm10, %v6785_v50, %v7908_v35  ;;  %v6874_v41 = vsel %vm4295_vm10, %v6827_v48, %v7907_v3  ;;  %vm7088_vm10 = vcmask 1024  }
 0xb28   : > { %v7916_v22 = vpop.permute.xlu1 %7915  ;;  %v6872_v52 = vsel %vm13035_vm6, %v6871_v17, %v7913_v44  ;;  %v6875_v28 = vsel %vm13036_vm3, %v6874_v41, %v7912_v1 }
 0xb29   : > { %v7918_v26 = vunpack.i.h.bf16 %v7916_v22  ;;  %v7917_v21 = vunpack.i.l.bf16 %v7916_v22 }
 0xb2b   : > { %v6873_v55 = vsel %vm5642_vm13, %v6872_v52, %v7918_v26  ;;  %v6876_v9 = vsel %vm5642_vm13, %v6875_v28, %v7917_v21 }
 0xb2c   : > { %v6877_v29 = vpack.c.bf16 %v6873_v55, %v6873_v55  ;;  %v6878_v54 = vpack.c.bf16 %v6876_v9, %v6876_v9 }
 0xb2e   : > { %7029 = vmatprep.mubr.bf16.mxu0 %v6878_v54 }
 0xb2f   : > { %7030 = vmatmul.mubr.bf16.vlgmr.msra.gmra.mrb[24].mxu0 %v6877_v29 }
 0xb82   : > { %v7071_v38 = vpop.f32.mrb[20].mxu1 }
 0xb83   : > { %v7436_v42 = vpop.f32.mrb[21].mxu1 }
 0xb84   : > { %v7074_v13 = vpop.f32.mrb[22].mxu1 }
 0xb85   : > { %v7437_v39 = vpop.f32.mrb[23].mxu1 }
 0xc02   : > { %v7347_v47 = vpop.f32.mrb[24].mxu0 }
 0xc03   : > { %v7348_v24 = vpop.f32.mrb[25].mxu0 }
 0xc04   : > { %v7349_v30 = vadd.f32 %v7348_v24, %v7347_v47  ;;  %v7350_v36 = vpop.f32.mrb[26].mxu0 }
 0xc05   : > { %v7351_v4 = vpop.f32.mrb[27].mxu0 }
 0xc06   : > { %v7032_v56 = vadd.f32 %v7349_v30, %v7252_v32 }
 0xc08   : > { %v7072_v43 = vadd.f32 %v7071_v38, %v7032_v56 }
 0xc0a   : > { %v7084_v14 = vrot.slane %v7072_v43, %v12853_v62 }
 0xc0c   : > { %v7085_v15 = vcombine.high %v7084_v14, %v7084_v14  ;;  %7089 = vst.msk [vmem:[%s658_s1] sm:$0x3] %vm7088_vm10, %v7084_v14 }
 0xc0e   : > { %7090 = vst.msk [vmem:[%s658_s1 + $0x2] sm:$0x3] %vm7088_vm10, %v7085_v15 }
 0xc0f PF: > { %s33_s26 = sadd.s32 1, %s8000_s26  }
 0xc10   : > { %p30_p4 = scmp.ge.s32.totalorder %s33_s26, 4  }
 0xc12   :  { %32 = sbr.rel (!%p30_p4) target bundleno = 7 (0x7), region = 134 }

</bundles_post_ra>
